<compile_context>
chip_gen: v5e
topology: v5e:2x2
jax: 0.10.0
libtpu: 0.0.40
codegen_flags: <defaults>
</compile_context>

<pallas_src>
import functools

import numpy as np
import jax
import jax.numpy as jnp
from jax.experimental import pallas as pl
from jax.experimental.pallas import tpu as pltpu


# ----------------------------------------------------------------------------
# Model dimensions (reduced stand-in channel counts, same interfaces).
# ----------------------------------------------------------------------------
NUM_CLASSES = 11
C_STEM, C_B1, C_LOW, C_HIGH = 16, 16, 16, 32
C_ASPP = 32          # per-branch ASPP output channels (stands in for 256)
C_DEC_LOW = 8        # decoder low-level projection    (stands in for 48)
C_DEC = 32           # decoder conv channels           (stands in for 256)
CP = 128             # lane-dense padded channel width for every activation


# ----------------------------------------------------------------------------
# Kernel 1: fused matmul + bias (+ReLU).  Used for every 1x1 conv / projection.
# A:(M,K) bf16, W:(K,Np) bf16, bias:(1,Np) f32, accumulate f32, store bf16/f32.
# ----------------------------------------------------------------------------
def _matmul_bias_kernel(a_ref, w_ref, b_ref, o_ref, *, relu):
    acc = jnp.dot(a_ref[...], w_ref[...], preferred_element_type=jnp.float32)
    out = acc + b_ref[...]
    if relu:
        out = jnp.maximum(out, 0.0)
    o_ref[...] = out.astype(o_ref.dtype)


def matmul_bias(a, w, bias, *, relu=False, out_dtype=jnp.bfloat16):
    M, K = a.shape
    Np = w.shape[1]
    tm = M if M <= 128 else 128          # no wrapper-side M padding
    assert M % tm == 0, (M, tm)
    a = a.astype(jnp.bfloat16)
    w = w.astype(jnp.bfloat16)
    return pl.pallas_call(
        functools.partial(_matmul_bias_kernel, relu=relu),
        out_shape=jax.ShapeDtypeStruct((M, Np), out_dtype),
        grid=(M // tm,),
        in_specs=[
            pl.BlockSpec((tm, K), lambda i: (i, 0)),
            pl.BlockSpec((K, Np), lambda i: (0, 0)),
            pl.BlockSpec((1, Np), lambda i: (0, 0)),
        ],
        out_specs=pl.BlockSpec((tm, Np), lambda i: (i, 0)),
        compiler_params=pltpu.CompilerParams(dimension_semantics=("parallel",)),
    )(a, w, bias)


def conv1x1_nhwc(x, w_mat, bias, *, relu=True):
    N, H, W, C = x.shape
    out = matmul_bias(x.reshape(N * H * W, C), w_mat, bias, relu=relu)
    return out.reshape(N, H, W, w_mat.shape[1])


# ----------------------------------------------------------------------------
# Kernel 2: 3x3 "same" conv, NHWC, im2col fused into the kernel.
# One grid step per batch element; the full padded map lives in VMEM and each
# of the k*k taps is a static slice matmul accumulated in f32.
# ----------------------------------------------------------------------------
def _conv3x3_kernel(x_ref, w_ref, b_ref, o_ref, *, k, dilation, stride, relu):
    # x_ref: (Hp, Wp, Cin) padded slab (bf16);  w_ref: (k*k*Cin, Cout) bf16
    # b_ref: (1, Cout) f32;                     o_ref: (oh, ow, Cout)
    oh, ow, cout = o_ref.shape
    cin = x_ref.shape[-1]
    bias = b_ref[...]

    def row_body(i, carry):
        acc = jnp.zeros((ow, cout), jnp.float32)
        for ki in range(k):
            row = x_ref[i * stride + ki * dilation]            # (Wp, Cin)
            for kj in range(k):
                tap = ki * k + kj
                patch = row[kj * dilation: kj * dilation + ow, :]
                w_tap = w_ref[tap * cin:(tap + 1) * cin, :]
                acc = acc + jnp.dot(patch, w_tap,
                                    preferred_element_type=jnp.float32)
        res = acc + bias
        if relu:
            res = jnp.maximum(res, 0.0)
        o_ref[i] = res.astype(o_ref.dtype)
        return carry

    jax.lax.fori_loop(0, oh, row_body, 0)


def conv3x3_nhwc(x, w_mat, bias, *, dilation=1, stride=1, relu=True):
    """3x3 'same' conv, BN folded, optional ReLU.  Row stride handled inside
    the kernel; column stride by subsampling the stride-1 output width."""
    N, H, W, Cin = x.shape
    k = 3
    pad = dilation
    xp = jnp.pad(x, ((0, 0), (pad, pad), (pad, pad), (0, 0)))
    Hp, Wp = H + 2 * pad, W + 2 * pad
    oh = (Hp - dilation * (k - 1) - 1) // stride + 1
    ow_full = Wp - dilation * (k - 1)                  # stride-1 output width
    Cout = w_mat.shape[1]

    out = pl.pallas_call(
        functools.partial(_conv3x3_kernel, k=k, dilation=dilation,
                          stride=stride, relu=relu),
        out_shape=jax.ShapeDtypeStruct((N, oh, ow_full, Cout), jnp.bfloat16),
        grid=(N,),
        in_specs=[
            pl.BlockSpec((None, Hp, Wp, Cin), lambda n: (n, 0, 0, 0)),
            pl.BlockSpec((k * k * Cin, Cout), lambda n: (0, 0)),
            pl.BlockSpec((1, Cout), lambda n: (0, 0)),
        ],
        out_specs=pl.BlockSpec((None, oh, ow_full, Cout),
                               lambda n: (n, 0, 0, 0)),
        compiler_params=pltpu.CompilerParams(dimension_semantics=("parallel",)),
    )(xp, w_mat, bias)

    if stride > 1:
        # TODO(synk): column stride via wrapper subsample of the stride-1 width
        # (exact; avoids strided in-kernel slices at negligible extra compute).
        out = out[:, :, ::stride, :]
    return out


# ----------------------------------------------------------------------------
# Kernel 3: bilinear resize (align_corners=True) as one interp-matrix matmul
# per batch element: out = B @ x,  B = kron(Wh, Ww)  (<=4 non-zeros per row).
# ----------------------------------------------------------------------------
def _bilinear_kernel(b_ref, x_ref, o_ref):
    o_ref[...] = jnp.dot(b_ref[...], x_ref[...].astype(jnp.float32),
                         preferred_element_type=jnp.float32).astype(o_ref.dtype)


def _interp_matrix(in_size, out_size):
    m = np.zeros((out_size, in_size), np.float32)
    for i in range(out_size):
        src = 0.0 if out_size == 1 else i * (in_size - 1) / (out_size - 1)
        i0 = int(np.floor(src))
        i1 = min(i0 + 1, in_size - 1)
        f = src - i0
        m[i, i0] += 1.0 - f
        m[i, i1] += f
    return m


def bilinear_upsample_nhwc(x, out_h, out_w, out_dtype=None):
    if out_dtype is None:
        out_dtype = x.dtype
    N, H, W, C = x.shape
    bmat = jnp.asarray(
        np.kron(_interp_matrix(H, out_h), _interp_matrix(W, out_w)), jnp.float32)
    xf = x.reshape(N, H * W, C)
    out = pl.pallas_call(
        _bilinear_kernel,
        out_shape=jax.ShapeDtypeStruct((N, out_h * out_w, C), out_dtype),
        grid=(N,),
        in_specs=[
            pl.BlockSpec((out_h * out_w, H * W), lambda n: (0, 0)),
            pl.BlockSpec((None, H * W, C), lambda n: (n, 0, 0)),
        ],
        out_specs=pl.BlockSpec((None, out_h * out_w, C), lambda n: (n, 0, 0)),
        compiler_params=pltpu.CompilerParams(dimension_semantics=("parallel",)),
    )(bmat, xf)
    return out.reshape(N, out_h, out_w, C)


# ----------------------------------------------------------------------------
# Parameter construction (deterministic, reduced channel counts).
# ----------------------------------------------------------------------------
def _conv_w(key, cout, cin, k):
    fan = cin * k * k
    return jax.random.normal(key, (cout, cin, k, k), jnp.float32) / np.sqrt(fan)


def _bn_fold(key, c, eps=1e-5):
    k1, k2 = jax.random.split(key)
    gamma = 1.0 + 0.1 * jax.random.normal(k1, (c,), jnp.float32)
    beta = 0.1 * jax.random.normal(k2, (c,), jnp.float32)
    scale = gamma / jnp.sqrt(1.0 + eps)    # eval BN with running stats (0, 1)
    return scale, beta


def make_params(seed=0):
    key = jax.random.PRNGKey(seed)
    keys = jax.random.split(key, 32)
    ki = iter(range(32))
    p = {}

    def conv_bn(name, cout, cin, k):
        p[name + "_w"] = _conv_w(keys[next(ki)], cout, cin, k)
        p[name + "_s"], p[name + "_b"] = _bn_fold(keys[next(ki)], cout)

    # backbone (DRN-like, reduced)
    conv_bn("stem", C_STEM, 3, 3)
    conv_bn("b1", C_B1, C_STEM, 3)
    conv_bn("b2", C_LOW, C_B1, 3)
    conv_bn("b3", C_HIGH, C_LOW, 3)
    conv_bn("b4", C_HIGH, C_HIGH, 3)
    # ASPP
    conv_bn("aspp1", C_ASPP, C_HIGH, 1)
    conv_bn("aspp2", C_ASPP, C_HIGH, 3)
    conv_bn("aspp3", C_ASPP, C_HIGH, 3)
    conv_bn("aspp4", C_ASPP, C_HIGH, 3)
    conv_bn("gp", C_ASPP, C_HIGH, 1)
    conv_bn("aspp_proj", C_ASPP, 5 * C_ASPP, 1)
    # decoder
    conv_bn("dec_low", C_DEC_LOW, C_LOW, 1)
    conv_bn("dec1", C_DEC, C_ASPP + C_DEC_LOW, 3)
    conv_bn("dec2", C_DEC, C_DEC, 3)
    p["cls_w"] = _conv_w(keys[next(ki)], NUM_CLASSES, C_DEC, 1)
    p["cls_b"] = 0.01 * jax.random.normal(keys[next(ki)], (NUM_CLASSES,), jnp.float32)
    return p


def _pack_w(w, cin_map, cin_pad, cout_pad=CP):
    """(Cout,Cin,k,k) conv weight -> (k*k*cin_pad, cout_pad) tap-major matrix.
    cin_map: list of (dst_slot, src_channel, length) placing real input
    channels at their lane-padded slots (handles padded concatenations)."""
    cout, _, k, _ = w.shape
    mat = jnp.zeros((k * k, cin_pad, cout_pad), jnp.float32)
    for dst, src, n in cin_map:
        blk = jnp.transpose(w[:, src:src + n], (2, 3, 1, 0)).reshape(k * k, n, cout)
        mat = mat.at[:, dst:dst + n, :cout].set(blk)
    return mat.reshape(k * k * cin_pad, cout_pad).astype(jnp.bfloat16)


def _pack_b(bias, cout_pad=CP):
    out = jnp.zeros((1, cout_pad), jnp.float32)
    return out.at[0, :bias.shape[0]].set(bias)


def prep_params(p):
    """Fold BN scale into the weights and build lane-dense (128-padded) mats."""
    q = {}

    def std(name, cin_pad=CP, cin_map=None, center_tap=False):
        w = p[name + "_w"] * p[name + "_s"][:, None, None, None]
        if center_tap:        # dilation >= feature size -> only the centre tap
            w = w[:, :, 1:2, 1:2]
        if cin_map is None:
            cin_map = [(0, 0, w.shape[1])]
        q[name + "_w"] = _pack_w(w, cin_map, cin_pad)
        q[name + "_b"] = _pack_b(p[name + "_b"])

    for name in ("stem", "b1", "b2", "b3", "b4", "aspp1", "gp",
                 "dec_low", "dec2"):
        std(name)
    for name in ("aspp2", "aspp3", "aspp4"):
        std(name, center_tap=True)
    std("aspp_proj", cin_pad=5 * CP,
        cin_map=[(b * CP, b * C_ASPP, C_ASPP) for b in range(5)])
    std("dec1", cin_pad=2 * CP,
        cin_map=[(0, 0, C_ASPP), (CP, C_ASPP, C_DEC_LOW)])
    q["cls_w"] = _pack_w(p["cls_w"], [(0, 0, C_DEC)], CP)
    q["cls_b"] = _pack_b(p["cls_b"])

    # Fuse the four parallel ASPP branches (same input) into one 512-lane matmul.
    q["aspp14_w"] = jnp.concatenate(
        [q.pop(n + "_w") for n in ("aspp1", "aspp2", "aspp3", "aspp4")], axis=1)
    q["aspp14_b"] = jnp.concatenate(
        [q.pop(n + "_b") for n in ("aspp1", "aspp2", "aspp3", "aspp4")], axis=1)
    return q


# ----------------------------------------------------------------------------
# DeepLab forward pass.
# ----------------------------------------------------------------------------
def deeplab_forward(inputs, q):
    N, _, H, W = inputs.shape
    x = jnp.transpose(inputs, (0, 2, 3, 1))                      # NCHW -> NHWC
    x = jnp.pad(x, ((0, 0), (0, 0), (0, 0), (0, CP - x.shape[-1])))
    x = x.astype(jnp.bfloat16)

    def cbr3(name, t, dilation=1, stride=1):
        return conv3x3_nhwc(t, q[name + "_w"], q[name + "_b"],
                            dilation=dilation, stride=stride, relu=True)

    # ---- backbone (low-level feature @ stride 4, high-level @ stride 8)
    h = cbr3("stem", x)
    h = cbr3("b1", h, stride=2)                                  # /2
    low = cbr3("b2", h, stride=2)                                # /4
    hi = cbr3("b3", low, stride=2)                               # /8
    hi = cbr3("b4", hi, dilation=2)                              # /8, dilated

    # ---- ASPP (output_stride=8 -> dilations 1, 12, 24, 36)
    Nb, Hh, Wh, _ = hi.shape
    # dilation >= feature size: every non-centre tap of the dilated 3x3 convs
    # reads only zero padding, so they reduce exactly to centre-tap 1x1 convs.
    assert Hh <= 12 and Wh <= 12, "ASPP centre-tap specialisation needs d >= H,W"
    a14 = conv1x1_nhwc(hi, q["aspp14_w"], q["aspp14_b"])         # branches 1-4

    pooled = jnp.mean(hi.astype(jnp.float32), axis=(1, 2)).astype(jnp.bfloat16)
    gp = matmul_bias(pooled, q["gp_w"], q["gp_b"], relu=True)    # (N, CP)
    # pooled map is 1x1 -> broadcast == bilinear upsample (align_corners=True)
    a5 = jnp.broadcast_to(gp[:, None, None, :], (Nb, Hh, Wh, CP))

    cat = jnp.concatenate([a14, a5], axis=-1)                    # (N,Hh,Wh,5*CP)
    xa = conv1x1_nhwc(cat, q["aspp_proj_w"], q["aspp_proj_b"])
    # Dropout(0.5) -> identity (eval)

    # ---- decoder
    lowp = conv1x1_nhwc(low, q["dec_low_w"], q["dec_low_b"])
    xa = bilinear_upsample_nhwc(xa, low.shape[1], low.shape[2])
    xd = jnp.concatenate([xa, lowp], axis=-1)                    # (N,..,2*CP)
    xd = cbr3("dec1", xd)
    xd = cbr3("dec2", xd)            # Dropout layers -> identity (eval)
    logits = conv1x1_nhwc(xd, q["cls_w"], q["cls_b"], relu=False)

    # ---- final bilinear upsample to input resolution (align_corners=True)
    out = bilinear_upsample_nhwc(logits, H, W, out_dtype=jnp.float32)
    out = out[..., :NUM_CLASSES]
    return jnp.transpose(out, (0, 3, 1, 2))                      # NHWC -> NCHW


if __name__ == "__main__":
    key = jax.random.PRNGKey(0)
    inputs = jax.random.normal(key, (2, 3, 32, 32), jnp.float32)   # NCHW
    params = prep_params(make_params(seed=0))

    fwd = jax.jit(deeplab_forward)
    out = jax.block_until_ready(fwd(inputs, params))

    assert out.shape == (2, NUM_CLASSES, 32, 32), out.shape
    assert out.dtype == jnp.float32
    assert bool(jnp.all(jnp.isfinite(out)))
    print("KERNEL_OK")
</pallas_src>

<mosaic_0001>
module attributes {stable_mosaic.version = 11 : i64} {
  func.func @_conv3x3_kernel(%arg0: i32, %arg1: memref<1x34x34x128xbf16, #tpu.memory_space<vmem>>, %arg2: memref<1152x128xbf16, #tpu.memory_space<vmem>>, %arg3: memref<1x128xf32, #tpu.memory_space<vmem>>, %arg4: memref<1x32x32x128xbf16, #tpu.memory_space<vmem>>) attributes {dimension_semantics = [#tpu.dimension_semantics<parallel>], iteration_bounds = array<i64: 2>, scalar_prefetch = 0 : i64, scratch_operands = 0 : i64, tpu.core_type = #tpu.core_type<tc>, window_params = [{transform_indices = @transform_0, window_bounds = array<i64: 1, 34, 34, 128>}, {pipeline_mode = #tpu.pipeline_mode<synchronous>, transform_indices = @transform_1, window_bounds = array<i64: 1152, 128>}, {pipeline_mode = #tpu.pipeline_mode<synchronous>, transform_indices = @transform_2, window_bounds = array<i64: 1, 128>}, {transform_indices = @transform_3, window_bounds = array<i64: 1, 32, 32, 128>}]} {
    %c0 = arith.constant 0 : index
    %c0_0 = arith.constant 0 : index
    %0 = vector.load %arg3[%c0, %c0_0] : memref<1x128xf32, #tpu.memory_space<vmem>>, vector<1x128xf32>
    %c0_i32 = arith.constant 0 : i32
    %c32_i32 = arith.constant 32 : i32
    %1 = arith.addi %c0_i32, %c32_i32 : i32
    %c1_i32 = arith.constant 1 : i32
    scf.for %arg5 = %c0_i32 to %1 step %c1_i32  : i32 {
      %cst = arith.constant 0.000000e+00 : f32
      %2 = vector.broadcast %cst : f32 to vector<32x128xf32>
      %c1_i32_2 = arith.constant 1 : i32
      %3 = arith.muli %arg5, %c1_i32_2 : i32
      %c0_i32_3 = arith.constant 0 : i32
      %4 = arith.addi %3, %c0_i32_3 : i32
      %c0_4 = arith.constant 0 : index
      %5 = arith.index_cast %4 : i32 to index
      %c0_5 = arith.constant 0 : index
      %c0_6 = arith.constant 0 : index
      %6 = vector.load %arg1[%c0_4, %5, %c0_5, %c0_6] : memref<1x34x34x128xbf16, #tpu.memory_space<vmem>>, vector<1x1x34x128xbf16>
      %7 = vector.shape_cast %6 : vector<1x1x34x128xbf16> to vector<34x128xbf16>
      %8 = vector.extract_strided_slice %7 {offsets = [0, 0], sizes = [32, 128], strides = [1, 1]} : vector<34x128xbf16> to vector<32x128xbf16>
      %c0_7 = arith.constant 0 : index
      %c0_8 = arith.constant 0 : index
      %9 = vector.load %arg2[%c0_7, %c0_8] : memref<1152x128xbf16, #tpu.memory_space<vmem>>, vector<128x128xbf16>
      %cst_9 = arith.constant dense<0.000000e+00> : vector<32x128xf32>
      %10 = tpu.matmul %8, %9, %cst_9 {dimension_numbers = #tpu.dot_dimension_numbers<[1], [0], [0], [1], [0, 0, 1, 1], [], []>} : vector<32x128xbf16>, vector<128x128xbf16>, vector<32x128xf32> -> vector<32x128xf32>
      %11 = arith.addf %2, %10 : vector<32x128xf32>
      %12 = vector.extract_strided_slice %7 {offsets = [1, 0], sizes = [32, 128], strides = [1, 1]} : vector<34x128xbf16> to vector<32x128xbf16>
      %c128 = arith.constant 128 : index
      %c0_10 = arith.constant 0 : index
      %13 = vector.load %arg2[%c128, %c0_10] : memref<1152x128xbf16, #tpu.memory_space<vmem>>, vector<128x128xbf16>
      %cst_11 = arith.constant dense<0.000000e+00> : vector<32x128xf32>
      %14 = tpu.matmul %12, %13, %cst_11 {dimension_numbers = #tpu.dot_dimension_numbers<[1], [0], [0], [1], [0, 0, 1, 1], [], []>} : vector<32x128xbf16>, vector<128x128xbf16>, vector<32x128xf32> -> vector<32x128xf32>
      %15 = arith.addf %11, %14 : vector<32x128xf32>
      %16 = vector.extract_strided_slice %7 {offsets = [2, 0], sizes = [32, 128], strides = [1, 1]} : vector<34x128xbf16> to vector<32x128xbf16>
      %c256 = arith.constant 256 : index
      %c0_12 = arith.constant 0 : index
      %17 = vector.load %arg2[%c256, %c0_12] : memref<1152x128xbf16, #tpu.memory_space<vmem>>, vector<128x128xbf16>
      %cst_13 = arith.constant dense<0.000000e+00> : vector<32x128xf32>
      %18 = tpu.matmul %16, %17, %cst_13 {dimension_numbers = #tpu.dot_dimension_numbers<[1], [0], [0], [1], [0, 0, 1, 1], [], []>} : vector<32x128xbf16>, vector<128x128xbf16>, vector<32x128xf32> -> vector<32x128xf32>
      %19 = arith.addf %15, %18 : vector<32x128xf32>
      %c1_i32_14 = arith.constant 1 : i32
      %20 = arith.muli %arg5, %c1_i32_14 : i32
      %c1_i32_15 = arith.constant 1 : i32
      %21 = arith.addi %20, %c1_i32_15 : i32
      %c0_16 = arith.constant 0 : index
      %22 = arith.index_cast %21 : i32 to index
      %c0_17 = arith.constant 0 : index
      %c0_18 = arith.constant 0 : index
      %23 = vector.load %arg1[%c0_16, %22, %c0_17, %c0_18] : memref<1x34x34x128xbf16, #tpu.memory_space<vmem>>, vector<1x1x34x128xbf16>
      %24 = vector.shape_cast %23 : vector<1x1x34x128xbf16> to vector<34x128xbf16>
      %25 = vector.extract_strided_slice %24 {offsets = [0, 0], sizes = [32, 128], strides = [1, 1]} : vector<34x128xbf16> to vector<32x128xbf16>
      %c384 = arith.constant 384 : index
      %c0_19 = arith.constant 0 : index
      %26 = vector.load %arg2[%c384, %c0_19] : memref<1152x128xbf16, #tpu.memory_space<vmem>>, vector<128x128xbf16>
      %cst_20 = arith.constant dense<0.000000e+00> : vector<32x128xf32>
      %27 = tpu.matmul %25, %26, %cst_20 {dimension_numbers = #tpu.dot_dimension_numbers<[1], [0], [0], [1], [0, 0, 1, 1], [], []>} : vector<32x128xbf16>, vector<128x128xbf16>, vector<32x128xf32> -> vector<32x128xf32>
      %28 = arith.addf %19, %27 : vector<32x128xf32>
      %29 = vector.extract_strided_slice %24 {offsets = [1, 0], sizes = [32, 128], strides = [1, 1]} : vector<34x128xbf16> to vector<32x128xbf16>
      %c512 = arith.constant 512 : index
      %c0_21 = arith.constant 0 : index
      %30 = vector.load %arg2[%c512, %c0_21] : memref<1152x128xbf16, #tpu.memory_space<vmem>>, vector<128x128xbf16>
      %cst_22 = arith.constant dense<0.000000e+00> : vector<32x128xf32>
      %31 = tpu.matmul %29, %30, %cst_22 {dimension_numbers = #tpu.dot_dimension_numbers<[1], [0], [0], [1], [0, 0, 1, 1], [], []>} : vector<32x128xbf16>, vector<128x128xbf16>, vector<32x128xf32> -> vector<32x128xf32>
      %32 = arith.addf %28, %31 : vector<32x128xf32>
      %33 = vector.extract_strided_slice %24 {offsets = [2, 0], sizes = [32, 128], strides = [1, 1]} : vector<34x128xbf16> to vector<32x128xbf16>
      %c640 = arith.constant 640 : index
      %c0_23 = arith.constant 0 : index
      %34 = vector.load %arg2[%c640, %c0_23] : memref<1152x128xbf16, #tpu.memory_space<vmem>>, vector<128x128xbf16>
      %cst_24 = arith.constant dense<0.000000e+00> : vector<32x128xf32>
      %35 = tpu.matmul %33, %34, %cst_24 {dimension_numbers = #tpu.dot_dimension_numbers<[1], [0], [0], [1], [0, 0, 1, 1], [], []>} : vector<32x128xbf16>, vector<128x128xbf16>, vector<32x128xf32> -> vector<32x128xf32>
      %36 = arith.addf %32, %35 : vector<32x128xf32>
      %c1_i32_25 = arith.constant 1 : i32
      %37 = arith.muli %arg5, %c1_i32_25 : i32
      %c2_i32 = arith.constant 2 : i32
      %38 = arith.addi %37, %c2_i32 : i32
      %c0_26 = arith.constant 0 : index
      %39 = arith.index_cast %38 : i32 to index
      %c0_27 = arith.constant 0 : index
      %c0_28 = arith.constant 0 : index
      %40 = vector.load %arg1[%c0_26, %39, %c0_27, %c0_28] : memref<1x34x34x128xbf16, #tpu.memory_space<vmem>>, vector<1x1x34x128xbf16>
      %41 = vector.shape_cast %40 : vector<1x1x34x128xbf16> to vector<34x128xbf16>
      %42 = vector.extract_strided_slice %41 {offsets = [0, 0], sizes = [32, 128], strides = [1, 1]} : vector<34x128xbf16> to vector<32x128xbf16>
      %c768 = arith.constant 768 : index
      %c0_29 = arith.constant 0 : index
      %43 = vector.load %arg2[%c768, %c0_29] : memref<1152x128xbf16, #tpu.memory_space<vmem>>, vector<128x128xbf16>
      %cst_30 = arith.constant dense<0.000000e+00> : vector<32x128xf32>
      %44 = tpu.matmul %42, %43, %cst_30 {dimension_numbers = #tpu.dot_dimension_numbers<[1], [0], [0], [1], [0, 0, 1, 1], [], []>} : vector<32x128xbf16>, vector<128x128xbf16>, vector<32x128xf32> -> vector<32x128xf32>
      %45 = arith.addf %36, %44 : vector<32x128xf32>
      %46 = vector.extract_strided_slice %41 {offsets = [1, 0], sizes = [32, 128], strides = [1, 1]} : vector<34x128xbf16> to vector<32x128xbf16>
      %c896 = arith.constant 896 : index
      %c0_31 = arith.constant 0 : index
      %47 = vector.load %arg2[%c896, %c0_31] : memref<1152x128xbf16, #tpu.memory_space<vmem>>, vector<128x128xbf16>
      %cst_32 = arith.constant dense<0.000000e+00> : vector<32x128xf32>
      %48 = tpu.matmul %46, %47, %cst_32 {dimension_numbers = #tpu.dot_dimension_numbers<[1], [0], [0], [1], [0, 0, 1, 1], [], []>} : vector<32x128xbf16>, vector<128x128xbf16>, vector<32x128xf32> -> vector<32x128xf32>
      %49 = arith.addf %45, %48 : vector<32x128xf32>
      %50 = vector.extract_strided_slice %41 {offsets = [2, 0], sizes = [32, 128], strides = [1, 1]} : vector<34x128xbf16> to vector<32x128xbf16>
      %c1024 = arith.constant 1024 : index
      %c0_33 = arith.constant 0 : index
      %51 = vector.load %arg2[%c1024, %c0_33] : memref<1152x128xbf16, #tpu.memory_space<vmem>>, vector<128x128xbf16>
      %cst_34 = arith.constant dense<0.000000e+00> : vector<32x128xf32>
      %52 = tpu.matmul %50, %51, %cst_34 {dimension_numbers = #tpu.dot_dimension_numbers<[1], [0], [0], [1], [0, 0, 1, 1], [], []>} : vector<32x128xbf16>, vector<128x128xbf16>, vector<32x128xf32> -> vector<32x128xf32>
      %53 = arith.addf %49, %52 : vector<32x128xf32>
      %54 = vector.broadcast %0 : vector<1x128xf32> to vector<32x128xf32>
      %55 = arith.addf %53, %54 : vector<32x128xf32>
      %cst_35 = arith.constant 0.000000e+00 : f32
      %56 = vector.broadcast %cst_35 : f32 to vector<32x128xf32>
      %57 = arith.maximumf %55, %56 : vector<32x128xf32>
      %58 = arith.truncf %57 : vector<32x128xf32> to vector<32x128xbf16>
      %c0_36 = arith.constant 0 : index
      %59 = arith.index_cast %arg5 : i32 to index
      %c0_37 = arith.constant 0 : index
      %c0_38 = arith.constant 0 : index
      %60 = vector.load %arg4[%c0_36, %59, %c0_37, %c0_38] : memref<1x32x32x128xbf16, #tpu.memory_space<vmem>>, vector<1x1x32x128xbf16>
      %61 = vector.shape_cast %60 : vector<1x1x32x128xbf16> to vector<32x128xbf16>
      %62 = vector.shape_cast %58 : vector<32x128xbf16> to vector<1x1x32x128xbf16>
      tpu.vector_store %arg4[%c0_36, %59, %c0_37, %c0_38], %62 {strides = array<i32>} : memref<1x32x32x128xbf16, #tpu.memory_space<vmem>>, vector<1x1x32x128xbf16>,
    }
    %c32_i32_1 = arith.constant 32 : i32
    return
  }
  func.func @transform_0(%arg0: i32) -> (i32, i32, i32, i32) {
    %c0_i32 = arith.constant 0 : i32
    %c0_i32_0 = arith.constant 0 : i32
    %c0_i32_1 = arith.constant 0 : i32
    %c0_i32_2 = arith.constant 0 : i32
    return %arg0, %c0_i32, %c0_i32_0, %c0_i32_1 : i32, i32, i32, i32
  }
  func.func @transform_1(%arg0: i32) -> (i32, i32) {
    %c0_i32 = arith.constant 0 : i32
    %c0_i32_0 = arith.constant 0 : i32
    %c0_i32_1 = arith.constant 0 : i32
    return %c0_i32, %c0_i32_0 : i32, i32
  }
  func.func @transform_2(%arg0: i32) -> (i32, i32) {
    %c0_i32 = arith.constant 0 : i32
    %c0_i32_0 = arith.constant 0 : i32
    %c0_i32_1 = arith.constant 0 : i32
    return %c0_i32, %c0_i32_0 : i32, i32
  }
  func.func @transform_3(%arg0: i32) -> (i32, i32, i32, i32) {
    %c0_i32 = arith.constant 0 : i32
    %c0_i32_0 = arith.constant 0 : i32
    %c0_i32_1 = arith.constant 0 : i32
    %c0_i32_2 = arith.constant 0 : i32
    return %arg0, %c0_i32, %c0_i32_0, %c0_i32_1 : i32, i32, i32, i32
  }
}

module attributes {stable_mosaic.version = 11 : i64} {
  func.func @_conv3x3_kernel(%arg0: i32, %arg1: memref<1x34x34x128xbf16, #tpu.memory_space<vmem>>, %arg2: memref<1152x128xbf16, #tpu.memory_space<vmem>>, %arg3: memref<1x128xf32, #tpu.memory_space<vmem>>, %arg4: memref<1x16x32x128xbf16, #tpu.memory_space<vmem>>) attributes {dimension_semantics = [#tpu.dimension_semantics<parallel>], iteration_bounds = array<i64: 2>, scalar_prefetch = 0 : i64, scratch_operands = 0 : i64, tpu.core_type = #tpu.core_type<tc>, window_params = [{transform_indices = @transform_0, window_bounds = array<i64: 1, 34, 34, 128>}, {pipeline_mode = #tpu.pipeline_mode<synchronous>, transform_indices = @transform_1, window_bounds = array<i64: 1152, 128>}, {pipeline_mode = #tpu.pipeline_mode<synchronous>, transform_indices = @transform_2, window_bounds = array<i64: 1, 128>}, {transform_indices = @transform_3, window_bounds = array<i64: 1, 16, 32, 128>}]} {
    %c0 = arith.constant 0 : index
    %c0_0 = arith.constant 0 : index
    %0 = vector.load %arg3[%c0, %c0_0] : memref<1x128xf32, #tpu.memory_space<vmem>>, vector<1x128xf32>
    %c0_i32 = arith.constant 0 : i32
    %c16_i32 = arith.constant 16 : i32
    %1 = arith.addi %c0_i32, %c16_i32 : i32
    %c1_i32 = arith.constant 1 : i32
    scf.for %arg5 = %c0_i32 to %1 step %c1_i32  : i32 {
      %cst = arith.constant 0.000000e+00 : f32
      %2 = vector.broadcast %cst : f32 to vector<32x128xf32>
      %c2_i32 = arith.constant 2 : i32
      %3 = arith.muli %arg5, %c2_i32 : i32
      %c0_i32_2 = arith.constant 0 : i32
      %4 = arith.addi %3, %c0_i32_2 : i32
      %c0_3 = arith.constant 0 : index
      %5 = arith.index_cast %4 : i32 to index
      %c0_4 = arith.constant 0 : index
      %c0_5 = arith.constant 0 : index
      %6 = vector.load %arg1[%c0_3, %5, %c0_4, %c0_5] : memref<1x34x34x128xbf16, #tpu.memory_space<vmem>>, vector<1x1x34x128xbf16>
      %7 = vector.shape_cast %6 : vector<1x1x34x128xbf16> to vector<34x128xbf16>
      %8 = vector.extract_strided_slice %7 {offsets = [0, 0], sizes = [32, 128], strides = [1, 1]} : vector<34x128xbf16> to vector<32x128xbf16>
      %c0_6 = arith.constant 0 : index
      %c0_7 = arith.constant 0 : index
      %9 = vector.load %arg2[%c0_6, %c0_7] : memref<1152x128xbf16, #tpu.memory_space<vmem>>, vector<128x128xbf16>
      %cst_8 = arith.constant dense<0.000000e+00> : vector<32x128xf32>
      %10 = tpu.matmul %8, %9, %cst_8 {dimension_numbers = #tpu.dot_dimension_numbers<[1], [0], [0], [1], [0, 0, 1, 1], [], []>} : vector<32x128xbf16>, vector<128x128xbf16>, vector<32x128xf32> -> vector<32x128xf32>
      %11 = arith.addf %2, %10 : vector<32x128xf32>
      %12 = vector.extract_strided_slice %7 {offsets = [1, 0], sizes = [32, 128], strides = [1, 1]} : vector<34x128xbf16> to vector<32x128xbf16>
      %c128 = arith.constant 128 : index
      %c0_9 = arith.constant 0 : index
      %13 = vector.load %arg2[%c128, %c0_9] : memref<1152x128xbf16, #tpu.memory_space<vmem>>, vector<128x128xbf16>
      %cst_10 = arith.constant dense<0.000000e+00> : vector<32x128xf32>
      %14 = tpu.matmul %12, %13, %cst_10 {dimension_numbers = #tpu.dot_dimension_numbers<[1], [0], [0], [1], [0, 0, 1, 1], [], []>} : vector<32x128xbf16>, vector<128x128xbf16>, vector<32x128xf32> -> vector<32x128xf32>
      %15 = arith.addf %11, %14 : vector<32x128xf32>
      %16 = vector.extract_strided_slice %7 {offsets = [2, 0], sizes = [32, 128], strides = [1, 1]} : vector<34x128xbf16> to vector<32x128xbf16>
      %c256 = arith.constant 256 : index
      %c0_11 = arith.constant 0 : index
      %17 = vector.load %arg2[%c256, %c0_11] : memref<1152x128xbf16, #tpu.memory_space<vmem>>, vector<128x128xbf16>
      %cst_12 = arith.constant dense<0.000000e+00> : vector<32x128xf32>
      %18 = tpu.matmul %16, %17, %cst_12 {dimension_numbers = #tpu.dot_dimension_numbers<[1], [0], [0], [1], [0, 0, 1, 1], [], []>} : vector<32x128xbf16>, vector<128x128xbf16>, vector<32x128xf32> -> vector<32x128xf32>
      %19 = arith.addf %15, %18 : vector<32x128xf32>
      %c2_i32_13 = arith.constant 2 : i32
      %20 = arith.muli %arg5, %c2_i32_13 : i32
      %c1_i32_14 = arith.constant 1 : i32
      %21 = arith.addi %20, %c1_i32_14 : i32
      %c0_15 = arith.constant 0 : index
      %22 = arith.index_cast %21 : i32 to index
      %c0_16 = arith.constant 0 : index
      %c0_17 = arith.constant 0 : index
      %23 = vector.load %arg1[%c0_15, %22, %c0_16, %c0_17] : memref<1x34x34x128xbf16, #tpu.memory_space<vmem>>, vector<1x1x34x128xbf16>
      %24 = vector.shape_cast %23 : vector<1x1x34x128xbf16> to vector<34x128xbf16>
      %25 = vector.extract_strided_slice %24 {offsets = [0, 0], sizes = [32, 128], strides = [1, 1]} : vector<34x128xbf16> to vector<32x128xbf16>
      %c384 = arith.constant 384 : index
      %c0_18 = arith.constant 0 : index
      %26 = vector.load %arg2[%c384, %c0_18] : memref<1152x128xbf16, #tpu.memory_space<vmem>>, vector<128x128xbf16>
      %cst_19 = arith.constant dense<0.000000e+00> : vector<32x128xf32>
      %27 = tpu.matmul %25, %26, %cst_19 {dimension_numbers = #tpu.dot_dimension_numbers<[1], [0], [0], [1], [0, 0, 1, 1], [], []>} : vector<32x128xbf16>, vector<128x128xbf16>, vector<32x128xf32> -> vector<32x128xf32>
      %28 = arith.addf %19, %27 : vector<32x128xf32>
      %29 = vector.extract_strided_slice %24 {offsets = [1, 0], sizes = [32, 128], strides = [1, 1]} : vector<34x128xbf16> to vector<32x128xbf16>
      %c512 = arith.constant 512 : index
      %c0_20 = arith.constant 0 : index
      %30 = vector.load %arg2[%c512, %c0_20] : memref<1152x128xbf16, #tpu.memory_space<vmem>>, vector<128x128xbf16>
      %cst_21 = arith.constant dense<0.000000e+00> : vector<32x128xf32>
      %31 = tpu.matmul %29, %30, %cst_21 {dimension_numbers = #tpu.dot_dimension_numbers<[1], [0], [0], [1], [0, 0, 1, 1], [], []>} : vector<32x128xbf16>, vector<128x128xbf16>, vector<32x128xf32> -> vector<32x128xf32>
      %32 = arith.addf %28, %31 : vector<32x128xf32>
      %33 = vector.extract_strided_slice %24 {offsets = [2, 0], sizes = [32, 128], strides = [1, 1]} : vector<34x128xbf16> to vector<32x128xbf16>
      %c640 = arith.constant 640 : index
      %c0_22 = arith.constant 0 : index
      %34 = vector.load %arg2[%c640, %c0_22] : memref<1152x128xbf16, #tpu.memory_space<vmem>>, vector<128x128xbf16>
      %cst_23 = arith.constant dense<0.000000e+00> : vector<32x128xf32>
      %35 = tpu.matmul %33, %34, %cst_23 {dimension_numbers = #tpu.dot_dimension_numbers<[1], [0], [0], [1], [0, 0, 1, 1], [], []>} : vector<32x128xbf16>, vector<128x128xbf16>, vector<32x128xf32> -> vector<32x128xf32>
      %36 = arith.addf %32, %35 : vector<32x128xf32>
      %c2_i32_24 = arith.constant 2 : i32
      %37 = arith.muli %arg5, %c2_i32_24 : i32
      %c2_i32_25 = arith.constant 2 : i32
      %38 = arith.addi %37, %c2_i32_25 : i32
      %c0_26 = arith.constant 0 : index
      %39 = arith.index_cast %38 : i32 to index
      %c0_27 = arith.constant 0 : index
      %c0_28 = arith.constant 0 : index
      %40 = vector.load %arg1[%c0_26, %39, %c0_27, %c0_28] : memref<1x34x34x128xbf16, #tpu.memory_space<vmem>>, vector<1x1x34x128xbf16>
      %41 = vector.shape_cast %40 : vector<1x1x34x128xbf16> to vector<34x128xbf16>
      %42 = vector.extract_strided_slice %41 {offsets = [0, 0], sizes = [32, 128], strides = [1, 1]} : vector<34x128xbf16> to vector<32x128xbf16>
      %c768 = arith.constant 768 : index
      %c0_29 = arith.constant 0 : index
      %43 = vector.load %arg2[%c768, %c0_29] : memref<1152x128xbf16, #tpu.memory_space<vmem>>, vector<128x128xbf16>
      %cst_30 = arith.constant dense<0.000000e+00> : vector<32x128xf32>
      %44 = tpu.matmul %42, %43, %cst_30 {dimension_numbers = #tpu.dot_dimension_numbers<[1], [0], [0], [1], [0, 0, 1, 1], [], []>} : vector<32x128xbf16>, vector<128x128xbf16>, vector<32x128xf32> -> vector<32x128xf32>
      %45 = arith.addf %36, %44 : vector<32x128xf32>
      %46 = vector.extract_strided_slice %41 {offsets = [1, 0], sizes = [32, 128], strides = [1, 1]} : vector<34x128xbf16> to vector<32x128xbf16>
      %c896 = arith.constant 896 : index
      %c0_31 = arith.constant 0 : index
      %47 = vector.load %arg2[%c896, %c0_31] : memref<1152x128xbf16, #tpu.memory_space<vmem>>, vector<128x128xbf16>
      %cst_32 = arith.constant dense<0.000000e+00> : vector<32x128xf32>
      %48 = tpu.matmul %46, %47, %cst_32 {dimension_numbers = #tpu.dot_dimension_numbers<[1], [0], [0], [1], [0, 0, 1, 1], [], []>} : vector<32x128xbf16>, vector<128x128xbf16>, vector<32x128xf32> -> vector<32x128xf32>
      %49 = arith.addf %45, %48 : vector<32x128xf32>
      %50 = vector.extract_strided_slice %41 {offsets = [2, 0], sizes = [32, 128], strides = [1, 1]} : vector<34x128xbf16> to vector<32x128xbf16>
      %c1024 = arith.constant 1024 : index
      %c0_33 = arith.constant 0 : index
      %51 = vector.load %arg2[%c1024, %c0_33] : memref<1152x128xbf16, #tpu.memory_space<vmem>>, vector<128x128xbf16>
      %cst_34 = arith.constant dense<0.000000e+00> : vector<32x128xf32>
      %52 = tpu.matmul %50, %51, %cst_34 {dimension_numbers = #tpu.dot_dimension_numbers<[1], [0], [0], [1], [0, 0, 1, 1], [], []>} : vector<32x128xbf16>, vector<128x128xbf16>, vector<32x128xf32> -> vector<32x128xf32>
      %53 = arith.addf %49, %52 : vector<32x128xf32>
      %54 = vector.broadcast %0 : vector<1x128xf32> to vector<32x128xf32>
      %55 = arith.addf %53, %54 : vector<32x128xf32>
      %cst_35 = arith.constant 0.000000e+00 : f32
      %56 = vector.broadcast %cst_35 : f32 to vector<32x128xf32>
      %57 = arith.maximumf %55, %56 : vector<32x128xf32>
      %58 = arith.truncf %57 : vector<32x128xf32> to vector<32x128xbf16>
      %c0_36 = arith.constant 0 : index
      %59 = arith.index_cast %arg5 : i32 to index
      %c0_37 = arith.constant 0 : index
      %c0_38 = arith.constant 0 : index
      %60 = vector.load %arg4[%c0_36, %59, %c0_37, %c0_38] : memref<1x16x32x128xbf16, #tpu.memory_space<vmem>>, vector<1x1x32x128xbf16>
      %61 = vector.shape_cast %60 : vector<1x1x32x128xbf16> to vector<32x128xbf16>
      %62 = vector.shape_cast %58 : vector<32x128xbf16> to vector<1x1x32x128xbf16>
      tpu.vector_store %arg4[%c0_36, %59, %c0_37, %c0_38], %62 {strides = array<i32>} : memref<1x16x32x128xbf16, #tpu.memory_space<vmem>>, vector<1x1x32x128xbf16>,
    }
    %c16_i32_1 = arith.constant 16 : i32
    return
  }
  func.func @transform_0(%arg0: i32) -> (i32, i32, i32, i32) {
    %c0_i32 = arith.constant 0 : i32
    %c0_i32_0 = arith.constant 0 : i32
    %c0_i32_1 = arith.constant 0 : i32
    %c0_i32_2 = arith.constant 0 : i32
    return %arg0, %c0_i32, %c0_i32_0, %c0_i32_1 : i32, i32, i32, i32
  }
  func.func @transform_1(%arg0: i32) -> (i32, i32) {
    %c0_i32 = arith.constant 0 : i32
    %c0_i32_0 = arith.constant 0 : i32
    %c0_i32_1 = arith.constant 0 : i32
    return %c0_i32, %c0_i32_0 : i32, i32
  }
  func.func @transform_2(%arg0: i32) -> (i32, i32) {
    %c0_i32 = arith.constant 0 : i32
    %c0_i32_0 = arith.constant 0 : i32
    %c0_i32_1 = arith.constant 0 : i32
    return %c0_i32, %c0_i32_0 : i32, i32
  }
  func.func @transform_3(%arg0: i32) -> (i32, i32, i32, i32) {
    %c0_i32 = arith.constant 0 : i32
    %c0_i32_0 = arith.constant 0 : i32
    %c0_i32_1 = arith.constant 0 : i32
    %c0_i32_2 = arith.constant 0 : i32
    return %arg0, %c0_i32, %c0_i32_0, %c0_i32_1 : i32, i32, i32, i32
  }
}

module attributes {stable_mosaic.version = 11 : i64} {
  func.func @_conv3x3_kernel(%arg0: i32, %arg1: memref<1x18x18x128xbf16, #tpu.memory_space<vmem>>, %arg2: memref<1152x128xbf16, #tpu.memory_space<vmem>>, %arg3: memref<1x128xf32, #tpu.memory_space<vmem>>, %arg4: memref<1x8x16x128xbf16, #tpu.memory_space<vmem>>) attributes {dimension_semantics = [#tpu.dimension_semantics<parallel>], iteration_bounds = array<i64: 2>, scalar_prefetch = 0 : i64, scratch_operands = 0 : i64, tpu.core_type = #tpu.core_type<tc>, window_params = [{transform_indices = @transform_0, window_bounds = array<i64: 1, 18, 18, 128>}, {pipeline_mode = #tpu.pipeline_mode<synchronous>, transform_indices = @transform_1, window_bounds = array<i64: 1152, 128>}, {pipeline_mode = #tpu.pipeline_mode<synchronous>, transform_indices = @transform_2, window_bounds = array<i64: 1, 128>}, {transform_indices = @transform_3, window_bounds = array<i64: 1, 8, 16, 128>}]} {
    %c0 = arith.constant 0 : index
    %c0_0 = arith.constant 0 : index
    %0 = vector.load %arg3[%c0, %c0_0] : memref<1x128xf32, #tpu.memory_space<vmem>>, vector<1x128xf32>
    %c0_i32 = arith.constant 0 : i32
    %c8_i32 = arith.constant 8 : i32
    %1 = arith.addi %c0_i32, %c8_i32 : i32
    %c1_i32 = arith.constant 1 : i32
    scf.for %arg5 = %c0_i32 to %1 step %c1_i32  : i32 {
      %cst = arith.constant 0.000000e+00 : f32
      %2 = vector.broadcast %cst : f32 to vector<16x128xf32>
      %c2_i32 = arith.constant 2 : i32
      %3 = arith.muli %arg5, %c2_i32 : i32
      %c0_i32_2 = arith.constant 0 : i32
      %4 = arith.addi %3, %c0_i32_2 : i32
      %c0_3 = arith.constant 0 : index
      %5 = arith.index_cast %4 : i32 to index
      %c0_4 = arith.constant 0 : index
      %c0_5 = arith.constant 0 : index
      %6 = vector.load %arg1[%c0_3, %5, %c0_4, %c0_5] : memref<1x18x18x128xbf16, #tpu.memory_space<vmem>>, vector<1x1x18x128xbf16>
      %7 = vector.shape_cast %6 : vector<1x1x18x128xbf16> to vector<18x128xbf16>
      %8 = vector.extract_strided_slice %7 {offsets = [0, 0], sizes = [16, 128], strides = [1, 1]} : vector<18x128xbf16> to vector<16x128xbf16>
      %c0_6 = arith.constant 0 : index
      %c0_7 = arith.constant 0 : index
      %9 = vector.load %arg2[%c0_6, %c0_7] : memref<1152x128xbf16, #tpu.memory_space<vmem>>, vector<128x128xbf16>
      %cst_8 = arith.constant dense<0.000000e+00> : vector<16x128xf32>
      %10 = tpu.matmul %8, %9, %cst_8 {dimension_numbers = #tpu.dot_dimension_numbers<[1], [0], [0], [1], [0, 0, 1, 1], [], []>} : vector<16x128xbf16>, vector<128x128xbf16>, vector<16x128xf32> -> vector<16x128xf32>
      %11 = arith.addf %2, %10 : vector<16x128xf32>
      %12 = vector.extract_strided_slice %7 {offsets = [1, 0], sizes = [16, 128], strides = [1, 1]} : vector<18x128xbf16> to vector<16x128xbf16>
      %c128 = arith.constant 128 : index
      %c0_9 = arith.constant 0 : index
      %13 = vector.load %arg2[%c128, %c0_9] : memref<1152x128xbf16, #tpu.memory_space<vmem>>, vector<128x128xbf16>
      %cst_10 = arith.constant dense<0.000000e+00> : vector<16x128xf32>
      %14 = tpu.matmul %12, %13, %cst_10 {dimension_numbers = #tpu.dot_dimension_numbers<[1], [0], [0], [1], [0, 0, 1, 1], [], []>} : vector<16x128xbf16>, vector<128x128xbf16>, vector<16x128xf32> -> vector<16x128xf32>
      %15 = arith.addf %11, %14 : vector<16x128xf32>
      %16 = vector.extract_strided_slice %7 {offsets = [2, 0], sizes = [16, 128], strides = [1, 1]} : vector<18x128xbf16> to vector<16x128xbf16>
      %c256 = arith.constant 256 : index
      %c0_11 = arith.constant 0 : index
      %17 = vector.load %arg2[%c256, %c0_11] : memref<1152x128xbf16, #tpu.memory_space<vmem>>, vector<128x128xbf16>
      %cst_12 = arith.constant dense<0.000000e+00> : vector<16x128xf32>
      %18 = tpu.matmul %16, %17, %cst_12 {dimension_numbers = #tpu.dot_dimension_numbers<[1], [0], [0], [1], [0, 0, 1, 1], [], []>} : vector<16x128xbf16>, vector<128x128xbf16>, vector<16x128xf32> -> vector<16x128xf32>
      %19 = arith.addf %15, %18 : vector<16x128xf32>
      %c2_i32_13 = arith.constant 2 : i32
      %20 = arith.muli %arg5, %c2_i32_13 : i32
      %c1_i32_14 = arith.constant 1 : i32
      %21 = arith.addi %20, %c1_i32_14 : i32
      %c0_15 = arith.constant 0 : index
      %22 = arith.index_cast %21 : i32 to index
      %c0_16 = arith.constant 0 : index
      %c0_17 = arith.constant 0 : index
      %23 = vector.load %arg1[%c0_15, %22, %c0_16, %c0_17] : memref<1x18x18x128xbf16, #tpu.memory_space<vmem>>, vector<1x1x18x128xbf16>
      %24 = vector.shape_cast %23 : vector<1x1x18x128xbf16> to vector<18x128xbf16>
      %25 = vector.extract_strided_slice %24 {offsets = [0, 0], sizes = [16, 128], strides = [1, 1]} : vector<18x128xbf16> to vector<16x128xbf16>
      %c384 = arith.constant 384 : index
      %c0_18 = arith.constant 0 : index
      %26 = vector.load %arg2[%c384, %c0_18] : memref<1152x128xbf16, #tpu.memory_space<vmem>>, vector<128x128xbf16>
      %cst_19 = arith.constant dense<0.000000e+00> : vector<16x128xf32>
      %27 = tpu.matmul %25, %26, %cst_19 {dimension_numbers = #tpu.dot_dimension_numbers<[1], [0], [0], [1], [0, 0, 1, 1], [], []>} : vector<16x128xbf16>, vector<128x128xbf16>, vector<16x128xf32> -> vector<16x128xf32>
      %28 = arith.addf %19, %27 : vector<16x128xf32>
      %29 = vector.extract_strided_slice %24 {offsets = [1, 0], sizes = [16, 128], strides = [1, 1]} : vector<18x128xbf16> to vector<16x128xbf16>
      %c512 = arith.constant 512 : index
      %c0_20 = arith.constant 0 : index
      %30 = vector.load %arg2[%c512, %c0_20] : memref<1152x128xbf16, #tpu.memory_space<vmem>>, vector<128x128xbf16>
      %cst_21 = arith.constant dense<0.000000e+00> : vector<16x128xf32>
      %31 = tpu.matmul %29, %30, %cst_21 {dimension_numbers = #tpu.dot_dimension_numbers<[1], [0], [0], [1], [0, 0, 1, 1], [], []>} : vector<16x128xbf16>, vector<128x128xbf16>, vector<16x128xf32> -> vector<16x128xf32>
      %32 = arith.addf %28, %31 : vector<16x128xf32>
      %33 = vector.extract_strided_slice %24 {offsets = [2, 0], sizes = [16, 128], strides = [1, 1]} : vector<18x128xbf16> to vector<16x128xbf16>
      %c640 = arith.constant 640 : index
      %c0_22 = arith.constant 0 : index
      %34 = vector.load %arg2[%c640, %c0_22] : memref<1152x128xbf16, #tpu.memory_space<vmem>>, vector<128x128xbf16>
      %cst_23 = arith.constant dense<0.000000e+00> : vector<16x128xf32>
      %35 = tpu.matmul %33, %34, %cst_23 {dimension_numbers = #tpu.dot_dimension_numbers<[1], [0], [0], [1], [0, 0, 1, 1], [], []>} : vector<16x128xbf16>, vector<128x128xbf16>, vector<16x128xf32> -> vector<16x128xf32>
      %36 = arith.addf %32, %35 : vector<16x128xf32>
      %c2_i32_24 = arith.constant 2 : i32
      %37 = arith.muli %arg5, %c2_i32_24 : i32
      %c2_i32_25 = arith.constant 2 : i32
      %38 = arith.addi %37, %c2_i32_25 : i32
      %c0_26 = arith.constant 0 : index
      %39 = arith.index_cast %38 : i32 to index
      %c0_27 = arith.constant 0 : index
      %c0_28 = arith.constant 0 : index
      %40 = vector.load %arg1[%c0_26, %39, %c0_27, %c0_28] : memref<1x18x18x128xbf16, #tpu.memory_space<vmem>>, vector<1x1x18x128xbf16>
      %41 = vector.shape_cast %40 : vector<1x1x18x128xbf16> to vector<18x128xbf16>
      %42 = vector.extract_strided_slice %41 {offsets = [0, 0], sizes = [16, 128], strides = [1, 1]} : vector<18x128xbf16> to vector<16x128xbf16>
      %c768 = arith.constant 768 : index
      %c0_29 = arith.constant 0 : index
      %43 = vector.load %arg2[%c768, %c0_29] : memref<1152x128xbf16, #tpu.memory_space<vmem>>, vector<128x128xbf16>
      %cst_30 = arith.constant dense<0.000000e+00> : vector<16x128xf32>
      %44 = tpu.matmul %42, %43, %cst_30 {dimension_numbers = #tpu.dot_dimension_numbers<[1], [0], [0], [1], [0, 0, 1, 1], [], []>} : vector<16x128xbf16>, vector<128x128xbf16>, vector<16x128xf32> -> vector<16x128xf32>
      %45 = arith.addf %36, %44 : vector<16x128xf32>
      %46 = vector.extract_strided_slice %41 {offsets = [1, 0], sizes = [16, 128], strides = [1, 1]} : vector<18x128xbf16> to vector<16x128xbf16>
      %c896 = arith.constant 896 : index
      %c0_31 = arith.constant 0 : index
      %47 = vector.load %arg2[%c896, %c0_31] : memref<1152x128xbf16, #tpu.memory_space<vmem>>, vector<128x128xbf16>
      %cst_32 = arith.constant dense<0.000000e+00> : vector<16x128xf32>
      %48 = tpu.matmul %46, %47, %cst_32 {dimension_numbers = #tpu.dot_dimension_numbers<[1], [0], [0], [1], [0, 0, 1, 1], [], []>} : vector<16x128xbf16>, vector<128x128xbf16>, vector<16x128xf32> -> vector<16x128xf32>
      %49 = arith.addf %45, %48 : vector<16x128xf32>
      %50 = vector.extract_strided_slice %41 {offsets = [2, 0], sizes = [16, 128], strides = [1, 1]} : vector<18x128xbf16> to vector<16x128xbf16>
      %c1024 = arith.constant 1024 : index
      %c0_33 = arith.constant 0 : index
      %51 = vector.load %arg2[%c1024, %c0_33] : memref<1152x128xbf16, #tpu.memory_space<vmem>>, vector<128x128xbf16>
      %cst_34 = arith.constant dense<0.000000e+00> : vector<16x128xf32>
      %52 = tpu.matmul %50, %51, %cst_34 {dimension_numbers = #tpu.dot_dimension_numbers<[1], [0], [0], [1], [0, 0, 1, 1], [], []>} : vector<16x128xbf16>, vector<128x128xbf16>, vector<16x128xf32> -> vector<16x128xf32>
      %53 = arith.addf %49, %52 : vector<16x128xf32>
      %54 = vector.broadcast %0 : vector<1x128xf32> to vector<16x128xf32>
      %55 = arith.addf %53, %54 : vector<16x128xf32>
      %cst_35 = arith.constant 0.000000e+00 : f32
      %56 = vector.broadcast %cst_35 : f32 to vector<16x128xf32>
      %57 = arith.maximumf %55, %56 : vector<16x128xf32>
      %58 = arith.truncf %57 : vector<16x128xf32> to vector<16x128xbf16>
      %c0_36 = arith.constant 0 : index
      %59 = arith.index_cast %arg5 : i32 to index
      %c0_37 = arith.constant 0 : index
      %c0_38 = arith.constant 0 : index
      %60 = vector.load %arg4[%c0_36, %59, %c0_37, %c0_38] : memref<1x8x16x128xbf16, #tpu.memory_space<vmem>>, vector<1x1x16x128xbf16>
      %61 = vector.shape_cast %60 : vector<1x1x16x128xbf16> to vector<16x128xbf16>
      %62 = vector.shape_cast %58 : vector<16x128xbf16> to vector<1x1x16x128xbf16>
      tpu.vector_store %arg4[%c0_36, %59, %c0_37, %c0_38], %62 {strides = array<i32>} : memref<1x8x16x128xbf16, #tpu.memory_space<vmem>>, vector<1x1x16x128xbf16>,
    }
    %c8_i32_1 = arith.constant 8 : i32
    return
  }
  func.func @transform_0(%arg0: i32) -> (i32, i32, i32, i32) {
    %c0_i32 = arith.constant 0 : i32
    %c0_i32_0 = arith.constant 0 : i32
    %c0_i32_1 = arith.constant 0 : i32
    %c0_i32_2 = arith.constant 0 : i32
    return %arg0, %c0_i32, %c0_i32_0, %c0_i32_1 : i32, i32, i32, i32
  }
  func.func @transform_1(%arg0: i32) -> (i32, i32) {
    %c0_i32 = arith.constant 0 : i32
    %c0_i32_0 = arith.constant 0 : i32
    %c0_i32_1 = arith.constant 0 : i32
    return %c0_i32, %c0_i32_0 : i32, i32
  }
  func.func @transform_2(%arg0: i32) -> (i32, i32) {
    %c0_i32 = arith.constant 0 : i32
    %c0_i32_0 = arith.constant 0 : i32
    %c0_i32_1 = arith.constant 0 : i32
    return %c0_i32, %c0_i32_0 : i32, i32
  }
  func.func @transform_3(%arg0: i32) -> (i32, i32, i32, i32) {
    %c0_i32 = arith.constant 0 : i32
    %c0_i32_0 = arith.constant 0 : i32
    %c0_i32_1 = arith.constant 0 : i32
    %c0_i32_2 = arith.constant 0 : i32
    return %arg0, %c0_i32, %c0_i32_0, %c0_i32_1 : i32, i32, i32, i32
  }
}

module attributes {stable_mosaic.version = 11 : i64} {
  func.func @_matmul_bias_kernel(%arg0: i32, %arg1: memref<128x128xbf16, #tpu.memory_space<vmem>>, %arg2: memref<128x128xbf16, #tpu.memory_space<vmem>>, %arg3: memref<1x128xf32, #tpu.memory_space<vmem>>, %arg4: memref<128x128xbf16, #tpu.memory_space<vmem>>) attributes {dimension_semantics = [#tpu.dimension_semantics<parallel>], iteration_bounds = array<i64: 1>, scalar_prefetch = 0 : i64, scratch_operands = 0 : i64, tpu.core_type = #tpu.core_type<tc>, window_params = [{transform_indices = @transform_0, window_bounds = array<i64: 128, 128>}, {pipeline_mode = #tpu.pipeline_mode<synchronous>, transform_indices = @transform_1, window_bounds = array<i64: 128, 128>}, {pipeline_mode = #tpu.pipeline_mode<synchronous>, transform_indices = @transform_2, window_bounds = array<i64: 1, 128>}, {transform_indices = @transform_3, window_bounds = array<i64: 128, 128>}]} {
    %c0 = arith.constant 0 : index
    %c0_0 = arith.constant 0 : index
    %0 = vector.load %arg1[%c0, %c0_0] : memref<128x128xbf16, #tpu.memory_space<vmem>>, vector<128x128xbf16>
    %c0_1 = arith.constant 0 : index
    %c0_2 = arith.constant 0 : index
    %1 = vector.load %arg2[%c0_1, %c0_2] : memref<128x128xbf16, #tpu.memory_space<vmem>>, vector<128x128xbf16>
    %cst = arith.constant dense<0.000000e+00> : vector<128x128xf32>
    %2 = tpu.matmul %0, %1, %cst {dimension_numbers = #tpu.dot_dimension_numbers<[1], [0], [0], [1], [0, 0, 1, 1], [], []>} : vector<128x128xbf16>, vector<128x128xbf16>, vector<128x128xf32> -> vector<128x128xf32>
    %c0_3 = arith.constant 0 : index
    %c0_4 = arith.constant 0 : index
    %3 = vector.load %arg3[%c0_3, %c0_4] : memref<1x128xf32, #tpu.memory_space<vmem>>, vector<1x128xf32>
    %4 = vector.broadcast %3 : vector<1x128xf32> to vector<128x128xf32>
    %5 = arith.addf %2, %4 : vector<128x128xf32>
    %cst_5 = arith.constant 0.000000e+00 : f32
    %6 = vector.broadcast %cst_5 : f32 to vector<128x128xf32>
    %7 = arith.maximumf %5, %6 : vector<128x128xf32>
    %8 = arith.truncf %7 : vector<128x128xf32> to vector<128x128xbf16>
    %c0_6 = arith.constant 0 : index
    %c0_7 = arith.constant 0 : index
    %9 = vector.load %arg4[%c0_6, %c0_7] : memref<128x128xbf16, #tpu.memory_space<vmem>>, vector<128x128xbf16>
    tpu.vector_store %arg4[%c0_6, %c0_7], %8 {strides = array<i32>} : memref<128x128xbf16, #tpu.memory_space<vmem>>, vector<128x128xbf16>,
    return
  }
  func.func @transform_0(%arg0: i32) -> (i32, i32) {
    %c0_i32 = arith.constant 0 : i32
    %c0_i32_0 = arith.constant 0 : i32
    return %arg0, %c0_i32 : i32, i32
  }
  func.func @transform_1(%arg0: i32) -> (i32, i32) {
    %c0_i32 = arith.constant 0 : i32
    %c0_i32_0 = arith.constant 0 : i32
    %c0_i32_1 = arith.constant 0 : i32
    return %c0_i32, %c0_i32_0 : i32, i32
  }
  func.func @transform_2(%arg0: i32) -> (i32, i32) {
    %c0_i32 = arith.constant 0 : i32
    %c0_i32_0 = arith.constant 0 : i32
    %c0_i32_1 = arith.constant 0 : i32
    return %c0_i32, %c0_i32_0 : i32, i32
  }
  func.func @transform_3(%arg0: i32) -> (i32, i32) {
    %c0_i32 = arith.constant 0 : i32
    %c0_i32_0 = arith.constant 0 : i32
    return %arg0, %c0_i32 : i32, i32
  }
}

module attributes {stable_mosaic.version = 11 : i64} {
  func.func @_conv3x3_kernel(%arg0: i32, %arg1: memref<1x10x10x128xbf16, #tpu.memory_space<vmem>>, %arg2: memref<1152x128xbf16, #tpu.memory_space<vmem>>, %arg3: memref<1x128xf32, #tpu.memory_space<vmem>>, %arg4: memref<1x4x8x128xbf16, #tpu.memory_space<vmem>>) attributes {dimension_semantics = [#tpu.dimension_semantics<parallel>], iteration_bounds = array<i64: 2>, scalar_prefetch = 0 : i64, scratch_operands = 0 : i64, tpu.core_type = #tpu.core_type<tc>, window_params = [{transform_indices = @transform_0, window_bounds = array<i64: 1, 10, 10, 128>}, {pipeline_mode = #tpu.pipeline_mode<synchronous>, transform_indices = @transform_1, window_bounds = array<i64: 1152, 128>}, {pipeline_mode = #tpu.pipeline_mode<synchronous>, transform_indices = @transform_2, window_bounds = array<i64: 1, 128>}, {transform_indices = @transform_3, window_bounds = array<i64: 1, 4, 8, 128>}]} {
    %c0 = arith.constant 0 : index
    %c0_0 = arith.constant 0 : index
    %0 = vector.load %arg3[%c0, %c0_0] : memref<1x128xf32, #tpu.memory_space<vmem>>, vector<1x128xf32>
    %c0_i32 = arith.constant 0 : i32
    %c4_i32 = arith.constant 4 : i32
    %1 = arith.addi %c0_i32, %c4_i32 : i32
    %c1_i32 = arith.constant 1 : i32
    scf.for %arg5 = %c0_i32 to %1 step %c1_i32  : i32 {
      %cst = arith.constant 0.000000e+00 : f32
      %2 = vector.broadcast %cst : f32 to vector<8x128xf32>
      %c2_i32 = arith.constant 2 : i32
      %3 = arith.muli %arg5, %c2_i32 : i32
      %c0_i32_2 = arith.constant 0 : i32
      %4 = arith.addi %3, %c0_i32_2 : i32
      %c0_3 = arith.constant 0 : index
      %5 = arith.index_cast %4 : i32 to index
      %c0_4 = arith.constant 0 : index
      %c0_5 = arith.constant 0 : index
      %6 = vector.load %arg1[%c0_3, %5, %c0_4, %c0_5] : memref<1x10x10x128xbf16, #tpu.memory_space<vmem>>, vector<1x1x10x128xbf16>
      %7 = vector.shape_cast %6 : vector<1x1x10x128xbf16> to vector<10x128xbf16>
      %8 = vector.extract_strided_slice %7 {offsets = [0, 0], sizes = [8, 128], strides = [1, 1]} : vector<10x128xbf16> to vector<8x128xbf16>
      %c0_6 = arith.constant 0 : index
      %c0_7 = arith.constant 0 : index
      %9 = vector.load %arg2[%c0_6, %c0_7] : memref<1152x128xbf16, #tpu.memory_space<vmem>>, vector<128x128xbf16>
      %cst_8 = arith.constant dense<0.000000e+00> : vector<8x128xf32>
      %10 = tpu.matmul %8, %9, %cst_8 {dimension_numbers = #tpu.dot_dimension_numbers<[1], [0], [0], [1], [0, 0, 1, 1], [], []>} : vector<8x128xbf16>, vector<128x128xbf16>, vector<8x128xf32> -> vector<8x128xf32>
      %11 = arith.addf %2, %10 : vector<8x128xf32>
      %12 = vector.extract_strided_slice %7 {offsets = [1, 0], sizes = [8, 128], strides = [1, 1]} : vector<10x128xbf16> to vector<8x128xbf16>
      %c128 = arith.constant 128 : index
      %c0_9 = arith.constant 0 : index
      %13 = vector.load %arg2[%c128, %c0_9] : memref<1152x128xbf16, #tpu.memory_space<vmem>>, vector<128x128xbf16>
      %cst_10 = arith.constant dense<0.000000e+00> : vector<8x128xf32>
      %14 = tpu.matmul %12, %13, %cst_10 {dimension_numbers = #tpu.dot_dimension_numbers<[1], [0], [0], [1], [0, 0, 1, 1], [], []>} : vector<8x128xbf16>, vector<128x128xbf16>, vector<8x128xf32> -> vector<8x128xf32>
      %15 = arith.addf %11, %14 : vector<8x128xf32>
      %16 = vector.extract_strided_slice %7 {offsets = [2, 0], sizes = [8, 128], strides = [1, 1]} : vector<10x128xbf16> to vector<8x128xbf16>
      %c256 = arith.constant 256 : index
      %c0_11 = arith.constant 0 : index
      %17 = vector.load %arg2[%c256, %c0_11] : memref<1152x128xbf16, #tpu.memory_space<vmem>>, vector<128x128xbf16>
      %cst_12 = arith.constant dense<0.000000e+00> : vector<8x128xf32>
      %18 = tpu.matmul %16, %17, %cst_12 {dimension_numbers = #tpu.dot_dimension_numbers<[1], [0], [0], [1], [0, 0, 1, 1], [], []>} : vector<8x128xbf16>, vector<128x128xbf16>, vector<8x128xf32> -> vector<8x128xf32>
      %19 = arith.addf %15, %18 : vector<8x128xf32>
      %c2_i32_13 = arith.constant 2 : i32
      %20 = arith.muli %arg5, %c2_i32_13 : i32
      %c1_i32_14 = arith.constant 1 : i32
      %21 = arith.addi %20, %c1_i32_14 : i32
      %c0_15 = arith.constant 0 : index
      %22 = arith.index_cast %21 : i32 to index
      %c0_16 = arith.constant 0 : index
      %c0_17 = arith.constant 0 : index
      %23 = vector.load %arg1[%c0_15, %22, %c0_16, %c0_17] : memref<1x10x10x128xbf16, #tpu.memory_space<vmem>>, vector<1x1x10x128xbf16>
      %24 = vector.shape_cast %23 : vector<1x1x10x128xbf16> to vector<10x128xbf16>
      %25 = vector.extract_strided_slice %24 {offsets = [0, 0], sizes = [8, 128], strides = [1, 1]} : vector<10x128xbf16> to vector<8x128xbf16>
      %c384 = arith.constant 384 : index
      %c0_18 = arith.constant 0 : index
      %26 = vector.load %arg2[%c384, %c0_18] : memref<1152x128xbf16, #tpu.memory_space<vmem>>, vector<128x128xbf16>
      %cst_19 = arith.constant dense<0.000000e+00> : vector<8x128xf32>
      %27 = tpu.matmul %25, %26, %cst_19 {dimension_numbers = #tpu.dot_dimension_numbers<[1], [0], [0], [1], [0, 0, 1, 1], [], []>} : vector<8x128xbf16>, vector<128x128xbf16>, vector<8x128xf32> -> vector<8x128xf32>
      %28 = arith.addf %19, %27 : vector<8x128xf32>
      %29 = vector.extract_strided_slice %24 {offsets = [1, 0], sizes = [8, 128], strides = [1, 1]} : vector<10x128xbf16> to vector<8x128xbf16>
      %c512 = arith.constant 512 : index
      %c0_20 = arith.constant 0 : index
      %30 = vector.load %arg2[%c512, %c0_20] : memref<1152x128xbf16, #tpu.memory_space<vmem>>, vector<128x128xbf16>
      %cst_21 = arith.constant dense<0.000000e+00> : vector<8x128xf32>
      %31 = tpu.matmul %29, %30, %cst_21 {dimension_numbers = #tpu.dot_dimension_numbers<[1], [0], [0], [1], [0, 0, 1, 1], [], []>} : vector<8x128xbf16>, vector<128x128xbf16>, vector<8x128xf32> -> vector<8x128xf32>
      %32 = arith.addf %28, %31 : vector<8x128xf32>
      %33 = vector.extract_strided_slice %24 {offsets = [2, 0], sizes = [8, 128], strides = [1, 1]} : vector<10x128xbf16> to vector<8x128xbf16>
      %c640 = arith.constant 640 : index
      %c0_22 = arith.constant 0 : index
      %34 = vector.load %arg2[%c640, %c0_22] : memref<1152x128xbf16, #tpu.memory_space<vmem>>, vector<128x128xbf16>
      %cst_23 = arith.constant dense<0.000000e+00> : vector<8x128xf32>
      %35 = tpu.matmul %33, %34, %cst_23 {dimension_numbers = #tpu.dot_dimension_numbers<[1], [0], [0], [1], [0, 0, 1, 1], [], []>} : vector<8x128xbf16>, vector<128x128xbf16>, vector<8x128xf32> -> vector<8x128xf32>
      %36 = arith.addf %32, %35 : vector<8x128xf32>
      %c2_i32_24 = arith.constant 2 : i32
      %37 = arith.muli %arg5, %c2_i32_24 : i32
      %c2_i32_25 = arith.constant 2 : i32
      %38 = arith.addi %37, %c2_i32_25 : i32
      %c0_26 = arith.constant 0 : index
      %39 = arith.index_cast %38 : i32 to index
      %c0_27 = arith.constant 0 : index
      %c0_28 = arith.constant 0 : index
      %40 = vector.load %arg1[%c0_26, %39, %c0_27, %c0_28] : memref<1x10x10x128xbf16, #tpu.memory_space<vmem>>, vector<1x1x10x128xbf16>
      %41 = vector.shape_cast %40 : vector<1x1x10x128xbf16> to vector<10x128xbf16>
      %42 = vector.extract_strided_slice %41 {offsets = [0, 0], sizes = [8, 128], strides = [1, 1]} : vector<10x128xbf16> to vector<8x128xbf16>
      %c768 = arith.constant 768 : index
      %c0_29 = arith.constant 0 : index
      %43 = vector.load %arg2[%c768, %c0_29] : memref<1152x128xbf16, #tpu.memory_space<vmem>>, vector<128x128xbf16>
      %cst_30 = arith.constant dense<0.000000e+00> : vector<8x128xf32>
      %44 = tpu.matmul %42, %43, %cst_30 {dimension_numbers = #tpu.dot_dimension_numbers<[1], [0], [0], [1], [0, 0, 1, 1], [], []>} : vector<8x128xbf16>, vector<128x128xbf16>, vector<8x128xf32> -> vector<8x128xf32>
      %45 = arith.addf %36, %44 : vector<8x128xf32>
      %46 = vector.extract_strided_slice %41 {offsets = [1, 0], sizes = [8, 128], strides = [1, 1]} : vector<10x128xbf16> to vector<8x128xbf16>
      %c896 = arith.constant 896 : index
      %c0_31 = arith.constant 0 : index
      %47 = vector.load %arg2[%c896, %c0_31] : memref<1152x128xbf16, #tpu.memory_space<vmem>>, vector<128x128xbf16>
      %cst_32 = arith.constant dense<0.000000e+00> : vector<8x128xf32>
      %48 = tpu.matmul %46, %47, %cst_32 {dimension_numbers = #tpu.dot_dimension_numbers<[1], [0], [0], [1], [0, 0, 1, 1], [], []>} : vector<8x128xbf16>, vector<128x128xbf16>, vector<8x128xf32> -> vector<8x128xf32>
      %49 = arith.addf %45, %48 : vector<8x128xf32>
      %50 = vector.extract_strided_slice %41 {offsets = [2, 0], sizes = [8, 128], strides = [1, 1]} : vector<10x128xbf16> to vector<8x128xbf16>
      %c1024 = arith.constant 1024 : index
      %c0_33 = arith.constant 0 : index
      %51 = vector.load %arg2[%c1024, %c0_33] : memref<1152x128xbf16, #tpu.memory_space<vmem>>, vector<128x128xbf16>
      %cst_34 = arith.constant dense<0.000000e+00> : vector<8x128xf32>
      %52 = tpu.matmul %50, %51, %cst_34 {dimension_numbers = #tpu.dot_dimension_numbers<[1], [0], [0], [1], [0, 0, 1, 1], [], []>} : vector<8x128xbf16>, vector<128x128xbf16>, vector<8x128xf32> -> vector<8x128xf32>
      %53 = arith.addf %49, %52 : vector<8x128xf32>
      %54 = vector.broadcast %0 : vector<1x128xf32> to vector<8x128xf32>
      %55 = arith.addf %53, %54 : vector<8x128xf32>
      %cst_35 = arith.constant 0.000000e+00 : f32
      %56 = vector.broadcast %cst_35 : f32 to vector<8x128xf32>
      %57 = arith.maximumf %55, %56 : vector<8x128xf32>
      %58 = arith.truncf %57 : vector<8x128xf32> to vector<8x128xbf16>
      %c0_36 = arith.constant 0 : index
      %59 = arith.index_cast %arg5 : i32 to index
      %c0_37 = arith.constant 0 : index
      %c0_38 = arith.constant 0 : index
      %60 = vector.load %arg4[%c0_36, %59, %c0_37, %c0_38] : memref<1x4x8x128xbf16, #tpu.memory_space<vmem>>, vector<1x1x8x128xbf16>
      %61 = vector.shape_cast %60 : vector<1x1x8x128xbf16> to vector<8x128xbf16>
      %62 = vector.shape_cast %58 : vector<8x128xbf16> to vector<1x1x8x128xbf16>
      tpu.vector_store %arg4[%c0_36, %59, %c0_37, %c0_38], %62 {strides = array<i32>} : memref<1x4x8x128xbf16, #tpu.memory_space<vmem>>, vector<1x1x8x128xbf16>,
    }
    %c4_i32_1 = arith.constant 4 : i32
    return
  }
  func.func @transform_0(%arg0: i32) -> (i32, i32, i32, i32) {
    %c0_i32 = arith.constant 0 : i32
    %c0_i32_0 = arith.constant 0 : i32
    %c0_i32_1 = arith.constant 0 : i32
    %c0_i32_2 = arith.constant 0 : i32
    return %arg0, %c0_i32, %c0_i32_0, %c0_i32_1 : i32, i32, i32, i32
  }
  func.func @transform_1(%arg0: i32) -> (i32, i32) {
    %c0_i32 = arith.constant 0 : i32
    %c0_i32_0 = arith.constant 0 : i32
    %c0_i32_1 = arith.constant 0 : i32
    return %c0_i32, %c0_i32_0 : i32, i32
  }
  func.func @transform_2(%arg0: i32) -> (i32, i32) {
    %c0_i32 = arith.constant 0 : i32
    %c0_i32_0 = arith.constant 0 : i32
    %c0_i32_1 = arith.constant 0 : i32
    return %c0_i32, %c0_i32_0 : i32, i32
  }
  func.func @transform_3(%arg0: i32) -> (i32, i32, i32, i32) {
    %c0_i32 = arith.constant 0 : i32
    %c0_i32_0 = arith.constant 0 : i32
    %c0_i32_1 = arith.constant 0 : i32
    %c0_i32_2 = arith.constant 0 : i32
    return %arg0, %c0_i32, %c0_i32_0, %c0_i32_1 : i32, i32, i32, i32
  }
}

module attributes {stable_mosaic.version = 11 : i64} {
  func.func @_conv3x3_kernel(%arg0: i32, %arg1: memref<1x8x8x128xbf16, #tpu.memory_space<vmem>>, %arg2: memref<1152x128xbf16, #tpu.memory_space<vmem>>, %arg3: memref<1x128xf32, #tpu.memory_space<vmem>>, %arg4: memref<1x4x4x128xbf16, #tpu.memory_space<vmem>>) attributes {dimension_semantics = [#tpu.dimension_semantics<parallel>], iteration_bounds = array<i64: 2>, scalar_prefetch = 0 : i64, scratch_operands = 0 : i64, tpu.core_type = #tpu.core_type<tc>, window_params = [{transform_indices = @transform_0, window_bounds = array<i64: 1, 8, 8, 128>}, {pipeline_mode = #tpu.pipeline_mode<synchronous>, transform_indices = @transform_1, window_bounds = array<i64: 1152, 128>}, {pipeline_mode = #tpu.pipeline_mode<synchronous>, transform_indices = @transform_2, window_bounds = array<i64: 1, 128>}, {transform_indices = @transform_3, window_bounds = array<i64: 1, 4, 4, 128>}]} {
    %c0 = arith.constant 0 : index
    %c0_0 = arith.constant 0 : index
    %0 = vector.load %arg3[%c0, %c0_0] : memref<1x128xf32, #tpu.memory_space<vmem>>, vector<1x128xf32>
    %c0_i32 = arith.constant 0 : i32
    %c4_i32 = arith.constant 4 : i32
    %1 = arith.addi %c0_i32, %c4_i32 : i32
    %c1_i32 = arith.constant 1 : i32
    scf.for %arg5 = %c0_i32 to %1 step %c1_i32  : i32 {
      %cst = arith.constant 0.000000e+00 : f32
      %2 = vector.broadcast %cst : f32 to vector<4x128xf32>
      %c1_i32_2 = arith.constant 1 : i32
      %3 = arith.muli %arg5, %c1_i32_2 : i32
      %c0_i32_3 = arith.constant 0 : i32
      %4 = arith.addi %3, %c0_i32_3 : i32
      %c0_4 = arith.constant 0 : index
      %5 = arith.index_cast %4 : i32 to index
      %c0_5 = arith.constant 0 : index
      %c0_6 = arith.constant 0 : index
      %6 = vector.load %arg1[%c0_4, %5, %c0_5, %c0_6] : memref<1x8x8x128xbf16, #tpu.memory_space<vmem>>, vector<1x1x8x128xbf16>
      %7 = vector.shape_cast %6 : vector<1x1x8x128xbf16> to vector<8x128xbf16>
      %8 = vector.extract_strided_slice %7 {offsets = [0, 0], sizes = [4, 128], strides = [1, 1]} : vector<8x128xbf16> to vector<4x128xbf16>
      %c0_7 = arith.constant 0 : index
      %c0_8 = arith.constant 0 : index
      %9 = vector.load %arg2[%c0_7, %c0_8] : memref<1152x128xbf16, #tpu.memory_space<vmem>>, vector<128x128xbf16>
      %cst_9 = arith.constant dense<0.000000e+00> : vector<4x128xf32>
      %10 = tpu.matmul %8, %9, %cst_9 {dimension_numbers = #tpu.dot_dimension_numbers<[1], [0], [0], [1], [0, 0, 1, 1], [], []>} : vector<4x128xbf16>, vector<128x128xbf16>, vector<4x128xf32> -> vector<4x128xf32>
      %11 = arith.addf %2, %10 : vector<4x128xf32>
      %12 = vector.extract_strided_slice %7 {offsets = [2, 0], sizes = [4, 128], strides = [1, 1]} : vector<8x128xbf16> to vector<4x128xbf16>
      %c128 = arith.constant 128 : index
      %c0_10 = arith.constant 0 : index
      %13 = vector.load %arg2[%c128, %c0_10] : memref<1152x128xbf16, #tpu.memory_space<vmem>>, vector<128x128xbf16>
      %cst_11 = arith.constant dense<0.000000e+00> : vector<4x128xf32>
      %14 = tpu.matmul %12, %13, %cst_11 {dimension_numbers = #tpu.dot_dimension_numbers<[1], [0], [0], [1], [0, 0, 1, 1], [], []>} : vector<4x128xbf16>, vector<128x128xbf16>, vector<4x128xf32> -> vector<4x128xf32>
      %15 = arith.addf %11, %14 : vector<4x128xf32>
      %16 = vector.extract_strided_slice %7 {offsets = [4, 0], sizes = [4, 128], strides = [1, 1]} : vector<8x128xbf16> to vector<4x128xbf16>
      %c256 = arith.constant 256 : index
      %c0_12 = arith.constant 0 : index
      %17 = vector.load %arg2[%c256, %c0_12] : memref<1152x128xbf16, #tpu.memory_space<vmem>>, vector<128x128xbf16>
      %cst_13 = arith.constant dense<0.000000e+00> : vector<4x128xf32>
      %18 = tpu.matmul %16, %17, %cst_13 {dimension_numbers = #tpu.dot_dimension_numbers<[1], [0], [0], [1], [0, 0, 1, 1], [], []>} : vector<4x128xbf16>, vector<128x128xbf16>, vector<4x128xf32> -> vector<4x128xf32>
      %19 = arith.addf %15, %18 : vector<4x128xf32>
      %c1_i32_14 = arith.constant 1 : i32
      %20 = arith.muli %arg5, %c1_i32_14 : i32
      %c2_i32 = arith.constant 2 : i32
      %21 = arith.addi %20, %c2_i32 : i32
      %c0_15 = arith.constant 0 : index
      %22 = arith.index_cast %21 : i32 to index
      %c0_16 = arith.constant 0 : index
      %c0_17 = arith.constant 0 : index
      %23 = vector.load %arg1[%c0_15, %22, %c0_16, %c0_17] : memref<1x8x8x128xbf16, #tpu.memory_space<vmem>>, vector<1x1x8x128xbf16>
      %24 = vector.shape_cast %23 : vector<1x1x8x128xbf16> to vector<8x128xbf16>
      %25 = vector.extract_strided_slice %24 {offsets = [0, 0], sizes = [4, 128], strides = [1, 1]} : vector<8x128xbf16> to vector<4x128xbf16>
      %c384 = arith.constant 384 : index
      %c0_18 = arith.constant 0 : index
      %26 = vector.load %arg2[%c384, %c0_18] : memref<1152x128xbf16, #tpu.memory_space<vmem>>, vector<128x128xbf16>
      %cst_19 = arith.constant dense<0.000000e+00> : vector<4x128xf32>
      %27 = tpu.matmul %25, %26, %cst_19 {dimension_numbers = #tpu.dot_dimension_numbers<[1], [0], [0], [1], [0, 0, 1, 1], [], []>} : vector<4x128xbf16>, vector<128x128xbf16>, vector<4x128xf32> -> vector<4x128xf32>
      %28 = arith.addf %19, %27 : vector<4x128xf32>
      %29 = vector.extract_strided_slice %24 {offsets = [2, 0], sizes = [4, 128], strides = [1, 1]} : vector<8x128xbf16> to vector<4x128xbf16>
      %c512 = arith.constant 512 : index
      %c0_20 = arith.constant 0 : index
      %30 = vector.load %arg2[%c512, %c0_20] : memref<1152x128xbf16, #tpu.memory_space<vmem>>, vector<128x128xbf16>
      %cst_21 = arith.constant dense<0.000000e+00> : vector<4x128xf32>
      %31 = tpu.matmul %29, %30, %cst_21 {dimension_numbers = #tpu.dot_dimension_numbers<[1], [0], [0], [1], [0, 0, 1, 1], [], []>} : vector<4x128xbf16>, vector<128x128xbf16>, vector<4x128xf32> -> vector<4x128xf32>
      %32 = arith.addf %28, %31 : vector<4x128xf32>
      %33 = vector.extract_strided_slice %24 {offsets = [4, 0], sizes = [4, 128], strides = [1, 1]} : vector<8x128xbf16> to vector<4x128xbf16>
      %c640 = arith.constant 640 : index
      %c0_22 = arith.constant 0 : index
      %34 = vector.load %arg2[%c640, %c0_22] : memref<1152x128xbf16, #tpu.memory_space<vmem>>, vector<128x128xbf16>
      %cst_23 = arith.constant dense<0.000000e+00> : vector<4x128xf32>
      %35 = tpu.matmul %33, %34, %cst_23 {dimension_numbers = #tpu.dot_dimension_numbers<[1], [0], [0], [1], [0, 0, 1, 1], [], []>} : vector<4x128xbf16>, vector<128x128xbf16>, vector<4x128xf32> -> vector<4x128xf32>
      %36 = arith.addf %32, %35 : vector<4x128xf32>
      %c1_i32_24 = arith.constant 1 : i32
      %37 = arith.muli %arg5, %c1_i32_24 : i32
      %c4_i32_25 = arith.constant 4 : i32
      %38 = arith.addi %37, %c4_i32_25 : i32
      %c0_26 = arith.constant 0 : index
      %39 = arith.index_cast %38 : i32 to index
      %c0_27 = arith.constant 0 : index
      %c0_28 = arith.constant 0 : index
      %40 = vector.load %arg1[%c0_26, %39, %c0_27, %c0_28] : memref<1x8x8x128xbf16, #tpu.memory_space<vmem>>, vector<1x1x8x128xbf16>
      %41 = vector.shape_cast %40 : vector<1x1x8x128xbf16> to vector<8x128xbf16>
      %42 = vector.extract_strided_slice %41 {offsets = [0, 0], sizes = [4, 128], strides = [1, 1]} : vector<8x128xbf16> to vector<4x128xbf16>
      %c768 = arith.constant 768 : index
      %c0_29 = arith.constant 0 : index
      %43 = vector.load %arg2[%c768, %c0_29] : memref<1152x128xbf16, #tpu.memory_space<vmem>>, vector<128x128xbf16>
      %cst_30 = arith.constant dense<0.000000e+00> : vector<4x128xf32>
      %44 = tpu.matmul %42, %43, %cst_30 {dimension_numbers = #tpu.dot_dimension_numbers<[1], [0], [0], [1], [0, 0, 1, 1], [], []>} : vector<4x128xbf16>, vector<128x128xbf16>, vector<4x128xf32> -> vector<4x128xf32>
      %45 = arith.addf %36, %44 : vector<4x128xf32>
      %46 = vector.extract_strided_slice %41 {offsets = [2, 0], sizes = [4, 128], strides = [1, 1]} : vector<8x128xbf16> to vector<4x128xbf16>
      %c896 = arith.constant 896 : index
      %c0_31 = arith.constant 0 : index
      %47 = vector.load %arg2[%c896, %c0_31] : memref<1152x128xbf16, #tpu.memory_space<vmem>>, vector<128x128xbf16>
      %cst_32 = arith.constant dense<0.000000e+00> : vector<4x128xf32>
      %48 = tpu.matmul %46, %47, %cst_32 {dimension_numbers = #tpu.dot_dimension_numbers<[1], [0], [0], [1], [0, 0, 1, 1], [], []>} : vector<4x128xbf16>, vector<128x128xbf16>, vector<4x128xf32> -> vector<4x128xf32>
      %49 = arith.addf %45, %48 : vector<4x128xf32>
      %50 = vector.extract_strided_slice %41 {offsets = [4, 0], sizes = [4, 128], strides = [1, 1]} : vector<8x128xbf16> to vector<4x128xbf16>
      %c1024 = arith.constant 1024 : index
      %c0_33 = arith.constant 0 : index
      %51 = vector.load %arg2[%c1024, %c0_33] : memref<1152x128xbf16, #tpu.memory_space<vmem>>, vector<128x128xbf16>
      %cst_34 = arith.constant dense<0.000000e+00> : vector<4x128xf32>
      %52 = tpu.matmul %50, %51, %cst_34 {dimension_numbers = #tpu.dot_dimension_numbers<[1], [0], [0], [1], [0, 0, 1, 1], [], []>} : vector<4x128xbf16>, vector<128x128xbf16>, vector<4x128xf32> -> vector<4x128xf32>
      %53 = arith.addf %49, %52 : vector<4x128xf32>
      %54 = vector.broadcast %0 : vector<1x128xf32> to vector<4x128xf32>
      %55 = arith.addf %53, %54 : vector<4x128xf32>
      %cst_35 = arith.constant 0.000000e+00 : f32
      %56 = vector.broadcast %cst_35 : f32 to vector<4x128xf32>
      %57 = arith.maximumf %55, %56 : vector<4x128xf32>
      %58 = arith.truncf %57 : vector<4x128xf32> to vector<4x128xbf16>
      %c0_36 = arith.constant 0 : index
      %59 = arith.index_cast %arg5 : i32 to index
      %c0_37 = arith.constant 0 : index
      %c0_38 = arith.constant 0 : index
      %60 = vector.load %arg4[%c0_36, %59, %c0_37, %c0_38] : memref<1x4x4x128xbf16, #tpu.memory_space<vmem>>, vector<1x1x4x128xbf16>
      %61 = vector.shape_cast %60 : vector<1x1x4x128xbf16> to vector<4x128xbf16>
      %62 = vector.shape_cast %58 : vector<4x128xbf16> to vector<1x1x4x128xbf16>
      tpu.vector_store %arg4[%c0_36, %59, %c0_37, %c0_38], %62 {strides = array<i32>} : memref<1x4x4x128xbf16, #tpu.memory_space<vmem>>, vector<1x1x4x128xbf16>,
    }
    %c4_i32_1 = arith.constant 4 : i32
    return
  }
  func.func @transform_0(%arg0: i32) -> (i32, i32, i32, i32) {
    %c0_i32 = arith.constant 0 : i32
    %c0_i32_0 = arith.constant 0 : i32
    %c0_i32_1 = arith.constant 0 : i32
    %c0_i32_2 = arith.constant 0 : i32
    return %arg0, %c0_i32, %c0_i32_0, %c0_i32_1 : i32, i32, i32, i32
  }
  func.func @transform_1(%arg0: i32) -> (i32, i32) {
    %c0_i32 = arith.constant 0 : i32
    %c0_i32_0 = arith.constant 0 : i32
    %c0_i32_1 = arith.constant 0 : i32
    return %c0_i32, %c0_i32_0 : i32, i32
  }
  func.func @transform_2(%arg0: i32) -> (i32, i32) {
    %c0_i32 = arith.constant 0 : i32
    %c0_i32_0 = arith.constant 0 : i32
    %c0_i32_1 = arith.constant 0 : i32
    return %c0_i32, %c0_i32_0 : i32, i32
  }
  func.func @transform_3(%arg0: i32) -> (i32, i32, i32, i32) {
    %c0_i32 = arith.constant 0 : i32
    %c0_i32_0 = arith.constant 0 : i32
    %c0_i32_1 = arith.constant 0 : i32
    %c0_i32_2 = arith.constant 0 : i32
    return %arg0, %c0_i32, %c0_i32_0, %c0_i32_1 : i32, i32, i32, i32
  }
}

module attributes {stable_mosaic.version = 11 : i64} {
  func.func @_matmul_bias_kernel(%arg0: i32, %arg1: memref<2x128xbf16, #tpu.memory_space<vmem>>, %arg2: memref<128x128xbf16, #tpu.memory_space<vmem>>, %arg3: memref<1x128xf32, #tpu.memory_space<vmem>>, %arg4: memref<2x128xbf16, #tpu.memory_space<vmem>>) attributes {dimension_semantics = [#tpu.dimension_semantics<parallel>], iteration_bounds = array<i64: 1>, scalar_prefetch = 0 : i64, scratch_operands = 0 : i64, tpu.core_type = #tpu.core_type<tc>, window_params = [{transform_indices = @transform_0, window_bounds = array<i64: 2, 128>}, {pipeline_mode = #tpu.pipeline_mode<synchronous>, transform_indices = @transform_1, window_bounds = array<i64: 128, 128>}, {pipeline_mode = #tpu.pipeline_mode<synchronous>, transform_indices = @transform_2, window_bounds = array<i64: 1, 128>}, {transform_indices = @transform_3, window_bounds = array<i64: 2, 128>}]} {
    %c0 = arith.constant 0 : index
    %c0_0 = arith.constant 0 : index
    %0 = vector.load %arg1[%c0, %c0_0] : memref<2x128xbf16, #tpu.memory_space<vmem>>, vector<2x128xbf16>
    %c0_1 = arith.constant 0 : index
    %c0_2 = arith.constant 0 : index
    %1 = vector.load %arg2[%c0_1, %c0_2] : memref<128x128xbf16, #tpu.memory_space<vmem>>, vector<128x128xbf16>
    %cst = arith.constant dense<0.000000e+00> : vector<2x128xf32>
    %2 = tpu.matmul %0, %1, %cst {dimension_numbers = #tpu.dot_dimension_numbers<[1], [0], [0], [1], [0, 0, 1, 1], [], []>} : vector<2x128xbf16>, vector<128x128xbf16>, vector<2x128xf32> -> vector<2x128xf32>
    %c0_3 = arith.constant 0 : index
    %c0_4 = arith.constant 0 : index
    %3 = vector.load %arg3[%c0_3, %c0_4] : memref<1x128xf32, #tpu.memory_space<vmem>>, vector<1x128xf32>
    %4 = vector.broadcast %3 : vector<1x128xf32> to vector<2x128xf32>
    %5 = arith.addf %2, %4 : vector<2x128xf32>
    %cst_5 = arith.constant 0.000000e+00 : f32
    %6 = vector.broadcast %cst_5 : f32 to vector<2x128xf32>
    %7 = arith.maximumf %5, %6 : vector<2x128xf32>
    %8 = arith.truncf %7 : vector<2x128xf32> to vector<2x128xbf16>
    %c0_6 = arith.constant 0 : index
    %c0_7 = arith.constant 0 : index
    %9 = vector.load %arg4[%c0_6, %c0_7] : memref<2x128xbf16, #tpu.memory_space<vmem>>, vector<2x128xbf16>
    tpu.vector_store %arg4[%c0_6, %c0_7], %8 {strides = array<i32>} : memref<2x128xbf16, #tpu.memory_space<vmem>>, vector<2x128xbf16>,
    return
  }
  func.func @transform_0(%arg0: i32) -> (i32, i32) {
    %c0_i32 = arith.constant 0 : i32
    %c0_i32_0 = arith.constant 0 : i32
    return %arg0, %c0_i32 : i32, i32
  }
  func.func @transform_1(%arg0: i32) -> (i32, i32) {
    %c0_i32 = arith.constant 0 : i32
    %c0_i32_0 = arith.constant 0 : i32
    %c0_i32_1 = arith.constant 0 : i32
    return %c0_i32, %c0_i32_0 : i32, i32
  }
  func.func @transform_2(%arg0: i32) -> (i32, i32) {
    %c0_i32 = arith.constant 0 : i32
    %c0_i32_0 = arith.constant 0 : i32
    %c0_i32_1 = arith.constant 0 : i32
    return %c0_i32, %c0_i32_0 : i32, i32
  }
  func.func @transform_3(%arg0: i32) -> (i32, i32) {
    %c0_i32 = arith.constant 0 : i32
    %c0_i32_0 = arith.constant 0 : i32
    return %arg0, %c0_i32 : i32, i32
  }
}

module attributes {stable_mosaic.version = 11 : i64} {
  func.func @_matmul_bias_kernel(%arg0: i32, %arg1: memref<32x128xbf16, #tpu.memory_space<vmem>>, %arg2: memref<128x512xbf16, #tpu.memory_space<vmem>>, %arg3: memref<1x512xf32, #tpu.memory_space<vmem>>, %arg4: memref<32x512xbf16, #tpu.memory_space<vmem>>) attributes {dimension_semantics = [#tpu.dimension_semantics<parallel>], iteration_bounds = array<i64: 1>, scalar_prefetch = 0 : i64, scratch_operands = 0 : i64, tpu.core_type = #tpu.core_type<tc>, window_params = [{transform_indices = @transform_0, window_bounds = array<i64: 32, 128>}, {pipeline_mode = #tpu.pipeline_mode<synchronous>, transform_indices = @transform_1, window_bounds = array<i64: 128, 512>}, {pipeline_mode = #tpu.pipeline_mode<synchronous>, transform_indices = @transform_2, window_bounds = array<i64: 1, 512>}, {transform_indices = @transform_3, window_bounds = array<i64: 32, 512>}]} {
    %c0 = arith.constant 0 : index
    %c0_0 = arith.constant 0 : index
    %0 = vector.load %arg1[%c0, %c0_0] : memref<32x128xbf16, #tpu.memory_space<vmem>>, vector<32x128xbf16>
    %c0_1 = arith.constant 0 : index
    %c0_2 = arith.constant 0 : index
    %1 = vector.load %arg2[%c0_1, %c0_2] : memref<128x512xbf16, #tpu.memory_space<vmem>>, vector<128x512xbf16>
    %cst = arith.constant dense<0.000000e+00> : vector<32x512xf32>
    %2 = tpu.matmul %0, %1, %cst {dimension_numbers = #tpu.dot_dimension_numbers<[1], [0], [0], [1], [0, 0, 1, 1], [], []>} : vector<32x128xbf16>, vector<128x512xbf16>, vector<32x512xf32> -> vector<32x512xf32>
    %c0_3 = arith.constant 0 : index
    %c0_4 = arith.constant 0 : index
    %3 = vector.load %arg3[%c0_3, %c0_4] : memref<1x512xf32, #tpu.memory_space<vmem>>, vector<1x512xf32>
    %4 = vector.broadcast %3 : vector<1x512xf32> to vector<32x512xf32>
    %5 = arith.addf %2, %4 : vector<32x512xf32>
    %cst_5 = arith.constant 0.000000e+00 : f32
    %6 = vector.broadcast %cst_5 : f32 to vector<32x512xf32>
    %7 = arith.maximumf %5, %6 : vector<32x512xf32>
    %8 = arith.truncf %7 : vector<32x512xf32> to vector<32x512xbf16>
    %c0_6 = arith.constant 0 : index
    %c0_7 = arith.constant 0 : index
    %9 = vector.load %arg4[%c0_6, %c0_7] : memref<32x512xbf16, #tpu.memory_space<vmem>>, vector<32x512xbf16>
    tpu.vector_store %arg4[%c0_6, %c0_7], %8 {strides = array<i32>} : memref<32x512xbf16, #tpu.memory_space<vmem>>, vector<32x512xbf16>,
    return
  }
  func.func @transform_0(%arg0: i32) -> (i32, i32) {
    %c0_i32 = arith.constant 0 : i32
    %c0_i32_0 = arith.constant 0 : i32
    return %arg0, %c0_i32 : i32, i32
  }
  func.func @transform_1(%arg0: i32) -> (i32, i32) {
    %c0_i32 = arith.constant 0 : i32
    %c0_i32_0 = arith.constant 0 : i32
    %c0_i32_1 = arith.constant 0 : i32
    return %c0_i32, %c0_i32_0 : i32, i32
  }
  func.func @transform_2(%arg0: i32) -> (i32, i32) {
    %c0_i32 = arith.constant 0 : i32
    %c0_i32_0 = arith.constant 0 : i32
    %c0_i32_1 = arith.constant 0 : i32
    return %c0_i32, %c0_i32_0 : i32, i32
  }
  func.func @transform_3(%arg0: i32) -> (i32, i32) {
    %c0_i32 = arith.constant 0 : i32
    %c0_i32_0 = arith.constant 0 : i32
    return %arg0, %c0_i32 : i32, i32
  }
}

module attributes {stable_mosaic.version = 11 : i64} {
  func.func @_matmul_bias_kernel(%arg0: i32, %arg1: memref<32x640xbf16, #tpu.memory_space<vmem>>, %arg2: memref<640x128xbf16, #tpu.memory_space<vmem>>, %arg3: memref<1x128xf32, #tpu.memory_space<vmem>>, %arg4: memref<32x128xbf16, #tpu.memory_space<vmem>>) attributes {dimension_semantics = [#tpu.dimension_semantics<parallel>], iteration_bounds = array<i64: 1>, scalar_prefetch = 0 : i64, scratch_operands = 0 : i64, tpu.core_type = #tpu.core_type<tc>, window_params = [{transform_indices = @transform_0, window_bounds = array<i64: 32, 640>}, {pipeline_mode = #tpu.pipeline_mode<synchronous>, transform_indices = @transform_1, window_bounds = array<i64: 640, 128>}, {pipeline_mode = #tpu.pipeline_mode<synchronous>, transform_indices = @transform_2, window_bounds = array<i64: 1, 128>}, {transform_indices = @transform_3, window_bounds = array<i64: 32, 128>}]} {
    %c0 = arith.constant 0 : index
    %c0_0 = arith.constant 0 : index
    %0 = vector.load %arg1[%c0, %c0_0] : memref<32x640xbf16, #tpu.memory_space<vmem>>, vector<32x640xbf16>
    %c0_1 = arith.constant 0 : index
    %c0_2 = arith.constant 0 : index
    %1 = vector.load %arg2[%c0_1, %c0_2] : memref<640x128xbf16, #tpu.memory_space<vmem>>, vector<640x128xbf16>
    %cst = arith.constant dense<0.000000e+00> : vector<32x128xf32>
    %2 = tpu.matmul %0, %1, %cst {dimension_numbers = #tpu.dot_dimension_numbers<[1], [0], [0], [1], [0, 0, 1, 1], [], []>} : vector<32x640xbf16>, vector<640x128xbf16>, vector<32x128xf32> -> vector<32x128xf32>
    %c0_3 = arith.constant 0 : index
    %c0_4 = arith.constant 0 : index
    %3 = vector.load %arg3[%c0_3, %c0_4] : memref<1x128xf32, #tpu.memory_space<vmem>>, vector<1x128xf32>
    %4 = vector.broadcast %3 : vector<1x128xf32> to vector<32x128xf32>
    %5 = arith.addf %2, %4 : vector<32x128xf32>
    %cst_5 = arith.constant 0.000000e+00 : f32
    %6 = vector.broadcast %cst_5 : f32 to vector<32x128xf32>
    %7 = arith.maximumf %5, %6 : vector<32x128xf32>
    %8 = arith.truncf %7 : vector<32x128xf32> to vector<32x128xbf16>
    %c0_6 = arith.constant 0 : index
    %c0_7 = arith.constant 0 : index
    %9 = vector.load %arg4[%c0_6, %c0_7] : memref<32x128xbf16, #tpu.memory_space<vmem>>, vector<32x128xbf16>
    tpu.vector_store %arg4[%c0_6, %c0_7], %8 {strides = array<i32>} : memref<32x128xbf16, #tpu.memory_space<vmem>>, vector<32x128xbf16>,
    return
  }
  func.func @transform_0(%arg0: i32) -> (i32, i32) {
    %c0_i32 = arith.constant 0 : i32
    %c0_i32_0 = arith.constant 0 : i32
    return %arg0, %c0_i32 : i32, i32
  }
  func.func @transform_1(%arg0: i32) -> (i32, i32) {
    %c0_i32 = arith.constant 0 : i32
    %c0_i32_0 = arith.constant 0 : i32
    %c0_i32_1 = arith.constant 0 : i32
    return %c0_i32, %c0_i32_0 : i32, i32
  }
  func.func @transform_2(%arg0: i32) -> (i32, i32) {
    %c0_i32 = arith.constant 0 : i32
    %c0_i32_0 = arith.constant 0 : i32
    %c0_i32_1 = arith.constant 0 : i32
    return %c0_i32, %c0_i32_0 : i32, i32
  }
  func.func @transform_3(%arg0: i32) -> (i32, i32) {
    %c0_i32 = arith.constant 0 : i32
    %c0_i32_0 = arith.constant 0 : i32
    return %arg0, %c0_i32 : i32, i32
  }
}

module attributes {stable_mosaic.version = 11 : i64} {
  func.func @_bilinear_kernel(%arg0: i32, %arg1: memref<64x16xf32, #tpu.memory_space<vmem>>, %arg2: memref<1x16x128xbf16, #tpu.memory_space<vmem>>, %arg3: memref<1x64x128xbf16, #tpu.memory_space<vmem>>) attributes {dimension_semantics = [#tpu.dimension_semantics<parallel>], iteration_bounds = array<i64: 2>, scalar_prefetch = 0 : i64, scratch_operands = 0 : i64, tpu.core_type = #tpu.core_type<tc>, window_params = [{pipeline_mode = #tpu.pipeline_mode<synchronous>, transform_indices = @transform_0, window_bounds = array<i64: 64, 16>}, {transform_indices = @transform_1, window_bounds = array<i64: 1, 16, 128>}, {transform_indices = @transform_2, window_bounds = array<i64: 1, 64, 128>}]} {
    %c0 = arith.constant 0 : index
    %c0_0 = arith.constant 0 : index
    %0 = vector.load %arg1[%c0, %c0_0] : memref<64x16xf32, #tpu.memory_space<vmem>>, vector<64x16xf32>
    %c0_1 = arith.constant 0 : index
    %c0_2 = arith.constant 0 : index
    %c0_3 = arith.constant 0 : index
    %1 = vector.load %arg2[%c0_1, %c0_2, %c0_3] : memref<1x16x128xbf16, #tpu.memory_space<vmem>>, vector<1x16x128xbf16>
    %2 = vector.shape_cast %1 : vector<1x16x128xbf16> to vector<16x128xbf16>
    %3 = arith.extf %2 : vector<16x128xbf16> to vector<16x128xf32>
    %cst = arith.constant dense<0.000000e+00> : vector<64x128xf32>
    %4 = tpu.matmul %0, %3, %cst {dimension_numbers = #tpu.dot_dimension_numbers<[1], [0], [0], [1], [0, 0, 1, 1], [], []>} : vector<64x16xf32>, vector<16x128xf32>, vector<64x128xf32> -> vector<64x128xf32>
    %5 = arith.truncf %4 : vector<64x128xf32> to vector<64x128xbf16>
    %c0_4 = arith.constant 0 : index
    %c0_5 = arith.constant 0 : index
    %c0_6 = arith.constant 0 : index
    %6 = vector.load %arg3[%c0_4, %c0_5, %c0_6] : memref<1x64x128xbf16, #tpu.memory_space<vmem>>, vector<1x64x128xbf16>
    %7 = vector.shape_cast %6 : vector<1x64x128xbf16> to vector<64x128xbf16>
    %8 = vector.shape_cast %5 : vector<64x128xbf16> to vector<1x64x128xbf16>
    tpu.vector_store %arg3[%c0_4, %c0_5, %c0_6], %8 {strides = array<i32>} : memref<1x64x128xbf16, #tpu.memory_space<vmem>>, vector<1x64x128xbf16>,
    return
  }
  func.func @transform_0(%arg0: i32) -> (i32, i32) {
    %c0_i32 = arith.constant 0 : i32
    %c0_i32_0 = arith.constant 0 : i32
    %c0_i32_1 = arith.constant 0 : i32
    return %c0_i32, %c0_i32_0 : i32, i32
  }
  func.func @transform_1(%arg0: i32) -> (i32, i32, i32) {
    %c0_i32 = arith.constant 0 : i32
    %c0_i32_0 = arith.constant 0 : i32
    %c0_i32_1 = arith.constant 0 : i32
    return %arg0, %c0_i32, %c0_i32_0 : i32, i32, i32
  }
  func.func @transform_2(%arg0: i32) -> (i32, i32, i32) {
    %c0_i32 = arith.constant 0 : i32
    %c0_i32_0 = arith.constant 0 : i32
    %c0_i32_1 = arith.constant 0 : i32
    return %arg0, %c0_i32, %c0_i32_0 : i32, i32, i32
  }
}

module attributes {stable_mosaic.version = 11 : i64} {
  func.func @_conv3x3_kernel(%arg0: i32, %arg1: memref<1x10x10x256xbf16, #tpu.memory_space<vmem>>, %arg2: memref<2304x128xbf16, #tpu.memory_space<vmem>>, %arg3: memref<1x128xf32, #tpu.memory_space<vmem>>, %arg4: memref<1x8x8x128xbf16, #tpu.memory_space<vmem>>) attributes {dimension_semantics = [#tpu.dimension_semantics<parallel>], iteration_bounds = array<i64: 2>, scalar_prefetch = 0 : i64, scratch_operands = 0 : i64, tpu.core_type = #tpu.core_type<tc>, window_params = [{transform_indices = @transform_0, window_bounds = array<i64: 1, 10, 10, 256>}, {pipeline_mode = #tpu.pipeline_mode<synchronous>, transform_indices = @transform_1, window_bounds = array<i64: 2304, 128>}, {pipeline_mode = #tpu.pipeline_mode<synchronous>, transform_indices = @transform_2, window_bounds = array<i64: 1, 128>}, {transform_indices = @transform_3, window_bounds = array<i64: 1, 8, 8, 128>}]} {
    %c0 = arith.constant 0 : index
    %c0_0 = arith.constant 0 : index
    %0 = vector.load %arg3[%c0, %c0_0] : memref<1x128xf32, #tpu.memory_space<vmem>>, vector<1x128xf32>
    %c0_i32 = arith.constant 0 : i32
    %c8_i32 = arith.constant 8 : i32
    %1 = arith.addi %c0_i32, %c8_i32 : i32
    %c1_i32 = arith.constant 1 : i32
    scf.for %arg5 = %c0_i32 to %1 step %c1_i32  : i32 {
      %cst = arith.constant 0.000000e+00 : f32
      %2 = vector.broadcast %cst : f32 to vector<8x128xf32>
      %c1_i32_2 = arith.constant 1 : i32
      %3 = arith.muli %arg5, %c1_i32_2 : i32
      %c0_i32_3 = arith.constant 0 : i32
      %4 = arith.addi %3, %c0_i32_3 : i32
      %c0_4 = arith.constant 0 : index
      %5 = arith.index_cast %4 : i32 to index
      %c0_5 = arith.constant 0 : index
      %c0_6 = arith.constant 0 : index
      %6 = vector.load %arg1[%c0_4, %5, %c0_5, %c0_6] : memref<1x10x10x256xbf16, #tpu.memory_space<vmem>>, vector<1x1x10x256xbf16>
      %7 = vector.shape_cast %6 : vector<1x1x10x256xbf16> to vector<10x256xbf16>
      %8 = vector.extract_strided_slice %7 {offsets = [0, 0], sizes = [8, 256], strides = [1, 1]} : vector<10x256xbf16> to vector<8x256xbf16>
      %c0_7 = arith.constant 0 : index
      %c0_8 = arith.constant 0 : index
      %9 = vector.load %arg2[%c0_7, %c0_8] : memref<2304x128xbf16, #tpu.memory_space<vmem>>, vector<256x128xbf16>
      %cst_9 = arith.constant dense<0.000000e+00> : vector<8x128xf32>
      %10 = tpu.matmul %8, %9, %cst_9 {dimension_numbers = #tpu.dot_dimension_numbers<[1], [0], [0], [1], [0, 0, 1, 1], [], []>} : vector<8x256xbf16>, vector<256x128xbf16>, vector<8x128xf32> -> vector<8x128xf32>
      %11 = arith.addf %2, %10 : vector<8x128xf32>
      %12 = vector.extract_strided_slice %7 {offsets = [1, 0], sizes = [8, 256], strides = [1, 1]} : vector<10x256xbf16> to vector<8x256xbf16>
      %c256 = arith.constant 256 : index
      %c0_10 = arith.constant 0 : index
      %13 = vector.load %arg2[%c256, %c0_10] : memref<2304x128xbf16, #tpu.memory_space<vmem>>, vector<256x128xbf16>
      %cst_11 = arith.constant dense<0.000000e+00> : vector<8x128xf32>
      %14 = tpu.matmul %12, %13, %cst_11 {dimension_numbers = #tpu.dot_dimension_numbers<[1], [0], [0], [1], [0, 0, 1, 1], [], []>} : vector<8x256xbf16>, vector<256x128xbf16>, vector<8x128xf32> -> vector<8x128xf32>
      %15 = arith.addf %11, %14 : vector<8x128xf32>
      %16 = vector.extract_strided_slice %7 {offsets = [2, 0], sizes = [8, 256], strides = [1, 1]} : vector<10x256xbf16> to vector<8x256xbf16>
      %c512 = arith.constant 512 : index
      %c0_12 = arith.constant 0 : index
      %17 = vector.load %arg2[%c512, %c0_12] : memref<2304x128xbf16, #tpu.memory_space<vmem>>, vector<256x128xbf16>
      %cst_13 = arith.constant dense<0.000000e+00> : vector<8x128xf32>
      %18 = tpu.matmul %16, %17, %cst_13 {dimension_numbers = #tpu.dot_dimension_numbers<[1], [0], [0], [1], [0, 0, 1, 1], [], []>} : vector<8x256xbf16>, vector<256x128xbf16>, vector<8x128xf32> -> vector<8x128xf32>
      %19 = arith.addf %15, %18 : vector<8x128xf32>
      %c1_i32_14 = arith.constant 1 : i32
      %20 = arith.muli %arg5, %c1_i32_14 : i32
      %c1_i32_15 = arith.constant 1 : i32
      %21 = arith.addi %20, %c1_i32_15 : i32
      %c0_16 = arith.constant 0 : index
      %22 = arith.index_cast %21 : i32 to index
      %c0_17 = arith.constant 0 : index
      %c0_18 = arith.constant 0 : index
      %23 = vector.load %arg1[%c0_16, %22, %c0_17, %c0_18] : memref<1x10x10x256xbf16, #tpu.memory_space<vmem>>, vector<1x1x10x256xbf16>
      %24 = vector.shape_cast %23 : vector<1x1x10x256xbf16> to vector<10x256xbf16>
      %25 = vector.extract_strided_slice %24 {offsets = [0, 0], sizes = [8, 256], strides = [1, 1]} : vector<10x256xbf16> to vector<8x256xbf16>
      %c768 = arith.constant 768 : index
      %c0_19 = arith.constant 0 : index
      %26 = vector.load %arg2[%c768, %c0_19] : memref<2304x128xbf16, #tpu.memory_space<vmem>>, vector<256x128xbf16>
      %cst_20 = arith.constant dense<0.000000e+00> : vector<8x128xf32>
      %27 = tpu.matmul %25, %26, %cst_20 {dimension_numbers = #tpu.dot_dimension_numbers<[1], [0], [0], [1], [0, 0, 1, 1], [], []>} : vector<8x256xbf16>, vector<256x128xbf16>, vector<8x128xf32> -> vector<8x128xf32>
      %28 = arith.addf %19, %27 : vector<8x128xf32>
      %29 = vector.extract_strided_slice %24 {offsets = [1, 0], sizes = [8, 256], strides = [1, 1]} : vector<10x256xbf16> to vector<8x256xbf16>
      %c1024 = arith.constant 1024 : index
      %c0_21 = arith.constant 0 : index
      %30 = vector.load %arg2[%c1024, %c0_21] : memref<2304x128xbf16, #tpu.memory_space<vmem>>, vector<256x128xbf16>
      %cst_22 = arith.constant dense<0.000000e+00> : vector<8x128xf32>
      %31 = tpu.matmul %29, %30, %cst_22 {dimension_numbers = #tpu.dot_dimension_numbers<[1], [0], [0], [1], [0, 0, 1, 1], [], []>} : vector<8x256xbf16>, vector<256x128xbf16>, vector<8x128xf32> -> vector<8x128xf32>
      %32 = arith.addf %28, %31 : vector<8x128xf32>
      %33 = vector.extract_strided_slice %24 {offsets = [2, 0], sizes = [8, 256], strides = [1, 1]} : vector<10x256xbf16> to vector<8x256xbf16>
      %c1280 = arith.constant 1280 : index
      %c0_23 = arith.constant 0 : index
      %34 = vector.load %arg2[%c1280, %c0_23] : memref<2304x128xbf16, #tpu.memory_space<vmem>>, vector<256x128xbf16>
      %cst_24 = arith.constant dense<0.000000e+00> : vector<8x128xf32>
      %35 = tpu.matmul %33, %34, %cst_24 {dimension_numbers = #tpu.dot_dimension_numbers<[1], [0], [0], [1], [0, 0, 1, 1], [], []>} : vector<8x256xbf16>, vector<256x128xbf16>, vector<8x128xf32> -> vector<8x128xf32>
      %36 = arith.addf %32, %35 : vector<8x128xf32>
      %c1_i32_25 = arith.constant 1 : i32
      %37 = arith.muli %arg5, %c1_i32_25 : i32
      %c2_i32 = arith.constant 2 : i32
      %38 = arith.addi %37, %c2_i32 : i32
      %c0_26 = arith.constant 0 : index
      %39 = arith.index_cast %38 : i32 to index
      %c0_27 = arith.constant 0 : index
      %c0_28 = arith.constant 0 : index
      %40 = vector.load %arg1[%c0_26, %39, %c0_27, %c0_28] : memref<1x10x10x256xbf16, #tpu.memory_space<vmem>>, vector<1x1x10x256xbf16>
      %41 = vector.shape_cast %40 : vector<1x1x10x256xbf16> to vector<10x256xbf16>
      %42 = vector.extract_strided_slice %41 {offsets = [0, 0], sizes = [8, 256], strides = [1, 1]} : vector<10x256xbf16> to vector<8x256xbf16>
      %c1536 = arith.constant 1536 : index
      %c0_29 = arith.constant 0 : index
      %43 = vector.load %arg2[%c1536, %c0_29] : memref<2304x128xbf16, #tpu.memory_space<vmem>>, vector<256x128xbf16>
      %cst_30 = arith.constant dense<0.000000e+00> : vector<8x128xf32>
      %44 = tpu.matmul %42, %43, %cst_30 {dimension_numbers = #tpu.dot_dimension_numbers<[1], [0], [0], [1], [0, 0, 1, 1], [], []>} : vector<8x256xbf16>, vector<256x128xbf16>, vector<8x128xf32> -> vector<8x128xf32>
      %45 = arith.addf %36, %44 : vector<8x128xf32>
      %46 = vector.extract_strided_slice %41 {offsets = [1, 0], sizes = [8, 256], strides = [1, 1]} : vector<10x256xbf16> to vector<8x256xbf16>
      %c1792 = arith.constant 1792 : index
      %c0_31 = arith.constant 0 : index
      %47 = vector.load %arg2[%c1792, %c0_31] : memref<2304x128xbf16, #tpu.memory_space<vmem>>, vector<256x128xbf16>
      %cst_32 = arith.constant dense<0.000000e+00> : vector<8x128xf32>
      %48 = tpu.matmul %46, %47, %cst_32 {dimension_numbers = #tpu.dot_dimension_numbers<[1], [0], [0], [1], [0, 0, 1, 1], [], []>} : vector<8x256xbf16>, vector<256x128xbf16>, vector<8x128xf32> -> vector<8x128xf32>
      %49 = arith.addf %45, %48 : vector<8x128xf32>
      %50 = vector.extract_strided_slice %41 {offsets = [2, 0], sizes = [8, 256], strides = [1, 1]} : vector<10x256xbf16> to vector<8x256xbf16>
      %c2048 = arith.constant 2048 : index
      %c0_33 = arith.constant 0 : index
      %51 = vector.load %arg2[%c2048, %c0_33] : memref<2304x128xbf16, #tpu.memory_space<vmem>>, vector<256x128xbf16>
      %cst_34 = arith.constant dense<0.000000e+00> : vector<8x128xf32>
      %52 = tpu.matmul %50, %51, %cst_34 {dimension_numbers = #tpu.dot_dimension_numbers<[1], [0], [0], [1], [0, 0, 1, 1], [], []>} : vector<8x256xbf16>, vector<256x128xbf16>, vector<8x128xf32> -> vector<8x128xf32>
      %53 = arith.addf %49, %52 : vector<8x128xf32>
      %54 = vector.broadcast %0 : vector<1x128xf32> to vector<8x128xf32>
      %55 = arith.addf %53, %54 : vector<8x128xf32>
      %cst_35 = arith.constant 0.000000e+00 : f32
      %56 = vector.broadcast %cst_35 : f32 to vector<8x128xf32>
      %57 = arith.maximumf %55, %56 : vector<8x128xf32>
      %58 = arith.truncf %57 : vector<8x128xf32> to vector<8x128xbf16>
      %c0_36 = arith.constant 0 : index
      %59 = arith.index_cast %arg5 : i32 to index
      %c0_37 = arith.constant 0 : index
      %c0_38 = arith.constant 0 : index
      %60 = vector.load %arg4[%c0_36, %59, %c0_37, %c0_38] : memref<1x8x8x128xbf16, #tpu.memory_space<vmem>>, vector<1x1x8x128xbf16>
      %61 = vector.shape_cast %60 : vector<1x1x8x128xbf16> to vector<8x128xbf16>
      %62 = vector.shape_cast %58 : vector<8x128xbf16> to vector<1x1x8x128xbf16>
      tpu.vector_store %arg4[%c0_36, %59, %c0_37, %c0_38], %62 {strides = array<i32>} : memref<1x8x8x128xbf16, #tpu.memory_space<vmem>>, vector<1x1x8x128xbf16>,
    }
    %c8_i32_1 = arith.constant 8 : i32
    return
  }
  func.func @transform_0(%arg0: i32) -> (i32, i32, i32, i32) {
    %c0_i32 = arith.constant 0 : i32
    %c0_i32_0 = arith.constant 0 : i32
    %c0_i32_1 = arith.constant 0 : i32
    %c0_i32_2 = arith.constant 0 : i32
    return %arg0, %c0_i32, %c0_i32_0, %c0_i32_1 : i32, i32, i32, i32
  }
  func.func @transform_1(%arg0: i32) -> (i32, i32) {
    %c0_i32 = arith.constant 0 : i32
    %c0_i32_0 = arith.constant 0 : i32
    %c0_i32_1 = arith.constant 0 : i32
    return %c0_i32, %c0_i32_0 : i32, i32
  }
  func.func @transform_2(%arg0: i32) -> (i32, i32) {
    %c0_i32 = arith.constant 0 : i32
    %c0_i32_0 = arith.constant 0 : i32
    %c0_i32_1 = arith.constant 0 : i32
    return %c0_i32, %c0_i32_0 : i32, i32
  }
  func.func @transform_3(%arg0: i32) -> (i32, i32, i32, i32) {
    %c0_i32 = arith.constant 0 : i32
    %c0_i32_0 = arith.constant 0 : i32
    %c0_i32_1 = arith.constant 0 : i32
    %c0_i32_2 = arith.constant 0 : i32
    return %arg0, %c0_i32, %c0_i32_0, %c0_i32_1 : i32, i32, i32, i32
  }
}

module attributes {stable_mosaic.version = 11 : i64} {
  func.func @_conv3x3_kernel(%arg0: i32, %arg1: memref<1x10x10x128xbf16, #tpu.memory_space<vmem>>, %arg2: memref<1152x128xbf16, #tpu.memory_space<vmem>>, %arg3: memref<1x128xf32, #tpu.memory_space<vmem>>, %arg4: memref<1x8x8x128xbf16, #tpu.memory_space<vmem>>) attributes {dimension_semantics = [#tpu.dimension_semantics<parallel>], iteration_bounds = array<i64: 2>, scalar_prefetch = 0 : i64, scratch_operands = 0 : i64, tpu.core_type = #tpu.core_type<tc>, window_params = [{transform_indices = @transform_0, window_bounds = array<i64: 1, 10, 10, 128>}, {pipeline_mode = #tpu.pipeline_mode<synchronous>, transform_indices = @transform_1, window_bounds = array<i64: 1152, 128>}, {pipeline_mode = #tpu.pipeline_mode<synchronous>, transform_indices = @transform_2, window_bounds = array<i64: 1, 128>}, {transform_indices = @transform_3, window_bounds = array<i64: 1, 8, 8, 128>}]} {
    %c0 = arith.constant 0 : index
    %c0_0 = arith.constant 0 : index
    %0 = vector.load %arg3[%c0, %c0_0] : memref<1x128xf32, #tpu.memory_space<vmem>>, vector<1x128xf32>
    %c0_i32 = arith.constant 0 : i32
    %c8_i32 = arith.constant 8 : i32
    %1 = arith.addi %c0_i32, %c8_i32 : i32
    %c1_i32 = arith.constant 1 : i32
    scf.for %arg5 = %c0_i32 to %1 step %c1_i32  : i32 {
      %cst = arith.constant 0.000000e+00 : f32
      %2 = vector.broadcast %cst : f32 to vector<8x128xf32>
      %c1_i32_2 = arith.constant 1 : i32
      %3 = arith.muli %arg5, %c1_i32_2 : i32
      %c0_i32_3 = arith.constant 0 : i32
      %4 = arith.addi %3, %c0_i32_3 : i32
      %c0_4 = arith.constant 0 : index
      %5 = arith.index_cast %4 : i32 to index
      %c0_5 = arith.constant 0 : index
      %c0_6 = arith.constant 0 : index
      %6 = vector.load %arg1[%c0_4, %5, %c0_5, %c0_6] : memref<1x10x10x128xbf16, #tpu.memory_space<vmem>>, vector<1x1x10x128xbf16>
      %7 = vector.shape_cast %6 : vector<1x1x10x128xbf16> to vector<10x128xbf16>
      %8 = vector.extract_strided_slice %7 {offsets = [0, 0], sizes = [8, 128], strides = [1, 1]} : vector<10x128xbf16> to vector<8x128xbf16>
      %c0_7 = arith.constant 0 : index
      %c0_8 = arith.constant 0 : index
      %9 = vector.load %arg2[%c0_7, %c0_8] : memref<1152x128xbf16, #tpu.memory_space<vmem>>, vector<128x128xbf16>
      %cst_9 = arith.constant dense<0.000000e+00> : vector<8x128xf32>
      %10 = tpu.matmul %8, %9, %cst_9 {dimension_numbers = #tpu.dot_dimension_numbers<[1], [0], [0], [1], [0, 0, 1, 1], [], []>} : vector<8x128xbf16>, vector<128x128xbf16>, vector<8x128xf32> -> vector<8x128xf32>
      %11 = arith.addf %2, %10 : vector<8x128xf32>
      %12 = vector.extract_strided_slice %7 {offsets = [1, 0], sizes = [8, 128], strides = [1, 1]} : vector<10x128xbf16> to vector<8x128xbf16>
      %c128 = arith.constant 128 : index
      %c0_10 = arith.constant 0 : index
      %13 = vector.load %arg2[%c128, %c0_10] : memref<1152x128xbf16, #tpu.memory_space<vmem>>, vector<128x128xbf16>
      %cst_11 = arith.constant dense<0.000000e+00> : vector<8x128xf32>
      %14 = tpu.matmul %12, %13, %cst_11 {dimension_numbers = #tpu.dot_dimension_numbers<[1], [0], [0], [1], [0, 0, 1, 1], [], []>} : vector<8x128xbf16>, vector<128x128xbf16>, vector<8x128xf32> -> vector<8x128xf32>
      %15 = arith.addf %11, %14 : vector<8x128xf32>
      %16 = vector.extract_strided_slice %7 {offsets = [2, 0], sizes = [8, 128], strides = [1, 1]} : vector<10x128xbf16> to vector<8x128xbf16>
      %c256 = arith.constant 256 : index
      %c0_12 = arith.constant 0 : index
      %17 = vector.load %arg2[%c256, %c0_12] : memref<1152x128xbf16, #tpu.memory_space<vmem>>, vector<128x128xbf16>
      %cst_13 = arith.constant dense<0.000000e+00> : vector<8x128xf32>
      %18 = tpu.matmul %16, %17, %cst_13 {dimension_numbers = #tpu.dot_dimension_numbers<[1], [0], [0], [1], [0, 0, 1, 1], [], []>} : vector<8x128xbf16>, vector<128x128xbf16>, vector<8x128xf32> -> vector<8x128xf32>
      %19 = arith.addf %15, %18 : vector<8x128xf32>
      %c1_i32_14 = arith.constant 1 : i32
      %20 = arith.muli %arg5, %c1_i32_14 : i32
      %c1_i32_15 = arith.constant 1 : i32
      %21 = arith.addi %20, %c1_i32_15 : i32
      %c0_16 = arith.constant 0 : index
      %22 = arith.index_cast %21 : i32 to index
      %c0_17 = arith.constant 0 : index
      %c0_18 = arith.constant 0 : index
      %23 = vector.load %arg1[%c0_16, %22, %c0_17, %c0_18] : memref<1x10x10x128xbf16, #tpu.memory_space<vmem>>, vector<1x1x10x128xbf16>
      %24 = vector.shape_cast %23 : vector<1x1x10x128xbf16> to vector<10x128xbf16>
      %25 = vector.extract_strided_slice %24 {offsets = [0, 0], sizes = [8, 128], strides = [1, 1]} : vector<10x128xbf16> to vector<8x128xbf16>
      %c384 = arith.constant 384 : index
      %c0_19 = arith.constant 0 : index
      %26 = vector.load %arg2[%c384, %c0_19] : memref<1152x128xbf16, #tpu.memory_space<vmem>>, vector<128x128xbf16>
      %cst_20 = arith.constant dense<0.000000e+00> : vector<8x128xf32>
      %27 = tpu.matmul %25, %26, %cst_20 {dimension_numbers = #tpu.dot_dimension_numbers<[1], [0], [0], [1], [0, 0, 1, 1], [], []>} : vector<8x128xbf16>, vector<128x128xbf16>, vector<8x128xf32> -> vector<8x128xf32>
      %28 = arith.addf %19, %27 : vector<8x128xf32>
      %29 = vector.extract_strided_slice %24 {offsets = [1, 0], sizes = [8, 128], strides = [1, 1]} : vector<10x128xbf16> to vector<8x128xbf16>
      %c512 = arith.constant 512 : index
      %c0_21 = arith.constant 0 : index
      %30 = vector.load %arg2[%c512, %c0_21] : memref<1152x128xbf16, #tpu.memory_space<vmem>>, vector<128x128xbf16>
      %cst_22 = arith.constant dense<0.000000e+00> : vector<8x128xf32>
      %31 = tpu.matmul %29, %30, %cst_22 {dimension_numbers = #tpu.dot_dimension_numbers<[1], [0], [0], [1], [0, 0, 1, 1], [], []>} : vector<8x128xbf16>, vector<128x128xbf16>, vector<8x128xf32> -> vector<8x128xf32>
      %32 = arith.addf %28, %31 : vector<8x128xf32>
      %33 = vector.extract_strided_slice %24 {offsets = [2, 0], sizes = [8, 128], strides = [1, 1]} : vector<10x128xbf16> to vector<8x128xbf16>
      %c640 = arith.constant 640 : index
      %c0_23 = arith.constant 0 : index
      %34 = vector.load %arg2[%c640, %c0_23] : memref<1152x128xbf16, #tpu.memory_space<vmem>>, vector<128x128xbf16>
      %cst_24 = arith.constant dense<0.000000e+00> : vector<8x128xf32>
      %35 = tpu.matmul %33, %34, %cst_24 {dimension_numbers = #tpu.dot_dimension_numbers<[1], [0], [0], [1], [0, 0, 1, 1], [], []>} : vector<8x128xbf16>, vector<128x128xbf16>, vector<8x128xf32> -> vector<8x128xf32>
      %36 = arith.addf %32, %35 : vector<8x128xf32>
      %c1_i32_25 = arith.constant 1 : i32
      %37 = arith.muli %arg5, %c1_i32_25 : i32
      %c2_i32 = arith.constant 2 : i32
      %38 = arith.addi %37, %c2_i32 : i32
      %c0_26 = arith.constant 0 : index
      %39 = arith.index_cast %38 : i32 to index
      %c0_27 = arith.constant 0 : index
      %c0_28 = arith.constant 0 : index
      %40 = vector.load %arg1[%c0_26, %39, %c0_27, %c0_28] : memref<1x10x10x128xbf16, #tpu.memory_space<vmem>>, vector<1x1x10x128xbf16>
      %41 = vector.shape_cast %40 : vector<1x1x10x128xbf16> to vector<10x128xbf16>
      %42 = vector.extract_strided_slice %41 {offsets = [0, 0], sizes = [8, 128], strides = [1, 1]} : vector<10x128xbf16> to vector<8x128xbf16>
      %c768 = arith.constant 768 : index
      %c0_29 = arith.constant 0 : index
      %43 = vector.load %arg2[%c768, %c0_29] : memref<1152x128xbf16, #tpu.memory_space<vmem>>, vector<128x128xbf16>
      %cst_30 = arith.constant dense<0.000000e+00> : vector<8x128xf32>
      %44 = tpu.matmul %42, %43, %cst_30 {dimension_numbers = #tpu.dot_dimension_numbers<[1], [0], [0], [1], [0, 0, 1, 1], [], []>} : vector<8x128xbf16>, vector<128x128xbf16>, vector<8x128xf32> -> vector<8x128xf32>
      %45 = arith.addf %36, %44 : vector<8x128xf32>
      %46 = vector.extract_strided_slice %41 {offsets = [1, 0], sizes = [8, 128], strides = [1, 1]} : vector<10x128xbf16> to vector<8x128xbf16>
      %c896 = arith.constant 896 : index
      %c0_31 = arith.constant 0 : index
      %47 = vector.load %arg2[%c896, %c0_31] : memref<1152x128xbf16, #tpu.memory_space<vmem>>, vector<128x128xbf16>
      %cst_32 = arith.constant dense<0.000000e+00> : vector<8x128xf32>
      %48 = tpu.matmul %46, %47, %cst_32 {dimension_numbers = #tpu.dot_dimension_numbers<[1], [0], [0], [1], [0, 0, 1, 1], [], []>} : vector<8x128xbf16>, vector<128x128xbf16>, vector<8x128xf32> -> vector<8x128xf32>
      %49 = arith.addf %45, %48 : vector<8x128xf32>
      %50 = vector.extract_strided_slice %41 {offsets = [2, 0], sizes = [8, 128], strides = [1, 1]} : vector<10x128xbf16> to vector<8x128xbf16>
      %c1024 = arith.constant 1024 : index
      %c0_33 = arith.constant 0 : index
      %51 = vector.load %arg2[%c1024, %c0_33] : memref<1152x128xbf16, #tpu.memory_space<vmem>>, vector<128x128xbf16>
      %cst_34 = arith.constant dense<0.000000e+00> : vector<8x128xf32>
      %52 = tpu.matmul %50, %51, %cst_34 {dimension_numbers = #tpu.dot_dimension_numbers<[1], [0], [0], [1], [0, 0, 1, 1], [], []>} : vector<8x128xbf16>, vector<128x128xbf16>, vector<8x128xf32> -> vector<8x128xf32>
      %53 = arith.addf %49, %52 : vector<8x128xf32>
      %54 = vector.broadcast %0 : vector<1x128xf32> to vector<8x128xf32>
      %55 = arith.addf %53, %54 : vector<8x128xf32>
      %cst_35 = arith.constant 0.000000e+00 : f32
      %56 = vector.broadcast %cst_35 : f32 to vector<8x128xf32>
      %57 = arith.maximumf %55, %56 : vector<8x128xf32>
      %58 = arith.truncf %57 : vector<8x128xf32> to vector<8x128xbf16>
      %c0_36 = arith.constant 0 : index
      %59 = arith.index_cast %arg5 : i32 to index
      %c0_37 = arith.constant 0 : index
      %c0_38 = arith.constant 0 : index
      %60 = vector.load %arg4[%c0_36, %59, %c0_37, %c0_38] : memref<1x8x8x128xbf16, #tpu.memory_space<vmem>>, vector<1x1x8x128xbf16>
      %61 = vector.shape_cast %60 : vector<1x1x8x128xbf16> to vector<8x128xbf16>
      %62 = vector.shape_cast %58 : vector<8x128xbf16> to vector<1x1x8x128xbf16>
      tpu.vector_store %arg4[%c0_36, %59, %c0_37, %c0_38], %62 {strides = array<i32>} : memref<1x8x8x128xbf16, #tpu.memory_space<vmem>>, vector<1x1x8x128xbf16>,
    }
    %c8_i32_1 = arith.constant 8 : i32
    return
  }
  func.func @transform_0(%arg0: i32) -> (i32, i32, i32, i32) {
    %c0_i32 = arith.constant 0 : i32
    %c0_i32_0 = arith.constant 0 : i32
    %c0_i32_1 = arith.constant 0 : i32
    %c0_i32_2 = arith.constant 0 : i32
    return %arg0, %c0_i32, %c0_i32_0, %c0_i32_1 : i32, i32, i32, i32
  }
  func.func @transform_1(%arg0: i32) -> (i32, i32) {
    %c0_i32 = arith.constant 0 : i32
    %c0_i32_0 = arith.constant 0 : i32
    %c0_i32_1 = arith.constant 0 : i32
    return %c0_i32, %c0_i32_0 : i32, i32
  }
  func.func @transform_2(%arg0: i32) -> (i32, i32) {
    %c0_i32 = arith.constant 0 : i32
    %c0_i32_0 = arith.constant 0 : i32
    %c0_i32_1 = arith.constant 0 : i32
    return %c0_i32, %c0_i32_0 : i32, i32
  }
  func.func @transform_3(%arg0: i32) -> (i32, i32, i32, i32) {
    %c0_i32 = arith.constant 0 : i32
    %c0_i32_0 = arith.constant 0 : i32
    %c0_i32_1 = arith.constant 0 : i32
    %c0_i32_2 = arith.constant 0 : i32
    return %arg0, %c0_i32, %c0_i32_0, %c0_i32_1 : i32, i32, i32, i32
  }
}

module attributes {stable_mosaic.version = 11 : i64} {
  func.func @_bilinear_kernel(%arg0: i32, %arg1: memref<1024x64xf32, #tpu.memory_space<vmem>>, %arg2: memref<1x64x128xbf16, #tpu.memory_space<vmem>>, %arg3: memref<1x1024x128xf32, #tpu.memory_space<vmem>>) attributes {dimension_semantics = [#tpu.dimension_semantics<parallel>], iteration_bounds = array<i64: 2>, scalar_prefetch = 0 : i64, scratch_operands = 0 : i64, tpu.core_type = #tpu.core_type<tc>, window_params = [{pipeline_mode = #tpu.pipeline_mode<synchronous>, transform_indices = @transform_0, window_bounds = array<i64: 1024, 64>}, {transform_indices = @transform_1, window_bounds = array<i64: 1, 64, 128>}, {transform_indices = @transform_2, window_bounds = array<i64: 1, 1024, 128>}]} {
    %c0 = arith.constant 0 : index
    %c0_0 = arith.constant 0 : index
    %0 = vector.load %arg1[%c0, %c0_0] : memref<1024x64xf32, #tpu.memory_space<vmem>>, vector<1024x64xf32>
    %c0_1 = arith.constant 0 : index
    %c0_2 = arith.constant 0 : index
    %c0_3 = arith.constant 0 : index
    %1 = vector.load %arg2[%c0_1, %c0_2, %c0_3] : memref<1x64x128xbf16, #tpu.memory_space<vmem>>, vector<1x64x128xbf16>
    %2 = vector.shape_cast %1 : vector<1x64x128xbf16> to vector<64x128xbf16>
    %3 = arith.extf %2 : vector<64x128xbf16> to vector<64x128xf32>
    %cst = arith.constant dense<0.000000e+00> : vector<1024x128xf32>
    %4 = tpu.matmul %0, %3, %cst {dimension_numbers = #tpu.dot_dimension_numbers<[1], [0], [0], [1], [0, 0, 1, 1], [], []>} : vector<1024x64xf32>, vector<64x128xf32>, vector<1024x128xf32> -> vector<1024x128xf32>
    %c0_4 = arith.constant 0 : index
    %c0_5 = arith.constant 0 : index
    %c0_6 = arith.constant 0 : index
    %5 = vector.load %arg3[%c0_4, %c0_5, %c0_6] : memref<1x1024x128xf32, #tpu.memory_space<vmem>>, vector<1x1024x128xf32>
    %6 = vector.shape_cast %5 : vector<1x1024x128xf32> to vector<1024x128xf32>
    %7 = vector.shape_cast %4 : vector<1024x128xf32> to vector<1x1024x128xf32>
    tpu.vector_store %arg3[%c0_4, %c0_5, %c0_6], %7 {strides = array<i32>} : memref<1x1024x128xf32, #tpu.memory_space<vmem>>, vector<1x1024x128xf32>,
    return
  }
  func.func @transform_0(%arg0: i32) -> (i32, i32) {
    %c0_i32 = arith.constant 0 : i32
    %c0_i32_0 = arith.constant 0 : i32
    %c0_i32_1 = arith.constant 0 : i32
    return %c0_i32, %c0_i32_0 : i32, i32
  }
  func.func @transform_1(%arg0: i32) -> (i32, i32, i32) {
    %c0_i32 = arith.constant 0 : i32
    %c0_i32_0 = arith.constant 0 : i32
    %c0_i32_1 = arith.constant 0 : i32
    return %arg0, %c0_i32, %c0_i32_0 : i32, i32, i32
  }
  func.func @transform_2(%arg0: i32) -> (i32, i32, i32) {
    %c0_i32 = arith.constant 0 : i32
    %c0_i32_0 = arith.constant 0 : i32
    %c0_i32_1 = arith.constant 0 : i32
    return %arg0, %c0_i32, %c0_i32_0 : i32, i32, i32
  }
}

module attributes {stable_mosaic.version = 11 : i64} {
  func.func @_matmul_bias_kernel(%arg0: i32, %arg1: memref<128x128xbf16, #tpu.memory_space<vmem>>, %arg2: memref<128x128xbf16, #tpu.memory_space<vmem>>, %arg3: memref<1x128xf32, #tpu.memory_space<vmem>>, %arg4: memref<128x128xbf16, #tpu.memory_space<vmem>>) attributes {dimension_semantics = [#tpu.dimension_semantics<parallel>], iteration_bounds = array<i64: 1>, scalar_prefetch = 0 : i64, scratch_operands = 0 : i64, tpu.core_type = #tpu.core_type<tc>, window_params = [{transform_indices = @transform_0, window_bounds = array<i64: 128, 128>}, {pipeline_mode = #tpu.pipeline_mode<synchronous>, transform_indices = @transform_1, window_bounds = array<i64: 128, 128>}, {pipeline_mode = #tpu.pipeline_mode<synchronous>, transform_indices = @transform_2, window_bounds = array<i64: 1, 128>}, {transform_indices = @transform_3, window_bounds = array<i64: 128, 128>}]} {
    %c0 = arith.constant 0 : index
    %c0_0 = arith.constant 0 : index
    %0 = vector.load %arg1[%c0, %c0_0] : memref<128x128xbf16, #tpu.memory_space<vmem>>, vector<128x128xbf16>
    %c0_1 = arith.constant 0 : index
    %c0_2 = arith.constant 0 : index
    %1 = vector.load %arg2[%c0_1, %c0_2] : memref<128x128xbf16, #tpu.memory_space<vmem>>, vector<128x128xbf16>
    %cst = arith.constant dense<0.000000e+00> : vector<128x128xf32>
    %2 = tpu.matmul %0, %1, %cst {dimension_numbers = #tpu.dot_dimension_numbers<[1], [0], [0], [1], [0, 0, 1, 1], [], []>} : vector<128x128xbf16>, vector<128x128xbf16>, vector<128x128xf32> -> vector<128x128xf32>
    %c0_3 = arith.constant 0 : index
    %c0_4 = arith.constant 0 : index
    %3 = vector.load %arg3[%c0_3, %c0_4] : memref<1x128xf32, #tpu.memory_space<vmem>>, vector<1x128xf32>
    %4 = vector.broadcast %3 : vector<1x128xf32> to vector<128x128xf32>
    %5 = arith.addf %2, %4 : vector<128x128xf32>
    %6 = arith.truncf %5 : vector<128x128xf32> to vector<128x128xbf16>
    %c0_5 = arith.constant 0 : index
    %c0_6 = arith.constant 0 : index
    %7 = vector.load %arg4[%c0_5, %c0_6] : memref<128x128xbf16, #tpu.memory_space<vmem>>, vector<128x128xbf16>
    tpu.vector_store %arg4[%c0_5, %c0_6], %6 {strides = array<i32>} : memref<128x128xbf16, #tpu.memory_space<vmem>>, vector<128x128xbf16>,
    return
  }
  func.func @transform_0(%arg0: i32) -> (i32, i32) {
    %c0_i32 = arith.constant 0 : i32
    %c0_i32_0 = arith.constant 0 : i32
    return %arg0, %c0_i32 : i32, i32
  }
  func.func @transform_1(%arg0: i32) -> (i32, i32) {
    %c0_i32 = arith.constant 0 : i32
    %c0_i32_0 = arith.constant 0 : i32
    %c0_i32_1 = arith.constant 0 : i32
    return %c0_i32, %c0_i32_0 : i32, i32
  }
  func.func @transform_2(%arg0: i32) -> (i32, i32) {
    %c0_i32 = arith.constant 0 : i32
    %c0_i32_0 = arith.constant 0 : i32
    %c0_i32_1 = arith.constant 0 : i32
    return %c0_i32, %c0_i32_0 : i32, i32
  }
  func.func @transform_3(%arg0: i32) -> (i32, i32) {
    %c0_i32 = arith.constant 0 : i32
    %c0_i32_0 = arith.constant 0 : i32
    return %arg0, %c0_i32 : i32, i32
  }
}

</mosaic_0001>

<bundles_post_ra>
// kernel: deeplab_forward.14
= control target key start
LH: loop header
LB: loop body
LE: loop exit
PB: predicated region body
PF: predicated region fallthrough
CT: control target
= control target key end

     0   :  { %s1693_s12 = smov 0   ;;  %s2001_s0 = inlined_call_operand.vmem [shape: bf16[2,34,34,128], index: 0, kind: input, shape index: {}]   ;;  %s2002_s1 = inlined_call_operand.vmem [shape: bf16[1152,128], index: 1, kind: input, shape index: {}]   ;;  %s2003_s2 = inlined_call_operand.vmem [shape: f32[1,128], index: 2, kind: input, shape index: {}]   ;;  %s2004_s3 = inlined_call_operand.vmem [shape: bf16[2,32,32,128], index: 3, kind: output, shape index: {}]  }
   0x1 LB: > { %s1205_s13 = sadd.s32 4294967295, %s1667_s12   ;;  %p1209_p0 = scmp.ge.s32.totalorder %s1667_s12, 1  ;;  %s1667_s12 = sphi %s1693_s12, %s13_s12  }
   0x2   : > { %p137_p1 = scmp.lt.s32.totalorder %s1667_s12, 3 }
   0x4   : > { %p138_p2 = pnand %p1209_p0, %p137_p1 }
   0x5   : > { %p161_p3 = scmp.lt.s32.totalorder (!%p138_p2), %s1205_s13, 1  ;;  %s1716_s24 = smov (!%p138_p2), 0  }
   0x6   : > { %141 = sbr.rel (%p138_p2) target bundleno = 255 (0xff), region = 32 }
   0xb   : > { %v1704_v0 = vld [vmem:[%s2003_s2] sm:$0x1]  ;;  %s2006_s13 = smov (!%p161_p3, %s1205_s13), 1 }
   0xc   : > { %s1640_s16 = smul.u32 680, %s2006_s13  ;;  %s1540_s17 = sshll.u32 %s2006_s13, 9 }
   0xd   : > { %s1709_s20 = scalar_lea.vmem %s2004_s3, %s1540_s17 }
   0xe   : > { %s1714_s23 = scalar_lea.vmem %s2001_s0, %s1640_s16 }
   0xf LB: >> { %v1559_v1 = vld [vmem:[%s2002_s1 + $0x78] sm:$0xff]  ;;  %v1558_v5 = vld [vmem:[%s2002_s1 + $0x70] sm:$0xff]  ;;  %v1557_v9 = vld [vmem:[%s2002_s1 + $0x68] sm:$0xff]  ;;  %s1541_s26 = smul.u32 20, %s1671_s24  ;;  %vm231_vm0 = vsmask.f32 7424  ;;  %s1671_s24 = sphi %s1716_s24, %s177_s24  }
  0x10   : >> { %v1551_v2 = vld [vmem:[%s2002_s1 + $0x38] sm:$0xff]  ;;  %302 = vmatpush.bf16.msra.mxu0 %v1559_v1  ;;  %v1550_v6 = vld [vmem:[%s2002_s1 + $0x30] sm:$0xff]  ;;  %v1549_v10 = vld [vmem:[%s2002_s1 + $0x28] sm:$0xff]  ;;  %vm406_vm1 = vcmask 1046528   ;;  %s1620_s10 = sshll.u32 %s1671_s24, 4  ;;  %s177_s24 = sadd.s32 1, %s1671_s24  }
  0x11   : >> { %v1567_v3 = vld [vmem:[%s2002_s1 + $0xb8] sm:$0xff]  ;;  %371 = vmatpush.bf16.msra.mxu1 %v1551_v2  ;;  %v1566_v7 = vld [vmem:[%s2002_s1 + $0xb0] sm:$0xff]  ;;  %v1565_v11 = vld [vmem:[%s2002_s1 + $0xa8] sm:$0xff]  ;;  %s1771_s8 = scalar_lea.vmem %s1714_s23, %s1541_s26  ;;  %s1130_s11 = scalar_lea.vmem %s1709_s20, %s1620_s10 }
  0x12   : >> { %v1577_v4 = vld [vmem:[%s2002_s1 + $0xf8] sm:$0xff]  ;;  %462 = vmatpush.bf16.msra.mxu2 %v1567_v3  ;;  %v1576_v8 = vld [vmem:[%s2002_s1 + $0xf0] sm:$0xff]  ;;  %v1575_v12 = vld [vmem:[%s2002_s1 + $0xe8] sm:$0xff]  ;;  %p174_p4 = scmp.ge.s32.totalorder %s177_s24, 32  }
  0x13   : >> { %570 = vmatpush.bf16.msra.mxu3 %v1577_v4  ;;  %v1556_v13 = vld [vmem:[%s2002_s1 + $0x60] sm:$0xff]  ;;  %v1555_v17 = vld [vmem:[%s2002_s1 + $0x58] sm:$0xff]  ;;  %v1554_v22 = vld [vmem:[%s2002_s1 + $0x50] sm:$0xff] }
  0x14   : >> { %303 = vmatpush.bf16.msra.mxu0 %v1558_v5  ;;  %v1548_v14 = vld [vmem:[%s2002_s1 + $0x20] sm:$0xff]  ;;  %v1547_v18 = vld [vmem:[%s2002_s1 + $0x18] sm:$0xff]  ;;  %v1546_v23 = vld [vmem:[%s2002_s1 + $0x10] sm:$0xff] }
  0x15   : >> { %372 = vmatpush.bf16.msra.mxu1 %v1550_v6  ;;  %v1564_v15 = vld [vmem:[%s2002_s1 + $0xa0] sm:$0xff]  ;;  %v1563_v20 = vld [vmem:[%s2002_s1 + $0x98] sm:$0xff]  ;;  %v1793_v24 = vld [vmem:[%s1771_s8 + $0x8] sm:$0xff] }
  0x16   : >> { %463 = vmatpush.bf16.msra.mxu2 %v1566_v7  ;;  %v1574_v16 = vld [vmem:[%s2002_s1 + $0xe0] sm:$0xff]  ;;  %v1573_v21 = vld [vmem:[%s2002_s1 + $0xd8] sm:$0xff]  ;;  %v1562_v26 = vld [vmem:[%s2002_s1 + $0x90] sm:$0xff]  ;;  %v240_v32 = vshll.u32 %v1793_v24, 16  ;;  %v408_v42 = vrot.slane %v1793_v24, 1  ;;  %v244_v59 = vshrl.u32 %v1793_v24, 16 }
  0x17   : >> { %571 = vmatpush.bf16.msra.mxu3 %v1576_v8  ;;  %v1542_v19 = vld [vmem:[%s1771_s8] sm:$0xff]  ;;  %v1572_v27 = vld [vmem:[%s2002_s1 + $0xd0] sm:$0xff]  ;;  %v1553_v28 = vld [vmem:[%s2002_s1 + $0x48] sm:$0xff] }
  0x18   : >> { %304 = vmatpush.bf16.msra.mxu0 %v1557_v9  ;;  %v235_v25 = vshll.u32 %v1542_v19, 16  ;;  %v1545_v29 = vld [vmem:[%s2002_s1 + $0x8] sm:$0xff]  ;;  %v233_v30 = vshrl.u32 %v1542_v19, 16  ;;  %v1552_v35 = vld [vmem:[%s2002_s1 + $0x40] sm:$0xff]  ;;  %v242_v38 = vrot.slane %v240_v32, 1  ;;  %v407_v41 = vrot.slane %v1542_v19, 1 }
  0x19   : >> { %373 = vmatpush.bf16.msra.mxu1 %v1549_v10  ;;  %v1561_v33 = vld [vmem:[%s2002_s1 + $0x88] sm:$0xff]  ;;  %v1544_v36 = vld [vmem:[%s2002_s1] sm:$0xff]  ;;  %v185_v43 = vld [vmem:[%s1771_s8 + $0x10] sm:$0x1] }
  0x1a   : >> { %464 = vmatpush.bf16.msra.mxu2 %v1565_v11  ;;  %v237_v31 = vrot.slane %v235_v25, 1  ;;  %v1571_v34 = vld [vmem:[%s2002_s1 + $0xc8] sm:$0xff]  ;;  %v1560_v39 = vld [vmem:[%s2002_s1 + $0x80] sm:$0xff]  ;;  %v1585_v44 = vld [vmem:[%s2002_s1 + $0x138] sm:$0xff]  ;;  %v227_v48 = vunpack.c.l.b16 %v185_v43  ;;  %v409_v49 = vsel %vm406_vm1, %v407_v41, %v408_v42  ;;  %v246_v2 = vor.u32 %v244_v59, %v242_v38 }
  0x1b   : >> { %572 = vmatpush.bf16.msra.mxu3 %v1575_v12  ;;  %v1570_v40 = vld [vmem:[%s2002_s1 + $0xc0] sm:$0xff]  ;;  %v1593_v45 = vld [vmem:[%s2002_s1 + $0x178] sm:$0xff]  ;;  %v1584_v52 = vld [vmem:[%s2002_s1 + $0x130] sm:$0xff] }
  0x1c   : >> { %305 = vmatpush.bf16.msra.mxu0 %v1556_v13  ;;  %v238_v37 = vor.u32 %v237_v31, %v233_v30  ;;  %v1836_v47 = vld [vmem:[%s1771_s8 + $0x14] sm:$0xff]  ;;  %v230_v54 = vpack.c.b16 %v227_v48, %v227_v48  ;;  %v1583_v57 = vld [vmem:[%s2002_s1 + $0x128] sm:$0xff]  ;;  %v1582_v63 = vld [vmem:[%s2002_s1 + $0x120] sm:$0xff] }
  0x1d   : >> { %374 = vmatpush.bf16.msra.mxu1 %v1548_v14  ;;  %v1603_v50 = vld [vmem:[%s2002_s1 + $0x1b8] sm:$0xff]  ;;  %v1592_v53 = vld [vmem:[%s2002_s1 + $0x170] sm:$0xff]  ;;  %v1591_v58 = vld [vmem:[%s2002_s1 + $0x168] sm:$0xff] }
  0x1e   : >> { %465 = vmatpush.bf16.msra.mxu2 %v1564_v15  ;;  %v243_v46 = vsel %vm231_vm0, %v238_v37, %v242_v38  ;;  %v1611_v51 = vld [vmem:[%s2002_s1 + $0x1f8] sm:$0xff]  ;;  %v1602_v55 = vld [vmem:[%s2002_s1 + $0x1b0] sm:$0xff]  ;;  %v248_v60 = vshll.u32 %v230_v54, 16  ;;  %v1601_v61 = vld [vmem:[%s2002_s1 + $0x1a8] sm:$0xff]  ;;  %v410_v6 = vrot.slane %v230_v54, 1  ;;  %v721_v37 = vrot.slane %v1836_v47, 1 }
  0x1f   : >> { %573 = vmatpush.bf16.msra.mxu3 %v1574_v16  ;;  %v1610_v56 = vld [vmem:[%s2002_s1 + $0x1f0] sm:$0xff]  ;;  %v1609_v62 = vld [vmem:[%s2002_s1 + $0x1e8] sm:$0xff]  ;;  %v1590_v1 = vld [vmem:[%s2002_s1 + $0x160] sm:$0xff] }
  0x20   : >> { %306 = vmatpush.bf16.msra.mxu0 %v1555_v17  ;;  %v250_v3 = vrot.slane %v248_v60, 1  ;;  %v1600_v4 = vld [vmem:[%s2002_s1 + $0x1a0] sm:$0xff]  ;;  %v1581_v7 = vld [vmem:[%s2002_s1 + $0x118] sm:$0xff]  ;;  %v411_v11 = vsel %vm406_vm1, %v408_v42, %v410_v6  ;;  %v1901_v14 = vld [vmem:[%s1771_s8 + $0x28] sm:$0xff]  ;;  %v615_v17 = vshll.u32 %v1836_v47, 16 }
  0x21   : >> { %375 = vmatpush.bf16.msra.mxu1 %v1547_v18  ;;  %v1608_v5 = vld [vmem:[%s2002_s1 + $0x1e0] sm:$0xff]  ;;  %v1589_v8 = vld [vmem:[%s2002_s1 + $0x158] sm:$0xff]  ;;  %v1580_v15 = vld [vmem:[%s2002_s1 + $0x110] sm:$0xff] }
  0x22   : >> { %466 = vmatpush.bf16.msra.mxu2 %v1563_v20  ;;  %v251_v9 = vsel %vm231_vm0, %v246_v2, %v250_v3  ;;  %v1891_v10 = vld [vmem:[%s1771_s8 + $0x1c] sm:$0xff]  ;;  %v1588_v16 = vld [vmem:[%s2002_s1 + $0x150] sm:$0xff]  ;;  %v617_v25 = vrot.slane %v615_v17, 1  ;;  %v1322_v43 = vld [vmem:[%s1771_s8 + $0x24] sm:$0x1] }
  0x23   : >> { %574 = vmatpush.bf16.msra.mxu3 %v1573_v21  ;;  %v1599_v12 = vld [vmem:[%s2002_s1 + $0x198] sm:$0xff]  ;;  %v1598_v18 = vld [vmem:[%s2002_s1 + $0x190] sm:$0xff]  ;;  %v929_v21 = vshll.u32 %v1901_v14, 16  ;;  %v1578_v32 = vld [vmem:[%s2002_s1 + $0x100] sm:$0xff]  ;;  %v722_v38 = vrot.slane %v1891_v10, 1  ;;  %v624_v54 = vshrl.u32 %v1891_v10, 16 }
  0x24   : >> { %307 = vmatpush.bf16.msra.mxu0 %v1554_v22  ;;  %v1607_v13 = vld [vmem:[%s2002_s1 + $0x1d8] sm:$0xff]  ;;  %v1919_v20 = vld [vmem:[%s1771_s8 + $0x30] sm:$0xff]  ;;  %v1579_v22 = vld [vmem:[%s2002_s1 + $0x108] sm:$0xff] }
  0x25   : >> { %376 = vmatpush.bf16.msra.mxu1 %v1546_v23  ;;  %v1587_v23 = vld [vmem:[%s2002_s1 + $0x148] sm:$0xff]  ;;  %v931_v30 = vrot.slane %v929_v21, 1  ;;  %v934_v31 = vshll.u32 %v1919_v20, 16 }
  0x26   : >> { %467 = vmatpush.bf16.msra.mxu2 %v1562_v26  ;;  %v620_v26 = vshll.u32 %v1891_v10, 16  ;;  %v1613_v6 = vld [vmem:[%s2002_s1 + $0x208] sm:$0xff] }
  0x27   : >> { %575 = vmatpush.bf16.msra.mxu3 %v1572_v27  ;;  %v1597_v27 = vld [vmem:[%s2002_s1 + $0x188] sm:$0xff]  ;;  %v936_v42 = vrot.slane %v934_v31, 1 }
  0x28   : >> { %308 = vmatpush.bf16.msra.mxu0 %v1553_v28  ;;  %v1605_v28 = vld [vmem:[%s2002_s1 + $0x1c8] sm:$0xff] }
  0x29   : >> { %377 = vmatpush.bf16.msra.mxu1 %v1545_v29  ;;  %v927_v29 = vshrl.u32 %v1901_v14, 16 }
  0x2a   : >> { %468 = vmatpush.bf16.msra.mxu2 %v1561_v33  ;;  %v1586_v33 = vld [vmem:[%s2002_s1 + $0x140] sm:$0xff] }
  0x2b   : >> { %576 = vmatpush.bf16.msra.mxu3 %v1571_v34  ;;  %v1619_v34 = vld [vmem:[%s2002_s1 + $0x238] sm:$0xff]  ;;  %v932_v41 = vor.u32 %v931_v30, %v927_v29 }
  0x2c   : >> { %309 = vmatpush.bf16.msra.mxu0 %v1552_v35 }
  0x2d   : >> { %378 = vmatpush.bf16.msra.mxu1 %v1544_v36  ;;  %v622_v36 = vrot.slane %v620_v26, 1  ;;  %v937_v48 = vsel %vm231_vm0, %v932_v41, %v936_v42 }
  0x2e   : >> { %469 = vmatpush.bf16.msra.mxu2 %v1560_v39  ;;  %v1596_v39 = vld [vmem:[%s2002_s1 + $0x180] sm:$0xff] }
  0x2f   : >> { %577 = vmatpush.bf16.msra.mxu3 %v1570_v40  ;;  %310 = vmatmul.bf16.vlgmr.msra.gmra.mxu0 %v243_v46  ;;  %v1604_v40 = vld [vmem:[%s2002_s1 + $0x1c0] sm:$0xff]  ;;  %v723_v46 = vsel %vm406_vm1, %v721_v37, %v722_v38  ;;  %v626_v59 = vor.u32 %v624_v54, %v622_v36 }
  0x30   : >> { %682 = vmatpush.bf16.msrb.mxu0 %v1585_v44  ;;  %379 = vmatmul.bf16.vlgmr.msra.gmra.mxu1 %v1542_v19  ;;  %v1606_v19 = vld [vmem:[%s2002_s1 + $0x1d0] sm:$0xff]  ;;  %v1431_v44 = vld [vmem:[%s1771_s8 + $0x38] sm:$0x1] }
  0x31   : >> { %776 = vmatpush.bf16.msrb.mxu1 %v1593_v45  ;;  %470 = vmatmul.bf16.vlgmr.msra.gmra.mxu2 %v409_v49  ;;  %v1618_v49 = vld [vmem:[%s2002_s1 + $0x230] sm:$0xff] }
  0x32   : >> { %578 = vmatmul.bf16.vlgmr.msra.gmra.mxu3 %v1836_v47  ;;  %884 = vmatpush.bf16.msrb.mxu2 %v1603_v50  ;;  %v924_v50 = vunpack.c.l.b16 %v1431_v44 }
  0x33   : >> { %996 = vmatpush.bf16.msrb.mxu3 %v1611_v51 }
  0x34   : >> { %683 = vmatpush.bf16.msrb.mxu0 %v1584_v52  ;;  %v1617_v52 = vld [vmem:[%s2002_s1 + $0x228] sm:$0xff] }
  0x35   : >> { %777 = vmatpush.bf16.msrb.mxu1 %v1592_v53  ;;  %v925_v53 = vpack.c.b16 %v924_v50, %v924_v50 }
  0x36   : >> { %885 = vmatpush.bf16.msrb.mxu2 %v1602_v55 }
  0x37   : >> { %997 = vmatpush.bf16.msrb.mxu3 %v1610_v56  ;;  %v1616_v56 = vld [vmem:[%s2002_s1 + $0x220] sm:$0xff] }
  0x38   : >> { %684 = vmatpush.bf16.msrb.mxu0 %v1583_v57  ;;  %v938_v57 = vshrl.u32 %v1919_v20, 16 }
  0x39   : >> { %778 = vmatpush.bf16.msrb.mxu1 %v1591_v58  ;;  %v942_v58 = vshll.u32 %v925_v53, 16 }
  0x3a   : >> { %886 = vmatpush.bf16.msrb.mxu2 %v1601_v61 }
  0x3b   : >> { %998 = vmatpush.bf16.msrb.mxu3 %v1609_v62  ;;  %v940_v62 = vor.u32 %v938_v57, %v936_v42 }
  0x3c   : >> { %685 = vmatpush.bf16.msrb.mxu0 %v1582_v63  ;;  %v944_v63 = vrot.slane %v942_v58, 1 }
  0x3d   : >> { %779 = vmatpush.bf16.msrb.mxu1 %v1590_v1  ;;  %v1615_v1 = vld [vmem:[%s2002_s1 + $0x218] sm:$0xff] }
  0x3e   : >> { %887 = vmatpush.bf16.msrb.mxu2 %v1600_v4  ;;  %v945_v4 = vsel %vm231_vm0, %v940_v62, %v944_v63 }
  0x3f   : >> { %999 = vmatpush.bf16.msrb.mxu3 %v1608_v5  ;;  %315 = vmatmul.bf16.gmra.mxu0 %v251_v9  ;;  %v1614_v5 = vld [vmem:[%s2002_s1 + $0x210] sm:$0xff]  ;;  %v1036_v9 = vrot.slane %v1919_v20, 1 }
  0x40   : >> { %686 = vmatpush.bf16.msrb.mxu0 %v1581_v7  ;;  %384 = vmatmul.bf16.gmra.mxu1 %v1793_v24  ;;  %v613_v24 = vshrl.u32 %v1836_v47, 16  ;;  %v610_v47 = vunpack.c.l.b16 %v1322_v43  ;;  %v1612_v7 = vld [vmem:[%s2002_s1 + $0x200] sm:$0xff] }
  0x41   : >> { %780 = vmatpush.bf16.msrb.mxu1 %v1589_v8  ;;  %475 = vmatmul.bf16.gmra.mxu2 %v411_v11  ;;  %v1035_v8 = vrot.slane %v1901_v14, 1 }
  0x42   : >> { %583 = vmatmul.bf16.gmra.mxu3 %v1891_v10  ;;  %888 = vmatpush.bf16.msrb.mxu2 %v1599_v12  ;;  %v618_v35 = vor.u32 %v617_v25, %v613_v24  ;;  %v611_v51 = vpack.c.b16 %v610_v47, %v610_v47  ;;  %v1038_v10 = vrot.slane %v925_v53, 1 }
  0x43   : >> { %1000 = vmatpush.bf16.msrb.mxu3 %v1607_v13  ;;  %v1037_v11 = vsel %vm406_vm1, %v1035_v8, %v1036_v9 }
  0x44   : >> { %687 = vmatpush.bf16.msrb.mxu0 %v1580_v15  ;;  %v623_v45 = vsel %vm231_vm0, %v618_v35, %v622_v36  ;;  %v628_v55 = vshll.u32 %v611_v51, 16  ;;  %v724_v61 = vrot.slane %v611_v51, 1  ;;  %v1039_v12 = vsel %vm406_vm1, %v1036_v9, %v1038_v10 }
  0x45   : >> { %781 = vmatpush.bf16.msrb.mxu1 %v1588_v16  ;;  %v1114_v10 = vperm.slane %v1704_v0, 0 }
  0x46   : >> { %889 = vmatpush.bf16.msrb.mxu2 %v1598_v18  ;;  %v630_v60 = vrot.slane %v628_v55, 1  ;;  %v725_v3 = vsel %vm406_vm1, %v722_v38, %v724_v61 }
  0x47   : >> { %1001 = vmatpush.bf16.msrb.mxu3 %v1606_v19 }
  0x48   : >> { %688 = vmatpush.bf16.msrb.mxu0 %v1579_v22  ;;  %v631_v2 = vsel %vm231_vm0, %v626_v59, %v630_v60 }
  0x49   : >> { %782 = vmatpush.bf16.msrb.mxu1 %v1587_v23 }
  0x4a   : >> { %890 = vmatpush.bf16.msrb.mxu2 %v1597_v27 }
  0x4b   : >> { %1002 = vmatpush.bf16.msrb.mxu3 %v1605_v28 }
  0x4c   : >> { %689 = vmatpush.bf16.msrb.mxu0 %v1578_v32 }
  0x4d   : >> { %783 = vmatpush.bf16.msrb.mxu1 %v1586_v33 }
  0x4e   : >> { %891 = vmatpush.bf16.msrb.mxu2 %v1596_v39 }
  0x4f   : >> { %1003 = vmatpush.bf16.msrb.mxu3 %v1604_v40  ;;  %690 = vmatmul.bf16.vlgmr.msrb.gmra.mxu0 %v623_v45 }
  0x50   : >> { %1090 = vmatpush.bf16.msra.mxu0 %v1619_v34  ;;  %784 = vmatmul.bf16.vlgmr.msrb.gmra.mxu1 %v723_v46 }
  0x51   : >> { %1632 = vmatpush.bf16.msra.mxu1 %v1619_v34  ;;  %892 = vmatmul.bf16.vlgmr.msrb.gmra.mxu2 %v1901_v14 }
  0x52   : >> { %1004 = vmatmul.bf16.vlgmr.msrb.gmra.mxu3 %v937_v48 }
  0x54   : >> { %1091 = vmatpush.bf16.msra.mxu0 %v1618_v49 }
  0x55   : >> { %1633 = vmatpush.bf16.msra.mxu1 %v1618_v49 }
  0x58   : >> { %1092 = vmatpush.bf16.msra.mxu0 %v1617_v52 }
  0x59   : >> { %1634 = vmatpush.bf16.msra.mxu1 %v1617_v52 }
  0x5c   : >> { %1093 = vmatpush.bf16.msra.mxu0 %v1616_v56 }
  0x5d   : >> { %1635 = vmatpush.bf16.msra.mxu1 %v1616_v56 }
  0x5f   : >> { %695 = vmatmul.bf16.gmra.mxu0 %v631_v2 }
  0x60   : >> { %1094 = vmatpush.bf16.msra.mxu0 %v1615_v1  ;;  %789 = vmatmul.bf16.gmra.mxu1 %v725_v3 }
  0x61   : >> { %1636 = vmatpush.bf16.msra.mxu1 %v1615_v1  ;;  %897 = vmatmul.bf16.gmra.mxu2 %v1919_v20 }
  0x62   : >> { %1009 = vmatmul.bf16.gmra.mxu3 %v945_v4 }
  0x64   : >> { %1095 = vmatpush.bf16.msra.mxu0 %v1614_v5 }
  0x65   : >> { %1637 = vmatpush.bf16.msra.mxu1 %v1614_v5 }
  0x68   : >> { %1096 = vmatpush.bf16.msra.mxu0 %v1613_v6 }
  0x69   : >> { %1638 = vmatpush.bf16.msra.mxu1 %v1613_v6 }
  0x6c   : >> { %1097 = vmatpush.bf16.msra.mxu0 %v1612_v7 }
  0x6d   : >> { %1639 = vmatpush.bf16.msra.mxu1 %v1612_v7 }
  0x6f   : >> { %1098 = vmatmul.bf16.vlgmr.msra.gmra.mxu0 %v1037_v11 }
  0x70   : >> { %1103 = vmatmul.bf16.vlgmr.msra.gmra.mxu1 %v1039_v12 }
  0xac   : >> { %v311_v13 = vpop.f32.mrf.mxu0 }
  0xad   : >> { %v380_v15 = vpop.f32.mrf.mxu1 }
  0xae   : >> { %v381_v38 = vadd.f32 %v380_v15, %v311_v13 }
  0xb4   : >> { %v471_v16 = vpop.f32.mrf.mxu2  ;;  %v313_v18 = vpop.f32.mrf.mxu0 }
  0xb5   : >> { %v579_v17 = vpop.f32.mrf.mxu3  ;;  %v382_v19 = vpop.f32.mrf.mxu1  ;;  %v481_v41 = vadd.f32 %v471_v16, %v381_v38 }
  0xb6   : >> { %v383_v43 = vadd.f32 %v382_v19, %v313_v18 }
  0xb7   : >> { %v589_v45 = vadd.f32 %v579_v17, %v481_v41 }
  0xbc   : >> { %v473_v21 = vpop.f32.mrf.mxu2  ;;  %v316_v14 = vpop.f32.mrf.mxu0 }
  0xbd   : >> { %v581_v22 = vpop.f32.mrf.mxu3  ;;  %v385_v23 = vpop.f32.mrf.mxu1  ;;  %v482_v46 = vadd.f32 %v473_v21, %v383_v43 }
  0xbe   : >> { %v386_v39 = vadd.f32 %v385_v23, %v316_v14 }
  0xbf   : >> { %v590_v54 = vadd.f32 %v581_v22, %v482_v46 }
  0xc4   : >> { %v476_v20 = vpop.f32.mrf.mxu2  ;;  %v318_v25 = vpop.f32.mrf.mxu0 }
  0xc5   : >> { %v584_v24 = vpop.f32.mrf.mxu3  ;;  %v387_v26 = vpop.f32.mrf.mxu1  ;;  %v483_v42 = vadd.f32 %v476_v20, %v386_v39 }
  0xc6   : >> { %v388_v44 = vadd.f32 %v387_v26, %v318_v25 }
  0xc7   : >> { %v591_v47 = vadd.f32 %v584_v24, %v483_v42 }
  0xcc   : >> { %v478_v27 = vpop.f32.mrf.mxu2  ;;  %v691_v29 = vpop.f32.mrf.mxu0 }
  0xcd   : >> { %v586_v28 = vpop.f32.mrf.mxu3  ;;  %v785_v30 = vpop.f32.mrf.mxu1  ;;  %v484_v48 = vadd.f32 %v478_v27, %v388_v44  ;;  %v701_v52 = vadd.f32 %v691_v29, %v589_v45 }
  0xcf   : >> { %v592_v55 = vadd.f32 %v586_v28, %v484_v48  ;;  %v795_v57 = vadd.f32 %v785_v30, %v701_v52 }
  0xd4   : >> { %v893_v31 = vpop.f32.mrf.mxu2  ;;  %v693_v33 = vpop.f32.mrf.mxu0 }
  0xd5   : >> { %v1005_v32 = vpop.f32.mrf.mxu3  ;;  %v787_v34 = vpop.f32.mrf.mxu1  ;;  %v702_v58 = vadd.f32 %v693_v33, %v590_v54  ;;  %v903_v61 = vadd.f32 %v893_v31, %v795_v57 }
  0xd7   : >> { %v796_v3 = vadd.f32 %v787_v34, %v702_v58  ;;  %v1015_v5 = vadd.f32 %v1005_v32, %v903_v61 }
  0xdc   : >> { %v895_v35 = vpop.f32.mrf.mxu2  ;;  %v696_v36 = vpop.f32.mrf.mxu0 }
  0xdd   : >> { %v790_v37 = vpop.f32.mrf.mxu1  ;;  %v1007_v40 = vpop.f32.mrf.mxu3  ;;  %v703_v53 = vadd.f32 %v696_v36, %v591_v47  ;;  %v904_v6 = vadd.f32 %v895_v35, %v796_v3 }
  0xdf   : >> { %v797_v59 = vadd.f32 %v790_v37, %v703_v53  ;;  %v1016_v13 = vadd.f32 %v1007_v40, %v904_v6 }
  0xe4   : >> { %v898_v49 = vpop.f32.mrf.mxu2  ;;  %v698_v50 = vpop.f32.mrf.mxu0 }
  0xe5   : >> { %v792_v51 = vpop.f32.mrf.mxu1  ;;  %v1010_v56 = vpop.f32.mrf.mxu3  ;;  %v704_v60 = vadd.f32 %v698_v50, %v592_v55  ;;  %v905_v62 = vadd.f32 %v898_v49, %v797_v59 }
  0xe7   : >> { %v798_v4 = vadd.f32 %v792_v51, %v704_v60  ;;  %v1017_v7 = vadd.f32 %v1010_v56, %v905_v62 }
  0xec   : >> { %v900_v63 = vpop.f32.mrf.mxu2  ;;  %v1099_v1 = vpop.f32.mrf.mxu0 }
  0xed   : >> { %v1104_v2 = vpop.f32.mrf.mxu1  ;;  %v906_v8 = vadd.f32 %v900_v63, %v798_v4  ;;  %v1109_v9 = vadd.f32 %v1099_v1, %v1015_v5  ;;  %v1012_v12 = vpop.f32.mrf.mxu3 }
  0xee   : >> { %v1111_v11 = vadd.f32 %v1104_v2, %v1017_v7 }
  0xef   : >> { %v1018_v15 = vadd.f32 %v1012_v12, %v906_v8  ;;  %v1116_v18 = vadd.f32 %v1114_v10, %v1109_v9 }
  0xf0   : >> { %v1118_v19 = vadd.f32 %v1114_v10, %v1111_v11 }
  0xf1   : >> { %v1120_v20 = vmax.f32 %v1116_v18, 0.0 }
  0xf2   : >> { %v1122_v24 = vmax.f32 %v1118_v19, 0.0 }
  0xf4   : >> { %v1101_v16 = vpop.f32.mrf.mxu0 }
  0xf5   : >> { %v1106_v17 = vpop.f32.mrf.mxu1  ;;  %v1110_v21 = vadd.f32 %v1101_v16, %v1016_v13 }
  0xf6   : >> { %v1112_v22 = vadd.f32 %v1106_v17, %v1018_v15 }
  0xf7   : >> { %v1117_v14 = vadd.f32 %v1114_v10, %v1110_v21 }
  0xf8   : >> { %v1119_v23 = vadd.f32 %v1114_v10, %v1112_v22 }
  0xf9   : >> { %v1121_v25 = vmax.f32 %v1117_v14, 0.0 }
  0xfa   : >> { %v1123_v26 = vmax.f32 %v1119_v23, 0.0  ;;  %176 = sbr.rel (!%p174_p4) target bundleno = 15 (0xf), region = 73 }
  0xfb   : >> { %v1624_v27 = vpack.c.bf16 %v1121_v25, %v1120_v20 }
  0xfc   : >> { %v1629_v28 = vpack.c.bf16 %v1123_v26, %v1122_v24 }
  0xfd   : >> { %1625 = vst [vmem:[%s1130_s11] sm:$0xff] %v1624_v27  }
  0xfe   : >> { %1631 = vst [vmem:[%s1130_s11 + $0x8] sm:$0xff] %v1629_v28  }
  0xff PF: > { %s13_s12 = sadd.s32 1, %s1667_s12  }
 0x100   : > { %p10_p5 = scmp.ge.s32.totalorder %s13_s12, 4  }
 0x102   :  { %12 = sbr.rel (!%p10_p5) target bundleno = 1 (0x1), region = 84 }

// kernel: deeplab_forward.15
= control target key start
LH: loop header
LB: loop body
LE: loop exit
PB: predicated region body
PF: predicated region fallthrough
CT: control target
= control target key end

     0   :  { %s1702_s12 = smov 0   ;;  %s2010_s0 = inlined_call_operand.vmem [shape: bf16[2,34,34,128], index: 0, kind: input, shape index: {}]   ;;  %s2011_s1 = inlined_call_operand.vmem [shape: bf16[1152,128], index: 1, kind: input, shape index: {}]   ;;  %s2012_s2 = inlined_call_operand.vmem [shape: f32[1,128], index: 2, kind: input, shape index: {}]   ;;  %s2013_s3 = inlined_call_operand.vmem [shape: bf16[2,16,32,128], index: 3, kind: output, shape index: {}]  }
   0x1 LB: > { %s1208_s13 = sadd.s32 4294967295, %s1676_s12   ;;  %p1212_p0 = scmp.ge.s32.totalorder %s1676_s12, 1  ;;  %s1676_s12 = sphi %s1702_s12, %s13_s12  }
   0x2   : > { %p137_p1 = scmp.lt.s32.totalorder %s1676_s12, 3 }
   0x4   : > { %p138_p2 = pnand %p1212_p0, %p137_p1 }
   0x5   : > { %p161_p3 = scmp.lt.s32.totalorder (!%p138_p2), %s1208_s13, 1  ;;  %s1725_s24 = smov (!%p138_p2), 0  }
   0x6   : > { %141 = sbr.rel (%p138_p2) target bundleno = 255 (0xff), region = 32 }
   0xb   : > { %v1713_v0 = vld [vmem:[%s2012_s2] sm:$0x1]  ;;  %s2015_s13 = smov (!%p161_p3, %s1208_s13), 1 }
   0xc   : > { %s1649_s16 = smul.u32 680, %s2015_s13  ;;  %s1549_s17 = sshll.u32 %s2015_s13, 8 }
   0xd   : > { %s1718_s20 = scalar_lea.vmem %s2013_s3, %s1549_s17 }
   0xe   : > { %s1723_s23 = scalar_lea.vmem %s2010_s0, %s1649_s16 }
   0xf LB: >> { %v1568_v1 = vld [vmem:[%s2011_s1 + $0x78] sm:$0xff]  ;;  %v1567_v5 = vld [vmem:[%s2011_s1 + $0x70] sm:$0xff]  ;;  %v1566_v9 = vld [vmem:[%s2011_s1 + $0x68] sm:$0xff]  ;;  %s1550_s26 = smul.u32 40, %s1680_s24  ;;  %vm232_vm0 = vsmask.f32 7424  ;;  %s1680_s24 = sphi %s1725_s24, %s177_s24  }
  0x10   : >> { %v1560_v2 = vld [vmem:[%s2011_s1 + $0x38] sm:$0xff]  ;;  %303 = vmatpush.bf16.msra.mxu0 %v1568_v1  ;;  %v1559_v6 = vld [vmem:[%s2011_s1 + $0x30] sm:$0xff]  ;;  %v1558_v10 = vld [vmem:[%s2011_s1 + $0x28] sm:$0xff]  ;;  %vm407_vm1 = vcmask 1046528   ;;  %s1629_s10 = sshll.u32 %s1680_s24, 4  ;;  %s177_s24 = sadd.s32 1, %s1680_s24  }
  0x11   : >> { %v1576_v3 = vld [vmem:[%s2011_s1 + $0xb8] sm:$0xff]  ;;  %372 = vmatpush.bf16.msra.mxu1 %v1560_v2  ;;  %v1575_v7 = vld [vmem:[%s2011_s1 + $0xb0] sm:$0xff]  ;;  %v1574_v11 = vld [vmem:[%s2011_s1 + $0xa8] sm:$0xff]  ;;  %s1780_s8 = scalar_lea.vmem %s1723_s23, %s1550_s26  ;;  %s1131_s11 = scalar_lea.vmem %s1718_s20, %s1629_s10 }
  0x12   : >> { %v1586_v4 = vld [vmem:[%s2011_s1 + $0xf8] sm:$0xff]  ;;  %463 = vmatpush.bf16.msra.mxu2 %v1576_v3  ;;  %v1585_v8 = vld [vmem:[%s2011_s1 + $0xf0] sm:$0xff]  ;;  %v1584_v12 = vld [vmem:[%s2011_s1 + $0xe8] sm:$0xff]  ;;  %p174_p4 = scmp.ge.s32.totalorder %s177_s24, 16  }
  0x13   : >> { %571 = vmatpush.bf16.msra.mxu3 %v1586_v4  ;;  %v1565_v13 = vld [vmem:[%s2011_s1 + $0x60] sm:$0xff]  ;;  %v1564_v17 = vld [vmem:[%s2011_s1 + $0x58] sm:$0xff]  ;;  %v1563_v22 = vld [vmem:[%s2011_s1 + $0x50] sm:$0xff] }
  0x14   : >> { %304 = vmatpush.bf16.msra.mxu0 %v1567_v5  ;;  %v1557_v14 = vld [vmem:[%s2011_s1 + $0x20] sm:$0xff]  ;;  %v1556_v18 = vld [vmem:[%s2011_s1 + $0x18] sm:$0xff]  ;;  %v1555_v23 = vld [vmem:[%s2011_s1 + $0x10] sm:$0xff] }
  0x15   : >> { %373 = vmatpush.bf16.msra.mxu1 %v1559_v6  ;;  %v1573_v15 = vld [vmem:[%s2011_s1 + $0xa0] sm:$0xff]  ;;  %v1572_v20 = vld [vmem:[%s2011_s1 + $0x98] sm:$0xff]  ;;  %v1802_v24 = vld [vmem:[%s1780_s8 + $0x8] sm:$0xff] }
  0x16   : >> { %464 = vmatpush.bf16.msra.mxu2 %v1575_v7  ;;  %v1583_v16 = vld [vmem:[%s2011_s1 + $0xe0] sm:$0xff]  ;;  %v1582_v21 = vld [vmem:[%s2011_s1 + $0xd8] sm:$0xff]  ;;  %v1571_v26 = vld [vmem:[%s2011_s1 + $0x90] sm:$0xff]  ;;  %v241_v32 = vshll.u32 %v1802_v24, 16  ;;  %v409_v42 = vrot.slane %v1802_v24, 1  ;;  %v245_v59 = vshrl.u32 %v1802_v24, 16 }
  0x17   : >> { %572 = vmatpush.bf16.msra.mxu3 %v1585_v8  ;;  %v1551_v19 = vld [vmem:[%s1780_s8] sm:$0xff]  ;;  %v1581_v27 = vld [vmem:[%s2011_s1 + $0xd0] sm:$0xff]  ;;  %v1562_v28 = vld [vmem:[%s2011_s1 + $0x48] sm:$0xff] }
  0x18   : >> { %305 = vmatpush.bf16.msra.mxu0 %v1566_v9  ;;  %v236_v25 = vshll.u32 %v1551_v19, 16  ;;  %v1554_v29 = vld [vmem:[%s2011_s1 + $0x8] sm:$0xff]  ;;  %v234_v30 = vshrl.u32 %v1551_v19, 16  ;;  %v1561_v35 = vld [vmem:[%s2011_s1 + $0x40] sm:$0xff]  ;;  %v243_v38 = vrot.slane %v241_v32, 1  ;;  %v408_v41 = vrot.slane %v1551_v19, 1 }
  0x19   : >> { %374 = vmatpush.bf16.msra.mxu1 %v1558_v10  ;;  %v1570_v33 = vld [vmem:[%s2011_s1 + $0x88] sm:$0xff]  ;;  %v1553_v36 = vld [vmem:[%s2011_s1] sm:$0xff]  ;;  %v186_v43 = vld [vmem:[%s1780_s8 + $0x10] sm:$0x1] }
  0x1a   : >> { %465 = vmatpush.bf16.msra.mxu2 %v1574_v11  ;;  %v238_v31 = vrot.slane %v236_v25, 1  ;;  %v1580_v34 = vld [vmem:[%s2011_s1 + $0xc8] sm:$0xff]  ;;  %v1569_v39 = vld [vmem:[%s2011_s1 + $0x80] sm:$0xff]  ;;  %v1594_v44 = vld [vmem:[%s2011_s1 + $0x138] sm:$0xff]  ;;  %v228_v48 = vunpack.c.l.b16 %v186_v43  ;;  %v410_v49 = vsel %vm407_vm1, %v408_v41, %v409_v42  ;;  %v247_v2 = vor.u32 %v245_v59, %v243_v38 }
  0x1b   : >> { %573 = vmatpush.bf16.msra.mxu3 %v1584_v12  ;;  %v1579_v40 = vld [vmem:[%s2011_s1 + $0xc0] sm:$0xff]  ;;  %v1602_v45 = vld [vmem:[%s2011_s1 + $0x178] sm:$0xff]  ;;  %v1593_v52 = vld [vmem:[%s2011_s1 + $0x130] sm:$0xff] }
  0x1c   : >> { %306 = vmatpush.bf16.msra.mxu0 %v1565_v13  ;;  %v239_v37 = vor.u32 %v238_v31, %v234_v30  ;;  %v1845_v47 = vld [vmem:[%s1780_s8 + $0x14] sm:$0xff]  ;;  %v231_v54 = vpack.c.b16 %v228_v48, %v228_v48  ;;  %v1592_v57 = vld [vmem:[%s2011_s1 + $0x128] sm:$0xff]  ;;  %v1591_v63 = vld [vmem:[%s2011_s1 + $0x120] sm:$0xff] }
  0x1d   : >> { %375 = vmatpush.bf16.msra.mxu1 %v1557_v14  ;;  %v1612_v50 = vld [vmem:[%s2011_s1 + $0x1b8] sm:$0xff]  ;;  %v1601_v53 = vld [vmem:[%s2011_s1 + $0x170] sm:$0xff]  ;;  %v1600_v58 = vld [vmem:[%s2011_s1 + $0x168] sm:$0xff] }
  0x1e   : >> { %466 = vmatpush.bf16.msra.mxu2 %v1573_v15  ;;  %v244_v46 = vsel %vm232_vm0, %v239_v37, %v243_v38  ;;  %v1620_v51 = vld [vmem:[%s2011_s1 + $0x1f8] sm:$0xff]  ;;  %v1611_v55 = vld [vmem:[%s2011_s1 + $0x1b0] sm:$0xff]  ;;  %v249_v60 = vshll.u32 %v231_v54, 16  ;;  %v1610_v61 = vld [vmem:[%s2011_s1 + $0x1a8] sm:$0xff]  ;;  %v411_v6 = vrot.slane %v231_v54, 1  ;;  %v722_v37 = vrot.slane %v1845_v47, 1 }
  0x1f   : >> { %574 = vmatpush.bf16.msra.mxu3 %v1583_v16  ;;  %v1619_v56 = vld [vmem:[%s2011_s1 + $0x1f0] sm:$0xff]  ;;  %v1618_v62 = vld [vmem:[%s2011_s1 + $0x1e8] sm:$0xff]  ;;  %v1599_v1 = vld [vmem:[%s2011_s1 + $0x160] sm:$0xff] }
  0x20   : >> { %307 = vmatpush.bf16.msra.mxu0 %v1564_v17  ;;  %v251_v3 = vrot.slane %v249_v60, 1  ;;  %v1609_v4 = vld [vmem:[%s2011_s1 + $0x1a0] sm:$0xff]  ;;  %v1590_v7 = vld [vmem:[%s2011_s1 + $0x118] sm:$0xff]  ;;  %v412_v11 = vsel %vm407_vm1, %v409_v42, %v411_v6  ;;  %v1910_v14 = vld [vmem:[%s1780_s8 + $0x28] sm:$0xff]  ;;  %v616_v17 = vshll.u32 %v1845_v47, 16 }
  0x21   : >> { %376 = vmatpush.bf16.msra.mxu1 %v1556_v18  ;;  %v1617_v5 = vld [vmem:[%s2011_s1 + $0x1e0] sm:$0xff]  ;;  %v1598_v8 = vld [vmem:[%s2011_s1 + $0x158] sm:$0xff]  ;;  %v1589_v15 = vld [vmem:[%s2011_s1 + $0x110] sm:$0xff] }
  0x22   : >> { %467 = vmatpush.bf16.msra.mxu2 %v1572_v20  ;;  %v252_v9 = vsel %vm232_vm0, %v247_v2, %v251_v3  ;;  %v1900_v10 = vld [vmem:[%s1780_s8 + $0x1c] sm:$0xff]  ;;  %v1597_v16 = vld [vmem:[%s2011_s1 + $0x150] sm:$0xff]  ;;  %v618_v25 = vrot.slane %v616_v17, 1  ;;  %v1329_v43 = vld [vmem:[%s1780_s8 + $0x24] sm:$0x1] }
  0x23   : >> { %575 = vmatpush.bf16.msra.mxu3 %v1582_v21  ;;  %v1608_v12 = vld [vmem:[%s2011_s1 + $0x198] sm:$0xff]  ;;  %v1607_v18 = vld [vmem:[%s2011_s1 + $0x190] sm:$0xff]  ;;  %v930_v21 = vshll.u32 %v1910_v14, 16  ;;  %v1587_v32 = vld [vmem:[%s2011_s1 + $0x100] sm:$0xff]  ;;  %v723_v38 = vrot.slane %v1900_v10, 1  ;;  %v625_v54 = vshrl.u32 %v1900_v10, 16 }
  0x24   : >> { %308 = vmatpush.bf16.msra.mxu0 %v1563_v22  ;;  %v1616_v13 = vld [vmem:[%s2011_s1 + $0x1d8] sm:$0xff]  ;;  %v1928_v20 = vld [vmem:[%s1780_s8 + $0x30] sm:$0xff]  ;;  %v1588_v22 = vld [vmem:[%s2011_s1 + $0x108] sm:$0xff] }
  0x25   : >> { %377 = vmatpush.bf16.msra.mxu1 %v1555_v23  ;;  %v1596_v23 = vld [vmem:[%s2011_s1 + $0x148] sm:$0xff]  ;;  %v932_v30 = vrot.slane %v930_v21, 1  ;;  %v935_v31 = vshll.u32 %v1928_v20, 16 }
  0x26   : >> { %468 = vmatpush.bf16.msra.mxu2 %v1571_v26  ;;  %v621_v26 = vshll.u32 %v1900_v10, 16  ;;  %v1622_v6 = vld [vmem:[%s2011_s1 + $0x208] sm:$0xff] }
  0x27   : >> { %576 = vmatpush.bf16.msra.mxu3 %v1581_v27  ;;  %v1606_v27 = vld [vmem:[%s2011_s1 + $0x188] sm:$0xff]  ;;  %v937_v42 = vrot.slane %v935_v31, 1 }
  0x28   : >> { %309 = vmatpush.bf16.msra.mxu0 %v1562_v28  ;;  %v1614_v28 = vld [vmem:[%s2011_s1 + $0x1c8] sm:$0xff] }
  0x29   : >> { %378 = vmatpush.bf16.msra.mxu1 %v1554_v29  ;;  %v928_v29 = vshrl.u32 %v1910_v14, 16 }
  0x2a   : >> { %469 = vmatpush.bf16.msra.mxu2 %v1570_v33  ;;  %v1595_v33 = vld [vmem:[%s2011_s1 + $0x140] sm:$0xff] }
  0x2b   : >> { %577 = vmatpush.bf16.msra.mxu3 %v1580_v34  ;;  %v1628_v34 = vld [vmem:[%s2011_s1 + $0x238] sm:$0xff]  ;;  %v933_v41 = vor.u32 %v932_v30, %v928_v29 }
  0x2c   : >> { %310 = vmatpush.bf16.msra.mxu0 %v1561_v35 }
  0x2d   : >> { %379 = vmatpush.bf16.msra.mxu1 %v1553_v36  ;;  %v623_v36 = vrot.slane %v621_v26, 1  ;;  %v938_v48 = vsel %vm232_vm0, %v933_v41, %v937_v42 }
  0x2e   : >> { %470 = vmatpush.bf16.msra.mxu2 %v1569_v39  ;;  %v1605_v39 = vld [vmem:[%s2011_s1 + $0x180] sm:$0xff] }
  0x2f   : >> { %578 = vmatpush.bf16.msra.mxu3 %v1579_v40  ;;  %311 = vmatmul.bf16.vlgmr.msra.gmra.mxu0 %v244_v46  ;;  %v1613_v40 = vld [vmem:[%s2011_s1 + $0x1c0] sm:$0xff]  ;;  %v724_v46 = vsel %vm407_vm1, %v722_v37, %v723_v38  ;;  %v627_v59 = vor.u32 %v625_v54, %v623_v36 }
  0x30   : >> { %683 = vmatpush.bf16.msrb.mxu0 %v1594_v44  ;;  %380 = vmatmul.bf16.vlgmr.msra.gmra.mxu1 %v1551_v19  ;;  %v1615_v19 = vld [vmem:[%s2011_s1 + $0x1d0] sm:$0xff]  ;;  %v1440_v44 = vld [vmem:[%s1780_s8 + $0x38] sm:$0x1] }
  0x31   : >> { %777 = vmatpush.bf16.msrb.mxu1 %v1602_v45  ;;  %471 = vmatmul.bf16.vlgmr.msra.gmra.mxu2 %v410_v49  ;;  %v1627_v49 = vld [vmem:[%s2011_s1 + $0x230] sm:$0xff] }
  0x32   : >> { %579 = vmatmul.bf16.vlgmr.msra.gmra.mxu3 %v1845_v47  ;;  %885 = vmatpush.bf16.msrb.mxu2 %v1612_v50  ;;  %v925_v50 = vunpack.c.l.b16 %v1440_v44 }
  0x33   : >> { %997 = vmatpush.bf16.msrb.mxu3 %v1620_v51 }
  0x34   : >> { %684 = vmatpush.bf16.msrb.mxu0 %v1593_v52  ;;  %v1626_v52 = vld [vmem:[%s2011_s1 + $0x228] sm:$0xff] }
  0x35   : >> { %778 = vmatpush.bf16.msrb.mxu1 %v1601_v53  ;;  %v926_v53 = vpack.c.b16 %v925_v50, %v925_v50 }
  0x36   : >> { %886 = vmatpush.bf16.msrb.mxu2 %v1611_v55 }
  0x37   : >> { %998 = vmatpush.bf16.msrb.mxu3 %v1619_v56  ;;  %v1625_v56 = vld [vmem:[%s2011_s1 + $0x220] sm:$0xff] }
  0x38   : >> { %685 = vmatpush.bf16.msrb.mxu0 %v1592_v57  ;;  %v939_v57 = vshrl.u32 %v1928_v20, 16 }
  0x39   : >> { %779 = vmatpush.bf16.msrb.mxu1 %v1600_v58  ;;  %v943_v58 = vshll.u32 %v926_v53, 16 }
  0x3a   : >> { %887 = vmatpush.bf16.msrb.mxu2 %v1610_v61 }
  0x3b   : >> { %999 = vmatpush.bf16.msrb.mxu3 %v1618_v62  ;;  %v941_v62 = vor.u32 %v939_v57, %v937_v42 }
  0x3c   : >> { %686 = vmatpush.bf16.msrb.mxu0 %v1591_v63  ;;  %v945_v63 = vrot.slane %v943_v58, 1 }
  0x3d   : >> { %780 = vmatpush.bf16.msrb.mxu1 %v1599_v1  ;;  %v1624_v1 = vld [vmem:[%s2011_s1 + $0x218] sm:$0xff] }
  0x3e   : >> { %888 = vmatpush.bf16.msrb.mxu2 %v1609_v4  ;;  %v946_v4 = vsel %vm232_vm0, %v941_v62, %v945_v63 }
  0x3f   : >> { %1000 = vmatpush.bf16.msrb.mxu3 %v1617_v5  ;;  %316 = vmatmul.bf16.gmra.mxu0 %v252_v9  ;;  %v1623_v5 = vld [vmem:[%s2011_s1 + $0x210] sm:$0xff]  ;;  %v1037_v9 = vrot.slane %v1928_v20, 1 }
  0x40   : >> { %687 = vmatpush.bf16.msrb.mxu0 %v1590_v7  ;;  %385 = vmatmul.bf16.gmra.mxu1 %v1802_v24  ;;  %v614_v24 = vshrl.u32 %v1845_v47, 16  ;;  %v611_v47 = vunpack.c.l.b16 %v1329_v43  ;;  %v1621_v7 = vld [vmem:[%s2011_s1 + $0x200] sm:$0xff] }
  0x41   : >> { %781 = vmatpush.bf16.msrb.mxu1 %v1598_v8  ;;  %476 = vmatmul.bf16.gmra.mxu2 %v412_v11  ;;  %v1036_v8 = vrot.slane %v1910_v14, 1 }
  0x42   : >> { %584 = vmatmul.bf16.gmra.mxu3 %v1900_v10  ;;  %889 = vmatpush.bf16.msrb.mxu2 %v1608_v12  ;;  %v619_v35 = vor.u32 %v618_v25, %v614_v24  ;;  %v612_v51 = vpack.c.b16 %v611_v47, %v611_v47  ;;  %v1039_v10 = vrot.slane %v926_v53, 1 }
  0x43   : >> { %1001 = vmatpush.bf16.msrb.mxu3 %v1616_v13  ;;  %v1038_v11 = vsel %vm407_vm1, %v1036_v8, %v1037_v9 }
  0x44   : >> { %688 = vmatpush.bf16.msrb.mxu0 %v1589_v15  ;;  %v624_v45 = vsel %vm232_vm0, %v619_v35, %v623_v36  ;;  %v629_v55 = vshll.u32 %v612_v51, 16  ;;  %v725_v61 = vrot.slane %v612_v51, 1  ;;  %v1040_v12 = vsel %vm407_vm1, %v1037_v9, %v1039_v10 }
  0x45   : >> { %782 = vmatpush.bf16.msrb.mxu1 %v1597_v16  ;;  %v1115_v10 = vperm.slane %v1713_v0, 0 }
  0x46   : >> { %890 = vmatpush.bf16.msrb.mxu2 %v1607_v18  ;;  %v631_v60 = vrot.slane %v629_v55, 1  ;;  %v726_v3 = vsel %vm407_vm1, %v723_v38, %v725_v61 }
  0x47   : >> { %1002 = vmatpush.bf16.msrb.mxu3 %v1615_v19 }
  0x48   : >> { %689 = vmatpush.bf16.msrb.mxu0 %v1588_v22  ;;  %v632_v2 = vsel %vm232_vm0, %v627_v59, %v631_v60 }
  0x49   : >> { %783 = vmatpush.bf16.msrb.mxu1 %v1596_v23 }
  0x4a   : >> { %891 = vmatpush.bf16.msrb.mxu2 %v1606_v27 }
  0x4b   : >> { %1003 = vmatpush.bf16.msrb.mxu3 %v1614_v28 }
  0x4c   : >> { %690 = vmatpush.bf16.msrb.mxu0 %v1587_v32 }
  0x4d   : >> { %784 = vmatpush.bf16.msrb.mxu1 %v1595_v33 }
  0x4e   : >> { %892 = vmatpush.bf16.msrb.mxu2 %v1605_v39 }
  0x4f   : >> { %1004 = vmatpush.bf16.msrb.mxu3 %v1613_v40  ;;  %691 = vmatmul.bf16.vlgmr.msrb.gmra.mxu0 %v624_v45 }
  0x50   : >> { %1091 = vmatpush.bf16.msra.mxu0 %v1628_v34  ;;  %785 = vmatmul.bf16.vlgmr.msrb.gmra.mxu1 %v724_v46 }
  0x51   : >> { %1641 = vmatpush.bf16.msra.mxu1 %v1628_v34  ;;  %893 = vmatmul.bf16.vlgmr.msrb.gmra.mxu2 %v1910_v14 }
  0x52   : >> { %1005 = vmatmul.bf16.vlgmr.msrb.gmra.mxu3 %v938_v48 }
  0x54   : >> { %1092 = vmatpush.bf16.msra.mxu0 %v1627_v49 }
  0x55   : >> { %1642 = vmatpush.bf16.msra.mxu1 %v1627_v49 }
  0x58   : >> { %1093 = vmatpush.bf16.msra.mxu0 %v1626_v52 }
  0x59   : >> { %1643 = vmatpush.bf16.msra.mxu1 %v1626_v52 }
  0x5c   : >> { %1094 = vmatpush.bf16.msra.mxu0 %v1625_v56 }
  0x5d   : >> { %1644 = vmatpush.bf16.msra.mxu1 %v1625_v56 }
  0x5f   : >> { %696 = vmatmul.bf16.gmra.mxu0 %v632_v2 }
  0x60   : >> { %1095 = vmatpush.bf16.msra.mxu0 %v1624_v1  ;;  %790 = vmatmul.bf16.gmra.mxu1 %v726_v3 }
  0x61   : >> { %1645 = vmatpush.bf16.msra.mxu1 %v1624_v1  ;;  %898 = vmatmul.bf16.gmra.mxu2 %v1928_v20 }
  0x62   : >> { %1010 = vmatmul.bf16.gmra.mxu3 %v946_v4 }
  0x64   : >> { %1096 = vmatpush.bf16.msra.mxu0 %v1623_v5 }
  0x65   : >> { %1646 = vmatpush.bf16.msra.mxu1 %v1623_v5 }
  0x68   : >> { %1097 = vmatpush.bf16.msra.mxu0 %v1622_v6 }
  0x69   : >> { %1647 = vmatpush.bf16.msra.mxu1 %v1622_v6 }
  0x6c   : >> { %1098 = vmatpush.bf16.msra.mxu0 %v1621_v7 }
  0x6d   : >> { %1648 = vmatpush.bf16.msra.mxu1 %v1621_v7 }
  0x6f   : >> { %1099 = vmatmul.bf16.vlgmr.msra.gmra.mxu0 %v1038_v11 }
  0x70   : >> { %1104 = vmatmul.bf16.vlgmr.msra.gmra.mxu1 %v1040_v12 }
  0xac   : >> { %v312_v13 = vpop.f32.mrf.mxu0 }
  0xad   : >> { %v381_v15 = vpop.f32.mrf.mxu1 }
  0xae   : >> { %v382_v38 = vadd.f32 %v381_v15, %v312_v13 }
  0xb4   : >> { %v472_v16 = vpop.f32.mrf.mxu2  ;;  %v314_v18 = vpop.f32.mrf.mxu0 }
  0xb5   : >> { %v580_v17 = vpop.f32.mrf.mxu3  ;;  %v383_v19 = vpop.f32.mrf.mxu1  ;;  %v482_v41 = vadd.f32 %v472_v16, %v382_v38 }
  0xb6   : >> { %v384_v43 = vadd.f32 %v383_v19, %v314_v18 }
  0xb7   : >> { %v590_v45 = vadd.f32 %v580_v17, %v482_v41 }
  0xbc   : >> { %v474_v21 = vpop.f32.mrf.mxu2  ;;  %v317_v14 = vpop.f32.mrf.mxu0 }
  0xbd   : >> { %v582_v22 = vpop.f32.mrf.mxu3  ;;  %v386_v23 = vpop.f32.mrf.mxu1  ;;  %v483_v46 = vadd.f32 %v474_v21, %v384_v43 }
  0xbe   : >> { %v387_v39 = vadd.f32 %v386_v23, %v317_v14 }
  0xbf   : >> { %v591_v54 = vadd.f32 %v582_v22, %v483_v46 }
  0xc4   : >> { %v477_v20 = vpop.f32.mrf.mxu2  ;;  %v319_v25 = vpop.f32.mrf.mxu0 }
  0xc5   : >> { %v585_v24 = vpop.f32.mrf.mxu3  ;;  %v388_v26 = vpop.f32.mrf.mxu1  ;;  %v484_v42 = vadd.f32 %v477_v20, %v387_v39 }
  0xc6   : >> { %v389_v44 = vadd.f32 %v388_v26, %v319_v25 }
  0xc7   : >> { %v592_v47 = vadd.f32 %v585_v24, %v484_v42 }
  0xcc   : >> { %v479_v27 = vpop.f32.mrf.mxu2  ;;  %v692_v29 = vpop.f32.mrf.mxu0 }
  0xcd   : >> { %v587_v28 = vpop.f32.mrf.mxu3  ;;  %v786_v30 = vpop.f32.mrf.mxu1  ;;  %v485_v48 = vadd.f32 %v479_v27, %v389_v44  ;;  %v702_v52 = vadd.f32 %v692_v29, %v590_v45 }
  0xcf   : >> { %v593_v55 = vadd.f32 %v587_v28, %v485_v48  ;;  %v796_v57 = vadd.f32 %v786_v30, %v702_v52 }
  0xd4   : >> { %v894_v31 = vpop.f32.mrf.mxu2  ;;  %v694_v33 = vpop.f32.mrf.mxu0 }
  0xd5   : >> { %v1006_v32 = vpop.f32.mrf.mxu3  ;;  %v788_v34 = vpop.f32.mrf.mxu1  ;;  %v703_v58 = vadd.f32 %v694_v33, %v591_v54  ;;  %v904_v61 = vadd.f32 %v894_v31, %v796_v57 }
  0xd7   : >> { %v797_v3 = vadd.f32 %v788_v34, %v703_v58  ;;  %v1016_v5 = vadd.f32 %v1006_v32, %v904_v61 }
  0xdc   : >> { %v896_v35 = vpop.f32.mrf.mxu2  ;;  %v697_v36 = vpop.f32.mrf.mxu0 }
  0xdd   : >> { %v791_v37 = vpop.f32.mrf.mxu1  ;;  %v1008_v40 = vpop.f32.mrf.mxu3  ;;  %v704_v53 = vadd.f32 %v697_v36, %v592_v47  ;;  %v905_v6 = vadd.f32 %v896_v35, %v797_v3 }
  0xdf   : >> { %v798_v59 = vadd.f32 %v791_v37, %v704_v53  ;;  %v1017_v13 = vadd.f32 %v1008_v40, %v905_v6 }
  0xe4   : >> { %v899_v49 = vpop.f32.mrf.mxu2  ;;  %v699_v50 = vpop.f32.mrf.mxu0 }
  0xe5   : >> { %v793_v51 = vpop.f32.mrf.mxu1  ;;  %v1011_v56 = vpop.f32.mrf.mxu3  ;;  %v705_v60 = vadd.f32 %v699_v50, %v593_v55  ;;  %v906_v62 = vadd.f32 %v899_v49, %v798_v59 }
  0xe7   : >> { %v799_v4 = vadd.f32 %v793_v51, %v705_v60  ;;  %v1018_v7 = vadd.f32 %v1011_v56, %v906_v62 }
  0xec   : >> { %v901_v63 = vpop.f32.mrf.mxu2  ;;  %v1100_v1 = vpop.f32.mrf.mxu0 }
  0xed   : >> { %v1105_v2 = vpop.f32.mrf.mxu1  ;;  %v907_v8 = vadd.f32 %v901_v63, %v799_v4  ;;  %v1110_v9 = vadd.f32 %v1100_v1, %v1016_v5  ;;  %v1013_v12 = vpop.f32.mrf.mxu3 }
  0xee   : >> { %v1112_v11 = vadd.f32 %v1105_v2, %v1018_v7 }
  0xef   : >> { %v1019_v15 = vadd.f32 %v1013_v12, %v907_v8  ;;  %v1117_v18 = vadd.f32 %v1115_v10, %v1110_v9 }
  0xf0   : >> { %v1119_v19 = vadd.f32 %v1115_v10, %v1112_v11 }
  0xf1   : >> { %v1121_v20 = vmax.f32 %v1117_v18, 0.0 }
  0xf2   : >> { %v1123_v24 = vmax.f32 %v1119_v19, 0.0 }
  0xf4   : >> { %v1102_v16 = vpop.f32.mrf.mxu0 }
  0xf5   : >> { %v1107_v17 = vpop.f32.mrf.mxu1  ;;  %v1111_v21 = vadd.f32 %v1102_v16, %v1017_v13 }
  0xf6   : >> { %v1113_v22 = vadd.f32 %v1107_v17, %v1019_v15 }
  0xf7   : >> { %v1118_v14 = vadd.f32 %v1115_v10, %v1111_v21 }
  0xf8   : >> { %v1120_v23 = vadd.f32 %v1115_v10, %v1113_v22 }
  0xf9   : >> { %v1122_v25 = vmax.f32 %v1118_v14, 0.0 }
  0xfa   : >> { %v1124_v26 = vmax.f32 %v1120_v23, 0.0  ;;  %176 = sbr.rel (!%p174_p4) target bundleno = 15 (0xf), region = 73 }
  0xfb   : >> { %v1633_v27 = vpack.c.bf16 %v1122_v25, %v1121_v20 }
  0xfc   : >> { %v1638_v28 = vpack.c.bf16 %v1124_v26, %v1123_v24 }
  0xfd   : >> { %1634 = vst [vmem:[%s1131_s11] sm:$0xff] %v1633_v27  }
  0xfe   : >> { %1640 = vst [vmem:[%s1131_s11 + $0x8] sm:$0xff] %v1638_v28  }
  0xff PF: > { %s13_s12 = sadd.s32 1, %s1676_s12  }
 0x100   : > { %p10_p5 = scmp.ge.s32.totalorder %s13_s12, 4  }
 0x102   :  { %12 = sbr.rel (!%p10_p5) target bundleno = 1 (0x1), region = 84 }

// kernel: deeplab_forward.22
= control target key start
LH: loop header
LB: loop body
LE: loop exit
PB: predicated region body
PF: predicated region fallthrough
CT: control target
= control target key end

     0   :  { %s494_s1 = inlined_call_operand.vmem [shape: bf16[128,128], index: 1, kind: input, shape index: {}]   ;;  %s495_s2 = inlined_call_operand.vmem [shape: f32[1,128], index: 2, kind: input, shape index: {}]   ;;  %s496_s0 = inlined_call_operand.vmem [shape: bf16[128,128], index: 0, kind: input, shape index: {}]   ;;  %s497_s3 = inlined_call_operand.vmem [shape: bf16[128,128], index: 3, kind: output, shape index: {}]  }
   0x1   :  { %v326_v0 = vld [vmem:[%s494_s1 + $0x38] sm:$0xff]  ;;  %v325_v1 = vld [vmem:[%s494_s1 + $0x30] sm:$0xff]  ;;  %v324_v2 = vld [vmem:[%s494_s1 + $0x28] sm:$0xff] }
   0x2   :  { %146 = vmatpush.bf16.msra.mxu0 %v326_v0  ;;  %374 = vmatpush.bf16.msra.mxu1 %v326_v0  ;;  %v323_v3 = vld [vmem:[%s494_s1 + $0x20] sm:$0xff]  ;;  %v322_v4 = vld [vmem:[%s494_s1 + $0x18] sm:$0xff]  ;;  %v321_v5 = vld [vmem:[%s494_s1 + $0x10] sm:$0xff] }
   0x3   :  { %375 = vmatpush.bf16.msra.mxu2 %v326_v0  ;;  %376 = vmatpush.bf16.msra.mxu3 %v326_v0  ;;  %v320_v6 = vld [vmem:[%s494_s1 + $0x8] sm:$0xff]  ;;  %v319_v7 = vld [vmem:[%s494_s1] sm:$0xff]  ;;  %v313_v9 = vld [vmem:[%s496_s0 + $0x10] sm:$0xff] }
   0x4   :  { %v311_v8 = vld [vmem:[%s496_s0] sm:$0xff]  ;;  %v317_v11 = vld [vmem:[%s496_s0 + $0x30] sm:$0xff]  ;;  %v312_v12 = vld [vmem:[%s496_s0 + $0x8] sm:$0xff] }
   0x5   :  { %v315_v10 = vld [vmem:[%s496_s0 + $0x20] sm:$0xff]  ;;  %v314_v13 = vld [vmem:[%s496_s0 + $0x18] sm:$0xff]  ;;  %v316_v14 = vld [vmem:[%s496_s0 + $0x28] sm:$0xff] }
   0x6   :  { %147 = vmatpush.bf16.msra.mxu0 %v325_v1  ;;  %377 = vmatpush.bf16.msra.mxu1 %v325_v1  ;;  %v318_v15 = vld [vmem:[%s496_s0 + $0x38] sm:$0xff]  ;;  %v398_v18 = vld [vmem:[%s495_s2] ss:$0 sm:$0xff] }
   0x7   :  { %378 = vmatpush.bf16.msra.mxu2 %v325_v1  ;;  %379 = vmatpush.bf16.msra.mxu3 %v325_v1 }
   0xa   :  { %148 = vmatpush.bf16.msra.mxu0 %v324_v2  ;;  %380 = vmatpush.bf16.msra.mxu1 %v324_v2 }
   0xb   :  { %381 = vmatpush.bf16.msra.mxu2 %v324_v2  ;;  %382 = vmatpush.bf16.msra.mxu3 %v324_v2 }
   0xe   :  { %149 = vmatpush.bf16.msra.mxu0 %v323_v3  ;;  %383 = vmatpush.bf16.msra.mxu1 %v323_v3 }
   0xf   :  { %384 = vmatpush.bf16.msra.mxu2 %v323_v3  ;;  %385 = vmatpush.bf16.msra.mxu3 %v323_v3 }
  0x12   :  { %150 = vmatpush.bf16.msra.mxu0 %v322_v4  ;;  %386 = vmatpush.bf16.msra.mxu1 %v322_v4 }
  0x13   :  { %387 = vmatpush.bf16.msra.mxu2 %v322_v4  ;;  %388 = vmatpush.bf16.msra.mxu3 %v322_v4 }
  0x16   :  { %151 = vmatpush.bf16.msra.mxu0 %v321_v5  ;;  %389 = vmatpush.bf16.msra.mxu1 %v321_v5 }
  0x17   :  { %390 = vmatpush.bf16.msra.mxu2 %v321_v5  ;;  %391 = vmatpush.bf16.msra.mxu3 %v321_v5 }
  0x1a   :  { %152 = vmatpush.bf16.msra.mxu0 %v320_v6  ;;  %392 = vmatpush.bf16.msra.mxu1 %v320_v6 }
  0x1b   :  { %393 = vmatpush.bf16.msra.mxu2 %v320_v6  ;;  %394 = vmatpush.bf16.msra.mxu3 %v320_v6 }
  0x1e   :  { %153 = vmatpush.bf16.msra.mxu0 %v319_v7  ;;  %395 = vmatpush.bf16.msra.mxu1 %v319_v7 }
  0x1f   :  { %396 = vmatpush.bf16.msra.mxu2 %v319_v7  ;;  %397 = vmatpush.bf16.msra.mxu3 %v319_v7 }
  0x21   :  { %154 = vmatmul.bf16.vlgmr.msra.gmra.mxu0 %v311_v8  ;;  %164 = vmatmul.bf16.vlgmr.msra.gmra.mxu1 %v313_v9 }
  0x22   :  { %174 = vmatmul.bf16.vlgmr.msra.gmra.mxu2 %v315_v10  ;;  %184 = vmatmul.bf16.vlgmr.msra.gmra.mxu3 %v317_v11 }
  0x31   :  { %159 = vmatmul.bf16.gmra.mxu0 %v312_v12  ;;  %169 = vmatmul.bf16.gmra.mxu1 %v314_v13 }
  0x32   :  { %179 = vmatmul.bf16.gmra.mxu2 %v316_v14  ;;  %189 = vmatmul.bf16.gmra.mxu3 %v318_v15 }
  0x9e   :  { %v155_v16 = vpop.f32.mrf.mxu0  ;;  %v165_v17 = vpop.f32.mrf.mxu1 }
  0x9f   :  { %v156_v19 = vadd.f32 %v398_v18, %v155_v16  ;;  %v166_v20 = vadd.f32 %v398_v18, %v165_v17 }
  0xa1   :  { %v195_v27 = vmax.f32 %v156_v19, 0.0  ;;  %v199_v28 = vmax.f32 %v166_v20, 0.0 }
  0xa5   :  { %v175_v21 = vpop.f32.mrf.mxu2  ;;  %v185_v22 = vpop.f32.mrf.mxu3 }
  0xa6   :  { %v157_v23 = vpop.f32.mrf.mxu0  ;;  %v167_v24 = vpop.f32.mrf.mxu1  ;;  %v176_v33 = vadd.f32 %v398_v18, %v175_v21  ;;  %v186_v34 = vadd.f32 %v398_v18, %v185_v22 }
  0xa7   :  { %v158_v25 = vadd.f32 %v398_v18, %v157_v23  ;;  %v168_v26 = vadd.f32 %v398_v18, %v167_v24 }
  0xa8   :  { %v203_v41 = vmax.f32 %v176_v33, 0.0  ;;  %v207_v42 = vmax.f32 %v186_v34, 0.0 }
  0xa9   :  { %v196_v29 = vmax.f32 %v158_v25, 0.0  ;;  %v200_v30 = vmax.f32 %v168_v26, 0.0 }
  0xab   :  { %v330_v31 = vpack.c.bf16 %v196_v29, %v195_v27  ;;  %v340_v32 = vpack.c.bf16 %v200_v30, %v199_v28 }
  0xad   :  { %331 = vst [vmem:[%s497_s3] sm:$0xff] %v330_v31   ;;  %v177_v35 = vpop.f32.mrf.mxu2  ;;  %v187_v36 = vpop.f32.mrf.mxu3 }
  0xae   :  { %368 = vst [vmem:[%s497_s3 + $0x10] sm:$0xff] %v340_v32   ;;  %v178_v37 = vadd.f32 %v398_v18, %v177_v35  ;;  %v188_v38 = vadd.f32 %v398_v18, %v187_v36  ;;  %v160_v39 = vpop.f32.mrf.mxu0  ;;  %v170_v40 = vpop.f32.mrf.mxu1 }
  0xaf   :  { %v161_v47 = vadd.f32 %v398_v18, %v160_v39  ;;  %v171_v48 = vadd.f32 %v398_v18, %v170_v40 }
  0xb0   :  { %v204_v43 = vmax.f32 %v178_v37, 0.0  ;;  %v208_v44 = vmax.f32 %v188_v38, 0.0 }
  0xb1   :  { %v197_v55 = vmax.f32 %v161_v47, 0.0  ;;  %v201_v56 = vmax.f32 %v171_v48, 0.0 }
  0xb2   :  { %v350_v45 = vpack.c.bf16 %v204_v43, %v203_v41  ;;  %v360_v46 = vpack.c.bf16 %v208_v44, %v207_v42 }
  0xb4   :  { %370 = vst [vmem:[%s497_s3 + $0x20] sm:$0xff] %v350_v45  }
  0xb5   :  { %372 = vst [vmem:[%s497_s3 + $0x30] sm:$0xff] %v360_v46   ;;  %v180_v49 = vpop.f32.mrf.mxu2  ;;  %v190_v50 = vpop.f32.mrf.mxu3 }
  0xb6   :  { %v162_v51 = vpop.f32.mrf.mxu0  ;;  %v172_v52 = vpop.f32.mrf.mxu1  ;;  %v181_v61 = vadd.f32 %v398_v18, %v180_v49  ;;  %v191_v62 = vadd.f32 %v398_v18, %v190_v50 }
  0xb7   :  { %v163_v53 = vadd.f32 %v398_v18, %v162_v51  ;;  %v173_v54 = vadd.f32 %v398_v18, %v172_v52 }
  0xb8   :  { %v205_v3 = vmax.f32 %v181_v61, 0.0  ;;  %v209_v4 = vmax.f32 %v191_v62, 0.0 }
  0xb9   :  { %v198_v57 = vmax.f32 %v163_v53, 0.0  ;;  %v202_v58 = vmax.f32 %v173_v54, 0.0 }
  0xbb   :  { %v335_v59 = vpack.c.bf16 %v198_v57, %v197_v55  ;;  %v345_v60 = vpack.c.bf16 %v202_v58, %v201_v56 }
  0xbd   :  { %367 = vst [vmem:[%s497_s3 + $0x8] sm:$0xff] %v335_v59   ;;  %v182_v63 = vpop.f32.mrf.mxu2  ;;  %v192_v0 = vpop.f32.mrf.mxu3 }
  0xbe   :  { %369 = vst [vmem:[%s497_s3 + $0x18] sm:$0xff] %v345_v60   ;;  %v183_v1 = vadd.f32 %v398_v18, %v182_v63  ;;  %v193_v2 = vadd.f32 %v398_v18, %v192_v0 }
  0xc0   :  { %v206_v5 = vmax.f32 %v183_v1, 0.0  ;;  %v210_v6 = vmax.f32 %v193_v2, 0.0 }
  0xc2   :  { %v355_v7 = vpack.c.bf16 %v206_v5, %v205_v3  ;;  %v365_v8 = vpack.c.bf16 %v210_v6, %v209_v4 }
  0xc4   :  { %371 = vst [vmem:[%s497_s3 + $0x28] sm:$0xff] %v355_v7  }
  0xc5   :  { %373 = vst [vmem:[%s497_s3 + $0x38] sm:$0xff] %v365_v8  }

// kernel: deeplab_forward.16
= control target key start
LH: loop header
LB: loop body
LE: loop exit
PB: predicated region body
PF: predicated region fallthrough
CT: control target
= control target key end

     0   :  { %s1540_s12 = smov 0   ;;  %s1821_s0 = inlined_call_operand.vmem [shape: bf16[2,18,18,128], index: 0, kind: input, shape index: {}]   ;;  %s1822_s1 = inlined_call_operand.vmem [shape: bf16[1152,128], index: 1, kind: input, shape index: {}]   ;;  %s1823_s2 = inlined_call_operand.vmem [shape: f32[1,128], index: 2, kind: input, shape index: {}]   ;;  %s1824_s3 = inlined_call_operand.vmem [shape: bf16[2,8,16,128], index: 3, kind: output, shape index: {}]  }
   0x1 LB: > { %s1080_s13 = sadd.s32 4294967295, %s1514_s12   ;;  %p1084_p0 = scmp.ge.s32.totalorder %s1514_s12, 1  ;;  %s1514_s12 = sphi %s1540_s12, %s13_s12  }
   0x2   : > { %p137_p1 = scmp.lt.s32.totalorder %s1514_s12, 3 }
   0x4   : > { %p138_p2 = pnand %p1084_p0, %p137_p1 }
   0x5   : > { %p161_p3 = scmp.lt.s32.totalorder (!%p138_p2), %s1080_s13, 1  ;;  %s1563_s24 = smov (!%p138_p2), 0  }
   0x6   : > { %141 = sbr.rel (%p138_p2) target bundleno = 254 (0xfe), region = 32 }
   0xb   : > { %v1551_v0 = vld [vmem:[%s1823_s2] sm:$0x1]  ;;  %s1826_s13 = smov (!%p161_p3, %s1080_s13), 1 }
   0xc   : > { %s1487_s16 = smul.u32 216, %s1826_s13  ;;  %s1404_s17 = sshll.u32 %s1826_s13, 6 }
   0xd   : > { %s1556_s20 = scalar_lea.vmem %s1824_s3, %s1404_s17 }
   0xe   : > { %s1561_s23 = scalar_lea.vmem %s1821_s0, %s1487_s16 }
   0xf LB: >> { %v1422_v1 = vld [vmem:[%s1822_s1 + $0x78] sm:$0xff]  ;;  %v1421_v5 = vld [vmem:[%s1822_s1 + $0x70] sm:$0xff]  ;;  %v1420_v9 = vld [vmem:[%s1822_s1 + $0x68] sm:$0xff]  ;;  %s1405_s26 = smul.u32 24, %s1518_s24  ;;  %vm225_vm0 = vsmask.f32 7424  ;;  %s1518_s24 = sphi %s1563_s24, %s177_s24  }
  0x10   : >> { %v1430_v2 = vld [vmem:[%s1822_s1 + $0xb8] sm:$0xff]  ;;  %287 = vmatpush.bf16.msra.mxu0 %v1422_v1  ;;  %v1429_v6 = vld [vmem:[%s1822_s1 + $0xb0] sm:$0xff]  ;;  %v1428_v10 = vld [vmem:[%s1822_s1 + $0xa8] sm:$0xff]  ;;  %vm380_vm1 = vcmask 1046528   ;;  %s1481_s9 = sshll.u32 %s1518_s24, 3  ;;  %s177_s24 = sadd.s32 1, %s1518_s24  }
  0x11   : >> { %v1414_v3 = vld [vmem:[%s1822_s1 + $0x38] sm:$0xff]  ;;  %433 = vmatpush.bf16.msra.mxu2 %v1430_v2  ;;  %v1413_v7 = vld [vmem:[%s1822_s1 + $0x30] sm:$0xff]  ;;  %v1412_v11 = vld [vmem:[%s1822_s1 + $0x28] sm:$0xff]  ;;  %s1618_s8 = scalar_lea.vmem %s1561_s23, %s1405_s26  ;;  %s1005_s10 = scalar_lea.vmem %s1556_s20, %s1481_s9 }
  0x12   : >> { %v1439_v4 = vld [vmem:[%s1822_s1 + $0xf8] sm:$0xff]  ;;  %350 = vmatpush.bf16.msra.mxu1 %v1414_v3  ;;  %v1438_v8 = vld [vmem:[%s1822_s1 + $0xf0] sm:$0xff]  ;;  %v1437_v12 = vld [vmem:[%s1822_s1 + $0xe8] sm:$0xff]  ;;  %p174_p4 = scmp.ge.s32.totalorder %s177_s24, 8  }
  0x13   : >> { %526 = vmatpush.bf16.msra.mxu3 %v1439_v4  ;;  %v1419_v13 = vld [vmem:[%s1822_s1 + $0x60] sm:$0xff]  ;;  %v1418_v17 = vld [vmem:[%s1822_s1 + $0x58] sm:$0xff]  ;;  %v184_v22 = vld [vmem:[%s1618_s8 + $0x8] sm:$0x1] }
  0x14   : >> { %288 = vmatpush.bf16.msra.mxu0 %v1421_v5  ;;  %v1427_v14 = vld [vmem:[%s1822_s1 + $0xa0] sm:$0xff]  ;;  %v1426_v18 = vld [vmem:[%s1822_s1 + $0x98] sm:$0xff]  ;;  %v222_v23 = vunpack.c.l.b16 %v184_v22  ;;  %v1417_v24 = vld [vmem:[%s1822_s1 + $0x50] sm:$0xff] }
  0x15   : >> { %434 = vmatpush.bf16.msra.mxu2 %v1429_v6  ;;  %v1411_v15 = vld [vmem:[%s1822_s1 + $0x20] sm:$0xff]  ;;  %v1410_v19 = vld [vmem:[%s1822_s1 + $0x18] sm:$0xff]  ;;  %v1425_v25 = vld [vmem:[%s1822_s1 + $0x90] sm:$0xff] }
  0x16   : >> { %351 = vmatpush.bf16.msra.mxu1 %v1413_v7  ;;  %v1436_v16 = vld [vmem:[%s1822_s1 + $0xe0] sm:$0xff]  ;;  %v1435_v20 = vld [vmem:[%s1822_s1 + $0xd8] sm:$0xff]  ;;  %v1409_v26 = vld [vmem:[%s1822_s1 + $0x10] sm:$0xff]  ;;  %v224_v28 = vpack.c.b16 %v222_v23, %v222_v23 }
  0x17   : >> { %527 = vmatpush.bf16.msra.mxu3 %v1438_v8  ;;  %v1406_v21 = vld [vmem:[%s1618_s8] sm:$0xff]  ;;  %v1434_v27 = vld [vmem:[%s1822_s1 + $0xd0] sm:$0xff]  ;;  %v1416_v30 = vld [vmem:[%s1822_s1 + $0x48] sm:$0xff] }
  0x18   : >> { %289 = vmatpush.bf16.msra.mxu0 %v1420_v9  ;;  %v229_v29 = vshll.u32 %v1406_v21, 16  ;;  %v1424_v31 = vld [vmem:[%s1822_s1 + $0x88] sm:$0xff]  ;;  %v227_v34 = vshrl.u32 %v1406_v21, 16  ;;  %v234_v36 = vshll.u32 %v224_v28, 16  ;;  %v1415_v37 = vld [vmem:[%s1822_s1 + $0x40] sm:$0xff]  ;;  %v1447_v39 = vld [vmem:[%s1822_s1 + $0x138] sm:$0xff] }
  0x19   : >> { %435 = vmatpush.bf16.msra.mxu2 %v1428_v10  ;;  %v1408_v32 = vld [vmem:[%s1822_s1 + $0x8] sm:$0xff]  ;;  %v1423_v38 = vld [vmem:[%s1822_s1 + $0x80] sm:$0xff]  ;;  %v1464_v40 = vld [vmem:[%s1822_s1 + $0x1b8] sm:$0xff]  ;;  %v381_v43 = vrot.slane %v1406_v21, 1  ;;  %v382_v44 = vrot.slane %v224_v28, 1 }
  0x1a   : >> { %352 = vmatpush.bf16.msra.mxu1 %v1412_v11  ;;  %v1433_v33 = vld [vmem:[%s1822_s1 + $0xc8] sm:$0xff]  ;;  %v231_v35 = vrot.slane %v229_v29, 1  ;;  %v236_v42 = vrot.slane %v234_v36, 1  ;;  %v1407_v45 = vld [vmem:[%s1822_s1] sm:$0xff]  ;;  %v1455_v47 = vld [vmem:[%s1822_s1 + $0x178] sm:$0xff] }
  0x1b   : >> { %528 = vmatpush.bf16.msra.mxu3 %v1437_v12  ;;  %v1432_v46 = vld [vmem:[%s1822_s1 + $0xc0] sm:$0xff]  ;;  %v1472_v48 = vld [vmem:[%s1822_s1 + $0x1f8] sm:$0xff]  ;;  %v1446_v49 = vld [vmem:[%s1822_s1 + $0x130] sm:$0xff]  ;;  %v383_v52 = vsel %vm380_vm1, %v381_v43, %v382_v44 }
  0x1c   : >> { %290 = vmatpush.bf16.msra.mxu0 %v1419_v13  ;;  %v232_v41 = vor.u32 %v231_v35, %v227_v34  ;;  %v1463_v50 = vld [vmem:[%s1822_s1 + $0x1b0] sm:$0xff]  ;;  %v1445_v56 = vld [vmem:[%s1822_s1 + $0x128] sm:$0xff]  ;;  %v1444_v60 = vld [vmem:[%s1822_s1 + $0x120] sm:$0xff] }
  0x1d   : >> { %436 = vmatpush.bf16.msra.mxu2 %v1427_v14  ;;  %v1691_v53 = vld [vmem:[%s1618_s8 + $0xc] sm:$0xff]  ;;  %v1461_v61 = vld [vmem:[%s1822_s1 + $0x1a0] sm:$0xff]  ;;  %v1195_v62 = vld [vmem:[%s1618_s8 + $0x14] sm:$0x1] }
  0x1e   : >> { %353 = vmatpush.bf16.msra.mxu1 %v1411_v15  ;;  %v237_v51 = vsel %vm225_vm0, %v232_v41, %v236_v42  ;;  %v1454_v54 = vld [vmem:[%s1822_s1 + $0x170] sm:$0xff]  ;;  %v1462_v57 = vld [vmem:[%s1822_s1 + $0x1a8] sm:$0xff]  ;;  %v1452_v63 = vld [vmem:[%s1822_s1 + $0x160] sm:$0xff]  ;;  %v559_v5 = vunpack.c.l.b16 %v1195_v62  ;;  %v564_v13 = vshll.u32 %v1691_v53, 16  ;;  %v654_v35 = vrot.slane %v1691_v53, 1 }
  0x1f   : >> { %529 = vmatpush.bf16.msra.mxu3 %v1436_v16  ;;  %v1471_v55 = vld [vmem:[%s1822_s1 + $0x1f0] sm:$0xff]  ;;  %v1453_v58 = vld [vmem:[%s1822_s1 + $0x168] sm:$0xff]  ;;  %v1469_v1 = vld [vmem:[%s1822_s1 + $0x1e0] sm:$0xff] }
  0x20   : >> { %291 = vmatpush.bf16.msra.mxu0 %v1418_v17  ;;  %v1470_v59 = vld [vmem:[%s1822_s1 + $0x1e8] sm:$0xff]  ;;  %v1300_v2 = vld [vmem:[%s1618_s8 + $0x20] sm:$0x1]  ;;  %v1443_v3 = vld [vmem:[%s1822_s1 + $0x118] sm:$0xff]  ;;  %v560_v12 = vpack.c.b16 %v559_v5, %v559_v5 }
  0x21   : >> { %437 = vmatpush.bf16.msra.mxu2 %v1426_v18  ;;  %v1460_v4 = vld [vmem:[%s1822_s1 + $0x198] sm:$0xff]  ;;  %v832_v9 = vunpack.c.l.b16 %v1300_v2  ;;  %v1442_v10 = vld [vmem:[%s1822_s1 + $0x110] sm:$0xff]  ;;  %v1441_v18 = vld [vmem:[%s1822_s1 + $0x108] sm:$0xff] }
  0x22   : >> { %354 = vmatpush.bf16.msra.mxu1 %v1410_v19  ;;  %v1451_v6 = vld [vmem:[%s1822_s1 + $0x158] sm:$0xff]  ;;  %v1459_v11 = vld [vmem:[%s1822_s1 + $0x190] sm:$0xff]  ;;  %v1458_v19 = vld [vmem:[%s1822_s1 + $0x188] sm:$0xff]  ;;  %v569_v22 = vshll.u32 %v560_v12, 16  ;;  %v655_v36 = vrot.slane %v560_v12, 1 }
  0x23   : >> { %530 = vmatpush.bf16.msra.mxu3 %v1435_v20  ;;  %v1468_v7 = vld [vmem:[%s1822_s1 + $0x1d8] sm:$0xff]  ;;  %v1450_v14 = vld [vmem:[%s1822_s1 + $0x150] sm:$0xff]  ;;  %v833_v16 = vpack.c.b16 %v832_v9, %v832_v9  ;;  %v562_v20 = vshrl.u32 %v1691_v53, 16  ;;  %v1449_v23 = vld [vmem:[%s1822_s1 + $0x148] sm:$0xff] }
  0x24   : >> { %292 = vmatpush.bf16.msra.mxu0 %v1417_v24  ;;  %v1739_v8 = vld [vmem:[%s1618_s8 + $0x18] sm:$0xff]  ;;  %v1467_v15 = vld [vmem:[%s1822_s1 + $0x1d0] sm:$0xff]  ;;  %v1466_v24 = vld [vmem:[%s1822_s1 + $0x1c8] sm:$0xff] }
  0x25   : >> { %438 = vmatpush.bf16.msra.mxu2 %v1425_v25  ;;  %v837_v17 = vshll.u32 %v1739_v8, 16  ;;  %v835_v25 = vshrl.u32 %v1739_v8, 16  ;;  %v1440_v28 = vld [vmem:[%s1822_s1 + $0x100] sm:$0xff]  ;;  %v1479_v42 = vld [vmem:[%s1822_s1 + $0x230] sm:$0xff]  ;;  %v1478_v43 = vld [vmem:[%s1822_s1 + $0x228] sm:$0xff] }
  0x26   : >> { %355 = vmatpush.bf16.msra.mxu1 %v1409_v26  ;;  %v1457_v29 = vld [vmem:[%s1822_s1 + $0x180] sm:$0xff] }
  0x27   : >> { %531 = vmatpush.bf16.msra.mxu3 %v1434_v27  ;;  %v839_v26 = vrot.slane %v837_v17, 1  ;;  %v842_v27 = vshll.u32 %v833_v16, 16  ;;  %v1465_v34 = vld [vmem:[%s1822_s1 + $0x1c0] sm:$0xff] }
  0x28   : >> { %293 = vmatpush.bf16.msra.mxu0 %v1416_v30  ;;  %v1477_v44 = vld [vmem:[%s1822_s1 + $0x220] sm:$0xff] }
  0x29   : >> { %439 = vmatpush.bf16.msra.mxu2 %v1424_v31  ;;  %v571_v31 = vrot.slane %v569_v22, 1 }
  0x2a   : >> { %356 = vmatpush.bf16.msra.mxu1 %v1408_v32  ;;  %v1480_v32 = vld [vmem:[%s1822_s1 + $0x238] sm:$0xff] }
  0x2b   : >> { %532 = vmatpush.bf16.msra.mxu3 %v1433_v33  ;;  %v1448_v33 = vld [vmem:[%s1822_s1 + $0x140] sm:$0xff] }
  0x2c   : >> { %294 = vmatpush.bf16.msra.mxu0 %v1415_v37  ;;  %v840_v37 = vor.u32 %v839_v26, %v835_v25 }
  0x2d   : >> { %440 = vmatpush.bf16.msra.mxu2 %v1423_v38  ;;  %v844_v38 = vrot.slane %v842_v27, 1 }
  0x2e   : >> { %357 = vmatpush.bf16.msra.mxu1 %v1407_v45  ;;  %v1476_v45 = vld [vmem:[%s1822_s1 + $0x218] sm:$0xff] }
  0x2f   : >> { %533 = vmatpush.bf16.msra.mxu3 %v1432_v46  ;;  %295 = vmatmul.bf16.vlgmr.msra.gmra.mxu0 %v237_v51  ;;  %v845_v41 = vsel %vm225_vm0, %v840_v37, %v844_v38  ;;  %v1475_v46 = vld [vmem:[%s1822_s1 + $0x210] sm:$0xff] }
  0x30   : >> { %622 = vmatpush.bf16.msrb.mxu0 %v1447_v39  ;;  %441 = vmatmul.bf16.vlgmr.msra.gmra.mxu2 %v383_v52 }
  0x31   : >> { %799 = vmatpush.bf16.msrb.mxu2 %v1464_v40  ;;  %358 = vmatmul.bf16.vlgmr.msra.gmra.mxu1 %v1406_v21  ;;  %v566_v21 = vrot.slane %v564_v13, 1  ;;  %v656_v40 = vsel %vm380_vm1, %v654_v35, %v655_v36 }
  0x32   : >> { %706 = vmatpush.bf16.msrb.mxu1 %v1455_v47  ;;  %534 = vmatmul.bf16.vlgmr.msra.gmra.mxu3 %v1691_v53  ;;  %v1474_v47 = vld [vmem:[%s1822_s1 + $0x208] sm:$0xff] }
  0x33   : >> { %895 = vmatpush.bf16.msrb.mxu3 %v1472_v48  ;;  %v567_v30 = vor.u32 %v566_v21, %v562_v20  ;;  %v1473_v48 = vld [vmem:[%s1822_s1 + $0x200] sm:$0xff]  ;;  %v996_v20 = vperm.slane %v1551_v0, 0 }
  0x34   : >> { %623 = vmatpush.bf16.msrb.mxu0 %v1446_v49  ;;  %v927_v49 = vrot.slane %v1739_v8, 1 }
  0x35   : >> { %800 = vmatpush.bf16.msrb.mxu2 %v1463_v50  ;;  %v572_v39 = vsel %vm225_vm0, %v567_v30, %v571_v31  ;;  %v928_v50 = vrot.slane %v833_v16, 1 }
  0x36   : >> { %707 = vmatpush.bf16.msrb.mxu1 %v1454_v54 }
  0x37   : >> { %896 = vmatpush.bf16.msrb.mxu3 %v1471_v55  ;;  %v929_v51 = vsel %vm380_vm1, %v927_v49, %v928_v50 }
  0x38   : >> { %624 = vmatpush.bf16.msrb.mxu0 %v1445_v56 }
  0x39   : >> { %801 = vmatpush.bf16.msrb.mxu2 %v1462_v57 }
  0x3a   : >> { %708 = vmatpush.bf16.msrb.mxu1 %v1453_v58 }
  0x3b   : >> { %897 = vmatpush.bf16.msrb.mxu3 %v1470_v59 }
  0x3c   : >> { %625 = vmatpush.bf16.msrb.mxu0 %v1444_v60 }
  0x3d   : >> { %802 = vmatpush.bf16.msrb.mxu2 %v1461_v61 }
  0x3e   : >> { %709 = vmatpush.bf16.msrb.mxu1 %v1452_v63 }
  0x3f   : >> { %898 = vmatpush.bf16.msrb.mxu3 %v1469_v1 }
  0x40   : >> { %626 = vmatpush.bf16.msrb.mxu0 %v1443_v3 }
  0x41   : >> { %803 = vmatpush.bf16.msrb.mxu2 %v1460_v4 }
  0x42   : >> { %710 = vmatpush.bf16.msrb.mxu1 %v1451_v6 }
  0x43   : >> { %899 = vmatpush.bf16.msrb.mxu3 %v1468_v7 }
  0x44   : >> { %627 = vmatpush.bf16.msrb.mxu0 %v1442_v10 }
  0x45   : >> { %804 = vmatpush.bf16.msrb.mxu2 %v1459_v11 }
  0x46   : >> { %711 = vmatpush.bf16.msrb.mxu1 %v1450_v14 }
  0x47   : >> { %900 = vmatpush.bf16.msrb.mxu3 %v1467_v15 }
  0x48   : >> { %628 = vmatpush.bf16.msrb.mxu0 %v1441_v18 }
  0x49   : >> { %805 = vmatpush.bf16.msrb.mxu2 %v1458_v19 }
  0x4a   : >> { %712 = vmatpush.bf16.msrb.mxu1 %v1449_v23 }
  0x4b   : >> { %901 = vmatpush.bf16.msrb.mxu3 %v1466_v24 }
  0x4c   : >> { %629 = vmatpush.bf16.msrb.mxu0 %v1440_v28 }
  0x4d   : >> { %806 = vmatpush.bf16.msrb.mxu2 %v1457_v29 }
  0x4e   : >> { %713 = vmatpush.bf16.msrb.mxu1 %v1448_v33 }
  0x4f   : >> { %902 = vmatpush.bf16.msrb.mxu3 %v1465_v34  ;;  %630 = vmatmul.bf16.vlgmr.msrb.gmra.mxu0 %v572_v39 }
  0x50   : >> { %979 = vmatpush.bf16.msra.mxu0 %v1480_v32  ;;  %807 = vmatmul.bf16.vlgmr.msrb.gmra.mxu2 %v1739_v8 }
  0x51   : >> { %714 = vmatmul.bf16.vlgmr.msrb.gmra.mxu1 %v656_v40 }
  0x52   : >> { %903 = vmatmul.bf16.vlgmr.msrb.gmra.mxu3 %v845_v41 }
  0x54   : >> { %980 = vmatpush.bf16.msra.mxu0 %v1479_v42 }
  0x58   : >> { %981 = vmatpush.bf16.msra.mxu0 %v1478_v43 }
  0x5c   : >> { %982 = vmatpush.bf16.msra.mxu0 %v1477_v44 }
  0x60   : >> { %983 = vmatpush.bf16.msra.mxu0 %v1476_v45 }
  0x64   : >> { %984 = vmatpush.bf16.msra.mxu0 %v1475_v46 }
  0x68   : >> { %985 = vmatpush.bf16.msra.mxu0 %v1474_v47 }
  0x6c   : >> { %986 = vmatpush.bf16.msra.mxu0 %v1473_v48 }
  0x6f   : >> { %987 = vmatmul.bf16.vlgmr.msra.gmra.mxu0 %v929_v51 }
  0xac   : >> { %v296_v52 = vpop.f32.mrf.mxu0 }
  0xae   : >> { %v359_v53 = vpop.f32.mrf.mxu1 }
  0xaf   : >> { %v360_v58 = vadd.f32 %v359_v53, %v296_v52 }
  0xb3   : >> { %v442_v54 = vpop.f32.mrf.mxu2 }
  0xb4   : >> { %v298_v55 = vpop.f32.mrf.mxu0  ;;  %v447_v61 = vadd.f32 %v442_v54, %v360_v58 }
  0xb5   : >> { %v535_v56 = vpop.f32.mrf.mxu3 }
  0xb6   : >> { %v361_v57 = vpop.f32.mrf.mxu1  ;;  %v540_v63 = vadd.f32 %v535_v56, %v447_v61 }
  0xb7   : >> { %v362_v1 = vadd.f32 %v361_v57, %v298_v55 }
  0xbb   : >> { %v444_v59 = vpop.f32.mrf.mxu2 }
  0xbc   : >> { %v448_v4 = vadd.f32 %v444_v59, %v362_v1 }
  0xbd   : >> { %v537_v62 = vpop.f32.mrf.mxu3 }
  0xbe   : >> { %v541_v8 = vadd.f32 %v537_v62, %v448_v4 }
  0xcc   : >> { %v631_v60 = vpop.f32.mrf.mxu0 }
  0xcd   : >> { %v636_v5 = vadd.f32 %v631_v60, %v540_v63 }
  0xce   : >> { %v715_v2 = vpop.f32.mrf.mxu1 }
  0xcf   : >> { %v720_v9 = vadd.f32 %v715_v2, %v636_v5 }
  0xd3   : >> { %v808_v3 = vpop.f32.mrf.mxu2 }
  0xd4   : >> { %v633_v6 = vpop.f32.mrf.mxu0  ;;  %v813_v12 = vadd.f32 %v808_v3, %v720_v9 }
  0xd5   : >> { %v904_v7 = vpop.f32.mrf.mxu3  ;;  %v637_v10 = vadd.f32 %v633_v6, %v541_v8 }
  0xd6   : >> { %v717_v11 = vpop.f32.mrf.mxu1  ;;  %v909_v16 = vadd.f32 %v904_v7, %v813_v12 }
  0xd7   : >> { %v721_v15 = vadd.f32 %v717_v11, %v637_v10 }
  0xdb   : >> { %v810_v13 = vpop.f32.mrf.mxu2 }
  0xdc   : >> { %v814_v17 = vadd.f32 %v810_v13, %v721_v15 }
  0xdd   : >> { %v906_v18 = vpop.f32.mrf.mxu3 }
  0xde   : >> { %v910_v21 = vadd.f32 %v906_v18, %v814_v17 }
  0xec   : >> { %v988_v14 = vpop.f32.mrf.mxu0 }
  0xed   : >> { %v993_v19 = vadd.f32 %v988_v14, %v909_v16 }
  0xef   : >> { %v998_v23 = vadd.f32 %v996_v20, %v993_v19 }
  0xf1   : >> { %v1000_v26 = vmax.f32 %v998_v23, 0.0 }
  0xf4   : >> { %v990_v22 = vpop.f32.mrf.mxu0 }
  0xf5   : >> { %v994_v24 = vadd.f32 %v990_v22, %v910_v21 }
  0xf7   : >> { %v999_v25 = vadd.f32 %v996_v20, %v994_v24 }
  0xf9   : >> { %v1001_v27 = vmax.f32 %v999_v25, 0.0  ;;  %176 = sbr.rel (!%p174_p4) target bundleno = 15 (0xf), region = 73 }
  0xfb   : >> { %v1485_v28 = vpack.c.bf16 %v1001_v27, %v1000_v26 }
  0xfd   : >> { %1486 = vst [vmem:[%s1005_s10] sm:$0xff] %v1485_v28  }
  0xfe PF: > { %s13_s12 = sadd.s32 1, %s1514_s12  }
  0xff   : > { %p10_p5 = scmp.ge.s32.totalorder %s13_s12, 4  }
 0x101   :  { %12 = sbr.rel (!%p10_p5) target bundleno = 1 (0x1), region = 84 }

// kernel: deeplab_forward.20
= control target key start
LH: loop header
LB: loop body
LE: loop exit
PB: predicated region body
PF: predicated region fallthrough
CT: control target
= control target key end

     0   :  { %s197_s1 = inlined_call_operand.vmem [shape: bf16[128,128], index: 1, kind: input, shape index: {}]   ;;  %s198_s2 = inlined_call_operand.vmem [shape: f32[1,128], index: 2, kind: input, shape index: {}]   ;;  %s199_s0 = inlined_call_operand.vmem [shape: bf16[2,128], index: 0, kind: input, shape index: {}]   ;;  %s200_s3 = inlined_call_operand.vmem [shape: bf16[2,128], index: 3, kind: output, shape index: {}]  }
   0x1   :  { %v142_v0 = vld [vmem:[%s197_s1 + $0x38] sm:$0xff]  ;;  %v141_v1 = vld [vmem:[%s197_s1 + $0x30] sm:$0xff]  ;;  %v140_v2 = vld [vmem:[%s197_s1 + $0x28] sm:$0xff] }
   0x2   :  { %83 = vmatpush.bf16.msra.mxu0 %v142_v0  ;;  %v139_v3 = vld [vmem:[%s197_s1 + $0x20] sm:$0xff]  ;;  %v138_v4 = vld [vmem:[%s197_s1 + $0x18] sm:$0xff]  ;;  %v137_v5 = vld [vmem:[%s197_s1 + $0x10] sm:$0xff] }
   0x3   :  { %v136_v6 = vld [vmem:[%s197_s1 + $0x8] sm:$0xff]  ;;  %v135_v7 = vld [vmem:[%s197_s1] sm:$0xff] }
   0x4   :  { %v14_v8 = vld [vmem:[%s199_s0] sm:$0x1] }
   0x5   :  { %v143_v9 = vld [vmem:[%s198_s2] ss:$0 sm:$0xff] }
   0x6   :  { %84 = vmatpush.bf16.msra.mxu0 %v141_v1 }
   0xa   :  { %85 = vmatpush.bf16.msra.mxu0 %v140_v2 }
   0xe   :  { %86 = vmatpush.bf16.msra.mxu0 %v139_v3 }
  0x12   :  { %87 = vmatpush.bf16.msra.mxu0 %v138_v4 }
  0x16   :  { %88 = vmatpush.bf16.msra.mxu0 %v137_v5 }
  0x1a   :  { %89 = vmatpush.bf16.msra.mxu0 %v136_v6 }
  0x1e   :  { %90 = vmatpush.bf16.msra.mxu0 %v135_v7 }
  0x21   :  { %91 = vmatmul.bf16.vlgmr.msra.gmra.mxu0 %v14_v8 }
  0x9e   :  { %v92_v10 = vpop.f32.mrf.mxu0 }
  0x9f   :  { %v93_v11 = vadd.f32 %v143_v9, %v92_v10 }
  0xa1   :  { %v96_v12 = vmax.f32 %v93_v11, 0.0 }
  0xa3   :  { %v97_v13 = vpack.c.bf16 %v96_v12, %v96_v12 }
  0xa5   :  { %98 = vst [vmem:[%s200_s3] sm:$0x1] %v97_v13 }
  0xa6   :  { %v94_v14 = vpop.f32.mrf.mxu0 }

// kernel: deeplab_forward.17
= control target key start
LH: loop header
LB: loop body
LE: loop exit
PB: predicated region body
PF: predicated region fallthrough
CT: control target
= control target key end

     0   :  { %s1477_s12 = smov 0   ;;  %s1743_s0 = inlined_call_operand.vmem [shape: bf16[2,10,10,128], index: 0, kind: input, shape index: {}]   ;;  %s1744_s1 = inlined_call_operand.vmem [shape: bf16[1152,128], index: 1, kind: input, shape index: {}]   ;;  %s1745_s2 = inlined_call_operand.vmem [shape: f32[1,128], index: 2, kind: input, shape index: {}]   ;;  %s1746_s3 = inlined_call_operand.vmem [shape: bf16[2,4,8,128], index: 3, kind: output, shape index: {}]  }
   0x1 LB: > { %s1022_s13 = sadd.s32 4294967295, %s1451_s12   ;;  %p1026_p0 = scmp.ge.s32.totalorder %s1451_s12, 1  ;;  %s1451_s12 = sphi %s1477_s12, %s13_s12  }
   0x2   : > { %p137_p1 = scmp.lt.s32.totalorder %s1451_s12, 3 }
   0x4   : > { %p138_p2 = pnand %p1026_p0, %p137_p1 }
   0x5   : > { %p161_p3 = scmp.lt.s32.totalorder (!%p138_p2), %s1022_s13, 1  ;;  %s1500_s24 = smov (!%p138_p2), 0  }
   0x6   : > { %141 = sbr.rel (%p138_p2) target bundleno = 246 (0xf6), region = 32 }
   0xb   : > { %v1488_v0 = vld [vmem:[%s1745_s2] sm:$0x1]  ;;  %s1748_s13 = smov (!%p161_p3, %s1022_s13), 1 }
   0xc   : > { %s1424_s16 = smul.u32 80, %s1748_s13  ;;  %s1344_s17 = sshll.u32 %s1748_s13, 4 }
   0xd   : > { %s1493_s20 = scalar_lea.vmem %s1746_s3, %s1344_s17 }
   0xe   : > { %s1498_s23 = scalar_lea.vmem %s1743_s0, %s1424_s16 }
   0xf LB: >> { %v1363_v1 = vld [vmem:[%s1744_s1 + $0x78] sm:$0xff]  ;;  %v1362_v5 = vld [vmem:[%s1744_s1 + $0x70] sm:$0xff]  ;;  %v1361_v9 = vld [vmem:[%s1744_s1 + $0x68] sm:$0xff]  ;;  %s1346_s26 = sshll.u32 %s1455_s24, 4  ;;  %s1341_s10 = sshll.u32 %s1455_s24, 2  ;;  %s1455_s24 = sphi %s1500_s24, %s177_s24  }
  0x10   : >> { %v1371_v2 = vld [vmem:[%s1744_s1 + $0xb8] sm:$0xff]  ;;  %277 = vmatpush.bf16.msra.mxu0 %v1363_v1  ;;  %v1370_v6 = vld [vmem:[%s1744_s1 + $0xb0] sm:$0xff]  ;;  %v1369_v10 = vld [vmem:[%s1744_s1 + $0xa8] sm:$0xff]  ;;  %s1555_s8 = scalar_lea.vmem %s1498_s23, %s1346_s26  ;;  %s948_s11 = scalar_lea.vmem %s1493_s20, %s1341_s10 }
  0x11   : >> { %v1381_v3 = vld [vmem:[%s1744_s1 + $0xf8] sm:$0xff]  ;;  %417 = vmatpush.bf16.msra.mxu2 %v1371_v2  ;;  %v1380_v7 = vld [vmem:[%s1744_s1 + $0xf0] sm:$0xff]  ;;  %v1379_v11 = vld [vmem:[%s1744_s1 + $0xe8] sm:$0xff]  ;;  %s177_s24 = sadd.s32 1, %s1455_s24  }
  0x12   : >> { %v1355_v4 = vld [vmem:[%s1744_s1 + $0x38] sm:$0xff]  ;;  %501 = vmatpush.bf16.msra.mxu3 %v1381_v3  ;;  %v1354_v8 = vld [vmem:[%s1744_s1 + $0x30] sm:$0xff]  ;;  %v1353_v12 = vld [vmem:[%s1744_s1 + $0x28] sm:$0xff]  ;;  %p174_p4 = scmp.ge.s32.totalorder %s177_s24, 4  }
  0x13   : >> { %338 = vmatpush.bf16.msra.mxu1 %v1355_v4  ;;  %v1360_v13 = vld [vmem:[%s1744_s1 + $0x60] sm:$0xff]  ;;  %v1359_v17 = vld [vmem:[%s1744_s1 + $0x58] sm:$0xff]  ;;  %v1358_v23 = vld [vmem:[%s1744_s1 + $0x50] sm:$0xff] }
  0x14   : >> { %278 = vmatpush.bf16.msra.mxu0 %v1362_v5  ;;  %v1368_v14 = vld [vmem:[%s1744_s1 + $0xa0] sm:$0xff]  ;;  %v1367_v18 = vld [vmem:[%s1744_s1 + $0x98] sm:$0xff]  ;;  %v1366_v24 = vld [vmem:[%s1744_s1 + $0x90] sm:$0xff] }
  0x15   : >> { %418 = vmatpush.bf16.msra.mxu2 %v1370_v6  ;;  %v1378_v15 = vld [vmem:[%s1744_s1 + $0xe0] sm:$0xff]  ;;  %v1377_v19 = vld [vmem:[%s1744_s1 + $0xd8] sm:$0xff]  ;;  %v1376_v26 = vld [vmem:[%s1744_s1 + $0xd0] sm:$0xff] }
  0x16   : >> { %502 = vmatpush.bf16.msra.mxu3 %v1380_v7  ;;  %v1352_v16 = vld [vmem:[%s1744_s1 + $0x20] sm:$0xff]  ;;  %v1351_v20 = vld [vmem:[%s1744_s1 + $0x18] sm:$0xff]  ;;  %v1350_v27 = vld [vmem:[%s1744_s1 + $0x10] sm:$0xff] }
  0x17   : >> { %339 = vmatpush.bf16.msra.mxu1 %v1354_v8  ;;  %v1035_v21 = vld [vmem:[%s1555_s8] sm:$0xf]  ;;  %v1347_v22 = vld [vmem:[%s1555_s8] sm:$0x10]  ;;  %v1357_v28 = vld [vmem:[%s1744_s1 + $0x48] sm:$0xff] }
  0x18   : >> { %279 = vmatpush.bf16.msra.mxu0 %v1361_v9  ;;  %v1036_v25 = vor.u32 %v1347_v22, %v1035_v21  ;;  %v1365_v29 = vld [vmem:[%s1744_s1 + $0x88] sm:$0xff]  ;;  %v1356_v33 = vld [vmem:[%s1744_s1 + $0x40] sm:$0xff]  ;;  %v1389_v37 = vld [vmem:[%s1744_s1 + $0x138] sm:$0xff] }
  0x19   : >> { %419 = vmatpush.bf16.msra.mxu2 %v1369_v10  ;;  %v1375_v31 = vld [vmem:[%s1744_s1 + $0xc8] sm:$0xff]  ;;  %v1364_v34 = vld [vmem:[%s1744_s1 + $0x80] sm:$0xff]  ;;  %v1407_v38 = vld [vmem:[%s1744_s1 + $0x1b8] sm:$0xff] }
  0x1a   : >> { %503 = vmatpush.bf16.msra.mxu3 %v1379_v11  ;;  %v224_v30 = vshll.u32 %v1036_v25, 16  ;;  %v1349_v32 = vld [vmem:[%s1744_s1 + $0x8] sm:$0xff]  ;;  %v222_v35 = vshrl.u32 %v1036_v25, 16  ;;  %v1374_v39 = vld [vmem:[%s1744_s1 + $0xc0] sm:$0xff]  ;;  %v1415_v41 = vld [vmem:[%s1744_s1 + $0x1f8] sm:$0xff]  ;;  %v367_v43 = vrot.slane %v1036_v25, 1 }
  0x1b   : >> { %340 = vmatpush.bf16.msra.mxu1 %v1353_v12  ;;  %v1348_v40 = vld [vmem:[%s1744_s1] sm:$0xff]  ;;  %v1397_v42 = vld [vmem:[%s1744_s1 + $0x178] sm:$0xff]  ;;  %v1388_v45 = vld [vmem:[%s1744_s1 + $0x130] sm:$0xff] }
  0x1c   : >> { %280 = vmatpush.bf16.msra.mxu0 %v1360_v13  ;;  %v226_v36 = vrot.slane %v224_v30, 1  ;;  %v1406_v46 = vld [vmem:[%s1744_s1 + $0x1b0] sm:$0xff]  ;;  %v1135_v49 = vld [vmem:[%s1555_s8 + $0x8] sm:$0xf]  ;;  %v182_v50 = vld [vmem:[%s1555_s8] sm:$0xf] }
  0x1d   : >> { %420 = vmatpush.bf16.msra.mxu2 %v1368_v14  ;;  %v1414_v47 = vld [vmem:[%s1744_s1 + $0x1f0] sm:$0xff]  ;;  %v1387_v51 = vld [vmem:[%s1744_s1 + $0x128] sm:$0xff]  ;;  %v1386_v55 = vld [vmem:[%s1744_s1 + $0x120] sm:$0xff] }
  0x1e   : >> { %504 = vmatpush.bf16.msra.mxu3 %v1378_v15  ;;  %v227_v44 = vor.u32 %v226_v36, %v222_v35  ;;  %v1396_v48 = vld [vmem:[%s1744_s1 + $0x170] sm:$0xff]  ;;  %v1405_v52 = vld [vmem:[%s1744_s1 + $0x1a8] sm:$0xff]  ;;  %v1404_v56 = vld [vmem:[%s1744_s1 + $0x1a0] sm:$0xff] }
  0x1f   : >> { %341 = vmatpush.bf16.msra.mxu1 %v1352_v16  ;;  %v1413_v53 = vld [vmem:[%s1744_s1 + $0x1e8] sm:$0xff]  ;;  %v1412_v57 = vld [vmem:[%s1744_s1 + $0x1e0] sm:$0xff]  ;;  %v1385_v59 = vld [vmem:[%s1744_s1 + $0x118] sm:$0xff] }
  0x20   : >> { %281 = vmatpush.bf16.msra.mxu0 %v1359_v17  ;;  %v1395_v54 = vld [vmem:[%s1744_s1 + $0x168] sm:$0xff]  ;;  %v1394_v58 = vld [vmem:[%s1744_s1 + $0x160] sm:$0xff]  ;;  %v1403_v60 = vld [vmem:[%s1744_s1 + $0x198] sm:$0xff] }
  0x21   : >> { %421 = vmatpush.bf16.msra.mxu2 %v1367_v18  ;;  %v1171_v61 = vld [vmem:[%s1555_s8 + $0x8] sm:$0xf]  ;;  %v1373_v62 = vld [vmem:[%s1555_s8 + $0x8] sm:$0x10]  ;;  %v1411_v63 = vld [vmem:[%s1744_s1 + $0x1d8] sm:$0xff] }
  0x22   : >> { %505 = vmatpush.bf16.msra.mxu3 %v1377_v19  ;;  %v1393_v1 = vld [vmem:[%s1744_s1 + $0x158] sm:$0xff]  ;;  %v1275_v2 = vld [vmem:[%s1555_s8 + $0x10] sm:$0xf]  ;;  %v1399_v3 = vld [vmem:[%s1555_s8 + $0x10] sm:$0x10]  ;;  %v1172_v4 = vor.u32 %v1373_v62, %v1171_v61 }
  0x23   : >> { %342 = vmatpush.bf16.msra.mxu1 %v1351_v20  ;;  %v1384_v5 = vld [vmem:[%s1744_s1 + $0x110] sm:$0xff]  ;;  %v1276_v7 = vor.u32 %v1399_v3, %v1275_v2  ;;  %v1383_v11 = vld [vmem:[%s1744_s1 + $0x108] sm:$0xff]  ;;  %v1382_v18 = vld [vmem:[%s1744_s1 + $0x100] sm:$0xff] }
  0x24   : >> { %282 = vmatpush.bf16.msra.mxu0 %v1358_v23  ;;  %v1402_v6 = vld [vmem:[%s1744_s1 + $0x190] sm:$0xff]  ;;  %v539_v10 = vshll.u32 %v1172_v4, 16  ;;  %v1401_v12 = vld [vmem:[%s1744_s1 + $0x188] sm:$0xff]  ;;  %v537_v16 = vshrl.u32 %v1172_v4, 16  ;;  %v1400_v19 = vld [vmem:[%s1744_s1 + $0x180] sm:$0xff] }
  0x25   : >> { %422 = vmatpush.bf16.msra.mxu2 %v1366_v24  ;;  %v1410_v8 = vld [vmem:[%s1744_s1 + $0x1d0] sm:$0xff]  ;;  %v794_v13 = vshll.u32 %v1276_v7, 16  ;;  %v1409_v14 = vld [vmem:[%s1744_s1 + $0x1c8] sm:$0xff]  ;;  %v1423_v20 = vld [vmem:[%s1744_s1 + $0x238] sm:$0xff]  ;;  %v792_v21 = vshrl.u32 %v1276_v7, 16  ;;  %v877_v36 = vrot.slane %v1276_v7, 1 }
  0x26   : >> { %506 = vmatpush.bf16.msra.mxu3 %v1376_v26  ;;  %v1392_v9 = vld [vmem:[%s1744_s1 + $0x150] sm:$0xff]  ;;  %v1391_v15 = vld [vmem:[%s1744_s1 + $0x148] sm:$0xff]  ;;  %v541_v17 = vrot.slane %v539_v10, 1  ;;  %v1408_v23 = vld [vmem:[%s1744_s1 + $0x1c0] sm:$0xff] }
  0x27   : >> { %343 = vmatpush.bf16.msra.mxu1 %v1350_v27  ;;  %v796_v22 = vrot.slane %v794_v13, 1  ;;  %v1390_v24 = vld [vmem:[%s1744_s1 + $0x140] sm:$0xff]  ;;  %v1239_v26 = vld [vmem:[%s1555_s8 + $0x10] sm:$0xf]  ;;  %v1421_v30 = vld [vmem:[%s1744_s1 + $0x228] sm:$0xff] }
  0x28   : >> { %283 = vmatpush.bf16.msra.mxu0 %v1357_v28  ;;  %v542_v25 = vor.u32 %v541_v17, %v537_v16  ;;  %v1422_v27 = vld [vmem:[%s1744_s1 + $0x230] sm:$0xff]  ;;  %v1416_v35 = vld [vmem:[%s1744_s1 + $0x200] sm:$0xff] }
  0x29   : >> { %423 = vmatpush.bf16.msra.mxu2 %v1365_v29  ;;  %v797_v28 = vor.u32 %v796_v22, %v792_v21  ;;  %v622_v29 = vrot.slane %v1172_v4, 1 }
  0x2a   : >> { %507 = vmatpush.bf16.msra.mxu3 %v1375_v31  ;;  %v1420_v31 = vld [vmem:[%s1744_s1 + $0x220] sm:$0xff] }
  0x2b   : >> { %344 = vmatpush.bf16.msra.mxu1 %v1349_v32  ;;  %v1419_v32 = vld [vmem:[%s1744_s1 + $0x218] sm:$0xff] }
  0x2c   : >> { %284 = vmatpush.bf16.msra.mxu0 %v1356_v33  ;;  %v1418_v33 = vld [vmem:[%s1744_s1 + $0x210] sm:$0xff] }
  0x2d   : >> { %424 = vmatpush.bf16.msra.mxu2 %v1364_v34  ;;  %v1417_v34 = vld [vmem:[%s1744_s1 + $0x208] sm:$0xff] }
  0x2e   : >> { %508 = vmatpush.bf16.msra.mxu3 %v1374_v39 }
  0x2f   : >> { %345 = vmatpush.bf16.msra.mxu1 %v1348_v40  ;;  %285 = vmatmul.bf16.vlgmr.msra.gmra.mxu0 %v227_v44 }
  0x30   : >> { %592 = vmatpush.bf16.msrb.mxu0 %v1389_v37  ;;  %425 = vmatmul.bf16.vlgmr.msra.gmra.mxu2 %v367_v43 }
  0x31   : >> { %756 = vmatpush.bf16.msrb.mxu2 %v1407_v38  ;;  %509 = vmatmul.bf16.vlgmr.msra.gmra.mxu3 %v1135_v49 }
  0x32   : >> { %847 = vmatpush.bf16.msrb.mxu3 %v1415_v41  ;;  %346 = vmatmul.bf16.vlgmr.msra.gmra.mxu1 %v182_v50 }
  0x33   : >> { %672 = vmatpush.bf16.msrb.mxu1 %v1397_v42 }
  0x34   : >> { %593 = vmatpush.bf16.msrb.mxu0 %v1388_v45 }
  0x35   : >> { %757 = vmatpush.bf16.msrb.mxu2 %v1406_v46 }
  0x36   : >> { %848 = vmatpush.bf16.msrb.mxu3 %v1414_v47 }
  0x37   : >> { %673 = vmatpush.bf16.msrb.mxu1 %v1396_v48 }
  0x38   : >> { %594 = vmatpush.bf16.msrb.mxu0 %v1387_v51 }
  0x39   : >> { %758 = vmatpush.bf16.msrb.mxu2 %v1405_v52 }
  0x3a   : >> { %849 = vmatpush.bf16.msrb.mxu3 %v1413_v53 }
  0x3b   : >> { %674 = vmatpush.bf16.msrb.mxu1 %v1395_v54 }
  0x3c   : >> { %595 = vmatpush.bf16.msrb.mxu0 %v1386_v55 }
  0x3d   : >> { %759 = vmatpush.bf16.msrb.mxu2 %v1404_v56 }
  0x3e   : >> { %850 = vmatpush.bf16.msrb.mxu3 %v1412_v57 }
  0x3f   : >> { %675 = vmatpush.bf16.msrb.mxu1 %v1394_v58 }
  0x40   : >> { %596 = vmatpush.bf16.msrb.mxu0 %v1385_v59 }
  0x41   : >> { %760 = vmatpush.bf16.msrb.mxu2 %v1403_v60  ;;  %v942_v60 = vperm.slane %v1488_v0, 0 }
  0x42   : >> { %851 = vmatpush.bf16.msrb.mxu3 %v1411_v63 }
  0x43   : >> { %676 = vmatpush.bf16.msrb.mxu1 %v1393_v1 }
  0x44   : >> { %597 = vmatpush.bf16.msrb.mxu0 %v1384_v5 }
  0x45   : >> { %761 = vmatpush.bf16.msrb.mxu2 %v1402_v6 }
  0x46   : >> { %852 = vmatpush.bf16.msrb.mxu3 %v1410_v8 }
  0x47   : >> { %677 = vmatpush.bf16.msrb.mxu1 %v1392_v9 }
  0x48   : >> { %598 = vmatpush.bf16.msrb.mxu0 %v1383_v11 }
  0x49   : >> { %762 = vmatpush.bf16.msrb.mxu2 %v1401_v12 }
  0x4a   : >> { %853 = vmatpush.bf16.msrb.mxu3 %v1409_v14 }
  0x4b   : >> { %678 = vmatpush.bf16.msrb.mxu1 %v1391_v15 }
  0x4c   : >> { %599 = vmatpush.bf16.msrb.mxu0 %v1382_v18 }
  0x4d   : >> { %763 = vmatpush.bf16.msrb.mxu2 %v1400_v19 }
  0x4e   : >> { %854 = vmatpush.bf16.msrb.mxu3 %v1408_v23 }
  0x4f   : >> { %679 = vmatpush.bf16.msrb.mxu1 %v1390_v24  ;;  %600 = vmatmul.bf16.vlgmr.msrb.gmra.mxu0 %v542_v25 }
  0x50   : >> { %927 = vmatpush.bf16.msra.mxu0 %v1423_v20  ;;  %764 = vmatmul.bf16.vlgmr.msrb.gmra.mxu2 %v1239_v26 }
  0x51   : >> { %855 = vmatmul.bf16.vlgmr.msrb.gmra.mxu3 %v797_v28 }
  0x52   : >> { %680 = vmatmul.bf16.vlgmr.msrb.gmra.mxu1 %v622_v29 }
  0x54   : >> { %928 = vmatpush.bf16.msra.mxu0 %v1422_v27 }
  0x58   : >> { %929 = vmatpush.bf16.msra.mxu0 %v1421_v30 }
  0x5c   : >> { %930 = vmatpush.bf16.msra.mxu0 %v1420_v31 }
  0x60   : >> { %931 = vmatpush.bf16.msra.mxu0 %v1419_v32 }
  0x64   : >> { %932 = vmatpush.bf16.msra.mxu0 %v1418_v33 }
  0x68   : >> { %933 = vmatpush.bf16.msra.mxu0 %v1417_v34 }
  0x6c   : >> { %934 = vmatpush.bf16.msra.mxu0 %v1416_v35 }
  0x6f   : >> { %935 = vmatmul.bf16.vlgmr.msra.gmra.mxu0 %v877_v36 }
  0xac   : >> { %v286_v37 = vpop.f32.mrf.mxu0 }
  0xaf   : >> { %v347_v38 = vpop.f32.mrf.mxu1 }
  0xb0   : >> { %v348_v47 = vadd.f32 %v347_v38, %v286_v37 }
  0xb3   : >> { %v426_v39 = vpop.f32.mrf.mxu2 }
  0xb4   : >> { %v510_v40 = vpop.f32.mrf.mxu3  ;;  %v288_v41 = vpop.f32.mrf.mxu0  ;;  %v430_v49 = vadd.f32 %v426_v39, %v348_v47 }
  0xb6   : >> { %v514_v53 = vadd.f32 %v510_v40, %v430_v49 }
  0xb7   : >> { %v349_v42 = vpop.f32.mrf.mxu1 }
  0xbb   : >> { %v428_v43 = vpop.f32.mrf.mxu2 }
  0xbc   : >> { %v512_v44 = vpop.f32.mrf.mxu3 }
  0xcc   : >> { %v601_v45 = vpop.f32.mrf.mxu0 }
  0xcd   : >> { %v605_v55 = vadd.f32 %v601_v45, %v514_v53 }
  0xcf   : >> { %v681_v46 = vpop.f32.mrf.mxu1 }
  0xd0   : >> { %v685_v57 = vadd.f32 %v681_v46, %v605_v55 }
  0xd3   : >> { %v765_v48 = vpop.f32.mrf.mxu2 }
  0xd4   : >> { %v856_v50 = vpop.f32.mrf.mxu3  ;;  %v603_v51 = vpop.f32.mrf.mxu0  ;;  %v769_v58 = vadd.f32 %v765_v48, %v685_v57 }
  0xd6   : >> { %v860_v59 = vadd.f32 %v856_v50, %v769_v58 }
  0xd7   : >> { %v683_v52 = vpop.f32.mrf.mxu1 }
  0xdb   : >> { %v767_v54 = vpop.f32.mrf.mxu2 }
  0xdc   : >> { %v858_v56 = vpop.f32.mrf.mxu3 }
  0xec   : >> { %v936_v61 = vpop.f32.mrf.mxu0 }
  0xed   : >> { %v940_v62 = vadd.f32 %v936_v61, %v860_v59 }
  0xef   : >> { %v944_v63 = vadd.f32 %v942_v60, %v940_v62 }
  0xf1   : >> { %v945_v1 = vmax.f32 %v944_v63, 0.0  ;;  %176 = sbr.rel (!%p174_p4) target bundleno = 15 (0xf), region = 73 }
  0xf3   : >> { %v946_v2 = vpack.c.bf16 %v945_v1, %v945_v1 }
  0xf4   : >> { %v938_v3 = vpop.f32.mrf.mxu0 }
  0xf5   : >> { %949 = vst [vmem:[%s948_s11] sm:$0xf] %v946_v2 }
  0xf6 PF: > { %s13_s12 = sadd.s32 1, %s1451_s12  }
  0xf7   : > { %p10_p5 = scmp.ge.s32.totalorder %s13_s12, 4  }
  0xf9   :  { %12 = sbr.rel (!%p10_p5) target bundleno = 1 (0x1), region = 84 }

// kernel: deeplab_forward.18
= control target key start
LH: loop header
LB: loop body
LE: loop exit
PB: predicated region body
PF: predicated region fallthrough
CT: control target
= control target key end

     0   :  { %s1420_s12 = smov 0   ;;  %s1680_s0 = inlined_call_operand.vmem [shape: bf16[2,8,8,128], index: 0, kind: input, shape index: {}]   ;;  %s1681_s1 = inlined_call_operand.vmem [shape: bf16[1152,128], index: 1, kind: input, shape index: {}]   ;;  %s1682_s2 = inlined_call_operand.vmem [shape: f32[1,128], index: 2, kind: input, shape index: {}]   ;;  %s1683_s3 = inlined_call_operand.vmem [shape: bf16[2,4,4,128], index: 3, kind: output, shape index: {}]  }
   0x1 LB: > { %s989_s13 = sadd.s32 4294967295, %s1394_s12   ;;  %p993_p0 = scmp.ge.s32.totalorder %s1394_s12, 1  ;;  %s1394_s12 = sphi %s1420_s12, %s13_s12  }
   0x2   : > { %p137_p1 = scmp.lt.s32.totalorder %s1394_s12, 3 }
   0x4   : > { %p138_p2 = pnand %p993_p0, %p137_p1 }
   0x5   : > { %p161_p3 = scmp.lt.s32.totalorder (!%p138_p2), %s989_s13, 1  ;;  %s1443_s24 = smov (!%p138_p2), 0  }
   0x6   : > { %141 = sbr.rel (%p138_p2) target bundleno = 245 (0xf5), region = 32 }
   0xb   : > { %v1431_v0 = vld [vmem:[%s1682_s2] sm:$0x1]  ;;  %s1685_s13 = smov (!%p161_p3, %s989_s13), 1 }
   0xc   : > { %s1294_s16 = sshll.u32 %s1685_s13, 5  ;;  %s1295_s17 = sshll.u32 %s1685_s13, 3 }
   0xd   : > { %s1436_s20 = scalar_lea.vmem %s1680_s0, %s1294_s16  ;;  %s1441_s23 = scalar_lea.vmem %s1683_s3, %s1295_s17 }
   0xe LB: >> { %v1311_v1 = vld [vmem:[%s1681_s1 + $0x78] sm:$0xff]  ;;  %v1310_v5 = vld [vmem:[%s1681_s1 + $0x70] sm:$0xff]  ;;  %v1309_v9 = vld [vmem:[%s1681_s1 + $0x68] sm:$0xff]  ;;  %s998_s7 = sshll.u32 %s1398_s24, 2  ;;  %s1291_s8 = sshll.u32 %s1398_s24, 1  ;;  %s1398_s24 = sphi %s1443_s24, %s177_s24  }
   0xf   : >> { %v1319_v2 = vld [vmem:[%s1681_s1 + $0xb8] sm:$0xff]  ;;  %266 = vmatpush.bf16.msra.mxu0 %v1311_v1  ;;  %v1318_v6 = vld [vmem:[%s1681_s1 + $0xb0] sm:$0xff]  ;;  %v1317_v10 = vld [vmem:[%s1681_s1 + $0xa8] sm:$0xff]  ;;  %s1510_s17 = scalar_lea.vmem %s1436_s20, %s998_s7  ;;  %s917_s9 = scalar_lea.vmem %s1441_s23, %s1291_s8 }
  0x10   : >> { %v1327_v3 = vld [vmem:[%s1681_s1 + $0xf8] sm:$0xff]  ;;  %406 = vmatpush.bf16.msra.mxu2 %v1319_v2  ;;  %v1326_v7 = vld [vmem:[%s1681_s1 + $0xf0] sm:$0xff]  ;;  %v1325_v11 = vld [vmem:[%s1681_s1 + $0xe8] sm:$0xff]  ;;  %s177_s24 = sadd.s32 1, %s1398_s24  }
  0x11   : >> { %v1303_v4 = vld [vmem:[%s1681_s1 + $0x38] sm:$0xff]  ;;  %488 = vmatpush.bf16.msra.mxu3 %v1327_v3  ;;  %v1302_v8 = vld [vmem:[%s1681_s1 + $0x30] sm:$0xff]  ;;  %v1301_v12 = vld [vmem:[%s1681_s1 + $0x28] sm:$0xff]  ;;  %p174_p4 = scmp.ge.s32.totalorder %s177_s24, 4  }
  0x12   : >> { %327 = vmatpush.bf16.msra.mxu1 %v1303_v4  ;;  %v1308_v13 = vld [vmem:[%s1681_s1 + $0x60] sm:$0xff]  ;;  %v1307_v17 = vld [vmem:[%s1681_s1 + $0x58] sm:$0xff]  ;;  %v1306_v21 = vld [vmem:[%s1681_s1 + $0x50] sm:$0xff] }
  0x13   : >> { %267 = vmatpush.bf16.msra.mxu0 %v1310_v5  ;;  %v1316_v14 = vld [vmem:[%s1681_s1 + $0xa0] sm:$0xff]  ;;  %v1315_v18 = vld [vmem:[%s1681_s1 + $0x98] sm:$0xff]  ;;  %v1314_v22 = vld [vmem:[%s1681_s1 + $0x90] sm:$0xff] }
  0x14   : >> { %407 = vmatpush.bf16.msra.mxu2 %v1318_v6  ;;  %v1324_v15 = vld [vmem:[%s1681_s1 + $0xe0] sm:$0xff]  ;;  %v1323_v19 = vld [vmem:[%s1681_s1 + $0xd8] sm:$0xff]  ;;  %v1322_v23 = vld [vmem:[%s1681_s1 + $0xd0] sm:$0xff] }
  0x15   : >> { %489 = vmatpush.bf16.msra.mxu3 %v1326_v7  ;;  %v1300_v16 = vld [vmem:[%s1681_s1 + $0x20] sm:$0xff]  ;;  %v1299_v20 = vld [vmem:[%s1681_s1 + $0x18] sm:$0xff]  ;;  %v1298_v24 = vld [vmem:[%s1681_s1 + $0x10] sm:$0xff] }
  0x16   : >> { %328 = vmatpush.bf16.msra.mxu1 %v1302_v8  ;;  %v180_v25 = vld [vmem:[%s1510_s17] sm:$0xf]  ;;  %v1305_v26 = vld [vmem:[%s1681_s1 + $0x48] sm:$0xff]  ;;  %v1335_v34 = vld [vmem:[%s1681_s1 + $0x138] sm:$0xff] }
  0x17   : >> { %268 = vmatpush.bf16.msra.mxu0 %v1309_v9  ;;  %v1313_v27 = vld [vmem:[%s1681_s1 + $0x88] sm:$0xff]  ;;  %v214_v28 = vunpack.c.l.b16 %v180_v25  ;;  %v1304_v31 = vld [vmem:[%s1681_s1 + $0x40] sm:$0xff]  ;;  %v1351_v35 = vld [vmem:[%s1681_s1 + $0x1b8] sm:$0xff] }
  0x18   : >> { %408 = vmatpush.bf16.msra.mxu2 %v1317_v10  ;;  %v1321_v29 = vld [vmem:[%s1681_s1 + $0xc8] sm:$0xff]  ;;  %v1312_v32 = vld [vmem:[%s1681_s1 + $0x80] sm:$0xff]  ;;  %v1359_v38 = vld [vmem:[%s1681_s1 + $0x1f8] sm:$0xff] }
  0x19   : >> { %490 = vmatpush.bf16.msra.mxu3 %v1325_v11  ;;  %v1297_v30 = vld [vmem:[%s1681_s1 + $0x8] sm:$0xff]  ;;  %v215_v33 = vpack.c.b16 %v214_v28, %v214_v28  ;;  %v1320_v36 = vld [vmem:[%s1681_s1 + $0xc0] sm:$0xff]  ;;  %v1343_v39 = vld [vmem:[%s1681_s1 + $0x178] sm:$0xff] }
  0x1a   : >> { %329 = vmatpush.bf16.msra.mxu1 %v1301_v12  ;;  %v1296_v37 = vld [vmem:[%s1681_s1] sm:$0xff]  ;;  %v1334_v42 = vld [vmem:[%s1681_s1 + $0x130] sm:$0xff]  ;;  %v1096_v46 = vld [vmem:[%s1510_s17 + $0x8] sm:$0xf] }
  0x1b   : >> { %269 = vmatpush.bf16.msra.mxu0 %v1308_v13  ;;  %v356_v40 = vrot.slane %v215_v33, 2  ;;  %v216_v41 = vrot.slane %v215_v33, 1  ;;  %v1350_v43 = vld [vmem:[%s1681_s1 + $0x1b0] sm:$0xff]  ;;  %v1333_v47 = vld [vmem:[%s1681_s1 + $0x128] sm:$0xff]  ;;  %v1332_v51 = vld [vmem:[%s1681_s1 + $0x120] sm:$0xff]  ;;  %v519_v1 = vunpack.c.l.b16 %v1096_v46 }
  0x1c   : >> { %409 = vmatpush.bf16.msra.mxu2 %v1316_v14  ;;  %v1358_v44 = vld [vmem:[%s1681_s1 + $0x1f0] sm:$0xff]  ;;  %v1349_v48 = vld [vmem:[%s1681_s1 + $0x1a8] sm:$0xff]  ;;  %v1348_v52 = vld [vmem:[%s1681_s1 + $0x1a0] sm:$0xff] }
  0x1d   : >> { %491 = vmatpush.bf16.msra.mxu3 %v1324_v15  ;;  %v1342_v45 = vld [vmem:[%s1681_s1 + $0x170] sm:$0xff]  ;;  %v1357_v49 = vld [vmem:[%s1681_s1 + $0x1e8] sm:$0xff]  ;;  %v1356_v53 = vld [vmem:[%s1681_s1 + $0x1e0] sm:$0xff]  ;;  %v520_v7 = vpack.c.b16 %v519_v1, %v519_v1 }
  0x1e   : >> { %330 = vmatpush.bf16.msra.mxu1 %v1300_v16  ;;  %v1341_v50 = vld [vmem:[%s1681_s1 + $0x168] sm:$0xff]  ;;  %v1340_v54 = vld [vmem:[%s1681_s1 + $0x160] sm:$0xff]  ;;  %v1331_v55 = vld [vmem:[%s1681_s1 + $0x118] sm:$0xff] }
  0x1f   : >> { %270 = vmatpush.bf16.msra.mxu0 %v1307_v17  ;;  %v1347_v56 = vld [vmem:[%s1681_s1 + $0x198] sm:$0xff]  ;;  %v1330_v59 = vld [vmem:[%s1681_s1 + $0x110] sm:$0xff]  ;;  %v1329_v2 = vld [vmem:[%s1681_s1 + $0x108] sm:$0xff]  ;;  %v521_v14 = vrot.slane %v520_v7, 1  ;;  %v601_v17 = vrot.slane %v520_v7, 2 }
  0x20   : >> { %410 = vmatpush.bf16.msra.mxu2 %v1315_v18  ;;  %v1355_v57 = vld [vmem:[%s1681_s1 + $0x1d8] sm:$0xff]  ;;  %v1346_v60 = vld [vmem:[%s1681_s1 + $0x190] sm:$0xff]  ;;  %v1345_v3 = vld [vmem:[%s1681_s1 + $0x188] sm:$0xff] }
  0x21   : >> { %492 = vmatpush.bf16.msra.mxu3 %v1323_v19  ;;  %v1339_v58 = vld [vmem:[%s1681_s1 + $0x158] sm:$0xff]  ;;  %v1354_v61 = vld [vmem:[%s1681_s1 + $0x1d0] sm:$0xff]  ;;  %v1353_v5 = vld [vmem:[%s1681_s1 + $0x1c8] sm:$0xff] }
  0x22   : >> { %331 = vmatpush.bf16.msra.mxu1 %v1299_v20  ;;  %v1338_v62 = vld [vmem:[%s1681_s1 + $0x150] sm:$0xff]  ;;  %v1337_v6 = vld [vmem:[%s1681_s1 + $0x148] sm:$0xff]  ;;  %v1328_v8 = vld [vmem:[%s1681_s1 + $0x100] sm:$0xff] }
  0x23   : >> { %271 = vmatpush.bf16.msra.mxu0 %v1306_v21  ;;  %v1194_v63 = vld [vmem:[%s1510_s17 + $0x10] sm:$0xf]  ;;  %v1344_v9 = vld [vmem:[%s1681_s1 + $0x180] sm:$0xff]  ;;  %v1367_v10 = vld [vmem:[%s1681_s1 + $0x238] sm:$0xff] }
  0x24   : >> { %411 = vmatpush.bf16.msra.mxu2 %v1314_v22  ;;  %v764_v4 = vunpack.c.l.b16 %v1194_v63  ;;  %v1352_v12 = vld [vmem:[%s1681_s1 + $0x1c0] sm:$0xff]  ;;  %v1366_v15 = vld [vmem:[%s1681_s1 + $0x230] sm:$0xff]  ;;  %v1365_v18 = vld [vmem:[%s1681_s1 + $0x228] sm:$0xff] }
  0x25   : >> { %493 = vmatpush.bf16.msra.mxu3 %v1322_v23  ;;  %v1336_v13 = vld [vmem:[%s1681_s1 + $0x140] sm:$0xff]  ;;  %v1363_v20 = vld [vmem:[%s1681_s1 + $0x218] sm:$0xff]  ;;  %v1362_v21 = vld [vmem:[%s1681_s1 + $0x210] sm:$0xff] }
  0x26   : >> { %332 = vmatpush.bf16.msra.mxu1 %v1298_v24  ;;  %v765_v11 = vpack.c.b16 %v764_v4, %v764_v4  ;;  %v1364_v19 = vld [vmem:[%s1681_s1 + $0x220] sm:$0xff]  ;;  %v1361_v22 = vld [vmem:[%s1681_s1 + $0x208] sm:$0xff] }
  0x27   : >> { %272 = vmatpush.bf16.msra.mxu0 %v1305_v26  ;;  %v1360_v23 = vld [vmem:[%s1681_s1 + $0x200] sm:$0xff] }
  0x28   : >> { %412 = vmatpush.bf16.msra.mxu2 %v1313_v27  ;;  %v766_v16 = vrot.slane %v765_v11, 1  ;;  %v846_v24 = vrot.slane %v765_v11, 2 }
  0x29   : >> { %494 = vmatpush.bf16.msra.mxu3 %v1321_v29 }
  0x2a   : >> { %333 = vmatpush.bf16.msra.mxu1 %v1297_v30 }
  0x2b   : >> { %273 = vmatpush.bf16.msra.mxu0 %v1304_v31 }
  0x2c   : >> { %413 = vmatpush.bf16.msra.mxu2 %v1312_v32 }
  0x2d   : >> { %495 = vmatpush.bf16.msra.mxu3 %v1320_v36 }
  0x2e   : >> { %334 = vmatpush.bf16.msra.mxu1 %v1296_v37  ;;  %274 = vmatmul.bf16.vlgmr.msra.gmra.mxu0 %v216_v41 }
  0x2f   : >> { %571 = vmatpush.bf16.msrb.mxu0 %v1335_v34  ;;  %414 = vmatmul.bf16.vlgmr.msra.gmra.mxu2 %v356_v40 }
  0x30   : >> { %733 = vmatpush.bf16.msrb.mxu2 %v1351_v35  ;;  %496 = vmatmul.bf16.vlgmr.msra.gmra.mxu3 %v1096_v46 }
  0x31   : >> { %816 = vmatpush.bf16.msrb.mxu3 %v1359_v38  ;;  %335 = vmatmul.bf16.vlgmr.msra.gmra.mxu1 %v180_v25 }
  0x32   : >> { %651 = vmatpush.bf16.msrb.mxu1 %v1343_v39 }
  0x33   : >> { %572 = vmatpush.bf16.msrb.mxu0 %v1334_v42 }
  0x34   : >> { %734 = vmatpush.bf16.msrb.mxu2 %v1350_v43 }
  0x35   : >> { %817 = vmatpush.bf16.msrb.mxu3 %v1358_v44 }
  0x36   : >> { %652 = vmatpush.bf16.msrb.mxu1 %v1342_v45 }
  0x37   : >> { %573 = vmatpush.bf16.msrb.mxu0 %v1333_v47 }
  0x38   : >> { %735 = vmatpush.bf16.msrb.mxu2 %v1349_v48  ;;  %v911_v48 = vperm.slane %v1431_v0, 0 }
  0x39   : >> { %818 = vmatpush.bf16.msrb.mxu3 %v1357_v49 }
  0x3a   : >> { %653 = vmatpush.bf16.msrb.mxu1 %v1341_v50 }
  0x3b   : >> { %574 = vmatpush.bf16.msrb.mxu0 %v1332_v51 }
  0x3c   : >> { %736 = vmatpush.bf16.msrb.mxu2 %v1348_v52 }
  0x3d   : >> { %819 = vmatpush.bf16.msrb.mxu3 %v1356_v53 }
  0x3e   : >> { %654 = vmatpush.bf16.msrb.mxu1 %v1340_v54 }
  0x3f   : >> { %575 = vmatpush.bf16.msrb.mxu0 %v1331_v55 }
  0x40   : >> { %737 = vmatpush.bf16.msrb.mxu2 %v1347_v56 }
  0x41   : >> { %820 = vmatpush.bf16.msrb.mxu3 %v1355_v57 }
  0x42   : >> { %655 = vmatpush.bf16.msrb.mxu1 %v1339_v58 }
  0x43   : >> { %576 = vmatpush.bf16.msrb.mxu0 %v1330_v59 }
  0x44   : >> { %738 = vmatpush.bf16.msrb.mxu2 %v1346_v60 }
  0x45   : >> { %821 = vmatpush.bf16.msrb.mxu3 %v1354_v61 }
  0x46   : >> { %656 = vmatpush.bf16.msrb.mxu1 %v1338_v62 }
  0x47   : >> { %577 = vmatpush.bf16.msrb.mxu0 %v1329_v2 }
  0x48   : >> { %739 = vmatpush.bf16.msrb.mxu2 %v1345_v3 }
  0x49   : >> { %822 = vmatpush.bf16.msrb.mxu3 %v1353_v5 }
  0x4a   : >> { %657 = vmatpush.bf16.msrb.mxu1 %v1337_v6 }
  0x4b   : >> { %578 = vmatpush.bf16.msrb.mxu0 %v1328_v8 }
  0x4c   : >> { %740 = vmatpush.bf16.msrb.mxu2 %v1344_v9 }
  0x4d   : >> { %823 = vmatpush.bf16.msrb.mxu3 %v1352_v12 }
  0x4e   : >> { %658 = vmatpush.bf16.msrb.mxu1 %v1336_v13  ;;  %579 = vmatmul.bf16.vlgmr.msrb.gmra.mxu0 %v521_v14 }
  0x4f   : >> { %896 = vmatpush.bf16.msra.mxu0 %v1367_v10  ;;  %741 = vmatmul.bf16.vlgmr.msrb.gmra.mxu2 %v1194_v63 }
  0x50   : >> { %824 = vmatmul.bf16.vlgmr.msrb.gmra.mxu3 %v766_v16 }
  0x51   : >> { %659 = vmatmul.bf16.vlgmr.msrb.gmra.mxu1 %v601_v17 }
  0x53   : >> { %897 = vmatpush.bf16.msra.mxu0 %v1366_v15 }
  0x57   : >> { %898 = vmatpush.bf16.msra.mxu0 %v1365_v18 }
  0x5b   : >> { %899 = vmatpush.bf16.msra.mxu0 %v1364_v19 }
  0x5f   : >> { %900 = vmatpush.bf16.msra.mxu0 %v1363_v20 }
  0x63   : >> { %901 = vmatpush.bf16.msra.mxu0 %v1362_v21 }
  0x67   : >> { %902 = vmatpush.bf16.msra.mxu0 %v1361_v22 }
  0x6b   : >> { %903 = vmatpush.bf16.msra.mxu0 %v1360_v23 }
  0x6e   : >> { %904 = vmatmul.bf16.vlgmr.msra.gmra.mxu0 %v846_v24 }
  0xab   : >> { %v275_v25 = vpop.f32.mrf.mxu0 }
  0xae   : >> { %v336_v26 = vpop.f32.mrf.mxu1 }
  0xaf   : >> { %v337_v35 = vadd.f32 %v336_v26, %v275_v25 }
  0xb2   : >> { %v415_v27 = vpop.f32.mrf.mxu2 }
  0xb3   : >> { %v497_v28 = vpop.f32.mrf.mxu3  ;;  %v277_v29 = vpop.f32.mrf.mxu0  ;;  %v419_v37 = vadd.f32 %v415_v27, %v337_v35 }
  0xb5   : >> { %v501_v41 = vadd.f32 %v497_v28, %v419_v37 }
  0xb6   : >> { %v338_v30 = vpop.f32.mrf.mxu1 }
  0xba   : >> { %v417_v31 = vpop.f32.mrf.mxu2 }
  0xbb   : >> { %v499_v32 = vpop.f32.mrf.mxu3 }
  0xcb   : >> { %v580_v33 = vpop.f32.mrf.mxu0 }
  0xcc   : >> { %v584_v43 = vadd.f32 %v580_v33, %v501_v41 }
  0xce   : >> { %v660_v34 = vpop.f32.mrf.mxu1 }
  0xcf   : >> { %v664_v45 = vadd.f32 %v660_v34, %v584_v43 }
  0xd2   : >> { %v742_v36 = vpop.f32.mrf.mxu2 }
  0xd3   : >> { %v825_v38 = vpop.f32.mrf.mxu3  ;;  %v582_v39 = vpop.f32.mrf.mxu0  ;;  %v746_v46 = vadd.f32 %v742_v36, %v664_v45 }
  0xd5   : >> { %v829_v47 = vadd.f32 %v825_v38, %v746_v46 }
  0xd6   : >> { %v662_v40 = vpop.f32.mrf.mxu1 }
  0xda   : >> { %v744_v42 = vpop.f32.mrf.mxu2 }
  0xdb   : >> { %v827_v44 = vpop.f32.mrf.mxu3 }
  0xeb   : >> { %v905_v49 = vpop.f32.mrf.mxu0 }
  0xec   : >> { %v909_v50 = vadd.f32 %v905_v49, %v829_v47 }
  0xee   : >> { %v913_v51 = vadd.f32 %v911_v48, %v909_v50 }
  0xf0   : >> { %v914_v52 = vmax.f32 %v913_v51, 0.0  ;;  %176 = sbr.rel (!%p174_p4) target bundleno = 14 (0xe), region = 73 }
  0xf2   : >> { %v915_v53 = vpack.c.bf16 %v914_v52, %v914_v52 }
  0xf3   : >> { %v907_v54 = vpop.f32.mrf.mxu0 }
  0xf4   : >> { %918 = vst [vmem:[%s917_s9] sm:$0x3] %v915_v53 }
  0xf5 PF: > { %s13_s12 = sadd.s32 1, %s1394_s12  }
  0xf6   : > { %p10_p5 = scmp.ge.s32.totalorder %s13_s12, 4  }
  0xf8   :  { %12 = sbr.rel (!%p10_p5) target bundleno = 1 (0x1), region = 84 }

// kernel: deeplab_forward.19
= control target key start
LH: loop header
LB: loop body
LE: loop exit
PB: predicated region body
PF: predicated region fallthrough
CT: control target
= control target key end

     0   :  { %s759_s1 = inlined_call_operand.vmem [shape: bf16[128,512], index: 1, kind: input, shape index: {}]   ;;  %s760_s0 = inlined_call_operand.vmem [shape: bf16[32,128], index: 0, kind: input, shape index: {}]   ;;  %s761_s2 = inlined_call_operand.vmem [shape: f32[1,512], index: 2, kind: input, shape index: {}]   ;;  %s762_s3 = inlined_call_operand.vmem [shape: bf16[32,512], index: 3, kind: output, shape index: {}]  }
   0x1   :  { %v466_v0 = vld [vmem:[%s759_s1 + $0xe0] sm:$0xf]  ;;  %v512_v1 = vld [vmem:[%s759_s1 + $0xec] sm:$0xf0]  ;;  %v510_v2 = vld [vmem:[%s759_s1 + $0xe4] sm:$0xf] }
   0x2   :  { %v467_v3 = vor.u32 %v512_v1, %v466_v0  ;;  %v468_v4 = vld [vmem:[%s759_s1 + $0xf0] sm:$0xf0]  ;;  %v474_v5 = vld [vmem:[%s759_s1 + $0xe8] sm:$0xf]  ;;  %v513_v6 = vld [vmem:[%s759_s1 + $0xf4] sm:$0xf0] }
   0x3   :  { %v471_v7 = vor.u32 %v510_v2, %v468_v4  ;;  %v475_v8 = vor.u32 %v513_v6, %v474_v5  ;;  %v511_v9 = vld [vmem:[%s759_s1 + $0xec] sm:$0xf]  ;;  %v476_v10 = vld [vmem:[%s759_s1 + $0xf8] sm:$0xf0]  ;;  %v450_v11 = vld [vmem:[%s759_s1 + $0xc0] sm:$0xf] }
   0x4   :  { %232 = vmatpush.bf16.msra.mxu0 %v467_v3  ;;  %v479_v12 = vor.u32 %v511_v9, %v476_v10  ;;  %v508_v13 = vld [vmem:[%s759_s1 + $0xcc] sm:$0xf0]  ;;  %v506_v14 = vld [vmem:[%s759_s1 + $0xc4] sm:$0xf]  ;;  %v452_v15 = vld [vmem:[%s759_s1 + $0xd0] sm:$0xf0] }
   0x5   :  { %251 = vmatpush.bf16.msra.mxu1 %v471_v7  ;;  %270 = vmatpush.bf16.msra.mxu2 %v475_v8  ;;  %v451_v16 = vor.u32 %v508_v13, %v450_v11  ;;  %v455_v17 = vor.u32 %v506_v14, %v452_v15  ;;  %v458_v18 = vld [vmem:[%s759_s1 + $0xc8] sm:$0xf]  ;;  %v509_v19 = vld [vmem:[%s759_s1 + $0xd4] sm:$0xf0]  ;;  %v507_v20 = vld [vmem:[%s759_s1 + $0xcc] sm:$0xf] }
   0x6   :  { %289 = vmatpush.bf16.msra.mxu3 %v479_v12  ;;  %v459_v21 = vor.u32 %v509_v19, %v458_v18  ;;  %v460_v22 = vld [vmem:[%s759_s1 + $0xd8] sm:$0xf0]  ;;  %v434_v23 = vld [vmem:[%s759_s1 + $0xa0] sm:$0xf]  ;;  %v504_v24 = vld [vmem:[%s759_s1 + $0xac] sm:$0xf0] }
   0x7   :  { %v463_v25 = vor.u32 %v507_v20, %v460_v22  ;;  %v502_v26 = vld [vmem:[%s759_s1 + $0xa4] sm:$0xf]  ;;  %v436_v27 = vld [vmem:[%s759_s1 + $0xb0] sm:$0xf0]  ;;  %v442_v28 = vld [vmem:[%s759_s1 + $0xa8] sm:$0xf]  ;;  %v435_v29 = vor.u32 %v504_v24, %v434_v23 }
   0x8   :  { %233 = vmatpush.bf16.msra.mxu0 %v451_v16  ;;  %v505_v30 = vld [vmem:[%s759_s1 + $0xb4] sm:$0xf0]  ;;  %v503_v31 = vld [vmem:[%s759_s1 + $0xac] sm:$0xf]  ;;  %v444_v32 = vld [vmem:[%s759_s1 + $0xb8] sm:$0xf0]  ;;  %v439_v33 = vor.u32 %v502_v26, %v436_v27 }
   0x9   :  { %252 = vmatpush.bf16.msra.mxu1 %v455_v17  ;;  %271 = vmatpush.bf16.msra.mxu2 %v459_v21  ;;  %v443_v34 = vor.u32 %v505_v30, %v442_v28  ;;  %v418_v35 = vld [vmem:[%s759_s1 + $0x80] sm:$0xf]  ;;  %v500_v36 = vld [vmem:[%s759_s1 + $0x8c] sm:$0xf0]  ;;  %v498_v37 = vld [vmem:[%s759_s1 + $0x84] sm:$0xf]  ;;  %v447_v38 = vor.u32 %v503_v31, %v444_v32 }
   0xa   :  { %290 = vmatpush.bf16.msra.mxu3 %v463_v25  ;;  %v420_v39 = vld [vmem:[%s759_s1 + $0x90] sm:$0xf0]  ;;  %v426_v40 = vld [vmem:[%s759_s1 + $0x88] sm:$0xf]  ;;  %v501_v41 = vld [vmem:[%s759_s1 + $0x94] sm:$0xf0]  ;;  %v419_v44 = vor.u32 %v500_v36, %v418_v35 }
   0xb   :  { %v499_v42 = vld [vmem:[%s759_s1 + $0x8c] sm:$0xf]  ;;  %v428_v43 = vld [vmem:[%s759_s1 + $0x98] sm:$0xf0]  ;;  %v423_v45 = vor.u32 %v498_v37, %v420_v39  ;;  %v427_v46 = vor.u32 %v501_v41, %v426_v40  ;;  %v402_v47 = vld [vmem:[%s759_s1 + $0x60] sm:$0xf] }
   0xc   :  { %234 = vmatpush.bf16.msra.mxu0 %v435_v29  ;;  %v496_v48 = vld [vmem:[%s759_s1 + $0x6c] sm:$0xf0]  ;;  %v494_v49 = vld [vmem:[%s759_s1 + $0x64] sm:$0xf]  ;;  %v431_v50 = vor.u32 %v499_v42, %v428_v43  ;;  %v404_v51 = vld [vmem:[%s759_s1 + $0x70] sm:$0xf0] }
   0xd   :  { %253 = vmatpush.bf16.msra.mxu1 %v439_v33  ;;  %272 = vmatpush.bf16.msra.mxu2 %v443_v34  ;;  %v410_v52 = vld [vmem:[%s759_s1 + $0x68] sm:$0xf]  ;;  %v497_v53 = vld [vmem:[%s759_s1 + $0x74] sm:$0xf0]  ;;  %v495_v54 = vld [vmem:[%s759_s1 + $0x6c] sm:$0xf]  ;;  %v403_v56 = vor.u32 %v496_v48, %v402_v47  ;;  %v407_v57 = vor.u32 %v494_v49, %v404_v51 }
   0xe   :  { %291 = vmatpush.bf16.msra.mxu3 %v447_v38  ;;  %v412_v55 = vld [vmem:[%s759_s1 + $0x78] sm:$0xf0]  ;;  %v411_v58 = vor.u32 %v497_v53, %v410_v52  ;;  %v386_v59 = vld [vmem:[%s759_s1 + $0x40] sm:$0xf]  ;;  %v492_v60 = vld [vmem:[%s759_s1 + $0x4c] sm:$0xf0] }
   0xf   :  { %v490_v61 = vld [vmem:[%s759_s1 + $0x44] sm:$0xf]  ;;  %v415_v62 = vor.u32 %v495_v54, %v412_v55  ;;  %v388_v63 = vld [vmem:[%s759_s1 + $0x50] sm:$0xf0]  ;;  %v394_v0 = vld [vmem:[%s759_s1 + $0x48] sm:$0xf]  ;;  %v387_v4 = vor.u32 %v492_v60, %v386_v59 }
  0x10   :  { %235 = vmatpush.bf16.msra.mxu0 %v419_v44  ;;  %v493_v1 = vld [vmem:[%s759_s1 + $0x54] sm:$0xf0]  ;;  %v491_v2 = vld [vmem:[%s759_s1 + $0x4c] sm:$0xf]  ;;  %v396_v3 = vld [vmem:[%s759_s1 + $0x58] sm:$0xf0]  ;;  %v391_v5 = vor.u32 %v490_v61, %v388_v63 }
  0x11   :  { %254 = vmatpush.bf16.msra.mxu1 %v423_v45  ;;  %273 = vmatpush.bf16.msra.mxu2 %v427_v46  ;;  %v395_v6 = vor.u32 %v493_v1, %v394_v0  ;;  %v370_v7 = vld [vmem:[%s759_s1 + $0x20] sm:$0xf]  ;;  %v488_v8 = vld [vmem:[%s759_s1 + $0x2c] sm:$0xf0]  ;;  %v486_v9 = vld [vmem:[%s759_s1 + $0x24] sm:$0xf]  ;;  %v399_v10 = vor.u32 %v491_v2, %v396_v3 }
  0x12   :  { %292 = vmatpush.bf16.msra.mxu3 %v431_v50  ;;  %v372_v11 = vld [vmem:[%s759_s1 + $0x30] sm:$0xf0]  ;;  %v378_v12 = vld [vmem:[%s759_s1 + $0x28] sm:$0xf]  ;;  %v489_v13 = vld [vmem:[%s759_s1 + $0x34] sm:$0xf0]  ;;  %v371_v16 = vor.u32 %v488_v8, %v370_v7 }
  0x13   :  { %v487_v14 = vld [vmem:[%s759_s1 + $0x2c] sm:$0xf]  ;;  %v380_v15 = vld [vmem:[%s759_s1 + $0x38] sm:$0xf0]  ;;  %v375_v17 = vor.u32 %v486_v9, %v372_v11  ;;  %v379_v18 = vor.u32 %v489_v13, %v378_v12  ;;  %v354_v19 = vld [vmem:[%s759_s1] sm:$0xf] }
  0x14   :  { %236 = vmatpush.bf16.msra.mxu0 %v403_v56  ;;  %v484_v20 = vld [vmem:[%s759_s1 + $0xc] sm:$0xf0]  ;;  %v482_v21 = vld [vmem:[%s759_s1 + $0x4] sm:$0xf]  ;;  %v383_v22 = vor.u32 %v487_v14, %v380_v15  ;;  %v356_v23 = vld [vmem:[%s759_s1 + $0x10] sm:$0xf0] }
  0x15   :  { %255 = vmatpush.bf16.msra.mxu1 %v407_v57  ;;  %274 = vmatpush.bf16.msra.mxu2 %v411_v58  ;;  %v362_v24 = vld [vmem:[%s759_s1 + $0x8] sm:$0xf]  ;;  %v485_v25 = vld [vmem:[%s759_s1 + $0x14] sm:$0xf0]  ;;  %v483_v26 = vld [vmem:[%s759_s1 + $0xc] sm:$0xf]  ;;  %v355_v28 = vor.u32 %v484_v20, %v354_v19  ;;  %v359_v29 = vor.u32 %v482_v21, %v356_v23 }
  0x16   :  { %293 = vmatpush.bf16.msra.mxu3 %v415_v62  ;;  %v364_v27 = vld [vmem:[%s759_s1 + $0x18] sm:$0xf0]  ;;  %v363_v30 = vor.u32 %v485_v25, %v362_v24  ;;  %v480_v32 = vld [vmem:[%s760_s0] sm:$0xff]  ;;  %v481_v33 = vld [vmem:[%s760_s0 + $0x8] sm:$0xff] }
  0x17   :  { %v367_v31 = vor.u32 %v483_v26, %v364_v27  ;;  %v50_v34 = vld [vmem:[%s761_s2] sm:$0xf] }
  0x18   :  { %237 = vmatpush.bf16.msra.mxu0 %v387_v4  ;;  %v52_v35 = vperm.slane %v50_v34, 0  ;;  %v53_v36 = vperm.slane %v50_v34, 1  ;;  %v54_v43 = vperm.slane %v50_v34, 2  ;;  %v55_v44 = vperm.slane %v50_v34, 3 }
  0x19   :  { %256 = vmatpush.bf16.msra.mxu1 %v391_v5  ;;  %275 = vmatpush.bf16.msra.mxu2 %v395_v6 }
  0x1a   :  { %294 = vmatpush.bf16.msra.mxu3 %v399_v10 }
  0x1c   :  { %238 = vmatpush.bf16.msra.mxu0 %v371_v16 }
  0x1d   :  { %257 = vmatpush.bf16.msra.mxu1 %v375_v17  ;;  %276 = vmatpush.bf16.msra.mxu2 %v379_v18 }
  0x1e   :  { %295 = vmatpush.bf16.msra.mxu3 %v383_v22 }
  0x20   :  { %239 = vmatpush.bf16.msra.mxu0 %v355_v28 }
  0x21   :  { %258 = vmatpush.bf16.msra.mxu1 %v359_v29  ;;  %277 = vmatpush.bf16.msra.mxu2 %v363_v30 }
  0x22   :  { %296 = vmatpush.bf16.msra.mxu3 %v367_v31 }
  0x23   :  { %240 = vmatmul.bf16.vlgmr.msra.gmra.mxu0 %v480_v32 }
  0x24   :  { %259 = vmatmul.bf16.vlgmr.msra.gmra.mxu1 %v480_v32  ;;  %278 = vmatmul.bf16.vlgmr.msra.gmra.mxu2 %v480_v32 }
  0x25   :  { %297 = vmatmul.bf16.vlgmr.msra.gmra.mxu3 %v480_v32 }
  0x33   :  { %245 = vmatmul.bf16.gmra.mxu0 %v481_v33 }
  0x34   :  { %264 = vmatmul.bf16.gmra.mxu1 %v481_v33  ;;  %283 = vmatmul.bf16.gmra.mxu2 %v481_v33 }
  0x35   :  { %302 = vmatmul.bf16.gmra.mxu3 %v481_v33 }
  0xa0   :  { %v241_v37 = vpop.f32.mrf.mxu0 }
  0xa1   :  { %v242_v38 = vadd.f32 %v241_v37, %v52_v35  ;;  %v260_v39 = vpop.f32.mrf.mxu1 }
  0xa2   :  { %v261_v40 = vadd.f32 %v260_v39, %v53_v36 }
  0xa3   :  { %v308_v41 = vmax.f32 %v242_v38, 0.0 }
  0xa4   :  { %v309_v42 = vmax.f32 %v261_v40, 0.0 }
  0xa6   :  { %v324_v45 = vpack.c.bf16 %v309_v42, %v308_v41 }
  0xa7   :  { %v279_v46 = vpop.f32.mrf.mxu2 }
  0xa8   :  { %332 = vst [vmem:[%s762_s3] sm:$0xff] %v324_v45  ;;  %v280_v47 = vadd.f32 %v279_v46, %v54_v43  ;;  %v298_v48 = vpop.f32.mrf.mxu3  ;;  %v243_v49 = vpop.f32.mrf.mxu0 }
  0xa9   :  { %v299_v50 = vadd.f32 %v298_v48, %v55_v44  ;;  %v244_v51 = vadd.f32 %v243_v49, %v52_v35  ;;  %v262_v52 = vpop.f32.mrf.mxu1 }
  0xaa   :  { %v310_v53 = vmax.f32 %v280_v47, 0.0  ;;  %v263_v54 = vadd.f32 %v262_v52, %v53_v36 }
  0xab   :  { %v311_v55 = vmax.f32 %v299_v50, 0.0  ;;  %v312_v56 = vmax.f32 %v244_v51, 0.0 }
  0xac   :  { %v313_v57 = vmax.f32 %v263_v54, 0.0 }
  0xad   :  { %v325_v58 = vpack.c.bf16 %v311_v55, %v310_v53 }
  0xae   :  { %v326_v59 = vpack.c.bf16 %v313_v57, %v312_v56 }
  0xaf   :  { %333 = vst [vmem:[%s762_s3 + $0x8] sm:$0xff] %v325_v58  ;;  %v281_v60 = vpop.f32.mrf.mxu2 }
  0xb0   :  { %334 = vst [vmem:[%s762_s3 + $0x10] sm:$0xff] %v326_v59  ;;  %v282_v61 = vadd.f32 %v281_v60, %v54_v43  ;;  %v300_v62 = vpop.f32.mrf.mxu3  ;;  %v246_v63 = vpop.f32.mrf.mxu0 }
  0xb1   :  { %v301_v0 = vadd.f32 %v300_v62, %v55_v44  ;;  %v247_v1 = vadd.f32 %v246_v63, %v52_v35  ;;  %v265_v2 = vpop.f32.mrf.mxu1 }
  0xb2   :  { %v314_v3 = vmax.f32 %v282_v61, 0.0  ;;  %v266_v4 = vadd.f32 %v265_v2, %v53_v36 }
  0xb3   :  { %v315_v5 = vmax.f32 %v301_v0, 0.0  ;;  %v316_v6 = vmax.f32 %v247_v1, 0.0 }
  0xb4   :  { %v317_v7 = vmax.f32 %v266_v4, 0.0 }
  0xb5   :  { %v327_v8 = vpack.c.bf16 %v315_v5, %v314_v3 }
  0xb6   :  { %v328_v9 = vpack.c.bf16 %v317_v7, %v316_v6 }
  0xb7   :  { %335 = vst [vmem:[%s762_s3 + $0x18] sm:$0xff] %v327_v8  ;;  %v284_v10 = vpop.f32.mrf.mxu2 }
  0xb8   :  { %336 = vst [vmem:[%s762_s3 + $0x20] sm:$0xff] %v328_v9  ;;  %v285_v11 = vadd.f32 %v284_v10, %v54_v43  ;;  %v303_v12 = vpop.f32.mrf.mxu3  ;;  %v248_v13 = vpop.f32.mrf.mxu0 }
  0xb9   :  { %v304_v14 = vadd.f32 %v303_v12, %v55_v44  ;;  %v249_v15 = vadd.f32 %v248_v13, %v52_v35  ;;  %v267_v16 = vpop.f32.mrf.mxu1 }
  0xba   :  { %v318_v17 = vmax.f32 %v285_v11, 0.0  ;;  %v268_v18 = vadd.f32 %v267_v16, %v53_v36 }
  0xbb   :  { %v319_v19 = vmax.f32 %v304_v14, 0.0  ;;  %v320_v20 = vmax.f32 %v249_v15, 0.0 }
  0xbc   :  { %v321_v21 = vmax.f32 %v268_v18, 0.0 }
  0xbd   :  { %v329_v22 = vpack.c.bf16 %v319_v19, %v318_v17 }
  0xbe   :  { %v330_v23 = vpack.c.bf16 %v321_v21, %v320_v20 }
  0xbf   :  { %337 = vst [vmem:[%s762_s3 + $0x28] sm:$0xff] %v329_v22  ;;  %v286_v24 = vpop.f32.mrf.mxu2 }
  0xc0   :  { %338 = vst [vmem:[%s762_s3 + $0x30] sm:$0xff] %v330_v23  ;;  %v287_v25 = vadd.f32 %v286_v24, %v54_v43  ;;  %v305_v26 = vpop.f32.mrf.mxu3 }
  0xc1   :  { %v306_v27 = vadd.f32 %v305_v26, %v55_v44 }
  0xc2   :  { %v322_v28 = vmax.f32 %v287_v25, 0.0 }
  0xc3   :  { %v323_v29 = vmax.f32 %v306_v27, 0.0 }
  0xc5   :  { %v331_v30 = vpack.c.bf16 %v323_v29, %v322_v28 }
  0xc7   :  { %339 = vst [vmem:[%s762_s3 + $0x38] sm:$0xff] %v331_v30 }

// kernel: deeplab_forward.23
= control target key start
LH: loop header
LB: loop body
LE: loop exit
PB: predicated region body
PF: predicated region fallthrough
CT: control target
= control target key end

     0   :  { %s378_s9 = smov 0   ;;  %s431_s0 = inlined_call_operand.vmem [shape: f32[64,16], index: 0, kind: input, shape index: {}]   ;;  %s432_s1 = inlined_call_operand.vmem [shape: bf16[2,16,128], index: 1, kind: input, shape index: {}]   ;;  %s433_s2 = inlined_call_operand.vmem [shape: bf16[2,64,128], index: 2, kind: output, shape index: {}]  }
   0x1 LB: > { %s293_s10 = sadd.s32 4294967295, %s361_s9   ;;  %p297_p0 = scmp.ge.s32.totalorder %s361_s9, 1  ;;  %s361_s9 = sphi %s378_s9, %s12_s9  }
   0x2   : > { %p112_p1 = scmp.lt.s32.totalorder %s361_s9, 3 }
   0x4   : > { %p113_p2 = pnand %p297_p0, %p112_p1 }
   0x5   : > { %p134_p3 = scmp.lt.s32.totalorder (!%p113_p2), %s293_s10, 1 }
   0x6   : > { %116 = sbr.rel (%p113_p2) target bundleno = 166 (0xa6), region = 28 }
   0xb   : > { %s435_s10 = smov (!%p134_p3, %s293_s10), 1  ;;  %v144_v3 = vld [vmem:[%s431_s0] sm:$0xff]  ;;  %vm156_vm0 = vcmask 130048   ;;  %v146_v4 = vld [vmem:[%s431_s0 + $0x10] sm:$0xff]  ;;  %v145_v7 = vld [vmem:[%s431_s0 + $0x8] sm:$0xff] }
   0xc   : > { %s312_s11 = sshll.u32 %s435_s10, 3  ;;  %v148_v5 = vld [vmem:[%s431_s0 + $0x20] sm:$0xff]  ;;  %v150_v6 = vld [vmem:[%s431_s0 + $0x30] sm:$0xff]  ;;  %v147_v8 = vld [vmem:[%s431_s0 + $0x18] sm:$0xff]  ;;  %s313_s3 = sshll.u32 %s435_s10, 5 }
   0xd   : > { %s138_s14 = scalar_lea.vmem %s432_s1, %s312_s11  ;;  %v149_v9 = vld [vmem:[%s431_s0 + $0x28] sm:$0xff]  ;;  %v151_v10 = vld [vmem:[%s431_s0 + $0x38] sm:$0xff]  ;;  %s143_s6 = scalar_lea.vmem %s433_s2, %s313_s3 }
   0xe   : > { %v315_v0 = vld [vmem:[%s138_s14] sm:$0xff]  }
   0xf   : > { %v317_v1 = vunpack.c.h.bf16 %v315_v0  ;;  %v316_v2 = vunpack.c.l.bf16 %v315_v0 }
  0x11   : > { %195 = vmatpush.msra.mxu0 %v317_v1  ;;  %341 = vmatpush.msra.mxu1 %v317_v1 }
  0x12   : > { %342 = vmatpush.msra.mxu2 %v317_v1  ;;  %343 = vmatpush.msra.mxu3 %v317_v1 }
  0x13   : > { %196 = vmatpush.msra.mxu0 %v316_v2  ;;  %344 = vmatpush.msra.mxu1 %v316_v2 }
  0x14   : > { %345 = vmatpush.msra.mxu2 %v316_v2  ;;  %346 = vmatpush.msra.mxu3 %v316_v2 }
  0x15   : > { %302 = vmatmul.msk.f32.vlgmr.msra.gmra.mxu0 %vm156_vm0, %v144_v3  ;;  %304 = vmatmul.msk.f32.vlgmr.msra.gmra.mxu1 %vm156_vm0, %v146_v4 }
  0x16   : > { %306 = vmatmul.msk.f32.vlgmr.msra.gmra.mxu2 %vm156_vm0, %v148_v5  ;;  %308 = vmatmul.msk.f32.vlgmr.msra.gmra.mxu3 %vm156_vm0, %v150_v6 }
  0x1d   : > { %303 = vmatmul.msk.f32.gmra.mxu0 %vm156_vm0, %v145_v7  ;;  %305 = vmatmul.msk.f32.gmra.mxu1 %vm156_vm0, %v147_v8 }
  0x1e   : > { %307 = vmatmul.msk.f32.gmra.mxu2 %vm156_vm0, %v149_v9  ;;  %309 = vmatmul.msk.f32.gmra.mxu3 %vm156_vm0, %v151_v10 }
  0x92   : > { %v198_v11 = vpop.f32.mrf.mxu0  ;;  %v204_v12 = vpop.f32.mrf.mxu1 }
  0x99   : > { %v210_v13 = vpop.f32.mrf.mxu2  ;;  %v216_v14 = vpop.f32.mrf.mxu3 }
  0x9a   : > { %v201_v15 = vpop.f32.mrf.mxu0  ;;  %v207_v16 = vpop.f32.mrf.mxu1 }
  0x9b   : > { %v321_v17 = vpack.c.bf16 %v201_v15, %v198_v11  ;;  %v326_v18 = vpack.c.bf16 %v207_v16, %v204_v12 }
  0x9d   : > { %322 = vst [vmem:[%s143_s6] sm:$0xff] %v321_v17  }
  0x9e   : > { %338 = vst [vmem:[%s143_s6 + $0x8] sm:$0xff] %v326_v18  }
  0xa1   : > { %v213_v19 = vpop.f32.mrf.mxu2  ;;  %v219_v20 = vpop.f32.mrf.mxu3 }
  0xa2   : > { %v331_v21 = vpack.c.bf16 %v213_v19, %v210_v13  ;;  %v336_v22 = vpack.c.bf16 %v219_v20, %v216_v14 }
  0xa4   : > { %339 = vst [vmem:[%s143_s6 + $0x10] sm:$0xff] %v331_v21  }
  0xa5   : > { %340 = vst [vmem:[%s143_s6 + $0x18] sm:$0xff] %v336_v22  }
  0xa6 PF: > { %s12_s9 = sadd.s32 1, %s361_s9  }
  0xa7   : > { %p9_p4 = scmp.ge.s32.totalorder %s12_s9, 4  }
  0xa9   :  { %11 = sbr.rel (!%p9_p4) target bundleno = 1 (0x1), region = 58 }

// kernel: deeplab_forward.21
= control target key start
LH: loop header
LB: loop body
LE: loop exit
PB: predicated region body
PF: predicated region fallthrough
CT: control target
= control target key end

     0   :  { %s992_s1 = inlined_call_operand.vmem [shape: bf16[640,128], index: 1, kind: input, shape index: {}]   ;;  %s993_s2 = inlined_call_operand.vmem [shape: f32[1,128], index: 2, kind: input, shape index: {}]   ;;  %s994_s0 = inlined_call_operand.vmem [shape: bf16[32,640], index: 0, kind: input, shape index: {}]   ;;  %s995_s3 = inlined_call_operand.vmem [shape: bf16[32,128], index: 3, kind: output, shape index: {}]  }
   0x1   :  { %v730_v0 = vld [vmem:[%s992_s1 + $0x38] sm:$0xff]  ;;  %v729_v4 = vld [vmem:[%s992_s1 + $0x30] sm:$0xff]  ;;  %v728_v8 = vld [vmem:[%s992_s1 + $0x28] sm:$0xff] }
   0x2   :  { %v738_v1 = vld [vmem:[%s992_s1 + $0x78] sm:$0xff]  ;;  %402 = vmatpush.bf16.msra.mxu0 %v730_v0  ;;  %v737_v5 = vld [vmem:[%s992_s1 + $0x70] sm:$0xff]  ;;  %v736_v9 = vld [vmem:[%s992_s1 + $0x68] sm:$0xff] }
   0x3   :  { %v746_v2 = vld [vmem:[%s992_s1 + $0xb8] sm:$0xff]  ;;  %421 = vmatpush.bf16.msra.mxu1 %v738_v1  ;;  %v745_v6 = vld [vmem:[%s992_s1 + $0xb0] sm:$0xff]  ;;  %v744_v10 = vld [vmem:[%s992_s1 + $0xa8] sm:$0xff] }
   0x4   :  { %v754_v3 = vld [vmem:[%s992_s1 + $0xf8] sm:$0xff]  ;;  %440 = vmatpush.bf16.msra.mxu2 %v746_v2  ;;  %v753_v7 = vld [vmem:[%s992_s1 + $0xf0] sm:$0xff]  ;;  %v752_v11 = vld [vmem:[%s992_s1 + $0xe8] sm:$0xff] }
   0x5   :  { %459 = vmatpush.bf16.msra.mxu3 %v754_v3  ;;  %v727_v12 = vld [vmem:[%s992_s1 + $0x20] sm:$0xff]  ;;  %v726_v16 = vld [vmem:[%s992_s1 + $0x18] sm:$0xff]  ;;  %v725_v20 = vld [vmem:[%s992_s1 + $0x10] sm:$0xff] }
   0x6   :  { %403 = vmatpush.bf16.msra.mxu0 %v729_v4  ;;  %v735_v13 = vld [vmem:[%s992_s1 + $0x60] sm:$0xff]  ;;  %v734_v17 = vld [vmem:[%s992_s1 + $0x58] sm:$0xff]  ;;  %v733_v21 = vld [vmem:[%s992_s1 + $0x50] sm:$0xff] }
   0x7   :  { %422 = vmatpush.bf16.msra.mxu1 %v737_v5  ;;  %v743_v14 = vld [vmem:[%s992_s1 + $0xa0] sm:$0xff]  ;;  %v742_v18 = vld [vmem:[%s992_s1 + $0x98] sm:$0xff]  ;;  %v741_v22 = vld [vmem:[%s992_s1 + $0x90] sm:$0xff] }
   0x8   :  { %441 = vmatpush.bf16.msra.mxu2 %v745_v6  ;;  %v751_v15 = vld [vmem:[%s992_s1 + $0xe0] sm:$0xff]  ;;  %v750_v19 = vld [vmem:[%s992_s1 + $0xd8] sm:$0xff]  ;;  %v749_v23 = vld [vmem:[%s992_s1 + $0xd0] sm:$0xff] }
   0x9   :  { %460 = vmatpush.bf16.msra.mxu3 %v753_v7  ;;  %v724_v24 = vld [vmem:[%s992_s1 + $0x8] sm:$0xff]  ;;  %v723_v28 = vld [vmem:[%s992_s1] sm:$0xff]  ;;  %v715_v33 = vld [vmem:[%s994_s0 + $0x10] sm:$0xf0] }
   0xa   :  { %404 = vmatpush.bf16.msra.mxu0 %v728_v8  ;;  %v732_v25 = vld [vmem:[%s992_s1 + $0x48] sm:$0xff]  ;;  %v731_v29 = vld [vmem:[%s992_s1 + $0x40] sm:$0xff]  ;;  %v517_v35 = vld [vmem:[%s994_s0 + $0x14] sm:$0xf0] }
   0xb   :  { %423 = vmatpush.bf16.msra.mxu1 %v736_v9  ;;  %v740_v26 = vld [vmem:[%s992_s1 + $0x88] sm:$0xff]  ;;  %v739_v30 = vld [vmem:[%s992_s1 + $0x80] sm:$0xff]  ;;  %v716_v37 = vld [vmem:[%s994_s0 + $0x18] sm:$0xf0] }
   0xc   :  { %442 = vmatpush.bf16.msra.mxu2 %v744_v10  ;;  %v748_v27 = vld [vmem:[%s992_s1 + $0xc8] sm:$0xff]  ;;  %v747_v31 = vld [vmem:[%s992_s1 + $0xc0] sm:$0xff]  ;;  %v762_v40 = vld [vmem:[%s992_s1 + $0x138] sm:$0xff] }
   0xd   :  { %461 = vmatpush.bf16.msra.mxu3 %v752_v11  ;;  %v515_v32 = vld [vmem:[%s994_s0] sm:$0xf]  ;;  %v713_v34 = vld [vmem:[%s994_s0 + $0x4] sm:$0xf]  ;;  %v523_v36 = vld [vmem:[%s994_s0 + $0x8] sm:$0xf] }
   0xe   :  { %405 = vmatpush.bf16.msra.mxu0 %v727_v12  ;;  %v714_v38 = vld [vmem:[%s994_s0 + $0xc] sm:$0xf]  ;;  %v525_v39 = vld [vmem:[%s994_s0 + $0x1c] sm:$0xf0]  ;;  %v516_v41 = vor.u32 %v715_v33, %v515_v32  ;;  %v520_v42 = vor.u32 %v713_v34, %v517_v35  ;;  %v524_v43 = vor.u32 %v716_v37, %v523_v36  ;;  %v761_v45 = vld [vmem:[%s992_s1 + $0x130] sm:$0xff] }
   0xf   :  { %424 = vmatpush.bf16.msra.mxu1 %v735_v13  ;;  %v528_v44 = vor.u32 %v714_v38, %v525_v39  ;;  %v760_v46 = vld [vmem:[%s992_s1 + $0x128] sm:$0xff]  ;;  %v759_v47 = vld [vmem:[%s992_s1 + $0x120] sm:$0xff]  ;;  %v720_v49 = vld [vmem:[%s994_s0 + $0x38] sm:$0xf0] }
  0x10   :  { %443 = vmatpush.bf16.msra.mxu2 %v743_v14  ;;  %v535_v48 = vld [vmem:[%s994_s0 + $0x28] sm:$0xf]  ;;  %v718_v50 = vld [vmem:[%s994_s0 + $0x2c] sm:$0xf]  ;;  %v537_v51 = vld [vmem:[%s994_s0 + $0x3c] sm:$0xf0] }
  0x11   :  { %462 = vmatpush.bf16.msra.mxu3 %v751_v15  ;;  %v543_v52 = vld [vmem:[%s994_s0 + $0x30] sm:$0xf]  ;;  %v721_v53 = vld [vmem:[%s994_s0 + $0x40] sm:$0xf0]  ;;  %v719_v54 = vld [vmem:[%s994_s0 + $0x34] sm:$0xf]  ;;  %v536_v57 = vor.u32 %v720_v49, %v535_v48  ;;  %v540_v58 = vor.u32 %v718_v50, %v537_v51 }
  0x12   :  { %406 = vmatpush.bf16.msra.mxu0 %v726_v16  ;;  %v545_v55 = vld [vmem:[%s994_s0 + $0x44] sm:$0xf0]  ;;  %v758_v56 = vld [vmem:[%s992_s1 + $0x118] sm:$0xff]  ;;  %v544_v59 = vor.u32 %v721_v53, %v543_v52  ;;  %v757_v61 = vld [vmem:[%s992_s1 + $0x110] sm:$0xff] }
  0x13   :  { %425 = vmatpush.bf16.msra.mxu1 %v734_v17  ;;  %v548_v60 = vor.u32 %v719_v54, %v545_v55  ;;  %v756_v62 = vld [vmem:[%s992_s1 + $0x108] sm:$0xff]  ;;  %v755_v63 = vld [vmem:[%s992_s1 + $0x100] sm:$0xff]  ;;  %v531_v0 = vld [vmem:[%s994_s0 + $0x10] sm:$0xf] }
  0x14   :  { %444 = vmatpush.bf16.msra.mxu2 %v742_v18  ;;  %v717_v1 = vld [vmem:[%s994_s0 + $0x20] sm:$0xf0]  ;;  %v551_v2 = vld [vmem:[%s994_s0 + $0x38] sm:$0xf]  ;;  %v722_v3 = vld [vmem:[%s994_s0 + $0x48] sm:$0xf0] }
  0x15   :  { %463 = vmatpush.bf16.msra.mxu3 %v750_v19  ;;  %v532_v4 = vor.u32 %v717_v1, %v531_v0  ;;  %v552_v5 = vor.u32 %v722_v3, %v551_v2  ;;  %v782_v16 = vld [vmem:[%s993_s2] ss:$0 sm:$0xff] }
  0x16   :  { %407 = vmatpush.bf16.msra.mxu0 %v725_v20 }
  0x17   :  { %426 = vmatpush.bf16.msra.mxu1 %v733_v21 }
  0x18   :  { %445 = vmatpush.bf16.msra.mxu2 %v741_v22 }
  0x19   :  { %464 = vmatpush.bf16.msra.mxu3 %v749_v23 }
  0x1a   :  { %408 = vmatpush.bf16.msra.mxu0 %v724_v24 }
  0x1b   :  { %427 = vmatpush.bf16.msra.mxu1 %v732_v25 }
  0x1c   :  { %446 = vmatpush.bf16.msra.mxu2 %v740_v26 }
  0x1d   :  { %465 = vmatpush.bf16.msra.mxu3 %v748_v27 }
  0x1e   :  { %409 = vmatpush.bf16.msra.mxu0 %v723_v28 }
  0x1f   :  { %428 = vmatpush.bf16.msra.mxu1 %v731_v29 }
  0x20   :  { %447 = vmatpush.bf16.msra.mxu2 %v739_v30 }
  0x21   :  { %466 = vmatpush.bf16.msra.mxu3 %v747_v31  ;;  %410 = vmatmul.bf16.vlgmr.msra.gmra.mxu0 %v516_v41 }
  0x22   :  { %478 = vmatpush.bf16.msrb.mxu0 %v762_v40  ;;  %429 = vmatmul.bf16.vlgmr.msra.gmra.mxu1 %v520_v42 }
  0x23   :  { %774 = vmatpush.bf16.msrb.mxu1 %v762_v40  ;;  %448 = vmatmul.bf16.vlgmr.msra.gmra.mxu2 %v524_v43 }
  0x24   :  { %467 = vmatmul.bf16.vlgmr.msra.gmra.mxu3 %v528_v44 }
  0x26   :  { %479 = vmatpush.bf16.msrb.mxu0 %v761_v45 }
  0x27   :  { %775 = vmatpush.bf16.msrb.mxu1 %v761_v45 }
  0x2a   :  { %480 = vmatpush.bf16.msrb.mxu0 %v760_v46 }
  0x2b   :  { %776 = vmatpush.bf16.msrb.mxu1 %v760_v46 }
  0x2e   :  { %481 = vmatpush.bf16.msrb.mxu0 %v759_v47 }
  0x2f   :  { %777 = vmatpush.bf16.msrb.mxu1 %v759_v47 }
  0x31   :  { %415 = vmatmul.bf16.gmra.mxu0 %v536_v57 }
  0x32   :  { %482 = vmatpush.bf16.msrb.mxu0 %v758_v56  ;;  %434 = vmatmul.bf16.gmra.mxu1 %v540_v58 }
  0x33   :  { %778 = vmatpush.bf16.msrb.mxu1 %v758_v56  ;;  %453 = vmatmul.bf16.gmra.mxu2 %v544_v59 }
  0x34   :  { %472 = vmatmul.bf16.gmra.mxu3 %v548_v60 }
  0x36   :  { %483 = vmatpush.bf16.msrb.mxu0 %v757_v61 }
  0x37   :  { %779 = vmatpush.bf16.msrb.mxu1 %v757_v61 }
  0x3a   :  { %484 = vmatpush.bf16.msrb.mxu0 %v756_v62 }
  0x3b   :  { %780 = vmatpush.bf16.msrb.mxu1 %v756_v62 }
  0x3e   :  { %485 = vmatpush.bf16.msrb.mxu0 %v755_v63 }
  0x3f   :  { %781 = vmatpush.bf16.msrb.mxu1 %v755_v63 }
  0x41   :  { %486 = vmatmul.bf16.vlgmr.msrb.gmra.mxu0 %v532_v4 }
  0x42   :  { %491 = vmatmul.bf16.vlgmr.msrb.gmra.mxu1 %v552_v5 }
  0x9e   :  { %v411_v6 = vpop.f32.mrf.mxu0 }
  0x9f   :  { %v430_v7 = vpop.f32.mrf.mxu1  ;;  %v412_v20 = vadd.f32 %v782_v16, %v411_v6 }
  0xa1   :  { %v431_v25 = vadd.f32 %v430_v7, %v412_v20 }
  0xa6   :  { %v449_v8 = vpop.f32.mrf.mxu2  ;;  %v413_v10 = vpop.f32.mrf.mxu0 }
  0xa7   :  { %v468_v9 = vpop.f32.mrf.mxu3  ;;  %v432_v11 = vpop.f32.mrf.mxu1  ;;  %v414_v23 = vadd.f32 %v782_v16, %v413_v10  ;;  %v450_v30 = vadd.f32 %v449_v8, %v431_v25 }
  0xa9   :  { %v433_v31 = vadd.f32 %v432_v11, %v414_v23  ;;  %v469_v36 = vadd.f32 %v468_v9, %v450_v30 }
  0xae   :  { %v451_v12 = vpop.f32.mrf.mxu2  ;;  %v416_v13 = vpop.f32.mrf.mxu0 }
  0xaf   :  { %v435_v14 = vpop.f32.mrf.mxu1  ;;  %v470_v15 = vpop.f32.mrf.mxu3  ;;  %v417_v21 = vadd.f32 %v782_v16, %v416_v13  ;;  %v452_v34 = vadd.f32 %v451_v12, %v433_v31 }
  0xb1   :  { %v436_v26 = vadd.f32 %v435_v14, %v417_v21  ;;  %v471_v39 = vadd.f32 %v470_v15, %v452_v34 }
  0xb6   :  { %v454_v17 = vpop.f32.mrf.mxu2  ;;  %v418_v18 = vpop.f32.mrf.mxu0 }
  0xb7   :  { %v437_v19 = vpop.f32.mrf.mxu1  ;;  %v473_v22 = vpop.f32.mrf.mxu3  ;;  %v419_v24 = vadd.f32 %v782_v16, %v418_v18  ;;  %v455_v32 = vadd.f32 %v454_v17, %v436_v26 }
  0xb9   :  { %v438_v33 = vadd.f32 %v437_v19, %v419_v24  ;;  %v474_v37 = vadd.f32 %v473_v22, %v455_v32 }
  0xbe   :  { %v456_v27 = vpop.f32.mrf.mxu2  ;;  %v487_v28 = vpop.f32.mrf.mxu0 }
  0xbf   :  { %v492_v29 = vpop.f32.mrf.mxu1  ;;  %v457_v35 = vadd.f32 %v456_v27, %v438_v33  ;;  %v475_v38 = vpop.f32.mrf.mxu3  ;;  %v488_v41 = vadd.f32 %v487_v28, %v469_v36 }
  0xc0   :  { %v493_v42 = vadd.f32 %v492_v29, %v474_v37 }
  0xc1   :  { %v476_v40 = vadd.f32 %v475_v38, %v457_v35  ;;  %v497_v47 = vmax.f32 %v488_v41, 0.0 }
  0xc2   :  { %v499_v48 = vmax.f32 %v493_v42, 0.0 }
  0xc6   :  { %v489_v43 = vpop.f32.mrf.mxu0 }
  0xc7   :  { %v494_v44 = vpop.f32.mrf.mxu1  ;;  %v490_v45 = vadd.f32 %v489_v43, %v471_v39 }
  0xc8   :  { %v495_v46 = vadd.f32 %v494_v44, %v476_v40 }
  0xc9   :  { %v498_v49 = vmax.f32 %v490_v45, 0.0 }
  0xca   :  { %v500_v50 = vmax.f32 %v495_v46, 0.0 }
  0xcb   :  { %v766_v51 = vpack.c.bf16 %v498_v49, %v497_v47 }
  0xcc   :  { %v771_v52 = vpack.c.bf16 %v500_v50, %v499_v48 }
  0xcd   :  { %767 = vst [vmem:[%s995_s3] sm:$0xff] %v766_v51  }
  0xce   :  { %773 = vst [vmem:[%s995_s3 + $0x8] sm:$0xff] %v771_v52  }

// kernel: deeplab_forward.26
= control target key start
LH: loop header
LB: loop body
LE: loop exit
PB: predicated region body
PF: predicated region fallthrough
CT: control target
= control target key end

     0   :  { %s478_s1 = inlined_call_operand.vmem [shape: bf16[128,128], index: 1, kind: input, shape index: {}]   ;;  %s479_s2 = inlined_call_operand.vmem [shape: f32[1,128], index: 2, kind: input, shape index: {}]   ;;  %s480_s0 = inlined_call_operand.vmem [shape: bf16[128,128], index: 0, kind: input, shape index: {}]   ;;  %s481_s3 = inlined_call_operand.vmem [shape: bf16[128,128], index: 3, kind: output, shape index: {}]  }
   0x1   :  { %v310_v0 = vld [vmem:[%s478_s1 + $0x38] sm:$0xff]  ;;  %v309_v1 = vld [vmem:[%s478_s1 + $0x30] sm:$0xff]  ;;  %v308_v2 = vld [vmem:[%s478_s1 + $0x28] sm:$0xff] }
   0x2   :  { %146 = vmatpush.bf16.msra.mxu0 %v310_v0  ;;  %358 = vmatpush.bf16.msra.mxu1 %v310_v0  ;;  %v307_v3 = vld [vmem:[%s478_s1 + $0x20] sm:$0xff]  ;;  %v306_v4 = vld [vmem:[%s478_s1 + $0x18] sm:$0xff]  ;;  %v305_v5 = vld [vmem:[%s478_s1 + $0x10] sm:$0xff] }
   0x3   :  { %359 = vmatpush.bf16.msra.mxu2 %v310_v0  ;;  %360 = vmatpush.bf16.msra.mxu3 %v310_v0  ;;  %v304_v6 = vld [vmem:[%s478_s1 + $0x8] sm:$0xff]  ;;  %v303_v7 = vld [vmem:[%s478_s1] sm:$0xff]  ;;  %v297_v9 = vld [vmem:[%s480_s0 + $0x10] sm:$0xff] }
   0x4   :  { %v295_v8 = vld [vmem:[%s480_s0] sm:$0xff]  ;;  %v301_v11 = vld [vmem:[%s480_s0 + $0x30] sm:$0xff]  ;;  %v296_v12 = vld [vmem:[%s480_s0 + $0x8] sm:$0xff] }
   0x5   :  { %v299_v10 = vld [vmem:[%s480_s0 + $0x20] sm:$0xff]  ;;  %v298_v13 = vld [vmem:[%s480_s0 + $0x18] sm:$0xff]  ;;  %v300_v14 = vld [vmem:[%s480_s0 + $0x28] sm:$0xff] }
   0x6   :  { %147 = vmatpush.bf16.msra.mxu0 %v309_v1  ;;  %361 = vmatpush.bf16.msra.mxu1 %v309_v1  ;;  %v302_v15 = vld [vmem:[%s480_s0 + $0x38] sm:$0xff]  ;;  %v382_v18 = vld [vmem:[%s479_s2] ss:$0 sm:$0xff] }
   0x7   :  { %362 = vmatpush.bf16.msra.mxu2 %v309_v1  ;;  %363 = vmatpush.bf16.msra.mxu3 %v309_v1 }
   0xa   :  { %148 = vmatpush.bf16.msra.mxu0 %v308_v2  ;;  %364 = vmatpush.bf16.msra.mxu1 %v308_v2 }
   0xb   :  { %365 = vmatpush.bf16.msra.mxu2 %v308_v2  ;;  %366 = vmatpush.bf16.msra.mxu3 %v308_v2 }
   0xe   :  { %149 = vmatpush.bf16.msra.mxu0 %v307_v3  ;;  %367 = vmatpush.bf16.msra.mxu1 %v307_v3 }
   0xf   :  { %368 = vmatpush.bf16.msra.mxu2 %v307_v3  ;;  %369 = vmatpush.bf16.msra.mxu3 %v307_v3 }
  0x12   :  { %150 = vmatpush.bf16.msra.mxu0 %v306_v4  ;;  %370 = vmatpush.bf16.msra.mxu1 %v306_v4 }
  0x13   :  { %371 = vmatpush.bf16.msra.mxu2 %v306_v4  ;;  %372 = vmatpush.bf16.msra.mxu3 %v306_v4 }
  0x16   :  { %151 = vmatpush.bf16.msra.mxu0 %v305_v5  ;;  %373 = vmatpush.bf16.msra.mxu1 %v305_v5 }
  0x17   :  { %374 = vmatpush.bf16.msra.mxu2 %v305_v5  ;;  %375 = vmatpush.bf16.msra.mxu3 %v305_v5 }
  0x1a   :  { %152 = vmatpush.bf16.msra.mxu0 %v304_v6  ;;  %376 = vmatpush.bf16.msra.mxu1 %v304_v6 }
  0x1b   :  { %377 = vmatpush.bf16.msra.mxu2 %v304_v6  ;;  %378 = vmatpush.bf16.msra.mxu3 %v304_v6 }
  0x1e   :  { %153 = vmatpush.bf16.msra.mxu0 %v303_v7  ;;  %379 = vmatpush.bf16.msra.mxu1 %v303_v7 }
  0x1f   :  { %380 = vmatpush.bf16.msra.mxu2 %v303_v7  ;;  %381 = vmatpush.bf16.msra.mxu3 %v303_v7 }
  0x21   :  { %154 = vmatmul.bf16.vlgmr.msra.gmra.mxu0 %v295_v8  ;;  %164 = vmatmul.bf16.vlgmr.msra.gmra.mxu1 %v297_v9 }
  0x22   :  { %174 = vmatmul.bf16.vlgmr.msra.gmra.mxu2 %v299_v10  ;;  %184 = vmatmul.bf16.vlgmr.msra.gmra.mxu3 %v301_v11 }
  0x31   :  { %159 = vmatmul.bf16.gmra.mxu0 %v296_v12  ;;  %169 = vmatmul.bf16.gmra.mxu1 %v298_v13 }
  0x32   :  { %179 = vmatmul.bf16.gmra.mxu2 %v300_v14  ;;  %189 = vmatmul.bf16.gmra.mxu3 %v302_v15 }
  0x9e   :  { %v155_v16 = vpop.f32.mrf.mxu0  ;;  %v165_v17 = vpop.f32.mrf.mxu1 }
  0x9f   :  { %v156_v23 = vadd.f32 %v382_v18, %v155_v16  ;;  %v166_v24 = vadd.f32 %v382_v18, %v165_v17 }
  0xa5   :  { %v175_v19 = vpop.f32.mrf.mxu2  ;;  %v185_v20 = vpop.f32.mrf.mxu3 }
  0xa6   :  { %v157_v21 = vpop.f32.mrf.mxu0  ;;  %v167_v22 = vpop.f32.mrf.mxu1  ;;  %v176_v31 = vadd.f32 %v382_v18, %v175_v19  ;;  %v186_v32 = vadd.f32 %v382_v18, %v185_v20 }
  0xa7   :  { %v158_v25 = vadd.f32 %v382_v18, %v157_v21  ;;  %v168_v26 = vadd.f32 %v382_v18, %v167_v22 }
  0xa9   :  { %v314_v27 = vpack.c.bf16 %v158_v25, %v156_v23  ;;  %v324_v28 = vpack.c.bf16 %v168_v26, %v166_v24 }
  0xab   :  { %315 = vst [vmem:[%s481_s3] sm:$0xff] %v314_v27  }
  0xac   :  { %352 = vst [vmem:[%s481_s3 + $0x10] sm:$0xff] %v324_v28  }
  0xad   :  { %v177_v29 = vpop.f32.mrf.mxu2  ;;  %v187_v30 = vpop.f32.mrf.mxu3 }
  0xae   :  { %v178_v33 = vadd.f32 %v382_v18, %v177_v29  ;;  %v188_v34 = vadd.f32 %v382_v18, %v187_v30  ;;  %v160_v35 = vpop.f32.mrf.mxu0  ;;  %v170_v36 = vpop.f32.mrf.mxu1 }
  0xaf   :  { %v161_v43 = vadd.f32 %v382_v18, %v160_v35  ;;  %v171_v44 = vadd.f32 %v382_v18, %v170_v36 }
  0xb0   :  { %v334_v37 = vpack.c.bf16 %v178_v33, %v176_v31  ;;  %v344_v38 = vpack.c.bf16 %v188_v34, %v186_v32 }
  0xb2   :  { %354 = vst [vmem:[%s481_s3 + $0x20] sm:$0xff] %v334_v37  }
  0xb3   :  { %356 = vst [vmem:[%s481_s3 + $0x30] sm:$0xff] %v344_v38  }
  0xb5   :  { %v180_v39 = vpop.f32.mrf.mxu2  ;;  %v190_v40 = vpop.f32.mrf.mxu3 }
  0xb6   :  { %v162_v41 = vpop.f32.mrf.mxu0  ;;  %v172_v42 = vpop.f32.mrf.mxu1  ;;  %v181_v51 = vadd.f32 %v382_v18, %v180_v39  ;;  %v191_v52 = vadd.f32 %v382_v18, %v190_v40 }
  0xb7   :  { %v163_v45 = vadd.f32 %v382_v18, %v162_v41  ;;  %v173_v46 = vadd.f32 %v382_v18, %v172_v42 }
  0xb9   :  { %v319_v47 = vpack.c.bf16 %v163_v45, %v161_v43  ;;  %v329_v48 = vpack.c.bf16 %v173_v46, %v171_v44 }
  0xbb   :  { %351 = vst [vmem:[%s481_s3 + $0x8] sm:$0xff] %v319_v47  }
  0xbc   :  { %353 = vst [vmem:[%s481_s3 + $0x18] sm:$0xff] %v329_v48  }
  0xbd   :  { %v182_v49 = vpop.f32.mrf.mxu2  ;;  %v192_v50 = vpop.f32.mrf.mxu3 }
  0xbe   :  { %v183_v53 = vadd.f32 %v382_v18, %v182_v49  ;;  %v193_v54 = vadd.f32 %v382_v18, %v192_v50 }
  0xc0   :  { %v339_v55 = vpack.c.bf16 %v183_v53, %v181_v51  ;;  %v349_v56 = vpack.c.bf16 %v193_v54, %v191_v52 }
  0xc2   :  { %355 = vst [vmem:[%s481_s3 + $0x28] sm:$0xff] %v339_v55  }
  0xc3   :  { %357 = vst [vmem:[%s481_s3 + $0x38] sm:$0xff] %v349_v56  }

// kernel: deeplab_forward.25
= control target key start
LH: loop header
LB: loop body
LE: loop exit
PB: predicated region body
PF: predicated region fallthrough
CT: control target
= control target key end

     0   :  { %s1468_s12 = smov 0   ;;  %s1734_s0 = inlined_call_operand.vmem [shape: bf16[2,10,10,128], index: 0, kind: input, shape index: {}]   ;;  %s1735_s1 = inlined_call_operand.vmem [shape: bf16[1152,128], index: 1, kind: input, shape index: {}]   ;;  %s1736_s2 = inlined_call_operand.vmem [shape: f32[1,128], index: 2, kind: input, shape index: {}]   ;;  %s1737_s3 = inlined_call_operand.vmem [shape: bf16[2,8,8,128], index: 3, kind: output, shape index: {}]  }
   0x1 LB: > { %s1019_s13 = sadd.s32 4294967295, %s1442_s12   ;;  %p1023_p0 = scmp.ge.s32.totalorder %s1442_s12, 1  ;;  %s1442_s12 = sphi %s1468_s12, %s13_s12  }
   0x2   : > { %p137_p1 = scmp.lt.s32.totalorder %s1442_s12, 3 }
   0x4   : > { %p138_p2 = pnand %p1023_p0, %p137_p1 }
   0x5   : > { %p161_p3 = scmp.lt.s32.totalorder (!%p138_p2), %s1019_s13, 1  ;;  %s1491_s24 = smov (!%p138_p2), 0  }
   0x6   : > { %141 = sbr.rel (%p138_p2) target bundleno = 246 (0xf6), region = 32 }
   0xb   : > { %v1479_v0 = vld [vmem:[%s1736_s2] sm:$0x1]  ;;  %s1739_s13 = smov (!%p161_p3, %s1019_s13), 1 }
   0xc   : > { %s1415_s16 = smul.u32 80, %s1739_s13  ;;  %s1338_s17 = sshll.u32 %s1739_s13, 5 }
   0xd   : > { %s1484_s20 = scalar_lea.vmem %s1737_s3, %s1338_s17 }
   0xe   : > { %s1489_s23 = scalar_lea.vmem %s1734_s0, %s1415_s16 }
   0xf LB: >> { %v1356_v1 = vld [vmem:[%s1735_s1 + $0x78] sm:$0xff]  ;;  %v1355_v5 = vld [vmem:[%s1735_s1 + $0x70] sm:$0xff]  ;;  %v1354_v9 = vld [vmem:[%s1735_s1 + $0x68] sm:$0xff]  ;;  %s1339_s26 = sshll.u32 %s1446_s24, 3  ;;  %s1335_s10 = sshll.u32 %s1446_s24, 2  ;;  %s1446_s24 = sphi %s1491_s24, %s177_s24  }
  0x10   : >> { %v1364_v2 = vld [vmem:[%s1735_s1 + $0xb8] sm:$0xff]  ;;  %276 = vmatpush.bf16.msra.mxu0 %v1356_v1  ;;  %v1363_v6 = vld [vmem:[%s1735_s1 + $0xb0] sm:$0xff]  ;;  %v1362_v10 = vld [vmem:[%s1735_s1 + $0xa8] sm:$0xff]  ;;  %s1546_s8 = scalar_lea.vmem %s1489_s23, %s1339_s26  ;;  %s947_s11 = scalar_lea.vmem %s1484_s20, %s1335_s10 }
  0x11   : >> { %v1373_v3 = vld [vmem:[%s1735_s1 + $0xf8] sm:$0xff]  ;;  %416 = vmatpush.bf16.msra.mxu2 %v1364_v2  ;;  %v1372_v7 = vld [vmem:[%s1735_s1 + $0xf0] sm:$0xff]  ;;  %v1371_v11 = vld [vmem:[%s1735_s1 + $0xe8] sm:$0xff]  ;;  %s177_s24 = sadd.s32 1, %s1446_s24  }
  0x12   : >> { %v1348_v4 = vld [vmem:[%s1735_s1 + $0x38] sm:$0xff]  ;;  %500 = vmatpush.bf16.msra.mxu3 %v1373_v3  ;;  %v1347_v8 = vld [vmem:[%s1735_s1 + $0x30] sm:$0xff]  ;;  %v1346_v12 = vld [vmem:[%s1735_s1 + $0x28] sm:$0xff]  ;;  %p174_p4 = scmp.ge.s32.totalorder %s177_s24, 8  }
  0x13   : >> { %337 = vmatpush.bf16.msra.mxu1 %v1348_v4  ;;  %v1353_v13 = vld [vmem:[%s1735_s1 + $0x60] sm:$0xff]  ;;  %v1352_v17 = vld [vmem:[%s1735_s1 + $0x58] sm:$0xff]  ;;  %v1351_v23 = vld [vmem:[%s1735_s1 + $0x50] sm:$0xff] }
  0x14   : >> { %277 = vmatpush.bf16.msra.mxu0 %v1355_v5  ;;  %v1361_v14 = vld [vmem:[%s1735_s1 + $0xa0] sm:$0xff]  ;;  %v1360_v18 = vld [vmem:[%s1735_s1 + $0x98] sm:$0xff]  ;;  %v1359_v24 = vld [vmem:[%s1735_s1 + $0x90] sm:$0xff] }
  0x15   : >> { %417 = vmatpush.bf16.msra.mxu2 %v1363_v6  ;;  %v1370_v15 = vld [vmem:[%s1735_s1 + $0xe0] sm:$0xff]  ;;  %v1369_v19 = vld [vmem:[%s1735_s1 + $0xd8] sm:$0xff]  ;;  %v1368_v26 = vld [vmem:[%s1735_s1 + $0xd0] sm:$0xff] }
  0x16   : >> { %501 = vmatpush.bf16.msra.mxu3 %v1372_v7  ;;  %v1345_v16 = vld [vmem:[%s1735_s1 + $0x20] sm:$0xff]  ;;  %v1344_v20 = vld [vmem:[%s1735_s1 + $0x18] sm:$0xff]  ;;  %v1343_v27 = vld [vmem:[%s1735_s1 + $0x10] sm:$0xff] }
  0x17   : >> { %338 = vmatpush.bf16.msra.mxu1 %v1347_v8  ;;  %v1031_v21 = vld [vmem:[%s1546_s8] sm:$0xf]  ;;  %v1340_v22 = vld [vmem:[%s1546_s8] sm:$0x10]  ;;  %v1350_v28 = vld [vmem:[%s1735_s1 + $0x48] sm:$0xff] }
  0x18   : >> { %278 = vmatpush.bf16.msra.mxu0 %v1354_v9  ;;  %v1032_v25 = vor.u32 %v1340_v22, %v1031_v21  ;;  %v1358_v29 = vld [vmem:[%s1735_s1 + $0x88] sm:$0xff]  ;;  %v1349_v33 = vld [vmem:[%s1735_s1 + $0x40] sm:$0xff]  ;;  %v1381_v37 = vld [vmem:[%s1735_s1 + $0x138] sm:$0xff] }
  0x19   : >> { %418 = vmatpush.bf16.msra.mxu2 %v1362_v10  ;;  %v1367_v31 = vld [vmem:[%s1735_s1 + $0xc8] sm:$0xff]  ;;  %v1357_v34 = vld [vmem:[%s1735_s1 + $0x80] sm:$0xff]  ;;  %v1398_v38 = vld [vmem:[%s1735_s1 + $0x1b8] sm:$0xff] }
  0x1a   : >> { %502 = vmatpush.bf16.msra.mxu3 %v1371_v11  ;;  %v223_v30 = vshll.u32 %v1032_v25, 16  ;;  %v1342_v32 = vld [vmem:[%s1735_s1 + $0x8] sm:$0xff]  ;;  %v221_v35 = vshrl.u32 %v1032_v25, 16  ;;  %v1366_v39 = vld [vmem:[%s1735_s1 + $0xc0] sm:$0xff]  ;;  %v1406_v41 = vld [vmem:[%s1735_s1 + $0x1f8] sm:$0xff]  ;;  %v366_v43 = vrot.slane %v1032_v25, 1 }
  0x1b   : >> { %339 = vmatpush.bf16.msra.mxu1 %v1346_v12  ;;  %v1341_v40 = vld [vmem:[%s1735_s1] sm:$0xff]  ;;  %v1389_v42 = vld [vmem:[%s1735_s1 + $0x178] sm:$0xff]  ;;  %v1380_v45 = vld [vmem:[%s1735_s1 + $0x130] sm:$0xff] }
  0x1c   : >> { %279 = vmatpush.bf16.msra.mxu0 %v1353_v13  ;;  %v225_v36 = vrot.slane %v223_v30, 1  ;;  %v1397_v46 = vld [vmem:[%s1735_s1 + $0x1b0] sm:$0xff]  ;;  %v1130_v49 = vld [vmem:[%s1546_s8 + $0x8] sm:$0xf]  ;;  %v181_v50 = vld [vmem:[%s1546_s8] sm:$0xf] }
  0x1d   : >> { %419 = vmatpush.bf16.msra.mxu2 %v1361_v14  ;;  %v1405_v47 = vld [vmem:[%s1735_s1 + $0x1f0] sm:$0xff]  ;;  %v1379_v51 = vld [vmem:[%s1735_s1 + $0x128] sm:$0xff]  ;;  %v1378_v55 = vld [vmem:[%s1735_s1 + $0x120] sm:$0xff] }
  0x1e   : >> { %503 = vmatpush.bf16.msra.mxu3 %v1370_v15  ;;  %v226_v44 = vor.u32 %v225_v36, %v221_v35  ;;  %v1388_v48 = vld [vmem:[%s1735_s1 + $0x170] sm:$0xff]  ;;  %v1396_v52 = vld [vmem:[%s1735_s1 + $0x1a8] sm:$0xff]  ;;  %v1395_v56 = vld [vmem:[%s1735_s1 + $0x1a0] sm:$0xff] }
  0x1f   : >> { %340 = vmatpush.bf16.msra.mxu1 %v1345_v16  ;;  %v1404_v53 = vld [vmem:[%s1735_s1 + $0x1e8] sm:$0xff]  ;;  %v1403_v57 = vld [vmem:[%s1735_s1 + $0x1e0] sm:$0xff]  ;;  %v1377_v59 = vld [vmem:[%s1735_s1 + $0x118] sm:$0xff] }
  0x20   : >> { %280 = vmatpush.bf16.msra.mxu0 %v1352_v17  ;;  %v1387_v54 = vld [vmem:[%s1735_s1 + $0x168] sm:$0xff]  ;;  %v1386_v58 = vld [vmem:[%s1735_s1 + $0x160] sm:$0xff]  ;;  %v1394_v60 = vld [vmem:[%s1735_s1 + $0x198] sm:$0xff] }
  0x21   : >> { %420 = vmatpush.bf16.msra.mxu2 %v1360_v18  ;;  %v1166_v61 = vld [vmem:[%s1546_s8 + $0x8] sm:$0xf]  ;;  %v1365_v62 = vld [vmem:[%s1546_s8 + $0x8] sm:$0x10]  ;;  %v1402_v63 = vld [vmem:[%s1735_s1 + $0x1d8] sm:$0xff] }
  0x22   : >> { %504 = vmatpush.bf16.msra.mxu3 %v1369_v19  ;;  %v1385_v1 = vld [vmem:[%s1735_s1 + $0x158] sm:$0xff]  ;;  %v1269_v2 = vld [vmem:[%s1546_s8 + $0x10] sm:$0xf]  ;;  %v1390_v3 = vld [vmem:[%s1546_s8 + $0x10] sm:$0x10]  ;;  %v1167_v4 = vor.u32 %v1365_v62, %v1166_v61 }
  0x23   : >> { %341 = vmatpush.bf16.msra.mxu1 %v1344_v20  ;;  %v1376_v5 = vld [vmem:[%s1735_s1 + $0x110] sm:$0xff]  ;;  %v1270_v7 = vor.u32 %v1390_v3, %v1269_v2  ;;  %v1375_v11 = vld [vmem:[%s1735_s1 + $0x108] sm:$0xff]  ;;  %v1374_v18 = vld [vmem:[%s1735_s1 + $0x100] sm:$0xff] }
  0x24   : >> { %281 = vmatpush.bf16.msra.mxu0 %v1351_v23  ;;  %v1393_v6 = vld [vmem:[%s1735_s1 + $0x190] sm:$0xff]  ;;  %v538_v10 = vshll.u32 %v1167_v4, 16  ;;  %v1392_v12 = vld [vmem:[%s1735_s1 + $0x188] sm:$0xff]  ;;  %v536_v16 = vshrl.u32 %v1167_v4, 16  ;;  %v1391_v19 = vld [vmem:[%s1735_s1 + $0x180] sm:$0xff] }
  0x25   : >> { %421 = vmatpush.bf16.msra.mxu2 %v1359_v24  ;;  %v1401_v8 = vld [vmem:[%s1735_s1 + $0x1d0] sm:$0xff]  ;;  %v793_v13 = vshll.u32 %v1270_v7, 16  ;;  %v1400_v14 = vld [vmem:[%s1735_s1 + $0x1c8] sm:$0xff]  ;;  %v1414_v20 = vld [vmem:[%s1735_s1 + $0x238] sm:$0xff]  ;;  %v791_v21 = vshrl.u32 %v1270_v7, 16  ;;  %v876_v36 = vrot.slane %v1270_v7, 1 }
  0x26   : >> { %505 = vmatpush.bf16.msra.mxu3 %v1368_v26  ;;  %v1384_v9 = vld [vmem:[%s1735_s1 + $0x150] sm:$0xff]  ;;  %v1383_v15 = vld [vmem:[%s1735_s1 + $0x148] sm:$0xff]  ;;  %v540_v17 = vrot.slane %v538_v10, 1  ;;  %v1399_v23 = vld [vmem:[%s1735_s1 + $0x1c0] sm:$0xff] }
  0x27   : >> { %342 = vmatpush.bf16.msra.mxu1 %v1343_v27  ;;  %v795_v22 = vrot.slane %v793_v13, 1  ;;  %v1382_v24 = vld [vmem:[%s1735_s1 + $0x140] sm:$0xff]  ;;  %v1233_v26 = vld [vmem:[%s1546_s8 + $0x10] sm:$0xf]  ;;  %v1412_v30 = vld [vmem:[%s1735_s1 + $0x228] sm:$0xff] }
  0x28   : >> { %282 = vmatpush.bf16.msra.mxu0 %v1350_v28  ;;  %v541_v25 = vor.u32 %v540_v17, %v536_v16  ;;  %v1413_v27 = vld [vmem:[%s1735_s1 + $0x230] sm:$0xff]  ;;  %v1407_v35 = vld [vmem:[%s1735_s1 + $0x200] sm:$0xff] }
  0x29   : >> { %422 = vmatpush.bf16.msra.mxu2 %v1358_v29  ;;  %v796_v28 = vor.u32 %v795_v22, %v791_v21  ;;  %v621_v29 = vrot.slane %v1167_v4, 1 }
  0x2a   : >> { %506 = vmatpush.bf16.msra.mxu3 %v1367_v31  ;;  %v1411_v31 = vld [vmem:[%s1735_s1 + $0x220] sm:$0xff] }
  0x2b   : >> { %343 = vmatpush.bf16.msra.mxu1 %v1342_v32  ;;  %v1410_v32 = vld [vmem:[%s1735_s1 + $0x218] sm:$0xff] }
  0x2c   : >> { %283 = vmatpush.bf16.msra.mxu0 %v1349_v33  ;;  %v1409_v33 = vld [vmem:[%s1735_s1 + $0x210] sm:$0xff] }
  0x2d   : >> { %423 = vmatpush.bf16.msra.mxu2 %v1357_v34  ;;  %v1408_v34 = vld [vmem:[%s1735_s1 + $0x208] sm:$0xff] }
  0x2e   : >> { %507 = vmatpush.bf16.msra.mxu3 %v1366_v39 }
  0x2f   : >> { %344 = vmatpush.bf16.msra.mxu1 %v1341_v40  ;;  %284 = vmatmul.bf16.vlgmr.msra.gmra.mxu0 %v226_v44 }
  0x30   : >> { %591 = vmatpush.bf16.msrb.mxu0 %v1381_v37  ;;  %424 = vmatmul.bf16.vlgmr.msra.gmra.mxu2 %v366_v43 }
  0x31   : >> { %755 = vmatpush.bf16.msrb.mxu2 %v1398_v38  ;;  %508 = vmatmul.bf16.vlgmr.msra.gmra.mxu3 %v1130_v49 }
  0x32   : >> { %846 = vmatpush.bf16.msrb.mxu3 %v1406_v41  ;;  %345 = vmatmul.bf16.vlgmr.msra.gmra.mxu1 %v181_v50 }
  0x33   : >> { %671 = vmatpush.bf16.msrb.mxu1 %v1389_v42 }
  0x34   : >> { %592 = vmatpush.bf16.msrb.mxu0 %v1380_v45 }
  0x35   : >> { %756 = vmatpush.bf16.msrb.mxu2 %v1397_v46 }
  0x36   : >> { %847 = vmatpush.bf16.msrb.mxu3 %v1405_v47 }
  0x37   : >> { %672 = vmatpush.bf16.msrb.mxu1 %v1388_v48 }
  0x38   : >> { %593 = vmatpush.bf16.msrb.mxu0 %v1379_v51 }
  0x39   : >> { %757 = vmatpush.bf16.msrb.mxu2 %v1396_v52 }
  0x3a   : >> { %848 = vmatpush.bf16.msrb.mxu3 %v1404_v53 }
  0x3b   : >> { %673 = vmatpush.bf16.msrb.mxu1 %v1387_v54 }
  0x3c   : >> { %594 = vmatpush.bf16.msrb.mxu0 %v1378_v55 }
  0x3d   : >> { %758 = vmatpush.bf16.msrb.mxu2 %v1395_v56 }
  0x3e   : >> { %849 = vmatpush.bf16.msrb.mxu3 %v1403_v57 }
  0x3f   : >> { %674 = vmatpush.bf16.msrb.mxu1 %v1386_v58 }
  0x40   : >> { %595 = vmatpush.bf16.msrb.mxu0 %v1377_v59 }
  0x41   : >> { %759 = vmatpush.bf16.msrb.mxu2 %v1394_v60  ;;  %v941_v60 = vperm.slane %v1479_v0, 0 }
  0x42   : >> { %850 = vmatpush.bf16.msrb.mxu3 %v1402_v63 }
  0x43   : >> { %675 = vmatpush.bf16.msrb.mxu1 %v1385_v1 }
  0x44   : >> { %596 = vmatpush.bf16.msrb.mxu0 %v1376_v5 }
  0x45   : >> { %760 = vmatpush.bf16.msrb.mxu2 %v1393_v6 }
  0x46   : >> { %851 = vmatpush.bf16.msrb.mxu3 %v1401_v8 }
  0x47   : >> { %676 = vmatpush.bf16.msrb.mxu1 %v1384_v9 }
  0x48   : >> { %597 = vmatpush.bf16.msrb.mxu0 %v1375_v11 }
  0x49   : >> { %761 = vmatpush.bf16.msrb.mxu2 %v1392_v12 }
  0x4a   : >> { %852 = vmatpush.bf16.msrb.mxu3 %v1400_v14 }
  0x4b   : >> { %677 = vmatpush.bf16.msrb.mxu1 %v1383_v15 }
  0x4c   : >> { %598 = vmatpush.bf16.msrb.mxu0 %v1374_v18 }
  0x4d   : >> { %762 = vmatpush.bf16.msrb.mxu2 %v1391_v19 }
  0x4e   : >> { %853 = vmatpush.bf16.msrb.mxu3 %v1399_v23 }
  0x4f   : >> { %678 = vmatpush.bf16.msrb.mxu1 %v1382_v24  ;;  %599 = vmatmul.bf16.vlgmr.msrb.gmra.mxu0 %v541_v25 }
  0x50   : >> { %926 = vmatpush.bf16.msra.mxu0 %v1414_v20  ;;  %763 = vmatmul.bf16.vlgmr.msrb.gmra.mxu2 %v1233_v26 }
  0x51   : >> { %854 = vmatmul.bf16.vlgmr.msrb.gmra.mxu3 %v796_v28 }
  0x52   : >> { %679 = vmatmul.bf16.vlgmr.msrb.gmra.mxu1 %v621_v29 }
  0x54   : >> { %927 = vmatpush.bf16.msra.mxu0 %v1413_v27 }
  0x58   : >> { %928 = vmatpush.bf16.msra.mxu0 %v1412_v30 }
  0x5c   : >> { %929 = vmatpush.bf16.msra.mxu0 %v1411_v31 }
  0x60   : >> { %930 = vmatpush.bf16.msra.mxu0 %v1410_v32 }
  0x64   : >> { %931 = vmatpush.bf16.msra.mxu0 %v1409_v33 }
  0x68   : >> { %932 = vmatpush.bf16.msra.mxu0 %v1408_v34 }
  0x6c   : >> { %933 = vmatpush.bf16.msra.mxu0 %v1407_v35 }
  0x6f   : >> { %934 = vmatmul.bf16.vlgmr.msra.gmra.mxu0 %v876_v36 }
  0xac   : >> { %v285_v37 = vpop.f32.mrf.mxu0 }
  0xaf   : >> { %v346_v38 = vpop.f32.mrf.mxu1 }
  0xb0   : >> { %v347_v47 = vadd.f32 %v346_v38, %v285_v37 }
  0xb3   : >> { %v425_v39 = vpop.f32.mrf.mxu2 }
  0xb4   : >> { %v509_v40 = vpop.f32.mrf.mxu3  ;;  %v287_v41 = vpop.f32.mrf.mxu0  ;;  %v429_v49 = vadd.f32 %v425_v39, %v347_v47 }
  0xb6   : >> { %v513_v53 = vadd.f32 %v509_v40, %v429_v49 }
  0xb7   : >> { %v348_v42 = vpop.f32.mrf.mxu1 }
  0xbb   : >> { %v427_v43 = vpop.f32.mrf.mxu2 }
  0xbc   : >> { %v511_v44 = vpop.f32.mrf.mxu3 }
  0xcc   : >> { %v600_v45 = vpop.f32.mrf.mxu0 }
  0xcd   : >> { %v604_v55 = vadd.f32 %v600_v45, %v513_v53 }
  0xcf   : >> { %v680_v46 = vpop.f32.mrf.mxu1 }
  0xd0   : >> { %v684_v57 = vadd.f32 %v680_v46, %v604_v55 }
  0xd3   : >> { %v764_v48 = vpop.f32.mrf.mxu2 }
  0xd4   : >> { %v855_v50 = vpop.f32.mrf.mxu3  ;;  %v602_v51 = vpop.f32.mrf.mxu0  ;;  %v768_v58 = vadd.f32 %v764_v48, %v684_v57 }
  0xd6   : >> { %v859_v59 = vadd.f32 %v855_v50, %v768_v58 }
  0xd7   : >> { %v682_v52 = vpop.f32.mrf.mxu1 }
  0xdb   : >> { %v766_v54 = vpop.f32.mrf.mxu2 }
  0xdc   : >> { %v857_v56 = vpop.f32.mrf.mxu3 }
  0xec   : >> { %v935_v61 = vpop.f32.mrf.mxu0 }
  0xed   : >> { %v939_v62 = vadd.f32 %v935_v61, %v859_v59 }
  0xef   : >> { %v943_v63 = vadd.f32 %v941_v60, %v939_v62 }
  0xf1   : >> { %v944_v1 = vmax.f32 %v943_v63, 0.0  ;;  %176 = sbr.rel (!%p174_p4) target bundleno = 15 (0xf), region = 73 }
  0xf3   : >> { %v945_v2 = vpack.c.bf16 %v944_v1, %v944_v1 }
  0xf4   : >> { %v937_v3 = vpop.f32.mrf.mxu0 }
  0xf5   : >> { %948 = vst [vmem:[%s947_s11] sm:$0xf] %v945_v2 }
  0xf6 PF: > { %s13_s12 = sadd.s32 1, %s1442_s12  }
  0xf7   : > { %p10_p5 = scmp.ge.s32.totalorder %s13_s12, 4  }
  0xf9   :  { %12 = sbr.rel (!%p10_p5) target bundleno = 1 (0x1), region = 84 }

// kernel: deeplab_forward.27
= control target key start
LH: loop header
LB: loop body
LE: loop exit
PB: predicated region body
PF: predicated region fallthrough
CT: control target
= control target key end

     0   :  { %s1472_s9 = smov 0   ;;  %s2135_s0 = inlined_call_operand.vmem [shape: f32[1024,64], index: 0, kind: input, shape index: {}]   ;;  %s2136_s1 = inlined_call_operand.vmem [shape: bf16[2,64,128], index: 1, kind: input, shape index: {}]   ;;  %s2137_s2 = inlined_call_operand.vmem [shape: f32[2,1024,128], index: 2, kind: output, shape index: {}]  }
   0x1 LB: > { %s1257_s10 = sadd.s32 4294967295, %s1455_s9   ;;  %p1261_p0 = scmp.ge.s32.totalorder %s1455_s9, 1  ;;  %s1455_s9 = sphi %s1472_s9, %s12_s9  }
   0x2   : > { %p112_p1 = scmp.lt.s32.totalorder %s1455_s9, 3 }
   0x4   : > { %p113_p2 = pnand %p1261_p0, %p112_p1 }
   0x5   : > { %p134_p3 = scmp.lt.s32.totalorder (!%p113_p2), %s1257_s10, 1 }
   0x6   : > { %116 = sbr.rel (%p113_p2) target bundleno = 414 (0x19e), region = 28 }
   0xb   : > { %s2139_s10 = smov (!%p134_p3, %s1257_s10), 1  ;;  %v208_v12 = vld [vmem:[%s2135_s0 + $0x200] sm:$0xff]  ;;  %vm288_vm0 = vcmask 523264   ;;  %v209_v16 = vld [vmem:[%s2135_s0 + $0x208] sm:$0xff]  ;;  %v210_v20 = vld [vmem:[%s2135_s0 + $0x210] sm:$0xff] }
   0xc   : > { %s1396_s11 = sshll.u32 %s2139_s10, 5  ;;  %v240_v13 = vld [vmem:[%s2135_s0 + $0x300] sm:$0xff]  ;;  %v241_v17 = vld [vmem:[%s2135_s0 + $0x308] sm:$0xff]  ;;  %v242_v21 = vld [vmem:[%s2135_s0 + $0x310] sm:$0xff]  ;;  %s1397_s13 = sshll.u32 %s2139_s10, 10 }
   0xd   : > { %s138_s14 = scalar_lea.vmem %s2136_s1, %s1396_s11  ;;  %v144_v14 = vld [vmem:[%s2135_s0] sm:$0xff]  ;;  %v145_v18 = vld [vmem:[%s2135_s0 + $0x8] sm:$0xff]  ;;  %v146_v22 = vld [vmem:[%s2135_s0 + $0x10] sm:$0xff]  ;;  %s1746_s16 = scalar_lea.vmem %s2137_s2, %s1397_s13 }
   0xe   : > { %v1416_v0 = vld [vmem:[%s138_s14 + $0x18] sm:$0xff]   ;;  %v1415_v1 = vld [vmem:[%s138_s14 + $0x10] sm:$0xff]   ;;  %v1414_v5 = vld [vmem:[%s138_s14 + $0x8] sm:$0xff]  }
   0xf   : > { %v1413_v2 = vunpack.c.h.bf16 %v1416_v0  ;;  %v1412_v3 = vunpack.c.l.bf16 %v1416_v0  ;;  %v1409_v4 = vunpack.c.h.bf16 %v1415_v1  ;;  %v1408_v6 = vunpack.c.l.bf16 %v1415_v1  ;;  %v1399_v8 = vld [vmem:[%s138_s14] sm:$0xff]   ;;  %v177_v19 = vld [vmem:[%s2135_s0 + $0x108] sm:$0xff]  ;;  %v178_v23 = vld [vmem:[%s2135_s0 + $0x110] sm:$0xff] }
  0x10   : > { %v1405_v7 = vunpack.c.h.bf16 %v1414_v5  ;;  %v1404_v9 = vunpack.c.l.bf16 %v1414_v5  ;;  %v1401_v10 = vunpack.c.h.bf16 %v1399_v8  ;;  %v1400_v11 = vunpack.c.l.bf16 %v1399_v8  ;;  %v176_v15 = vld [vmem:[%s2135_s0 + $0x100] sm:$0xff]  ;;  %v211_v24 = vld [vmem:[%s2135_s0 + $0x218] sm:$0xff]  ;;  %v213_v32 = vld [vmem:[%s2135_s0 + $0x228] sm:$0xff] }
  0x11   : > { %1418 = vmatpush.msra.mxu2 %v1413_v2  ;;  %1419 = vmatpush.msra.mxu3 %v1413_v2  ;;  %v243_v25 = vld [vmem:[%s2135_s0 + $0x318] sm:$0xff]  ;;  %v212_v28 = vld [vmem:[%s2135_s0 + $0x220] sm:$0xff]  ;;  %v245_v33 = vld [vmem:[%s2135_s0 + $0x328] sm:$0xff] }
  0x12   : > { %681 = vmatpush.msra.mxu0 %v1413_v2  ;;  %1417 = vmatpush.msra.mxu1 %v1413_v2  ;;  %v147_v26 = vld [vmem:[%s2135_s0 + $0x18] sm:$0xff]  ;;  %v244_v29 = vld [vmem:[%s2135_s0 + $0x320] sm:$0xff]  ;;  %v149_v34 = vld [vmem:[%s2135_s0 + $0x28] sm:$0xff] }
  0x13   : > { %1421 = vmatpush.msra.mxu2 %v1412_v3  ;;  %1422 = vmatpush.msra.mxu3 %v1412_v3  ;;  %v179_v27 = vld [vmem:[%s2135_s0 + $0x118] sm:$0xff]  ;;  %v148_v30 = vld [vmem:[%s2135_s0 + $0x20] sm:$0xff]  ;;  %v181_v35 = vld [vmem:[%s2135_s0 + $0x128] sm:$0xff] }
  0x14   : > { %682 = vmatpush.msra.mxu0 %v1412_v3  ;;  %1420 = vmatpush.msra.mxu1 %v1412_v3  ;;  %v180_v31 = vld [vmem:[%s2135_s0 + $0x120] sm:$0xff]  ;;  %v214_v36 = vld [vmem:[%s2135_s0 + $0x230] sm:$0xff]  ;;  %v215_v40 = vld [vmem:[%s2135_s0 + $0x238] sm:$0xff] }
  0x15   : > { %1424 = vmatpush.msra.mxu2 %v1409_v4  ;;  %1425 = vmatpush.msra.mxu3 %v1409_v4  ;;  %v246_v37 = vld [vmem:[%s2135_s0 + $0x330] sm:$0xff]  ;;  %v247_v41 = vld [vmem:[%s2135_s0 + $0x338] sm:$0xff]  ;;  %v216_v44 = vld [vmem:[%s2135_s0 + $0x240] sm:$0xff] }
  0x16   : > { %683 = vmatpush.msra.mxu0 %v1409_v4  ;;  %1423 = vmatpush.msra.mxu1 %v1409_v4  ;;  %v150_v38 = vld [vmem:[%s2135_s0 + $0x30] sm:$0xff]  ;;  %v151_v42 = vld [vmem:[%s2135_s0 + $0x38] sm:$0xff]  ;;  %v248_v45 = vld [vmem:[%s2135_s0 + $0x340] sm:$0xff] }
  0x17   : > { %1427 = vmatpush.msra.mxu2 %v1408_v6  ;;  %1428 = vmatpush.msra.mxu3 %v1408_v6  ;;  %v182_v39 = vld [vmem:[%s2135_s0 + $0x130] sm:$0xff]  ;;  %v183_v43 = vld [vmem:[%s2135_s0 + $0x138] sm:$0xff]  ;;  %v152_v46 = vld [vmem:[%s2135_s0 + $0x40] sm:$0xff] }
  0x18   : > { %684 = vmatpush.msra.mxu0 %v1408_v6  ;;  %1426 = vmatpush.msra.mxu1 %v1408_v6  ;;  %v184_v47 = vld [vmem:[%s2135_s0 + $0x140] sm:$0xff]  ;;  %v217_v48 = vld [vmem:[%s2135_s0 + $0x248] sm:$0xff]  ;;  %v218_v52 = vld [vmem:[%s2135_s0 + $0x250] sm:$0xff] }
  0x19   : > { %1430 = vmatpush.msra.mxu2 %v1405_v7  ;;  %1431 = vmatpush.msra.mxu3 %v1405_v7  ;;  %v249_v49 = vld [vmem:[%s2135_s0 + $0x348] sm:$0xff]  ;;  %v250_v53 = vld [vmem:[%s2135_s0 + $0x350] sm:$0xff]  ;;  %v219_v56 = vld [vmem:[%s2135_s0 + $0x258] sm:$0xff] }
  0x1a   : > { %685 = vmatpush.msra.mxu0 %v1405_v7  ;;  %1429 = vmatpush.msra.mxu1 %v1405_v7  ;;  %v153_v50 = vld [vmem:[%s2135_s0 + $0x48] sm:$0xff]  ;;  %v154_v54 = vld [vmem:[%s2135_s0 + $0x50] sm:$0xff]  ;;  %v251_v57 = vld [vmem:[%s2135_s0 + $0x358] sm:$0xff] }
  0x1b   : > { %1433 = vmatpush.msra.mxu2 %v1404_v9  ;;  %1434 = vmatpush.msra.mxu3 %v1404_v9  ;;  %v185_v51 = vld [vmem:[%s2135_s0 + $0x148] sm:$0xff]  ;;  %v186_v55 = vld [vmem:[%s2135_s0 + $0x150] sm:$0xff]  ;;  %v155_v58 = vld [vmem:[%s2135_s0 + $0x58] sm:$0xff] }
  0x1c   : > { %686 = vmatpush.msra.mxu0 %v1404_v9  ;;  %1432 = vmatpush.msra.mxu1 %v1404_v9  ;;  %v187_v59 = vld [vmem:[%s2135_s0 + $0x158] sm:$0xff]  ;;  %v220_v60 = vld [vmem:[%s2135_s0 + $0x260] sm:$0xff]  ;;  %v221_v0 = vld [vmem:[%s2135_s0 + $0x268] sm:$0xff] }
  0x1d   : > { %1436 = vmatpush.msra.mxu2 %v1401_v10  ;;  %1437 = vmatpush.msra.mxu3 %v1401_v10  ;;  %v252_v61 = vld [vmem:[%s2135_s0 + $0x360] sm:$0xff]  ;;  %v253_v1 = vld [vmem:[%s2135_s0 + $0x368] sm:$0xff]  ;;  %v222_v4 = vld [vmem:[%s2135_s0 + $0x270] sm:$0xff] }
  0x1e   : > { %687 = vmatpush.msra.mxu0 %v1401_v10  ;;  %1435 = vmatpush.msra.mxu1 %v1401_v10  ;;  %v156_v62 = vld [vmem:[%s2135_s0 + $0x60] sm:$0xff]  ;;  %v157_v2 = vld [vmem:[%s2135_s0 + $0x68] sm:$0xff]  ;;  %v254_v5 = vld [vmem:[%s2135_s0 + $0x370] sm:$0xff] }
  0x1f   : > { %1439 = vmatpush.msra.mxu2 %v1400_v11  ;;  %1440 = vmatpush.msra.mxu3 %v1400_v11  ;;  %v188_v63 = vld [vmem:[%s2135_s0 + $0x160] sm:$0xff]  ;;  %v189_v3 = vld [vmem:[%s2135_s0 + $0x168] sm:$0xff]  ;;  %v158_v6 = vld [vmem:[%s2135_s0 + $0x70] sm:$0xff] }
  0x20   : > { %1330 = vmatmul.msk.f32.vlgmr.msra.gmra.mxu2 %vm288_vm0, %v208_v12  ;;  %1362 = vmatmul.msk.f32.vlgmr.msra.gmra.mxu3 %vm288_vm0, %v240_v13  ;;  %v190_v7 = vld [vmem:[%s2135_s0 + $0x170] sm:$0xff]  ;;  %v223_v8 = vld [vmem:[%s2135_s0 + $0x278] sm:$0xff]  ;;  %v224_v12 = vld [vmem:[%s2135_s0 + $0x280] sm:$0xff] }
  0x21   : > { %688 = vmatpush.msra.mxu0 %v1400_v11  ;;  %1438 = vmatpush.msra.mxu1 %v1400_v11  ;;  %v255_v9 = vld [vmem:[%s2135_s0 + $0x378] sm:$0xff]  ;;  %v256_v13 = vld [vmem:[%s2135_s0 + $0x380] sm:$0xff] }
  0x22   : > { %1266 = vmatmul.msk.f32.vlgmr.msra.gmra.mxu0 %vm288_vm0, %v144_v14  ;;  %1298 = vmatmul.msk.f32.vlgmr.msra.gmra.mxu1 %vm288_vm0, %v176_v15  ;;  %v159_v10 = vld [vmem:[%s2135_s0 + $0x78] sm:$0xff] }
  0x23   : > { %v191_v11 = vld [vmem:[%s2135_s0 + $0x178] sm:$0xff] }
  0x28   : > { %1331 = vmatmul.msk.f32.gmra.mxu2 %vm288_vm0, %v209_v16  ;;  %1363 = vmatmul.msk.f32.gmra.mxu3 %vm288_vm0, %v241_v17  ;;  %v160_v16 = vld [vmem:[%s2135_s0 + $0x80] sm:$0xff] }
  0x29   : > { %v192_v17 = vld [vmem:[%s2135_s0 + $0x180] sm:$0xff] }
  0x2a   : > { %1267 = vmatmul.msk.f32.gmra.mxu0 %vm288_vm0, %v145_v18  ;;  %1299 = vmatmul.msk.f32.gmra.mxu1 %vm288_vm0, %v177_v19 }
  0x30   : > { %1332 = vmatmul.msk.f32.gmra.mxu2 %vm288_vm0, %v210_v20  ;;  %1364 = vmatmul.msk.f32.gmra.mxu3 %vm288_vm0, %v242_v21  ;;  %v225_v20 = vld [vmem:[%s2135_s0 + $0x288] sm:$0xff] }
  0x31   : > { %v257_v21 = vld [vmem:[%s2135_s0 + $0x388] sm:$0xff] }
  0x32   : > { %1268 = vmatmul.msk.f32.gmra.mxu0 %vm288_vm0, %v146_v22  ;;  %1300 = vmatmul.msk.f32.gmra.mxu1 %vm288_vm0, %v178_v23 }
  0x38   : > { %1333 = vmatmul.msk.f32.gmra.mxu2 %vm288_vm0, %v211_v24  ;;  %1365 = vmatmul.msk.f32.gmra.mxu3 %vm288_vm0, %v243_v25  ;;  %v161_v24 = vld [vmem:[%s2135_s0 + $0x88] sm:$0xff] }
  0x39   : > { %v193_v25 = vld [vmem:[%s2135_s0 + $0x188] sm:$0xff] }
  0x3a   : > { %1269 = vmatmul.msk.f32.gmra.mxu0 %vm288_vm0, %v147_v26  ;;  %1301 = vmatmul.msk.f32.gmra.mxu1 %vm288_vm0, %v179_v27 }
  0x40   : > { %1334 = vmatmul.msk.f32.gmra.mxu2 %vm288_vm0, %v212_v28  ;;  %1366 = vmatmul.msk.f32.gmra.mxu3 %vm288_vm0, %v244_v29  ;;  %v226_v28 = vld [vmem:[%s2135_s0 + $0x290] sm:$0xff] }
  0x41   : > { %v258_v29 = vld [vmem:[%s2135_s0 + $0x390] sm:$0xff] }
  0x42   : > { %1270 = vmatmul.msk.f32.gmra.mxu0 %vm288_vm0, %v148_v30  ;;  %1302 = vmatmul.msk.f32.gmra.mxu1 %vm288_vm0, %v180_v31 }
  0x48   : > { %1335 = vmatmul.msk.f32.gmra.mxu2 %vm288_vm0, %v213_v32  ;;  %1367 = vmatmul.msk.f32.gmra.mxu3 %vm288_vm0, %v245_v33  ;;  %v162_v32 = vld [vmem:[%s2135_s0 + $0x90] sm:$0xff] }
  0x49   : > { %v194_v33 = vld [vmem:[%s2135_s0 + $0x190] sm:$0xff] }
  0x4a   : > { %1271 = vmatmul.msk.f32.gmra.mxu0 %vm288_vm0, %v149_v34  ;;  %1303 = vmatmul.msk.f32.gmra.mxu1 %vm288_vm0, %v181_v35 }
  0x50   : > { %1336 = vmatmul.msk.f32.gmra.mxu2 %vm288_vm0, %v214_v36  ;;  %1368 = vmatmul.msk.f32.gmra.mxu3 %vm288_vm0, %v246_v37  ;;  %v227_v36 = vld [vmem:[%s2135_s0 + $0x298] sm:$0xff] }
  0x51   : > { %v259_v37 = vld [vmem:[%s2135_s0 + $0x398] sm:$0xff] }
  0x52   : > { %1272 = vmatmul.msk.f32.gmra.mxu0 %vm288_vm0, %v150_v38  ;;  %1304 = vmatmul.msk.f32.gmra.mxu1 %vm288_vm0, %v182_v39 }
  0x58   : > { %1337 = vmatmul.msk.f32.gmra.mxu2 %vm288_vm0, %v215_v40  ;;  %1369 = vmatmul.msk.f32.gmra.mxu3 %vm288_vm0, %v247_v41  ;;  %v163_v40 = vld [vmem:[%s2135_s0 + $0x98] sm:$0xff] }
  0x59   : > { %v195_v41 = vld [vmem:[%s2135_s0 + $0x198] sm:$0xff] }
  0x5a   : > { %1273 = vmatmul.msk.f32.gmra.mxu0 %vm288_vm0, %v151_v42  ;;  %1305 = vmatmul.msk.f32.gmra.mxu1 %vm288_vm0, %v183_v43 }
  0x60   : > { %1338 = vmatmul.msk.f32.gmra.mxu2 %vm288_vm0, %v216_v44  ;;  %1370 = vmatmul.msk.f32.gmra.mxu3 %vm288_vm0, %v248_v45  ;;  %v228_v44 = vld [vmem:[%s2135_s0 + $0x2a0] sm:$0xff] }
  0x61   : > { %v260_v45 = vld [vmem:[%s2135_s0 + $0x3a0] sm:$0xff] }
  0x62   : > { %1274 = vmatmul.msk.f32.gmra.mxu0 %vm288_vm0, %v152_v46  ;;  %1306 = vmatmul.msk.f32.gmra.mxu1 %vm288_vm0, %v184_v47 }
  0x68   : > { %1339 = vmatmul.msk.f32.gmra.mxu2 %vm288_vm0, %v217_v48  ;;  %1371 = vmatmul.msk.f32.gmra.mxu3 %vm288_vm0, %v249_v49  ;;  %v164_v48 = vld [vmem:[%s2135_s0 + $0xa0] sm:$0xff] }
  0x69   : > { %v196_v49 = vld [vmem:[%s2135_s0 + $0x1a0] sm:$0xff] }
  0x6a   : > { %1275 = vmatmul.msk.f32.gmra.mxu0 %vm288_vm0, %v153_v50  ;;  %1307 = vmatmul.msk.f32.gmra.mxu1 %vm288_vm0, %v185_v51 }
  0x70   : > { %1340 = vmatmul.msk.f32.gmra.mxu2 %vm288_vm0, %v218_v52  ;;  %1372 = vmatmul.msk.f32.gmra.mxu3 %vm288_vm0, %v250_v53  ;;  %v229_v52 = vld [vmem:[%s2135_s0 + $0x2a8] sm:$0xff] }
  0x71   : > { %v261_v53 = vld [vmem:[%s2135_s0 + $0x3a8] sm:$0xff] }
  0x72   : > { %1276 = vmatmul.msk.f32.gmra.mxu0 %vm288_vm0, %v154_v54  ;;  %1308 = vmatmul.msk.f32.gmra.mxu1 %vm288_vm0, %v186_v55 }
  0x78   : > { %1341 = vmatmul.msk.f32.gmra.mxu2 %vm288_vm0, %v219_v56  ;;  %1373 = vmatmul.msk.f32.gmra.mxu3 %vm288_vm0, %v251_v57  ;;  %v165_v56 = vld [vmem:[%s2135_s0 + $0xa8] sm:$0xff] }
  0x79   : > { %v197_v57 = vld [vmem:[%s2135_s0 + $0x1a8] sm:$0xff] }
  0x7a   : > { %1277 = vmatmul.msk.f32.gmra.mxu0 %vm288_vm0, %v155_v58  ;;  %1309 = vmatmul.msk.f32.gmra.mxu1 %vm288_vm0, %v187_v59 }
  0x80   : > { %1342 = vmatmul.msk.f32.gmra.mxu2 %vm288_vm0, %v220_v60  ;;  %1374 = vmatmul.msk.f32.gmra.mxu3 %vm288_vm0, %v252_v61  ;;  %v230_v60 = vld [vmem:[%s2135_s0 + $0x2b0] sm:$0xff] }
  0x81   : > { %v262_v61 = vld [vmem:[%s2135_s0 + $0x3b0] sm:$0xff] }
  0x82   : > { %1278 = vmatmul.msk.f32.gmra.mxu0 %vm288_vm0, %v156_v62  ;;  %1310 = vmatmul.msk.f32.gmra.mxu1 %vm288_vm0, %v188_v63 }
  0x88   : > { %1343 = vmatmul.msk.f32.gmra.mxu2 %vm288_vm0, %v221_v0  ;;  %1375 = vmatmul.msk.f32.gmra.mxu3 %vm288_vm0, %v253_v1  ;;  %v166_v0 = vld [vmem:[%s2135_s0 + $0xb0] sm:$0xff] }
  0x89   : > { %v198_v1 = vld [vmem:[%s2135_s0 + $0x1b0] sm:$0xff] }
  0x8a   : > { %1279 = vmatmul.msk.f32.gmra.mxu0 %vm288_vm0, %v157_v2  ;;  %1311 = vmatmul.msk.f32.gmra.mxu1 %vm288_vm0, %v189_v3 }
  0x90   : > { %1344 = vmatmul.msk.f32.gmra.mxu2 %vm288_vm0, %v222_v4  ;;  %1376 = vmatmul.msk.f32.gmra.mxu3 %vm288_vm0, %v254_v5  ;;  %v231_v4 = vld [vmem:[%s2135_s0 + $0x2b8] sm:$0xff] }
  0x91   : > { %v263_v5 = vld [vmem:[%s2135_s0 + $0x3b8] sm:$0xff] }
  0x92   : > { %1280 = vmatmul.msk.f32.gmra.mxu0 %vm288_vm0, %v158_v6  ;;  %1312 = vmatmul.msk.f32.gmra.mxu1 %vm288_vm0, %v190_v7 }
  0x98   : > { %1345 = vmatmul.msk.f32.gmra.mxu2 %vm288_vm0, %v223_v8  ;;  %1377 = vmatmul.msk.f32.gmra.mxu3 %vm288_vm0, %v255_v9  ;;  %v167_v8 = vld [vmem:[%s2135_s0 + $0xb8] sm:$0xff] }
  0x99   : > { %v199_v9 = vld [vmem:[%s2135_s0 + $0x1b8] sm:$0xff] }
  0x9a   : > { %1281 = vmatmul.msk.f32.gmra.mxu0 %vm288_vm0, %v159_v10  ;;  %1313 = vmatmul.msk.f32.gmra.mxu1 %vm288_vm0, %v191_v11 }
  0x9f   : > { %v690_v14 = vpop.f32.mrf.mxu0  ;;  %v786_v15 = vpop.f32.mrf.mxu1 }
  0xa0   : > { %1346 = vmatmul.msk.f32.gmra.mxu2 %vm288_vm0, %v224_v12  ;;  %1378 = vmatmul.msk.f32.gmra.mxu3 %vm288_vm0, %v256_v13  ;;  %1074 = vst [vmem:[%s1746_s16] sm:$0xff] %v690_v14  ;;  %v232_v12 = vld [vmem:[%s2135_s0 + $0x2c0] sm:$0xff] }
  0xa1   : > { %1106 = vst [vmem:[%s1746_s16 + $0x100] sm:$0xff] %v786_v15  ;;  %v264_v13 = vld [vmem:[%s2135_s0 + $0x3c0] sm:$0xff] }
  0xa2   : > { %1282 = vmatmul.msk.f32.gmra.mxu0 %vm288_vm0, %v160_v16  ;;  %1314 = vmatmul.msk.f32.gmra.mxu1 %vm288_vm0, %v192_v17  ;;  %v168_v16 = vld [vmem:[%s2135_s0 + $0xc0] sm:$0xff] }
  0xa3   : > { %v882_v18 = vpop.f32.mrf.mxu2  ;;  %v978_v19 = vpop.f32.mrf.mxu3  ;;  %v200_v17 = vld [vmem:[%s2135_s0 + $0x1c0] sm:$0xff] }
  0xa4   : > { %1138 = vst [vmem:[%s1746_s16 + $0x200] sm:$0xff] %v882_v18 }
  0xa5   : > { %1170 = vst [vmem:[%s1746_s16 + $0x300] sm:$0xff] %v978_v19 }
  0xa7   : > { %v693_v22 = vpop.f32.mrf.mxu0  ;;  %v789_v23 = vpop.f32.mrf.mxu1 }
  0xa8   : > { %1347 = vmatmul.msk.f32.gmra.mxu2 %vm288_vm0, %v225_v20  ;;  %1379 = vmatmul.msk.f32.gmra.mxu3 %vm288_vm0, %v257_v21  ;;  %1075 = vst [vmem:[%s1746_s16 + $0x8] sm:$0xff] %v693_v22  ;;  %v233_v20 = vld [vmem:[%s2135_s0 + $0x2c8] sm:$0xff] }
  0xa9   : > { %1107 = vst [vmem:[%s1746_s16 + $0x108] sm:$0xff] %v789_v23  ;;  %v265_v21 = vld [vmem:[%s2135_s0 + $0x3c8] sm:$0xff] }
  0xaa   : > { %1283 = vmatmul.msk.f32.gmra.mxu0 %vm288_vm0, %v161_v24  ;;  %1315 = vmatmul.msk.f32.gmra.mxu1 %vm288_vm0, %v193_v25  ;;  %v169_v24 = vld [vmem:[%s2135_s0 + $0xc8] sm:$0xff] }
  0xab   : > { %v885_v26 = vpop.f32.mrf.mxu2  ;;  %v981_v27 = vpop.f32.mrf.mxu3  ;;  %v201_v25 = vld [vmem:[%s2135_s0 + $0x1c8] sm:$0xff] }
  0xac   : > { %1139 = vst [vmem:[%s1746_s16 + $0x208] sm:$0xff] %v885_v26 }
  0xad   : > { %1171 = vst [vmem:[%s1746_s16 + $0x308] sm:$0xff] %v981_v27 }
  0xaf   : > { %v696_v30 = vpop.f32.mrf.mxu0  ;;  %v792_v31 = vpop.f32.mrf.mxu1 }
  0xb0   : > { %1348 = vmatmul.msk.f32.gmra.mxu2 %vm288_vm0, %v226_v28  ;;  %1380 = vmatmul.msk.f32.gmra.mxu3 %vm288_vm0, %v258_v29  ;;  %1076 = vst [vmem:[%s1746_s16 + $0x10] sm:$0xff] %v696_v30  ;;  %v234_v28 = vld [vmem:[%s2135_s0 + $0x2d0] sm:$0xff] }
  0xb1   : > { %1108 = vst [vmem:[%s1746_s16 + $0x110] sm:$0xff] %v792_v31  ;;  %v266_v29 = vld [vmem:[%s2135_s0 + $0x3d0] sm:$0xff] }
  0xb2   : > { %1284 = vmatmul.msk.f32.gmra.mxu0 %vm288_vm0, %v162_v32  ;;  %1316 = vmatmul.msk.f32.gmra.mxu1 %vm288_vm0, %v194_v33  ;;  %v170_v32 = vld [vmem:[%s2135_s0 + $0xd0] sm:$0xff] }
  0xb3   : > { %v888_v34 = vpop.f32.mrf.mxu2  ;;  %v984_v35 = vpop.f32.mrf.mxu3  ;;  %v202_v33 = vld [vmem:[%s2135_s0 + $0x1d0] sm:$0xff] }
  0xb4   : > { %1140 = vst [vmem:[%s1746_s16 + $0x210] sm:$0xff] %v888_v34 }
  0xb5   : > { %1172 = vst [vmem:[%s1746_s16 + $0x310] sm:$0xff] %v984_v35 }
  0xb7   : > { %v699_v38 = vpop.f32.mrf.mxu0  ;;  %v795_v39 = vpop.f32.mrf.mxu1 }
  0xb8   : > { %1349 = vmatmul.msk.f32.gmra.mxu2 %vm288_vm0, %v227_v36  ;;  %1381 = vmatmul.msk.f32.gmra.mxu3 %vm288_vm0, %v259_v37  ;;  %1077 = vst [vmem:[%s1746_s16 + $0x18] sm:$0xff] %v699_v38  ;;  %v235_v36 = vld [vmem:[%s2135_s0 + $0x2d8] sm:$0xff] }
  0xb9   : > { %1109 = vst [vmem:[%s1746_s16 + $0x118] sm:$0xff] %v795_v39  ;;  %v267_v37 = vld [vmem:[%s2135_s0 + $0x3d8] sm:$0xff] }
  0xba   : > { %1285 = vmatmul.msk.f32.gmra.mxu0 %vm288_vm0, %v163_v40  ;;  %1317 = vmatmul.msk.f32.gmra.mxu1 %vm288_vm0, %v195_v41  ;;  %v171_v40 = vld [vmem:[%s2135_s0 + $0xd8] sm:$0xff] }
  0xbb   : > { %v891_v42 = vpop.f32.mrf.mxu2  ;;  %v987_v43 = vpop.f32.mrf.mxu3  ;;  %v203_v41 = vld [vmem:[%s2135_s0 + $0x1d8] sm:$0xff] }
  0xbc   : > { %1141 = vst [vmem:[%s1746_s16 + $0x218] sm:$0xff] %v891_v42 }
  0xbd   : > { %1173 = vst [vmem:[%s1746_s16 + $0x318] sm:$0xff] %v987_v43 }
  0xbf   : > { %v702_v46 = vpop.f32.mrf.mxu0  ;;  %v798_v47 = vpop.f32.mrf.mxu1 }
  0xc0   : > { %1350 = vmatmul.msk.f32.gmra.mxu2 %vm288_vm0, %v228_v44  ;;  %1382 = vmatmul.msk.f32.gmra.mxu3 %vm288_vm0, %v260_v45  ;;  %1078 = vst [vmem:[%s1746_s16 + $0x20] sm:$0xff] %v702_v46  ;;  %v236_v44 = vld [vmem:[%s2135_s0 + $0x2e0] sm:$0xff] }
  0xc1   : > { %1110 = vst [vmem:[%s1746_s16 + $0x120] sm:$0xff] %v798_v47  ;;  %v268_v45 = vld [vmem:[%s2135_s0 + $0x3e0] sm:$0xff] }
  0xc2   : > { %1286 = vmatmul.msk.f32.gmra.mxu0 %vm288_vm0, %v164_v48  ;;  %1318 = vmatmul.msk.f32.gmra.mxu1 %vm288_vm0, %v196_v49  ;;  %v172_v48 = vld [vmem:[%s2135_s0 + $0xe0] sm:$0xff] }
  0xc3   : > { %v894_v50 = vpop.f32.mrf.mxu2  ;;  %v990_v51 = vpop.f32.mrf.mxu3  ;;  %v204_v49 = vld [vmem:[%s2135_s0 + $0x1e0] sm:$0xff] }
  0xc4   : > { %1142 = vst [vmem:[%s1746_s16 + $0x220] sm:$0xff] %v894_v50 }
  0xc5   : > { %1174 = vst [vmem:[%s1746_s16 + $0x320] sm:$0xff] %v990_v51 }
  0xc7   : > { %v705_v54 = vpop.f32.mrf.mxu0  ;;  %v801_v55 = vpop.f32.mrf.mxu1 }
  0xc8   : > { %1351 = vmatmul.msk.f32.gmra.mxu2 %vm288_vm0, %v229_v52  ;;  %1383 = vmatmul.msk.f32.gmra.mxu3 %vm288_vm0, %v261_v53  ;;  %1079 = vst [vmem:[%s1746_s16 + $0x28] sm:$0xff] %v705_v54  ;;  %v237_v52 = vld [vmem:[%s2135_s0 + $0x2e8] sm:$0xff] }
  0xc9   : > { %1111 = vst [vmem:[%s1746_s16 + $0x128] sm:$0xff] %v801_v55  ;;  %v269_v53 = vld [vmem:[%s2135_s0 + $0x3e8] sm:$0xff] }
  0xca   : > { %1287 = vmatmul.msk.f32.gmra.mxu0 %vm288_vm0, %v165_v56  ;;  %1319 = vmatmul.msk.f32.gmra.mxu1 %vm288_vm0, %v197_v57  ;;  %v173_v56 = vld [vmem:[%s2135_s0 + $0xe8] sm:$0xff] }
  0xcb   : > { %v897_v58 = vpop.f32.mrf.mxu2  ;;  %v993_v59 = vpop.f32.mrf.mxu3  ;;  %v205_v57 = vld [vmem:[%s2135_s0 + $0x1e8] sm:$0xff] }
  0xcc   : > { %1143 = vst [vmem:[%s1746_s16 + $0x228] sm:$0xff] %v897_v58 }
  0xcd   : > { %1175 = vst [vmem:[%s1746_s16 + $0x328] sm:$0xff] %v993_v59 }
  0xcf   : > { %v708_v62 = vpop.f32.mrf.mxu0  ;;  %v804_v63 = vpop.f32.mrf.mxu1 }
  0xd0   : > { %1352 = vmatmul.msk.f32.gmra.mxu2 %vm288_vm0, %v230_v60  ;;  %1384 = vmatmul.msk.f32.gmra.mxu3 %vm288_vm0, %v262_v61  ;;  %1080 = vst [vmem:[%s1746_s16 + $0x30] sm:$0xff] %v708_v62  ;;  %v238_v60 = vld [vmem:[%s2135_s0 + $0x2f0] sm:$0xff] }
  0xd1   : > { %1112 = vst [vmem:[%s1746_s16 + $0x130] sm:$0xff] %v804_v63  ;;  %v270_v61 = vld [vmem:[%s2135_s0 + $0x3f0] sm:$0xff] }
  0xd2   : > { %1288 = vmatmul.msk.f32.gmra.mxu0 %vm288_vm0, %v166_v0  ;;  %1320 = vmatmul.msk.f32.gmra.mxu1 %vm288_vm0, %v198_v1  ;;  %v174_v0 = vld [vmem:[%s2135_s0 + $0xf0] sm:$0xff] }
  0xd3   : > { %v900_v2 = vpop.f32.mrf.mxu2  ;;  %v996_v3 = vpop.f32.mrf.mxu3  ;;  %v206_v1 = vld [vmem:[%s2135_s0 + $0x1f0] sm:$0xff] }
  0xd4   : > { %1144 = vst [vmem:[%s1746_s16 + $0x230] sm:$0xff] %v900_v2 }
  0xd5   : > { %1176 = vst [vmem:[%s1746_s16 + $0x330] sm:$0xff] %v996_v3 }
  0xd7   : > { %v711_v6 = vpop.f32.mrf.mxu0  ;;  %v807_v7 = vpop.f32.mrf.mxu1 }
  0xd8   : > { %1353 = vmatmul.msk.f32.gmra.mxu2 %vm288_vm0, %v231_v4  ;;  %1385 = vmatmul.msk.f32.gmra.mxu3 %vm288_vm0, %v263_v5  ;;  %1081 = vst [vmem:[%s1746_s16 + $0x38] sm:$0xff] %v711_v6  ;;  %v239_v4 = vld [vmem:[%s2135_s0 + $0x2f8] sm:$0xff] }
  0xd9   : > { %1113 = vst [vmem:[%s1746_s16 + $0x138] sm:$0xff] %v807_v7  ;;  %v271_v5 = vld [vmem:[%s2135_s0 + $0x3f8] sm:$0xff] }
  0xda   : > { %1289 = vmatmul.msk.f32.gmra.mxu0 %vm288_vm0, %v167_v8  ;;  %1321 = vmatmul.msk.f32.gmra.mxu1 %vm288_vm0, %v199_v9  ;;  %v175_v8 = vld [vmem:[%s2135_s0 + $0xf8] sm:$0xff] }
  0xdb   : > { %v903_v10 = vpop.f32.mrf.mxu2  ;;  %v999_v11 = vpop.f32.mrf.mxu3  ;;  %v207_v9 = vld [vmem:[%s2135_s0 + $0x1f8] sm:$0xff] }
  0xdc   : > { %1145 = vst [vmem:[%s1746_s16 + $0x238] sm:$0xff] %v903_v10 }
  0xdd   : > { %1177 = vst [vmem:[%s1746_s16 + $0x338] sm:$0xff] %v999_v11 }
  0xdf   : > { %v714_v14 = vpop.f32.mrf.mxu0  ;;  %v810_v15 = vpop.f32.mrf.mxu1 }
  0xe0   : > { %1354 = vmatmul.msk.f32.gmra.mxu2 %vm288_vm0, %v232_v12  ;;  %1386 = vmatmul.msk.f32.gmra.mxu3 %vm288_vm0, %v264_v13  ;;  %1082 = vst [vmem:[%s1746_s16 + $0x40] sm:$0xff] %v714_v14 }
  0xe1   : > { %1114 = vst [vmem:[%s1746_s16 + $0x140] sm:$0xff] %v810_v15 }
  0xe2   : > { %1290 = vmatmul.msk.f32.gmra.mxu0 %vm288_vm0, %v168_v16  ;;  %1322 = vmatmul.msk.f32.gmra.mxu1 %vm288_vm0, %v200_v17 }
  0xe3   : > { %v906_v18 = vpop.f32.mrf.mxu2  ;;  %v1002_v19 = vpop.f32.mrf.mxu3 }
  0xe4   : > { %1146 = vst [vmem:[%s1746_s16 + $0x240] sm:$0xff] %v906_v18 }
  0xe5   : > { %1178 = vst [vmem:[%s1746_s16 + $0x340] sm:$0xff] %v1002_v19 }
  0xe7   : > { %v717_v22 = vpop.f32.mrf.mxu0  ;;  %v813_v23 = vpop.f32.mrf.mxu1 }
  0xe8   : > { %1355 = vmatmul.msk.f32.gmra.mxu2 %vm288_vm0, %v233_v20  ;;  %1387 = vmatmul.msk.f32.gmra.mxu3 %vm288_vm0, %v265_v21  ;;  %1083 = vst [vmem:[%s1746_s16 + $0x48] sm:$0xff] %v717_v22 }
  0xe9   : > { %1115 = vst [vmem:[%s1746_s16 + $0x148] sm:$0xff] %v813_v23 }
  0xea   : > { %1291 = vmatmul.msk.f32.gmra.mxu0 %vm288_vm0, %v169_v24  ;;  %1323 = vmatmul.msk.f32.gmra.mxu1 %vm288_vm0, %v201_v25 }
  0xeb   : > { %v909_v26 = vpop.f32.mrf.mxu2  ;;  %v1005_v27 = vpop.f32.mrf.mxu3 }
  0xec   : > { %1147 = vst [vmem:[%s1746_s16 + $0x248] sm:$0xff] %v909_v26 }
  0xed   : > { %1179 = vst [vmem:[%s1746_s16 + $0x348] sm:$0xff] %v1005_v27 }
  0xef   : > { %v720_v30 = vpop.f32.mrf.mxu0  ;;  %v816_v31 = vpop.f32.mrf.mxu1 }
  0xf0   : > { %1356 = vmatmul.msk.f32.gmra.mxu2 %vm288_vm0, %v234_v28  ;;  %1388 = vmatmul.msk.f32.gmra.mxu3 %vm288_vm0, %v266_v29  ;;  %1084 = vst [vmem:[%s1746_s16 + $0x50] sm:$0xff] %v720_v30 }
  0xf1   : > { %1116 = vst [vmem:[%s1746_s16 + $0x150] sm:$0xff] %v816_v31 }
  0xf2   : > { %1292 = vmatmul.msk.f32.gmra.mxu0 %vm288_vm0, %v170_v32  ;;  %1324 = vmatmul.msk.f32.gmra.mxu1 %vm288_vm0, %v202_v33 }
  0xf3   : > { %v912_v34 = vpop.f32.mrf.mxu2  ;;  %v1008_v35 = vpop.f32.mrf.mxu3 }
  0xf4   : > { %1148 = vst [vmem:[%s1746_s16 + $0x250] sm:$0xff] %v912_v34 }
  0xf5   : > { %1180 = vst [vmem:[%s1746_s16 + $0x350] sm:$0xff] %v1008_v35 }
  0xf7   : > { %v723_v38 = vpop.f32.mrf.mxu0  ;;  %v819_v39 = vpop.f32.mrf.mxu1 }
  0xf8   : > { %1357 = vmatmul.msk.f32.gmra.mxu2 %vm288_vm0, %v235_v36  ;;  %1389 = vmatmul.msk.f32.gmra.mxu3 %vm288_vm0, %v267_v37  ;;  %1085 = vst [vmem:[%s1746_s16 + $0x58] sm:$0xff] %v723_v38 }
  0xf9   : > { %1117 = vst [vmem:[%s1746_s16 + $0x158] sm:$0xff] %v819_v39 }
  0xfa   : > { %1293 = vmatmul.msk.f32.gmra.mxu0 %vm288_vm0, %v171_v40  ;;  %1325 = vmatmul.msk.f32.gmra.mxu1 %vm288_vm0, %v203_v41 }
  0xfb   : > { %v915_v42 = vpop.f32.mrf.mxu2  ;;  %v1011_v43 = vpop.f32.mrf.mxu3 }
  0xfc   : > { %1149 = vst [vmem:[%s1746_s16 + $0x258] sm:$0xff] %v915_v42 }
  0xfd   : > { %1181 = vst [vmem:[%s1746_s16 + $0x358] sm:$0xff] %v1011_v43 }
  0xff   : > { %v726_v46 = vpop.f32.mrf.mxu0  ;;  %v822_v47 = vpop.f32.mrf.mxu1 }
 0x100   : > { %1358 = vmatmul.msk.f32.gmra.mxu2 %vm288_vm0, %v236_v44  ;;  %1390 = vmatmul.msk.f32.gmra.mxu3 %vm288_vm0, %v268_v45  ;;  %1086 = vst [vmem:[%s1746_s16 + $0x60] sm:$0xff] %v726_v46 }
 0x101   : > { %1118 = vst [vmem:[%s1746_s16 + $0x160] sm:$0xff] %v822_v47 }
 0x102   : > { %1294 = vmatmul.msk.f32.gmra.mxu0 %vm288_vm0, %v172_v48  ;;  %1326 = vmatmul.msk.f32.gmra.mxu1 %vm288_vm0, %v204_v49 }
 0x103   : > { %v918_v50 = vpop.f32.mrf.mxu2  ;;  %v1014_v51 = vpop.f32.mrf.mxu3 }
 0x104   : > { %1150 = vst [vmem:[%s1746_s16 + $0x260] sm:$0xff] %v918_v50 }
 0x105   : > { %1182 = vst [vmem:[%s1746_s16 + $0x360] sm:$0xff] %v1014_v51 }
 0x107   : > { %v729_v54 = vpop.f32.mrf.mxu0  ;;  %v825_v55 = vpop.f32.mrf.mxu1 }
 0x108   : > { %1359 = vmatmul.msk.f32.gmra.mxu2 %vm288_vm0, %v237_v52  ;;  %1391 = vmatmul.msk.f32.gmra.mxu3 %vm288_vm0, %v269_v53  ;;  %1087 = vst [vmem:[%s1746_s16 + $0x68] sm:$0xff] %v729_v54 }
 0x109   : > { %1119 = vst [vmem:[%s1746_s16 + $0x168] sm:$0xff] %v825_v55 }
 0x10a   : > { %1295 = vmatmul.msk.f32.gmra.mxu0 %vm288_vm0, %v173_v56  ;;  %1327 = vmatmul.msk.f32.gmra.mxu1 %vm288_vm0, %v205_v57 }
 0x10b   : > { %v921_v58 = vpop.f32.mrf.mxu2  ;;  %v1017_v59 = vpop.f32.mrf.mxu3 }
 0x10c   : > { %1151 = vst [vmem:[%s1746_s16 + $0x268] sm:$0xff] %v921_v58 }
 0x10d   : > { %1183 = vst [vmem:[%s1746_s16 + $0x368] sm:$0xff] %v1017_v59 }
 0x10f   : > { %v732_v62 = vpop.f32.mrf.mxu0  ;;  %v828_v63 = vpop.f32.mrf.mxu1 }
 0x110   : > { %1360 = vmatmul.msk.f32.gmra.mxu2 %vm288_vm0, %v238_v60  ;;  %1392 = vmatmul.msk.f32.gmra.mxu3 %vm288_vm0, %v270_v61  ;;  %1088 = vst [vmem:[%s1746_s16 + $0x70] sm:$0xff] %v732_v62 }
 0x111   : > { %1120 = vst [vmem:[%s1746_s16 + $0x170] sm:$0xff] %v828_v63 }
 0x112   : > { %1296 = vmatmul.msk.f32.gmra.mxu0 %vm288_vm0, %v174_v0  ;;  %1328 = vmatmul.msk.f32.gmra.mxu1 %vm288_vm0, %v206_v1 }
 0x113   : > { %v924_v2 = vpop.f32.mrf.mxu2  ;;  %v1020_v3 = vpop.f32.mrf.mxu3 }
 0x114   : > { %1152 = vst [vmem:[%s1746_s16 + $0x270] sm:$0xff] %v924_v2 }
 0x115   : > { %1184 = vst [vmem:[%s1746_s16 + $0x370] sm:$0xff] %v1020_v3 }
 0x117   : > { %v735_v6 = vpop.f32.mrf.mxu0  ;;  %v831_v7 = vpop.f32.mrf.mxu1 }
 0x118   : > { %1361 = vmatmul.msk.f32.gmra.mxu2 %vm288_vm0, %v239_v4  ;;  %1393 = vmatmul.msk.f32.gmra.mxu3 %vm288_vm0, %v271_v5  ;;  %1089 = vst [vmem:[%s1746_s16 + $0x78] sm:$0xff] %v735_v6 }
 0x119   : > { %1121 = vst [vmem:[%s1746_s16 + $0x178] sm:$0xff] %v831_v7 }
 0x11a   : > { %1297 = vmatmul.msk.f32.gmra.mxu0 %vm288_vm0, %v175_v8  ;;  %1329 = vmatmul.msk.f32.gmra.mxu1 %vm288_vm0, %v207_v9 }
 0x11b   : > { %v927_v10 = vpop.f32.mrf.mxu2  ;;  %v1023_v11 = vpop.f32.mrf.mxu3 }
 0x11c   : > { %1153 = vst [vmem:[%s1746_s16 + $0x278] sm:$0xff] %v927_v10 }
 0x11d   : > { %1185 = vst [vmem:[%s1746_s16 + $0x378] sm:$0xff] %v1023_v11 }
 0x11f   : > { %v738_v12 = vpop.f32.mrf.mxu0  ;;  %v834_v13 = vpop.f32.mrf.mxu1 }
 0x120   : > { %1090 = vst [vmem:[%s1746_s16 + $0x80] sm:$0xff] %v738_v12 }
 0x121   : > { %1122 = vst [vmem:[%s1746_s16 + $0x180] sm:$0xff] %v834_v13 }
 0x123   : > { %v930_v14 = vpop.f32.mrf.mxu2  ;;  %v1026_v15 = vpop.f32.mrf.mxu3 }
 0x124   : > { %1154 = vst [vmem:[%s1746_s16 + $0x280] sm:$0xff] %v930_v14 }
 0x125   : > { %1186 = vst [vmem:[%s1746_s16 + $0x380] sm:$0xff] %v1026_v15 }
 0x127   : > { %v741_v16 = vpop.f32.mrf.mxu0  ;;  %v837_v17 = vpop.f32.mrf.mxu1 }
 0x128   : > { %1091 = vst [vmem:[%s1746_s16 + $0x88] sm:$0xff] %v741_v16 }
 0x129   : > { %1123 = vst [vmem:[%s1746_s16 + $0x188] sm:$0xff] %v837_v17 }
 0x12b   : > { %v933_v18 = vpop.f32.mrf.mxu2  ;;  %v1029_v19 = vpop.f32.mrf.mxu3 }
 0x12c   : > { %1155 = vst [vmem:[%s1746_s16 + $0x288] sm:$0xff] %v933_v18 }
 0x12d   : > { %1187 = vst [vmem:[%s1746_s16 + $0x388] sm:$0xff] %v1029_v19 }
 0x12f   : > { %v744_v20 = vpop.f32.mrf.mxu0  ;;  %v840_v21 = vpop.f32.mrf.mxu1 }
 0x130   : > { %1092 = vst [vmem:[%s1746_s16 + $0x90] sm:$0xff] %v744_v20 }
 0x131   : > { %1124 = vst [vmem:[%s1746_s16 + $0x190] sm:$0xff] %v840_v21 }
 0x133   : > { %v936_v22 = vpop.f32.mrf.mxu2  ;;  %v1032_v23 = vpop.f32.mrf.mxu3 }
 0x134   : > { %1156 = vst [vmem:[%s1746_s16 + $0x290] sm:$0xff] %v936_v22 }
 0x135   : > { %1188 = vst [vmem:[%s1746_s16 + $0x390] sm:$0xff] %v1032_v23 }
 0x137   : > { %v747_v24 = vpop.f32.mrf.mxu0  ;;  %v843_v25 = vpop.f32.mrf.mxu1 }
 0x138   : > { %1093 = vst [vmem:[%s1746_s16 + $0x98] sm:$0xff] %v747_v24 }
 0x139   : > { %1125 = vst [vmem:[%s1746_s16 + $0x198] sm:$0xff] %v843_v25 }
 0x13b   : > { %v939_v26 = vpop.f32.mrf.mxu2  ;;  %v1035_v27 = vpop.f32.mrf.mxu3 }
 0x13c   : > { %1157 = vst [vmem:[%s1746_s16 + $0x298] sm:$0xff] %v939_v26 }
 0x13d   : > { %1189 = vst [vmem:[%s1746_s16 + $0x398] sm:$0xff] %v1035_v27 }
 0x13f   : > { %v750_v28 = vpop.f32.mrf.mxu0  ;;  %v846_v29 = vpop.f32.mrf.mxu1 }
 0x140   : > { %1094 = vst [vmem:[%s1746_s16 + $0xa0] sm:$0xff] %v750_v28 }
 0x141   : > { %1126 = vst [vmem:[%s1746_s16 + $0x1a0] sm:$0xff] %v846_v29 }
 0x143   : > { %v942_v30 = vpop.f32.mrf.mxu2  ;;  %v1038_v31 = vpop.f32.mrf.mxu3 }
 0x144   : > { %1158 = vst [vmem:[%s1746_s16 + $0x2a0] sm:$0xff] %v942_v30 }
 0x145   : > { %1190 = vst [vmem:[%s1746_s16 + $0x3a0] sm:$0xff] %v1038_v31 }
 0x147   : > { %v753_v32 = vpop.f32.mrf.mxu0  ;;  %v849_v33 = vpop.f32.mrf.mxu1 }
 0x148   : > { %1095 = vst [vmem:[%s1746_s16 + $0xa8] sm:$0xff] %v753_v32 }
 0x149   : > { %1127 = vst [vmem:[%s1746_s16 + $0x1a8] sm:$0xff] %v849_v33 }
 0x14b   : > { %v945_v34 = vpop.f32.mrf.mxu2  ;;  %v1041_v35 = vpop.f32.mrf.mxu3 }
 0x14c   : > { %1159 = vst [vmem:[%s1746_s16 + $0x2a8] sm:$0xff] %v945_v34 }
 0x14d   : > { %1191 = vst [vmem:[%s1746_s16 + $0x3a8] sm:$0xff] %v1041_v35 }
 0x14f   : > { %v756_v36 = vpop.f32.mrf.mxu0  ;;  %v852_v37 = vpop.f32.mrf.mxu1 }
 0x150   : > { %1096 = vst [vmem:[%s1746_s16 + $0xb0] sm:$0xff] %v756_v36 }
 0x151   : > { %1128 = vst [vmem:[%s1746_s16 + $0x1b0] sm:$0xff] %v852_v37 }
 0x153   : > { %v948_v38 = vpop.f32.mrf.mxu2  ;;  %v1044_v39 = vpop.f32.mrf.mxu3 }
 0x154   : > { %1160 = vst [vmem:[%s1746_s16 + $0x2b0] sm:$0xff] %v948_v38 }
 0x155   : > { %1192 = vst [vmem:[%s1746_s16 + $0x3b0] sm:$0xff] %v1044_v39 }
 0x157   : > { %v759_v40 = vpop.f32.mrf.mxu0  ;;  %v855_v41 = vpop.f32.mrf.mxu1 }
 0x158   : > { %1097 = vst [vmem:[%s1746_s16 + $0xb8] sm:$0xff] %v759_v40 }
 0x159   : > { %1129 = vst [vmem:[%s1746_s16 + $0x1b8] sm:$0xff] %v855_v41 }
 0x15b   : > { %v951_v42 = vpop.f32.mrf.mxu2  ;;  %v1047_v43 = vpop.f32.mrf.mxu3 }
 0x15c   : > { %1161 = vst [vmem:[%s1746_s16 + $0x2b8] sm:$0xff] %v951_v42 }
 0x15d   : > { %1193 = vst [vmem:[%s1746_s16 + $0x3b8] sm:$0xff] %v1047_v43 }
 0x15f   : > { %v762_v44 = vpop.f32.mrf.mxu0  ;;  %v858_v45 = vpop.f32.mrf.mxu1 }
 0x160   : > { %1098 = vst [vmem:[%s1746_s16 + $0xc0] sm:$0xff] %v762_v44 }
 0x161   : > { %1130 = vst [vmem:[%s1746_s16 + $0x1c0] sm:$0xff] %v858_v45 }
 0x163   : > { %v954_v46 = vpop.f32.mrf.mxu2  ;;  %v1050_v47 = vpop.f32.mrf.mxu3 }
 0x164   : > { %1162 = vst [vmem:[%s1746_s16 + $0x2c0] sm:$0xff] %v954_v46 }
 0x165   : > { %1194 = vst [vmem:[%s1746_s16 + $0x3c0] sm:$0xff] %v1050_v47 }
 0x167   : > { %v765_v48 = vpop.f32.mrf.mxu0  ;;  %v861_v49 = vpop.f32.mrf.mxu1 }
 0x168   : > { %1099 = vst [vmem:[%s1746_s16 + $0xc8] sm:$0xff] %v765_v48 }
 0x169   : > { %1131 = vst [vmem:[%s1746_s16 + $0x1c8] sm:$0xff] %v861_v49 }
 0x16b   : > { %v957_v50 = vpop.f32.mrf.mxu2  ;;  %v1053_v51 = vpop.f32.mrf.mxu3 }
 0x16c   : > { %1163 = vst [vmem:[%s1746_s16 + $0x2c8] sm:$0xff] %v957_v50 }
 0x16d   : > { %1195 = vst [vmem:[%s1746_s16 + $0x3c8] sm:$0xff] %v1053_v51 }
 0x16f   : > { %v768_v52 = vpop.f32.mrf.mxu0  ;;  %v864_v53 = vpop.f32.mrf.mxu1 }
 0x170   : > { %1100 = vst [vmem:[%s1746_s16 + $0xd0] sm:$0xff] %v768_v52 }
 0x171   : > { %1132 = vst [vmem:[%s1746_s16 + $0x1d0] sm:$0xff] %v864_v53 }
 0x173   : > { %v960_v54 = vpop.f32.mrf.mxu2  ;;  %v1056_v55 = vpop.f32.mrf.mxu3 }
 0x174   : > { %1164 = vst [vmem:[%s1746_s16 + $0x2d0] sm:$0xff] %v960_v54 }
 0x175   : > { %1196 = vst [vmem:[%s1746_s16 + $0x3d0] sm:$0xff] %v1056_v55 }
 0x177   : > { %v771_v56 = vpop.f32.mrf.mxu0  ;;  %v867_v57 = vpop.f32.mrf.mxu1 }
 0x178   : > { %1101 = vst [vmem:[%s1746_s16 + $0xd8] sm:$0xff] %v771_v56 }
 0x179   : > { %1133 = vst [vmem:[%s1746_s16 + $0x1d8] sm:$0xff] %v867_v57 }
 0x17b   : > { %v963_v58 = vpop.f32.mrf.mxu2  ;;  %v1059_v59 = vpop.f32.mrf.mxu3 }
 0x17c   : > { %1165 = vst [vmem:[%s1746_s16 + $0x2d8] sm:$0xff] %v963_v58 }
 0x17d   : > { %1197 = vst [vmem:[%s1746_s16 + $0x3d8] sm:$0xff] %v1059_v59 }
 0x17f   : > { %v774_v60 = vpop.f32.mrf.mxu0  ;;  %v870_v61 = vpop.f32.mrf.mxu1 }
 0x180   : > { %1102 = vst [vmem:[%s1746_s16 + $0xe0] sm:$0xff] %v774_v60 }
 0x181   : > { %1134 = vst [vmem:[%s1746_s16 + $0x1e0] sm:$0xff] %v870_v61 }
 0x183   : > { %v966_v62 = vpop.f32.mrf.mxu2  ;;  %v1062_v63 = vpop.f32.mrf.mxu3 }
 0x184   : > { %1166 = vst [vmem:[%s1746_s16 + $0x2e0] sm:$0xff] %v966_v62 }
 0x185   : > { %1198 = vst [vmem:[%s1746_s16 + $0x3e0] sm:$0xff] %v1062_v63 }
 0x187   : > { %v777_v0 = vpop.f32.mrf.mxu0  ;;  %v873_v1 = vpop.f32.mrf.mxu1 }
 0x188   : > { %1103 = vst [vmem:[%s1746_s16 + $0xe8] sm:$0xff] %v777_v0 }
 0x189   : > { %1135 = vst [vmem:[%s1746_s16 + $0x1e8] sm:$0xff] %v873_v1 }
 0x18b   : > { %v969_v2 = vpop.f32.mrf.mxu2  ;;  %v1065_v3 = vpop.f32.mrf.mxu3 }
 0x18c   : > { %1167 = vst [vmem:[%s1746_s16 + $0x2e8] sm:$0xff] %v969_v2 }
 0x18d   : > { %1199 = vst [vmem:[%s1746_s16 + $0x3e8] sm:$0xff] %v1065_v3 }
 0x18f   : > { %v780_v4 = vpop.f32.mrf.mxu0  ;;  %v876_v5 = vpop.f32.mrf.mxu1 }
 0x190   : > { %1104 = vst [vmem:[%s1746_s16 + $0xf0] sm:$0xff] %v780_v4 }
 0x191   : > { %1136 = vst [vmem:[%s1746_s16 + $0x1f0] sm:$0xff] %v876_v5 }
 0x193   : > { %v972_v6 = vpop.f32.mrf.mxu2  ;;  %v1068_v7 = vpop.f32.mrf.mxu3 }
 0x194   : > { %1168 = vst [vmem:[%s1746_s16 + $0x2f0] sm:$0xff] %v972_v6 }
 0x195   : > { %1200 = vst [vmem:[%s1746_s16 + $0x3f0] sm:$0xff] %v1068_v7 }
 0x197   : > { %v783_v8 = vpop.f32.mrf.mxu0  ;;  %v879_v9 = vpop.f32.mrf.mxu1 }
 0x198   : > { %1105 = vst [vmem:[%s1746_s16 + $0xf8] sm:$0xff] %v783_v8 }
 0x199   : > { %1137 = vst [vmem:[%s1746_s16 + $0x1f8] sm:$0xff] %v879_v9 }
 0x19b   : > { %v975_v10 = vpop.f32.mrf.mxu2  ;;  %v1071_v11 = vpop.f32.mrf.mxu3 }
 0x19c   : > { %1169 = vst [vmem:[%s1746_s16 + $0x2f8] sm:$0xff] %v975_v10 }
 0x19d   : > { %1201 = vst [vmem:[%s1746_s16 + $0x3f8] sm:$0xff] %v1071_v11 }
 0x19e PF: > { %s12_s9 = sadd.s32 1, %s1455_s9  }
 0x19f   : > { %p9_p4 = scmp.ge.s32.totalorder %s12_s9, 4  }
 0x1a1   :  { %11 = sbr.rel (!%p9_p4) target bundleno = 1 (0x1), region = 58 }

// kernel: deeplab_forward.24
= control target key start
LH: loop header
LB: loop body
LE: loop exit
PB: predicated region body
PF: predicated region fallthrough
CT: control target
= control target key end

     0   :  { %s2557_s12 = smov 0   ;;  %s3056_s0 = inlined_call_operand.vmem [shape: bf16[2,10,10,256], index: 0, kind: input, shape index: {}]   ;;  %s3057_s1 = inlined_call_operand.vmem [shape: bf16[2304,128], index: 1, kind: input, shape index: {}]   ;;  %s3058_s2 = inlined_call_operand.vmem [shape: f32[1,128], index: 2, kind: input, shape index: {}]   ;;  %s3059_s3 = inlined_call_operand.vmem [shape: bf16[2,8,8,128], index: 3, kind: output, shape index: {}]  }
   0x1 LB: > { %s1763_s13 = sadd.s32 4294967295, %s2531_s12   ;;  %p1767_p0 = scmp.ge.s32.totalorder %s2531_s12, 1  ;;  %s2531_s12 = sphi %s2557_s12, %s13_s12  }
   0x2   : > { %p137_p1 = scmp.lt.s32.totalorder %s2531_s12, 3 }
   0x4   : > { %p138_p2 = pnand %p1767_p0, %p137_p1 }
   0x5   : > { %p161_p3 = scmp.lt.s32.totalorder (!%p138_p2), %s1763_s13, 1  ;;  %s2580_s24 = smov (!%p138_p2), 0  }
   0x6   : > { %141 = sbr.rel (%p138_p2) target bundleno = 313 (0x139), region = 32 }
   0xb   : > { %v2568_v0 = vld [vmem:[%s3058_s2] sm:$0x1]  ;;  %s3061_s13 = smov (!%p161_p3, %s1763_s13), 1 }
   0xc   : > { %s2504_s16 = smul.u32 160, %s3061_s13  ;;  %s2358_s17 = sshll.u32 %s3061_s13, 5 }
   0xd   : > { %s2573_s20 = scalar_lea.vmem %s3059_s3, %s2358_s17 }
   0xe   : > { %s2578_s23 = scalar_lea.vmem %s3056_s0, %s2504_s16 }
   0xf LB: >> { %v2383_v1 = vld [vmem:[%s3057_s1 + $0xb8] sm:$0xff]  ;;  %v2382_v5 = vld [vmem:[%s3057_s1 + $0xb0] sm:$0xff]  ;;  %v2381_v9 = vld [vmem:[%s3057_s1 + $0xa8] sm:$0xff]  ;;  %s2359_s30 = sshll.u32 %s2535_s24, 4  ;;  %s2355_s22 = sshll.u32 %s2535_s24, 2  ;;  %s2535_s24 = sphi %s2580_s24, %s177_s24  }
  0x10   : >> { %v2391_v2 = vld [vmem:[%s3057_s1 + $0xf8] sm:$0xff]  ;;  %367 = vmatpush.bf16.msra.mxu0 %v2383_v1  ;;  %v2390_v6 = vld [vmem:[%s3057_s1 + $0xf0] sm:$0xff]  ;;  %v2389_v10 = vld [vmem:[%s3057_s1 + $0xe8] sm:$0xff]  ;;  %s2635_s8 = scalar_lea.vmem %s2578_s23, %s2359_s30  ;;  %s1691_s25 = scalar_lea.vmem %s2573_s20, %s2355_s22 }
  0x11   : >> { %v2367_v3 = vld [vmem:[%s3057_s1 + $0x38] sm:$0xff]  ;;  %380 = vmatpush.bf16.msra.mxu1 %v2391_v2  ;;  %v2366_v7 = vld [vmem:[%s3057_s1 + $0x30] sm:$0xff]  ;;  %v2365_v11 = vld [vmem:[%s3057_s1 + $0x28] sm:$0xff]  ;;  %s177_s24 = sadd.s32 1, %s2535_s24  }
  0x12   : >> { %v2375_v4 = vld [vmem:[%s3057_s1 + $0x78] sm:$0xff]  ;;  %493 = vmatpush.bf16.msra.mxu2 %v2367_v3  ;;  %v2374_v8 = vld [vmem:[%s3057_s1 + $0x70] sm:$0xff]  ;;  %v2373_v12 = vld [vmem:[%s3057_s1 + $0x68] sm:$0xff]  ;;  %p174_p4 = scmp.ge.s32.totalorder %s177_s24, 8  }
  0x13   : >> { %506 = vmatpush.bf16.msra.mxu3 %v2375_v4  ;;  %v2380_v13 = vld [vmem:[%s3057_s1 + $0xa0] sm:$0xff]  ;;  %v2379_v17 = vld [vmem:[%s3057_s1 + $0x98] sm:$0xff]  ;;  %v182_v22 = vld [vmem:[%s2635_s8 + $0x8] sm:$0x11] }
  0x14   : >> { %368 = vmatpush.bf16.msra.mxu0 %v2382_v5  ;;  %v2388_v14 = vld [vmem:[%s3057_s1 + $0xe0] sm:$0xff]  ;;  %v2387_v18 = vld [vmem:[%s3057_s1 + $0xd8] sm:$0xff]  ;;  %v251_v24 = vunpack.c.l.b16 %v182_v22  ;;  %v252_v26 = vunpack.c.h.b16 %v182_v22  ;;  %v2378_v27 = vld [vmem:[%s3057_s1 + $0x90] sm:$0xff] }
  0x15   : >> { %381 = vmatpush.bf16.msra.mxu1 %v2390_v6  ;;  %v2364_v15 = vld [vmem:[%s3057_s1 + $0x20] sm:$0xff]  ;;  %v2363_v19 = vld [vmem:[%s3057_s1 + $0x18] sm:$0xff]  ;;  %v2386_v28 = vld [vmem:[%s3057_s1 + $0xd0] sm:$0xff] }
  0x16   : >> { %494 = vmatpush.bf16.msra.mxu2 %v2366_v7  ;;  %v2372_v16 = vld [vmem:[%s3057_s1 + $0x60] sm:$0xff]  ;;  %v2371_v20 = vld [vmem:[%s3057_s1 + $0x58] sm:$0xff]  ;;  %v2362_v29 = vld [vmem:[%s3057_s1 + $0x10] sm:$0xff] }
  0x17   : >> { %507 = vmatpush.bf16.msra.mxu3 %v2374_v8  ;;  %v181_v21 = vld [vmem:[%s2635_s8] sm:$0xff]  ;;  %v2370_v30 = vld [vmem:[%s3057_s1 + $0x50] sm:$0xff]  ;;  %v2377_v33 = vld [vmem:[%s3057_s1 + $0x88] sm:$0xff] }
  0x18   : >> { %369 = vmatpush.bf16.msra.mxu0 %v2381_v9  ;;  %v249_v23 = vunpack.c.l.b16 %v181_v21  ;;  %v250_v25 = vunpack.c.h.b16 %v181_v21  ;;  %v2385_v34 = vld [vmem:[%s3057_s1 + $0xc8] sm:$0xff]  ;;  %v2376_v39 = vld [vmem:[%s3057_s1 + $0x80] sm:$0xff]  ;;  %v2399_v47 = vld [vmem:[%s3057_s1 + $0x138] sm:$0xff] }
  0x19   : >> { %382 = vmatpush.bf16.msra.mxu1 %v2389_v10  ;;  %v2361_v35 = vld [vmem:[%s3057_s1 + $0x8] sm:$0xff]  ;;  %v2384_v40 = vld [vmem:[%s3057_s1 + $0xc0] sm:$0xff]  ;;  %v2407_v48 = vld [vmem:[%s3057_s1 + $0x178] sm:$0xff] }
  0x1a   : >> { %495 = vmatpush.bf16.msra.mxu2 %v2365_v11  ;;  %v2663_v31 = vpack.c.b16 %v251_v24, %v249_v23  ;;  %v2665_v32 = vpack.c.b16 %v252_v26, %v250_v25  ;;  %v2369_v36 = vld [vmem:[%s3057_s1 + $0x48] sm:$0xff]  ;;  %v2360_v41 = vld [vmem:[%s3057_s1] sm:$0xff]  ;;  %v2415_v49 = vld [vmem:[%s3057_s1 + $0x1b8] sm:$0xff]  ;;  %v393_v51 = vpack.c.b16 %v249_v23, %v249_v23  ;;  %v394_v52 = vpack.c.b16 %v250_v25, %v250_v25 }
  0x1b   : >> { %508 = vmatpush.bf16.msra.mxu3 %v2373_v12  ;;  %v2368_v42 = vld [vmem:[%s3057_s1 + $0x40] sm:$0xff]  ;;  %v2423_v50 = vld [vmem:[%s3057_s1 + $0x1f8] sm:$0xff]  ;;  %v2398_v55 = vld [vmem:[%s3057_s1 + $0x130] sm:$0xff] }
  0x1c   : >> { %370 = vmatpush.bf16.msra.mxu0 %v2380_v13  ;;  %v258_v37 = vshll.u32 %v2663_v31, 16  ;;  %v265_v38 = vshll.u32 %v2665_v32, 16  ;;  %v256_v43 = vshrl.u32 %v2663_v31, 16  ;;  %v263_v45 = vshrl.u32 %v2665_v32, 16  ;;  %v2406_v56 = vld [vmem:[%s3057_s1 + $0x170] sm:$0xff]  ;;  %v2397_v59 = vld [vmem:[%s3057_s1 + $0x128] sm:$0xff] }
  0x1d   : >> { %383 = vmatpush.bf16.msra.mxu1 %v2388_v14  ;;  %v2414_v57 = vld [vmem:[%s3057_s1 + $0x1b0] sm:$0xff]  ;;  %v2405_v60 = vld [vmem:[%s3057_s1 + $0x168] sm:$0xff]  ;;  %v2396_v63 = vld [vmem:[%s3057_s1 + $0x120] sm:$0xff] }
  0x1e   : >> { %496 = vmatpush.bf16.msra.mxu2 %v2364_v15  ;;  %v260_v44 = vrot.slane %v258_v37, 1  ;;  %v267_v46 = vrot.slane %v265_v38, 1  ;;  %v2422_v58 = vld [vmem:[%s3057_s1 + $0x1f0] sm:$0xff]  ;;  %v2413_v61 = vld [vmem:[%s3057_s1 + $0x1a8] sm:$0xff]  ;;  %v2404_v1 = vld [vmem:[%s3057_s1 + $0x160] sm:$0xff] }
  0x1f   : >> { %509 = vmatpush.bf16.msra.mxu3 %v2372_v16  ;;  %v2421_v62 = vld [vmem:[%s3057_s1 + $0x1e8] sm:$0xff]  ;;  %v2412_v2 = vld [vmem:[%s3057_s1 + $0x1a0] sm:$0xff]  ;;  %v2395_v4 = vld [vmem:[%s3057_s1 + $0x118] sm:$0xff] }
  0x20   : >> { %371 = vmatpush.bf16.msra.mxu0 %v2379_v17  ;;  %v261_v53 = vor.u32 %v260_v44, %v256_v43  ;;  %v268_v54 = vor.u32 %v267_v46, %v263_v45  ;;  %v2420_v3 = vld [vmem:[%s3057_s1 + $0x1e0] sm:$0xff]  ;;  %v2403_v5 = vld [vmem:[%s3057_s1 + $0x158] sm:$0xff]  ;;  %v2394_v8 = vld [vmem:[%s3057_s1 + $0x110] sm:$0xff] }
  0x21   : >> { %384 = vmatpush.bf16.msra.mxu1 %v2387_v18  ;;  %v2411_v6 = vld [vmem:[%s3057_s1 + $0x198] sm:$0xff]  ;;  %v2402_v9 = vld [vmem:[%s3057_s1 + $0x150] sm:$0xff]  ;;  %v2393_v12 = vld [vmem:[%s3057_s1 + $0x108] sm:$0xff] }
  0x22   : >> { %497 = vmatpush.bf16.msra.mxu2 %v2363_v19  ;;  %v2419_v7 = vld [vmem:[%s3057_s1 + $0x1d8] sm:$0xff]  ;;  %v2410_v10 = vld [vmem:[%s3057_s1 + $0x190] sm:$0xff]  ;;  %v2401_v13 = vld [vmem:[%s3057_s1 + $0x148] sm:$0xff] }
  0x23   : >> { %510 = vmatpush.bf16.msra.mxu3 %v2371_v20  ;;  %v2418_v11 = vld [vmem:[%s3057_s1 + $0x1d0] sm:$0xff]  ;;  %v2409_v14 = vld [vmem:[%s3057_s1 + $0x188] sm:$0xff]  ;;  %v2392_v17 = vld [vmem:[%s3057_s1 + $0x100] sm:$0xff] }
  0x24   : >> { %372 = vmatpush.bf16.msra.mxu0 %v2378_v27  ;;  %v2417_v15 = vld [vmem:[%s3057_s1 + $0x1c8] sm:$0xff]  ;;  %v1966_v16 = vld [vmem:[%s2635_s8 + $0x10] sm:$0xff]  ;;  %v2400_v18 = vld [vmem:[%s3057_s1 + $0x140] sm:$0xff] }
  0x25   : >> { %385 = vmatpush.bf16.msra.mxu1 %v2386_v28  ;;  %v717_v19 = vunpack.c.l.b16 %v1966_v16  ;;  %v718_v20 = vunpack.c.h.b16 %v1966_v16  ;;  %v2408_v21 = vld [vmem:[%s3057_s1 + $0x180] sm:$0xff]  ;;  %v2431_v23 = vld [vmem:[%s3057_s1 + $0x238] sm:$0xff]  ;;  %v2445_v37 = vld [vmem:[%s3057_s1 + $0x2a8] sm:$0xff] }
  0x26   : >> { %498 = vmatpush.bf16.msra.mxu2 %v2362_v29  ;;  %v2416_v22 = vld [vmem:[%s3057_s1 + $0x1c0] sm:$0xff]  ;;  %v2439_v24 = vld [vmem:[%s3057_s1 + $0x278] sm:$0xff]  ;;  %v551_v29 = vrot.slane %v2663_v31, 1  ;;  %v2454_v31 = vld [vmem:[%s3057_s1 + $0x2f0] sm:$0xff] }
  0x27   : >> { %511 = vmatpush.bf16.msra.mxu3 %v2370_v30  ;;  %v2447_v25 = vld [vmem:[%s3057_s1 + $0x2b8] sm:$0xff]  ;;  %v719_v27 = vpack.c.b16 %v717_v19, %v717_v19  ;;  %v720_v28 = vpack.c.b16 %v718_v20, %v718_v20  ;;  %v552_v30 = vrot.slane %v2665_v32, 1  ;;  %v2429_v32 = vld [vmem:[%s3057_s1 + $0x228] sm:$0xff]  ;;  %v2452_v43 = vld [vmem:[%s3057_s1 + $0x2e0] sm:$0xff] }
  0x28   : >> { %373 = vmatpush.bf16.msra.mxu0 %v2377_v33  ;;  %v2455_v26 = vld [vmem:[%s3057_s1 + $0x2f8] sm:$0xff]  ;;  %v2430_v33 = vld [vmem:[%s3057_s1 + $0x230] sm:$0xff]  ;;  %v2453_v38 = vld [vmem:[%s3057_s1 + $0x2e8] sm:$0xff] }
  0x29   : >> { %386 = vmatpush.bf16.msra.mxu1 %v2385_v34  ;;  %v2438_v34 = vld [vmem:[%s3057_s1 + $0x270] sm:$0xff]  ;;  %v2427_v46 = vld [vmem:[%s3057_s1 + $0x218] sm:$0xff] }
  0x2a   : >> { %499 = vmatpush.bf16.msra.mxu2 %v2361_v35  ;;  %v2446_v35 = vld [vmem:[%s3057_s1 + $0x2b0] sm:$0xff] }
  0x2b   : >> { %512 = vmatpush.bf16.msra.mxu3 %v2369_v36  ;;  %v2437_v36 = vld [vmem:[%s3057_s1 + $0x268] sm:$0xff]  ;;  %v2470_v16 = vld [vmem:[%s3057_s1 + $0x370] sm:$0xff] }
  0x2c   : >> { %374 = vmatpush.bf16.msra.mxu0 %v2376_v39  ;;  %v2428_v39 = vld [vmem:[%s3057_s1 + $0x220] sm:$0xff] }
  0x2d   : >> { %387 = vmatpush.bf16.msra.mxu1 %v2384_v40  ;;  %v2436_v40 = vld [vmem:[%s3057_s1 + $0x260] sm:$0xff] }
  0x2e   : >> { %500 = vmatpush.bf16.msra.mxu2 %v2360_v41  ;;  %v1967_v41 = vld [vmem:[%s2635_s8 + $0x18] sm:$0x11] }
  0x2f   : >> { %513 = vmatpush.bf16.msra.mxu3 %v2368_v42  ;;  %375 = vmatmul.bf16.vlgmr.msra.gmra.mxu0 %v261_v53  ;;  %v2444_v42 = vld [vmem:[%s3057_s1 + $0x2a0] sm:$0xff]  ;;  %v879_v44 = vunpack.c.l.b16 %v1967_v41  ;;  %v880_v45 = vunpack.c.h.b16 %v1967_v41  ;;  %v2434_v53 = vld [vmem:[%s3057_s1 + $0x250] sm:$0xff] }
  0x30   : >> { %651 = vmatpush.bf16.msrb.mxu0 %v2399_v47  ;;  %388 = vmatmul.bf16.vlgmr.msra.gmra.mxu1 %v268_v54  ;;  %v2435_v47 = vld [vmem:[%s3057_s1 + $0x258] sm:$0xff]  ;;  %v2442_v54 = vld [vmem:[%s3057_s1 + $0x290] sm:$0xff] }
  0x31   : >> { %664 = vmatpush.bf16.msrb.mxu1 %v2407_v48  ;;  %501 = vmatmul.bf16.vlgmr.msra.gmra.mxu2 %v393_v51  ;;  %v2443_v48 = vld [vmem:[%s3057_s1 + $0x298] sm:$0xff]  ;;  %v882_v51 = vpack.c.b16 %v880_v45, %v718_v20  ;;  %v2469_v20 = vld [vmem:[%s3057_s1 + $0x368] sm:$0xff]  ;;  %v2474_v41 = vld [vmem:[%s3057_s1 + $0x390] sm:$0xff] }
  0x32   : >> { %819 = vmatpush.bf16.msrb.mxu2 %v2415_v49  ;;  %514 = vmatmul.bf16.vlgmr.msra.gmra.mxu3 %v394_v52  ;;  %v2451_v49 = vld [vmem:[%s3057_s1 + $0x2d8] sm:$0xff]  ;;  %v2426_v52 = vld [vmem:[%s3057_s1 + $0x210] sm:$0xff] }
  0x33   : >> { %832 = vmatpush.bf16.msrb.mxu3 %v2423_v50  ;;  %v881_v50 = vpack.c.b16 %v879_v44, %v717_v19  ;;  %v2461_v19 = vld [vmem:[%s3057_s1 + $0x328] sm:$0xff] }
  0x34   : >> { %652 = vmatpush.bf16.msrb.mxu0 %v2398_v55  ;;  %v2450_v55 = vld [vmem:[%s3057_s1 + $0x2d0] sm:$0xff]  ;;  %v2465_v44 = vld [vmem:[%s3057_s1 + $0x348] sm:$0xff] }
  0x35   : >> { %665 = vmatpush.bf16.msrb.mxu1 %v2406_v56  ;;  %v2425_v56 = vld [vmem:[%s3057_s1 + $0x208] sm:$0xff] }
  0x36   : >> { %820 = vmatpush.bf16.msrb.mxu2 %v2414_v57  ;;  %v2433_v57 = vld [vmem:[%s3057_s1 + $0x248] sm:$0xff] }
  0x37   : >> { %833 = vmatpush.bf16.msrb.mxu3 %v2422_v58  ;;  %v886_v58 = vshll.u32 %v881_v50, 16 }
  0x38   : >> { %653 = vmatpush.bf16.msrb.mxu0 %v2397_v59  ;;  %v893_v59 = vshll.u32 %v882_v51, 16 }
  0x39   : >> { %666 = vmatpush.bf16.msrb.mxu1 %v2405_v60  ;;  %v2441_v60 = vld [vmem:[%s3057_s1 + $0x288] sm:$0xff] }
  0x3a   : >> { %821 = vmatpush.bf16.msrb.mxu2 %v2413_v61  ;;  %v2449_v61 = vld [vmem:[%s3057_s1 + $0x2c8] sm:$0xff] }
  0x3b   : >> { %834 = vmatpush.bf16.msrb.mxu3 %v2421_v62  ;;  %v2424_v62 = vld [vmem:[%s3057_s1 + $0x200] sm:$0xff] }
  0x3c   : >> { %654 = vmatpush.bf16.msrb.mxu0 %v2396_v63  ;;  %v2432_v63 = vld [vmem:[%s3057_s1 + $0x240] sm:$0xff] }
  0x3d   : >> { %667 = vmatpush.bf16.msrb.mxu1 %v2404_v1  ;;  %v884_v1 = vshrl.u32 %v881_v50, 16 }
  0x3e   : >> { %822 = vmatpush.bf16.msrb.mxu2 %v2412_v2  ;;  %v888_v2 = vrot.slane %v886_v58, 1  ;;  %v2503_v58 = vld [vmem:[%s3057_s1 + $0x478] sm:$0xff] }
  0x3f   : >> { %835 = vmatpush.bf16.msrb.mxu3 %v2420_v3  ;;  %v891_v3 = vshrl.u32 %v882_v51, 16 }
  0x40   : >> { %655 = vmatpush.bf16.msrb.mxu0 %v2395_v4  ;;  %v895_v4 = vrot.slane %v893_v59, 1 }
  0x41   : >> { %668 = vmatpush.bf16.msrb.mxu1 %v2403_v5  ;;  %v2440_v5 = vld [vmem:[%s3057_s1 + $0x280] sm:$0xff] }
  0x42   : >> { %823 = vmatpush.bf16.msrb.mxu2 %v2411_v6  ;;  %v2448_v6 = vld [vmem:[%s3057_s1 + $0x2c0] sm:$0xff] }
  0x43   : >> { %836 = vmatpush.bf16.msrb.mxu3 %v2419_v7  ;;  %v2463_v7 = vld [vmem:[%s3057_s1 + $0x338] sm:$0xff] }
  0x44   : >> { %656 = vmatpush.bf16.msrb.mxu0 %v2394_v8  ;;  %v2471_v8 = vld [vmem:[%s3057_s1 + $0x378] sm:$0xff] }
  0x45   : >> { %669 = vmatpush.bf16.msrb.mxu1 %v2402_v9  ;;  %v2479_v9 = vld [vmem:[%s3057_s1 + $0x3b8] sm:$0xff] }
  0x46   : >> { %824 = vmatpush.bf16.msrb.mxu2 %v2410_v10  ;;  %v2487_v10 = vld [vmem:[%s3057_s1 + $0x3f8] sm:$0xff] }
  0x47   : >> { %837 = vmatpush.bf16.msrb.mxu3 %v2418_v11  ;;  %v889_v11 = vor.u32 %v888_v2, %v884_v1  ;;  %v2502_v1 = vld [vmem:[%s3057_s1 + $0x470] sm:$0xff]  ;;  %v2493_v2 = vld [vmem:[%s3057_s1 + $0x428] sm:$0xff] }
  0x48   : >> { %657 = vmatpush.bf16.msrb.mxu0 %v2393_v12  ;;  %v896_v12 = vor.u32 %v895_v4, %v891_v3  ;;  %v2501_v3 = vld [vmem:[%s3057_s1 + $0x468] sm:$0xff]  ;;  %v2492_v4 = vld [vmem:[%s3057_s1 + $0x420] sm:$0xff] }
  0x49   : >> { %670 = vmatpush.bf16.msrb.mxu1 %v2401_v13  ;;  %v1054_v13 = vrot.slane %v881_v50, 1  ;;  %v2464_v50 = vld [vmem:[%s3057_s1 + $0x340] sm:$0xff] }
  0x4a   : >> { %825 = vmatpush.bf16.msrb.mxu2 %v2409_v14  ;;  %v1055_v14 = vrot.slane %v882_v51, 1 }
  0x4b   : >> { %838 = vmatpush.bf16.msrb.mxu3 %v2417_v15  ;;  %v2462_v15 = vld [vmem:[%s3057_s1 + $0x330] sm:$0xff] }
  0x4c   : >> { %658 = vmatpush.bf16.msrb.mxu0 %v2392_v17  ;;  %v2478_v17 = vld [vmem:[%s3057_s1 + $0x3b0] sm:$0xff] }
  0x4d   : >> { %671 = vmatpush.bf16.msrb.mxu1 %v2400_v18  ;;  %v2486_v18 = vld [vmem:[%s3057_s1 + $0x3f0] sm:$0xff] }
  0x4e   : >> { %826 = vmatpush.bf16.msrb.mxu2 %v2408_v21  ;;  %v2477_v21 = vld [vmem:[%s3057_s1 + $0x3a8] sm:$0xff] }
  0x4f   : >> { %839 = vmatpush.bf16.msrb.mxu3 %v2416_v22  ;;  %659 = vmatmul.bf16.vlgmr.msrb.gmra.mxu0 %v551_v29  ;;  %v2485_v22 = vld [vmem:[%s3057_s1 + $0x3e8] sm:$0xff]  ;;  %v2459_v29 = vld [vmem:[%s3057_s1 + $0x318] sm:$0xff] }
  0x50   : >> { %995 = vmatpush.bf16.msra.mxu0 %v2431_v23  ;;  %672 = vmatmul.bf16.vlgmr.msrb.gmra.mxu1 %v552_v30  ;;  %v2460_v23 = vld [vmem:[%s3057_s1 + $0x320] sm:$0xff]  ;;  %v2467_v30 = vld [vmem:[%s3057_s1 + $0x358] sm:$0xff] }
  0x51   : >> { %1008 = vmatpush.bf16.msra.mxu1 %v2439_v24  ;;  %827 = vmatmul.bf16.vlgmr.msrb.gmra.mxu2 %v719_v27  ;;  %v2468_v24 = vld [vmem:[%s3057_s1 + $0x360] sm:$0xff] }
  0x52   : >> { %1154 = vmatpush.bf16.msra.mxu2 %v2447_v25  ;;  %840 = vmatmul.bf16.vlgmr.msrb.gmra.mxu3 %v720_v28  ;;  %v2476_v25 = vld [vmem:[%s3057_s1 + $0x3a0] sm:$0xff]  ;;  %v2162_v28 = vld [vmem:[%s2635_s8 + $0x28] sm:$0x11] }
  0x53   : >> { %1167 = vmatpush.bf16.msra.mxu3 %v2455_v26  ;;  %v2484_v26 = vld [vmem:[%s3057_s1 + $0x3e0] sm:$0xff] }
  0x54   : >> { %996 = vmatpush.bf16.msra.mxu0 %v2430_v33  ;;  %v2161_v27 = vld [vmem:[%s2635_s8 + $0x20] sm:$0xff] }
  0x55   : >> { %1009 = vmatpush.bf16.msra.mxu1 %v2438_v34  ;;  %v1220_v33 = vunpack.c.l.b16 %v2161_v27  ;;  %v1382_v34 = vunpack.c.l.b16 %v2162_v28 }
  0x56   : >> { %1155 = vmatpush.bf16.msra.mxu2 %v2446_v35  ;;  %v1221_v35 = vunpack.c.h.b16 %v2161_v27 }
  0x57   : >> { %1168 = vmatpush.bf16.msra.mxu3 %v2454_v31  ;;  %v1383_v31 = vunpack.c.h.b16 %v2162_v28  ;;  %v1222_v59 = vpack.c.b16 %v1220_v33, %v1220_v33 }
  0x58   : >> { %997 = vmatpush.bf16.msra.mxu0 %v2429_v32  ;;  %v2475_v32 = vld [vmem:[%s3057_s1 + $0x398] sm:$0xff] }
  0x59   : >> { %1010 = vmatpush.bf16.msra.mxu1 %v2437_v36  ;;  %v2483_v36 = vld [vmem:[%s3057_s1 + $0x3d8] sm:$0xff] }
  0x5a   : >> { %1156 = vmatpush.bf16.msra.mxu2 %v2445_v37  ;;  %v2458_v37 = vld [vmem:[%s3057_s1 + $0x310] sm:$0xff] }
  0x5b   : >> { %1169 = vmatpush.bf16.msra.mxu3 %v2453_v38  ;;  %v2466_v38 = vld [vmem:[%s3057_s1 + $0x350] sm:$0xff] }
  0x5c   : >> { %998 = vmatpush.bf16.msra.mxu0 %v2428_v39  ;;  %v2959_v39 = vpack.c.b16 %v1382_v34, %v1220_v33 }
  0x5d   : >> { %1011 = vmatpush.bf16.msra.mxu1 %v2436_v40  ;;  %v2961_v40 = vpack.c.b16 %v1383_v31, %v1221_v35 }
  0x5e   : >> { %1157 = vmatpush.bf16.msra.mxu2 %v2444_v42  ;;  %v2482_v42 = vld [vmem:[%s3057_s1 + $0x3d0] sm:$0xff]  ;;  %v1389_v45 = vshll.u32 %v2959_v39, 16  ;;  %v1387_v51 = vshrl.u32 %v2959_v39, 16 }
  0x5f   : >> { %1170 = vmatpush.bf16.msra.mxu3 %v2452_v43  ;;  %v2457_v43 = vld [vmem:[%s3057_s1 + $0x308] sm:$0xff] }
  0x60   : >> { %999 = vmatpush.bf16.msra.mxu0 %v2427_v46  ;;  %v1396_v46 = vshll.u32 %v2961_v40, 16 }
  0x61   : >> { %1012 = vmatpush.bf16.msra.mxu1 %v2435_v47  ;;  %v2473_v47 = vld [vmem:[%s3057_s1 + $0x388] sm:$0xff] }
  0x62   : >> { %1158 = vmatpush.bf16.msra.mxu2 %v2443_v48  ;;  %v2481_v48 = vld [vmem:[%s3057_s1 + $0x3c8] sm:$0xff] }
  0x63   : >> { %1171 = vmatpush.bf16.msra.mxu3 %v2451_v49  ;;  %v2456_v49 = vld [vmem:[%s3057_s1 + $0x300] sm:$0xff] }
  0x64   : >> { %1000 = vmatpush.bf16.msra.mxu0 %v2426_v52  ;;  %v1391_v52 = vrot.slane %v1389_v45, 1 }
  0x65   : >> { %1013 = vmatpush.bf16.msra.mxu1 %v2434_v53  ;;  %v1394_v53 = vshrl.u32 %v2961_v40, 16 }
  0x66   : >> { %1159 = vmatpush.bf16.msra.mxu2 %v2442_v54  ;;  %v1398_v54 = vrot.slane %v1396_v46, 1 }
  0x67   : >> { %1172 = vmatpush.bf16.msra.mxu3 %v2450_v55  ;;  %v2472_v55 = vld [vmem:[%s3057_s1 + $0x380] sm:$0xff] }
  0x68   : >> { %1001 = vmatpush.bf16.msra.mxu0 %v2425_v56  ;;  %v2480_v56 = vld [vmem:[%s3057_s1 + $0x3c0] sm:$0xff] }
  0x69   : >> { %1014 = vmatpush.bf16.msra.mxu1 %v2433_v57  ;;  %v2495_v57 = vld [vmem:[%s3057_s1 + $0x438] sm:$0xff] }
  0x6a   : >> { %1160 = vmatpush.bf16.msra.mxu2 %v2441_v60  ;;  %v1223_v60 = vpack.c.b16 %v1221_v35, %v1221_v35 }
  0x6b   : >> { %1173 = vmatpush.bf16.msra.mxu3 %v2449_v61  ;;  %v1392_v61 = vor.u32 %v1391_v52, %v1387_v51 }
  0x6c   : >> { %1002 = vmatpush.bf16.msra.mxu0 %v2424_v62  ;;  %v1399_v62 = vor.u32 %v1398_v54, %v1394_v53 }
  0x6d   : >> { %1015 = vmatpush.bf16.msra.mxu1 %v2432_v63  ;;  %v2494_v63 = vld [vmem:[%s3057_s1 + $0x430] sm:$0xff] }
  0x6e   : >> { %1161 = vmatpush.bf16.msra.mxu2 %v2440_v5  ;;  %v2500_v5 = vld [vmem:[%s3057_s1 + $0x460] sm:$0xff] }
  0x6f   : >> { %1174 = vmatpush.bf16.msra.mxu3 %v2448_v6  ;;  %1003 = vmatmul.bf16.vlgmr.msra.gmra.mxu0 %v889_v11  ;;  %v2491_v6 = vld [vmem:[%s3057_s1 + $0x418] sm:$0xff]  ;;  %v2497_v11 = vld [vmem:[%s3057_s1 + $0x448] sm:$0xff] }
  0x70   : >> { %1322 = vmatpush.bf16.msrb.mxu0 %v2463_v7  ;;  %1016 = vmatmul.bf16.vlgmr.msra.gmra.mxu1 %v896_v12  ;;  %v2499_v7 = vld [vmem:[%s3057_s1 + $0x458] sm:$0xff]  ;;  %v2488_v12 = vld [vmem:[%s3057_s1 + $0x400] sm:$0xff] }
  0x71   : >> { %1335 = vmatpush.bf16.msrb.mxu1 %v2471_v8  ;;  %1162 = vmatmul.bf16.vlgmr.msra.gmra.mxu2 %v1054_v13  ;;  %v2490_v8 = vld [vmem:[%s3057_s1 + $0x410] sm:$0xff]  ;;  %v2496_v13 = vld [vmem:[%s3057_s1 + $0x440] sm:$0xff] }
  0x72   : >> { %1498 = vmatpush.bf16.msrb.mxu2 %v2479_v9  ;;  %1175 = vmatmul.bf16.vlgmr.msra.gmra.mxu3 %v1055_v14  ;;  %v2498_v9 = vld [vmem:[%s3057_s1 + $0x450] sm:$0xff]  ;;  %v1557_v14 = vrot.slane %v2959_v39, 1 }
  0x73   : >> { %1511 = vmatpush.bf16.msrb.mxu3 %v2487_v10  ;;  %v2489_v10 = vld [vmem:[%s3057_s1 + $0x408] sm:$0xff] }
  0x74   : >> { %1323 = vmatpush.bf16.msrb.mxu0 %v2462_v15  ;;  %v1558_v15 = vrot.slane %v2961_v40, 1 }
  0x75   : >> { %1336 = vmatpush.bf16.msrb.mxu1 %v2470_v16 }
  0x76   : >> { %1499 = vmatpush.bf16.msrb.mxu2 %v2478_v17 }
  0x77   : >> { %1512 = vmatpush.bf16.msrb.mxu3 %v2486_v18 }
  0x78   : >> { %1324 = vmatpush.bf16.msrb.mxu0 %v2461_v19 }
  0x79   : >> { %1337 = vmatpush.bf16.msrb.mxu1 %v2469_v20 }
  0x7a   : >> { %1500 = vmatpush.bf16.msrb.mxu2 %v2477_v21 }
  0x7b   : >> { %1513 = vmatpush.bf16.msrb.mxu3 %v2485_v22 }
  0x7c   : >> { %1325 = vmatpush.bf16.msrb.mxu0 %v2460_v23 }
  0x7d   : >> { %1338 = vmatpush.bf16.msrb.mxu1 %v2468_v24 }
  0x7e   : >> { %1501 = vmatpush.bf16.msrb.mxu2 %v2476_v25 }
  0x7f   : >> { %1514 = vmatpush.bf16.msrb.mxu3 %v2484_v26 }
  0x80   : >> { %1326 = vmatpush.bf16.msrb.mxu0 %v2459_v29 }
  0x81   : >> { %1339 = vmatpush.bf16.msrb.mxu1 %v2467_v30 }
  0x82   : >> { %1502 = vmatpush.bf16.msrb.mxu2 %v2475_v32 }
  0x83   : >> { %1515 = vmatpush.bf16.msrb.mxu3 %v2483_v36 }
  0x84   : >> { %1327 = vmatpush.bf16.msrb.mxu0 %v2458_v37 }
  0x85   : >> { %1340 = vmatpush.bf16.msrb.mxu1 %v2466_v38 }
  0x86   : >> { %1503 = vmatpush.bf16.msrb.mxu2 %v2474_v41 }
  0x87   : >> { %1516 = vmatpush.bf16.msrb.mxu3 %v2482_v42 }
  0x88   : >> { %1328 = vmatpush.bf16.msrb.mxu0 %v2457_v43 }
  0x89   : >> { %1341 = vmatpush.bf16.msrb.mxu1 %v2465_v44 }
  0x8a   : >> { %1504 = vmatpush.bf16.msrb.mxu2 %v2473_v47 }
  0x8b   : >> { %1517 = vmatpush.bf16.msrb.mxu3 %v2481_v48 }
  0x8c   : >> { %1329 = vmatpush.bf16.msrb.mxu0 %v2456_v49 }
  0x8d   : >> { %1342 = vmatpush.bf16.msrb.mxu1 %v2464_v50 }
  0x8e   : >> { %1505 = vmatpush.bf16.msrb.mxu2 %v2472_v55 }
  0x8f   : >> { %1518 = vmatpush.bf16.msrb.mxu3 %v2480_v56  ;;  %1330 = vmatmul.bf16.vlgmr.msrb.gmra.mxu0 %v1222_v59 }
  0x90   : >> { %1657 = vmatpush.bf16.msra.mxu0 %v2495_v57  ;;  %1343 = vmatmul.bf16.vlgmr.msrb.gmra.mxu1 %v1223_v60 }
  0x91   : >> { %1670 = vmatpush.bf16.msra.mxu1 %v2503_v58  ;;  %1506 = vmatmul.bf16.vlgmr.msrb.gmra.mxu2 %v1392_v61 }
  0x92   : >> { %1519 = vmatmul.bf16.vlgmr.msrb.gmra.mxu3 %v1399_v62 }
  0x94   : >> { %1658 = vmatpush.bf16.msra.mxu0 %v2494_v63 }
  0x95   : >> { %1671 = vmatpush.bf16.msra.mxu1 %v2502_v1 }
  0x98   : >> { %1659 = vmatpush.bf16.msra.mxu0 %v2493_v2 }
  0x99   : >> { %1672 = vmatpush.bf16.msra.mxu1 %v2501_v3  ;;  %v1685_v3 = vperm.slane %v2568_v0, 0 }
  0x9c   : >> { %1660 = vmatpush.bf16.msra.mxu0 %v2492_v4 }
  0x9d   : >> { %1673 = vmatpush.bf16.msra.mxu1 %v2500_v5 }
  0xa0   : >> { %1661 = vmatpush.bf16.msra.mxu0 %v2491_v6 }
  0xa1   : >> { %1674 = vmatpush.bf16.msra.mxu1 %v2499_v7 }
  0xa4   : >> { %1662 = vmatpush.bf16.msra.mxu0 %v2490_v8 }
  0xa5   : >> { %1675 = vmatpush.bf16.msra.mxu1 %v2498_v9 }
  0xa8   : >> { %1663 = vmatpush.bf16.msra.mxu0 %v2489_v10 }
  0xa9   : >> { %1676 = vmatpush.bf16.msra.mxu1 %v2497_v11 }
  0xac   : >> { %1664 = vmatpush.bf16.msra.mxu0 %v2488_v12  ;;  %v376_v16 = vpop.f32.mrf.mxu0 }
  0xad   : >> { %1677 = vmatpush.bf16.msra.mxu1 %v2496_v13  ;;  %v389_v17 = vpop.f32.mrf.mxu1 }
  0xae   : >> { %v390_v18 = vadd.f32 %v389_v17, %v376_v16 }
  0xaf   : >> { %1665 = vmatmul.bf16.vlgmr.msra.gmra.mxu0 %v1557_v14 }
  0xb0   : >> { %1678 = vmatmul.bf16.vlgmr.msra.gmra.mxu1 %v1558_v15 }
  0xb4   : >> { %v502_v19 = vpop.f32.mrf.mxu2  ;;  %v378_v23 = vpop.f32.mrf.mxu0 }
  0xb5   : >> { %v515_v20 = vpop.f32.mrf.mxu3  ;;  %v503_v21 = vadd.f32 %v502_v19, %v390_v18  ;;  %v391_v24 = vpop.f32.mrf.mxu1 }
  0xb7   : >> { %v516_v22 = vadd.f32 %v515_v20, %v503_v21 }
  0xbc   : >> { %v504_v25 = vpop.f32.mrf.mxu2 }
  0xbd   : >> { %v517_v26 = vpop.f32.mrf.mxu3 }
  0xcc   : >> { %v660_v27 = vpop.f32.mrf.mxu0 }
  0xcd   : >> { %v673_v28 = vpop.f32.mrf.mxu1 }
  0xce   : >> { %v674_v29 = vadd.f32 %v673_v28, %v660_v27 }
  0xd0   : >> { %v677_v30 = vadd.f32 %v674_v29, %v516_v22 }
  0xd4   : >> { %v828_v33 = vpop.f32.mrf.mxu2  ;;  %v662_v32 = vpop.f32.mrf.mxu0 }
  0xd5   : >> { %v841_v34 = vpop.f32.mrf.mxu3  ;;  %v675_v36 = vpop.f32.mrf.mxu1 }
  0xd6   : >> { %v842_v35 = vadd.f32 %v841_v34, %v828_v33 }
  0xd8   : >> { %v845_v31 = vadd.f32 %v842_v35, %v677_v30 }
  0xdc   : >> { %v830_v37 = vpop.f32.mrf.mxu2 }
  0xdd   : >> { %v843_v38 = vpop.f32.mrf.mxu3 }
  0xec   : >> { %v1004_v39 = vpop.f32.mrf.mxu0 }
  0xed   : >> { %v1017_v40 = vpop.f32.mrf.mxu1 }
  0xee   : >> { %v1018_v55 = vadd.f32 %v1017_v40, %v1004_v39 }
  0xf0   : >> { %v1021_v57 = vadd.f32 %v1018_v55, %v845_v31 }
  0xf4   : >> { %v1163_v41 = vpop.f32.mrf.mxu2  ;;  %v1006_v43 = vpop.f32.mrf.mxu0 }
  0xf5   : >> { %v1176_v42 = vpop.f32.mrf.mxu3  ;;  %v1019_v44 = vpop.f32.mrf.mxu1 }
  0xf6   : >> { %v1177_v56 = vadd.f32 %v1176_v42, %v1163_v41 }
  0xf8   : >> { %v1180_v59 = vadd.f32 %v1177_v56, %v1021_v57 }
  0xfc   : >> { %v1165_v45 = vpop.f32.mrf.mxu2 }
  0xfd   : >> { %v1178_v46 = vpop.f32.mrf.mxu3 }
 0x10c   : >> { %v1331_v47 = vpop.f32.mrf.mxu0 }
 0x10d   : >> { %v1344_v48 = vpop.f32.mrf.mxu1 }
 0x10e   : >> { %v1345_v58 = vadd.f32 %v1344_v48, %v1331_v47 }
 0x110   : >> { %v1348_v61 = vadd.f32 %v1345_v58, %v1180_v59 }
 0x114   : >> { %v1507_v49 = vpop.f32.mrf.mxu2  ;;  %v1333_v51 = vpop.f32.mrf.mxu0 }
 0x115   : >> { %v1520_v50 = vpop.f32.mrf.mxu3  ;;  %v1346_v52 = vpop.f32.mrf.mxu1 }
 0x116   : >> { %v1521_v60 = vadd.f32 %v1520_v50, %v1507_v49 }
 0x118   : >> { %v1524_v1 = vadd.f32 %v1521_v60, %v1348_v61 }
 0x11c   : >> { %v1509_v53 = vpop.f32.mrf.mxu2 }
 0x11d   : >> { %v1522_v54 = vpop.f32.mrf.mxu3 }
 0x12c   : >> { %v1666_v62 = vpop.f32.mrf.mxu0 }
 0x12d   : >> { %v1679_v63 = vpop.f32.mrf.mxu1 }
 0x12e   : >> { %v1680_v2 = vadd.f32 %v1679_v63, %v1666_v62 }
 0x130   : >> { %v1683_v4 = vadd.f32 %v1680_v2, %v1524_v1 }
 0x132   : >> { %v1687_v5 = vadd.f32 %v1685_v3, %v1683_v4 }
 0x134   : >> { %v1688_v6 = vmax.f32 %v1687_v5, 0.0  ;;  %v1668_v7 = vpop.f32.mrf.mxu0  ;;  %176 = sbr.rel (!%p174_p4) target bundleno = 15 (0xf), region = 73 }
 0x135   : >> { %v1681_v8 = vpop.f32.mrf.mxu1 }
 0x136   : >> { %v1689_v9 = vpack.c.bf16 %v1688_v6, %v1688_v6 }
 0x138   : >> { %1692 = vst [vmem:[%s1691_s25] sm:$0xf] %v1689_v9 }
 0x139 PF: > { %s13_s12 = sadd.s32 1, %s2531_s12  }
 0x13a   : > { %p10_p5 = scmp.ge.s32.totalorder %s13_s12, 4  }
 0x13c   :  { %12 = sbr.rel (!%p10_p5) target bundleno = 1 (0x1), region = 84 }

</bundles_post_ra>
